<compile_context>
chip_gen: v6e
topology: v6e:2x2x1
jax: 0.10.0
libtpu: 0.0.40
codegen_flags: <defaults>
</compile_context>

<pallas_src>
import math

import jax
import jax.numpy as jnp
from jax import lax
from jax.experimental import pallas as pl
from jax.experimental.pallas import tpu as pltpu

# Model hyper-params (match the PyTorch module)
INPUT_SIZE = 5        # len(feature_cols)
HIDDEN_SIZE = 64
HIDDEN_PAD = 128      # lane-aligned gate blocks (128-lane vreg width)
NUM_LAYERS = 2
OUTPUT_SIZE = 1
SUBLANE = 8

# PyTorch gate order is [i, f, g, o]; kernel uses [i, f, o, g] so all sigmoid gates
# are contiguous (one sigmoid over 3*Hp lanes, one tanh over Hp lanes).
GATE_ORDER = (0, 1, 3, 2)


def _lstm_kernel(xflat_ref,    # (T*Bp, I)     time-major, batch-padded, flattened input
                 wih0_ref,     # (I,  4Hp)     layer-0 input weights (transposed, gate-padded)
                 whh0_ref,     # (Hp, 4Hp)     layer-0 recurrent weights
                 b0_ref,       # (1,  4Hp)     layer-0 combined bias (b_ih + b_hh), f32
                 wih1_ref,     # (Hp, 4Hp)     layer-1 input weights
                 whh1_ref,     # (Hp, 4Hp)
                 b1_ref,       # (1,  4Hp)
                 fcw_ref,      # (Hp, 1)       fc weight (transposed, row-padded)
                 fcb_ref,      # (1, 1)        fc bias
                 out_ref,      # (Bp, 1)       output
                 proj0_ref):   # (T*Bp, 4Hp)   scratch: hoisted layer-0 input projection (f32)
    TB = xflat_ref.shape[0]
    Hp = whh0_ref.shape[0]
    Bp = out_ref.shape[0]
    T = TB // Bp
    mxu_dtype = whh0_ref.dtype   # f32 by default; bf16 if packed that way

    # ---- hoisted layer-0 input projection: one time-parallel MXU matmul, bias folded ----
    proj0_ref[...] = (jnp.dot(xflat_ref[...].astype(mxu_dtype), wih0_ref[...],
                              preferred_element_type=jnp.float32)
                      + b0_ref[...])

    def gates_to_hc(gates, c):
        """Gate order [i, f, o, g]: one sigmoid over the aligned [:, :3Hp] slab."""
        ifo = jax.nn.sigmoid(gates[:, :3 * Hp])
        i_g = ifo[:, :Hp]
        f_g = ifo[:, Hp:2 * Hp]
        o_g = ifo[:, 2 * Hp:]
        g_g = jnp.tanh(gates[:, 3 * Hp:])
        c_new = f_g * c + i_g * g_g
        h_new = o_g * jnp.tanh(c_new)
        return h_new, c_new

    def step(t, carry):
        h0, c0, h1, c1 = carry
        r = pl.multiple_of(t * Bp, Bp)          # sublane-aligned row offset

        # ---- layer 0, step t (depends only on h0_{t-1}) ----
        g0 = (jnp.dot(h0.astype(mxu_dtype), whh0_ref[...],
                      preferred_element_type=jnp.float32)
              + proj0_ref[pl.ds(r, Bp), :])
        h0, c0 = gates_to_hc(g0, c0)

        # ---- layer-1 input projection for step t: off the h1 dependency chain ----
        p1 = (jnp.dot(h0.astype(mxu_dtype), wih1_ref[...],
                      preferred_element_type=jnp.float32)
              + b1_ref[...])

        # ---- layer 1, step t (depends on h1_{t-1} and h0_t) ----
        g1 = (jnp.dot(h1.astype(mxu_dtype), whh1_ref[...],
                      preferred_element_type=jnp.float32)
              + p1)
        h1, c1 = gates_to_hc(g1, c1)
        return h0, c0, h1, c1

    zeros = jnp.zeros((Bp, Hp), jnp.float32)
    # Full unroll for short sequences (scheduler interleaves the two chains across
    # iterations); cap unroll for long T to bound code size / vreg live ranges.
    unroll = True if T <= 32 else 8
    _, _, h1_last, _ = lax.fori_loop(0, T, step, (zeros, zeros, zeros, zeros),
                                     unroll=unroll)

    # ---- fc on the last timestep's layer-1 hidden state ----
    out_ref[...] = (jnp.dot(h1_last.astype(mxu_dtype), fcw_ref[...],
                            preferred_element_type=jnp.float32)
                    + fcb_ref[...])


# --------------------------------------------------------------------------------------
# Parameter packing: PyTorch layouts -> transposed, gate-reordered, gate-padded layouts
# --------------------------------------------------------------------------------------
def _pack_gate_cols(w_t, H, Hp):
    """(K, 4H) in PyTorch order [i,f,g,o] -> (K, 4Hp) in kernel order [i,f,o,g],
    each gate block zero-padded from H to Hp on the lane axis."""
    return jnp.concatenate(
        [jnp.pad(w_t[:, k * H:(k + 1) * H], ((0, 0), (0, Hp - H)))
         for k in GATE_ORDER], axis=1)


def pack_params(raw, param_dtype=jnp.float32):
    """param_dtype=jnp.bfloat16 enables the bf16-MXU-operand path (f32 accumulation);
    keep f32 when validating against an f32 reference at 1e-4 tolerance."""
    H, Hp = HIDDEN_SIZE, HIDDEN_PAD

    def lstm_layer(w_ih, w_hh, b_ih, b_hh, pad_in_rows):
        wih_t = _pack_gate_cols(w_ih.T, H, Hp)                  # (I or H, 4Hp)
        if pad_in_rows:
            wih_t = jnp.pad(wih_t, ((0, Hp - H), (0, 0)))       # (Hp, 4Hp)
        whh_t = jnp.pad(_pack_gate_cols(w_hh.T, H, Hp),
                        ((0, Hp - H), (0, 0)))                  # (Hp, 4Hp)
        b = _pack_gate_cols((b_ih + b_hh).reshape(1, 4 * H), H, Hp)
        return (wih_t.astype(param_dtype), whh_t.astype(param_dtype),
                b.astype(jnp.float32))

    wih0_t, whh0_t, b0 = lstm_layer(raw["w_ih_l0"], raw["w_hh_l0"],
                                    raw["b_ih_l0"], raw["b_hh_l0"], False)
    wih1_t, whh1_t, b1 = lstm_layer(raw["w_ih_l1"], raw["w_hh_l1"],
                                    raw["b_ih_l1"], raw["b_hh_l1"], True)
    fcw_t = jnp.pad(raw["fc_w"].T, ((0, Hp - H), (0, 0))).astype(param_dtype)  # (Hp, 1)
    fcb = raw["fc_b"].reshape(1, OUTPUT_SIZE).astype(jnp.float32)
    return {"wih0_t": wih0_t, "whh0_t": whh0_t, "b0": b0,
            "wih1_t": wih1_t, "whh1_t": whh1_t, "b1": b1,
            "fcw_t": fcw_t, "fcb": fcb}


def lstm_model_forward(x, packed):
    """x: (B, T, INPUT_SIZE) float32 (PyTorch batch_first layout)."""
    B, T, I = x.shape
    Hp = HIDDEN_PAD
    Bp = ((B + SUBLANE - 1) // SUBLANE) * SUBLANE   # pad batch to full sublanes

    x_tm = jnp.transpose(x, (1, 0, 2))                      # (T, B, I) time-major
    x_tm = jnp.pad(x_tm, ((0, 0), (0, Bp - B), (0, 0)))     # (T, Bp, I)
    x_flat = x_tm.reshape(T * Bp, I)                        # (T*Bp, I)

    vmem = pl.BlockSpec(memory_space=pltpu.MemorySpace.VMEM)
    # TODO(synk): for production T/B add a T-chunk grid ("arbitrary") with h/c carried
    # in scratch and a batch-parallel grid axis (v7x dual TensorCore); no-ops at T=8, B=2.
    out = pl.pallas_call(
        _lstm_kernel,
        out_shape=jax.ShapeDtypeStruct((Bp, OUTPUT_SIZE), jnp.float32),
        in_specs=[vmem] * 9,
        out_specs=vmem,
        scratch_shapes=[pltpu.VMEM((T * Bp, 4 * Hp), jnp.float32)],   # proj0
        compiler_params=pltpu.CompilerParams(
            vmem_limit_bytes=32 * 1024 * 1024),
    )(x_flat,
      packed["wih0_t"], packed["whh0_t"], packed["b0"],
      packed["wih1_t"], packed["whh1_t"], packed["b1"],
      packed["fcw_t"], packed["fcb"])
    return out[:B]


# --------------------------------------------------------------------------------------
# Init + pure-JAX reference (PyTorch nn.LSTM + nn.Linear semantics, unpadded, f32)
# --------------------------------------------------------------------------------------
def init_params(key):
    """Deterministic PyTorch-style init: U(-1/sqrt(H), 1/sqrt(H)), PyTorch layouts."""
    H, I = HIDDEN_SIZE, INPUT_SIZE
    stdv = 1.0 / math.sqrt(H)
    ks = jax.random.split(key, 10)
    u = lambda k, shape: jax.random.uniform(k, shape, jnp.float32, -stdv, stdv)
    return {
        "w_ih_l0": u(ks[0], (4 * H, I)),
        "w_hh_l0": u(ks[1], (4 * H, H)),
        "b_ih_l0": u(ks[2], (4 * H,)),
        "b_hh_l0": u(ks[3], (4 * H,)),
        "w_ih_l1": u(ks[4], (4 * H, H)),
        "w_hh_l1": u(ks[5], (4 * H, H)),
        "b_ih_l1": u(ks[6], (4 * H,)),
        "b_hh_l1": u(ks[7], (4 * H,)),
        "fc_w": u(ks[8], (OUTPUT_SIZE, H)),
        "fc_b": u(ks[9], (OUTPUT_SIZE,)),
    }


def _reference_forward(x, raw):
    B, T, _ = x.shape
    H = HIDDEN_SIZE

    def cell(xt, h, c, w_ih, w_hh, b_ih, b_hh):
        gates = xt @ w_ih.T + h @ w_hh.T + b_ih + b_hh
        i = jax.nn.sigmoid(gates[:, :H])
        f = jax.nn.sigmoid(gates[:, H:2 * H])
        g = jnp.tanh(gates[:, 2 * H:3 * H])
        o = jax.nn.sigmoid(gates[:, 3 * H:])
        c = f * c + i * g
        return o * jnp.tanh(c), c

    h = c = jnp.zeros((B, H), jnp.float32)
    seq = []
    for t in range(T):
        h, c = cell(x[:, t, :], h, c, raw["w_ih_l0"], raw["w_hh_l0"],
                    raw["b_ih_l0"], raw["b_hh_l0"])
        seq.append(h)
    h = c = jnp.zeros((B, H), jnp.float32)
    for t in range(T):
        h, c = cell(seq[t], h, c, raw["w_ih_l1"], raw["w_hh_l1"],
                    raw["b_ih_l1"], raw["b_hh_l1"])
    return h @ raw["fc_w"].T + raw["fc_b"]


if __name__ == "__main__":
    key = jax.random.PRNGKey(0)
    k_param, k_x = jax.random.split(key)

    B, T = 2, 8
    raw = init_params(k_param)
    packed = pack_params(raw)                      # f32 MXU operands (validation mode)
    x = jax.random.normal(k_x, (B, T, INPUT_SIZE), dtype=jnp.float32)

    out = lstm_model_forward(x, packed)
    out = jax.block_until_ready(out)

    ref = _reference_forward(x, raw)
    assert out.shape == (B, OUTPUT_SIZE)
    assert jnp.allclose(out, ref, atol=1e-4, rtol=1e-4)

    print("KERNEL_OK")
</pallas_src>

<mosaic_0001>
module attributes {stable_mosaic.version = 11 : i64} {
  func.func @_lstm_kernel(%arg0: memref<64x5xf32, #tpu.memory_space<vmem>>, %arg1: memref<5x512xf32, #tpu.memory_space<vmem>>, %arg2: memref<128x512xf32, #tpu.memory_space<vmem>>, %arg3: memref<1x512xf32, #tpu.memory_space<vmem>>, %arg4: memref<128x512xf32, #tpu.memory_space<vmem>>, %arg5: memref<128x512xf32, #tpu.memory_space<vmem>>, %arg6: memref<1x512xf32, #tpu.memory_space<vmem>>, %arg7: memref<128x1xf32, #tpu.memory_space<vmem>>, %arg8: memref<1x1xf32, #tpu.memory_space<vmem>>, %arg9: memref<8x1xf32, #tpu.memory_space<vmem>>, %arg10: memref<64x512xf32, #tpu.memory_space<vmem>>) attributes {dimension_semantics = [], scalar_prefetch = 0 : i64, scratch_operands = 1 : i64, tpu.core_type = #tpu.core_type<tc>} {
    %c0 = arith.constant 0 : index
    %c0_0 = arith.constant 0 : index
    %0 = vector.load %arg0[%c0, %c0_0] : memref<64x5xf32, #tpu.memory_space<vmem>>, vector<64x5xf32>
    %c0_1 = arith.constant 0 : index
    %c0_2 = arith.constant 0 : index
    %1 = vector.load %arg1[%c0_1, %c0_2] : memref<5x512xf32, #tpu.memory_space<vmem>>, vector<5x512xf32>
    %cst = arith.constant dense<0.000000e+00> : vector<64x512xf32>
    %2 = tpu.matmul %0, %1, %cst {dimension_numbers = #tpu.dot_dimension_numbers<[1], [0], [0], [1], [0, 0, 1, 1], [], []>} : vector<64x5xf32>, vector<5x512xf32>, vector<64x512xf32> -> vector<64x512xf32>
    %c0_3 = arith.constant 0 : index
    %c0_4 = arith.constant 0 : index
    %3 = vector.load %arg3[%c0_3, %c0_4] : memref<1x512xf32, #tpu.memory_space<vmem>>, vector<1x512xf32>
    %4 = vector.broadcast %3 : vector<1x512xf32> to vector<64x512xf32>
    %5 = arith.addf %2, %4 : vector<64x512xf32>
    %c0_5 = arith.constant 0 : index
    %c0_6 = arith.constant 0 : index
    %6 = vector.load %arg10[%c0_5, %c0_6] : memref<64x512xf32, #tpu.memory_space<vmem>>, vector<64x512xf32>
    tpu.vector_store %arg10[%c0_5, %c0_6], %5 {strides = array<i32>} : memref<64x512xf32, #tpu.memory_space<vmem>>, vector<64x512xf32>,
    %cst_7 = arith.constant 0.000000e+00 : f32
    %7 = vector.broadcast %cst_7 : f32 to vector<8x128xf32>
    %c0_i32 = arith.constant 0 : i32
    %c8_i32 = arith.constant 8 : i32
    %8 = arith.muli %c0_i32, %c8_i32 : i32
    %9 = tpu.assume_multiple %8, 8 : i32
    %c0_8 = arith.constant 0 : index
    %c0_9 = arith.constant 0 : index
    %10 = vector.load %arg2[%c0_8, %c0_9] : memref<128x512xf32, #tpu.memory_space<vmem>>, vector<128x512xf32>
    %cst_10 = arith.constant dense<0.000000e+00> : vector<8x512xf32>
    %11 = tpu.matmul %7, %10, %cst_10 {dimension_numbers = #tpu.dot_dimension_numbers<[1], [0], [0], [1], [0, 0, 1, 1], [], []>} : vector<8x128xf32>, vector<128x512xf32>, vector<8x512xf32> -> vector<8x512xf32>
    %12 = arith.index_cast %9 : i32 to index
    %c0_11 = arith.constant 0 : index
    %13 = vector.load %arg10[%12, %c0_11] : memref<64x512xf32, #tpu.memory_space<vmem>>, vector<8x512xf32>
    %14 = arith.addf %11, %13 : vector<8x512xf32>
    %15 = vector.extract_strided_slice %14 {offsets = [0, 0], sizes = [8, 384], strides = [1, 1]} : vector<8x512xf32> to vector<8x384xf32>
    %16 = arith.negf %15 : vector<8x384xf32>
    %17 = math.exp %16 : vector<8x384xf32>
    %cst_12 = arith.constant 1.000000e+00 : f32
    %18 = vector.broadcast %cst_12 : f32 to vector<8x384xf32>
    %19 = arith.addf %18, %17 : vector<8x384xf32>
    %20 = arith.divf %18, %19 : vector<8x384xf32>
    %21 = vector.extract_strided_slice %20 {offsets = [0, 0], sizes = [8, 128], strides = [1, 1]} : vector<8x384xf32> to vector<8x128xf32>
    %22 = vector.extract_strided_slice %20 {offsets = [0, 128], sizes = [8, 128], strides = [1, 1]} : vector<8x384xf32> to vector<8x128xf32>
    %23 = vector.extract_strided_slice %20 {offsets = [0, 256], sizes = [8, 128], strides = [1, 1]} : vector<8x384xf32> to vector<8x128xf32>
    %24 = vector.extract_strided_slice %14 {offsets = [0, 384], sizes = [8, 128], strides = [1, 1]} : vector<8x512xf32> to vector<8x128xf32>
    %25 = math.tanh %24 : vector<8x128xf32>
    %26 = arith.mulf %22, %7 : vector<8x128xf32>
    %27 = arith.mulf %21, %25 : vector<8x128xf32>
    %28 = arith.addf %26, %27 : vector<8x128xf32>
    %29 = math.tanh %28 : vector<8x128xf32>
    %30 = arith.mulf %23, %29 : vector<8x128xf32>
    %c0_13 = arith.constant 0 : index
    %c0_14 = arith.constant 0 : index
    %31 = vector.load %arg4[%c0_13, %c0_14] : memref<128x512xf32, #tpu.memory_space<vmem>>, vector<128x512xf32>
    %cst_15 = arith.constant dense<0.000000e+00> : vector<8x512xf32>
    %32 = tpu.matmul %30, %31, %cst_15 {dimension_numbers = #tpu.dot_dimension_numbers<[1], [0], [0], [1], [0, 0, 1, 1], [], []>} : vector<8x128xf32>, vector<128x512xf32>, vector<8x512xf32> -> vector<8x512xf32>
    %c0_16 = arith.constant 0 : index
    %c0_17 = arith.constant 0 : index
    %33 = vector.load %arg6[%c0_16, %c0_17] : memref<1x512xf32, #tpu.memory_space<vmem>>, vector<1x512xf32>
    %34 = vector.broadcast %33 : vector<1x512xf32> to vector<8x512xf32>
    %35 = arith.addf %32, %34 : vector<8x512xf32>
    %c0_18 = arith.constant 0 : index
    %c0_19 = arith.constant 0 : index
    %36 = vector.load %arg5[%c0_18, %c0_19] : memref<128x512xf32, #tpu.memory_space<vmem>>, vector<128x512xf32>
    %cst_20 = arith.constant dense<0.000000e+00> : vector<8x512xf32>
    %37 = tpu.matmul %7, %36, %cst_20 {dimension_numbers = #tpu.dot_dimension_numbers<[1], [0], [0], [1], [0, 0, 1, 1], [], []>} : vector<8x128xf32>, vector<128x512xf32>, vector<8x512xf32> -> vector<8x512xf32>
    %38 = arith.addf %37, %35 : vector<8x512xf32>
    %39 = vector.extract_strided_slice %38 {offsets = [0, 0], sizes = [8, 384], strides = [1, 1]} : vector<8x512xf32> to vector<8x384xf32>
    %40 = arith.negf %39 : vector<8x384xf32>
    %41 = math.exp %40 : vector<8x384xf32>
    %cst_21 = arith.constant 1.000000e+00 : f32
    %42 = vector.broadcast %cst_21 : f32 to vector<8x384xf32>
    %43 = arith.addf %42, %41 : vector<8x384xf32>
    %44 = arith.divf %42, %43 : vector<8x384xf32>
    %45 = vector.extract_strided_slice %44 {offsets = [0, 0], sizes = [8, 128], strides = [1, 1]} : vector<8x384xf32> to vector<8x128xf32>
    %46 = vector.extract_strided_slice %44 {offsets = [0, 128], sizes = [8, 128], strides = [1, 1]} : vector<8x384xf32> to vector<8x128xf32>
    %47 = vector.extract_strided_slice %44 {offsets = [0, 256], sizes = [8, 128], strides = [1, 1]} : vector<8x384xf32> to vector<8x128xf32>
    %48 = vector.extract_strided_slice %38 {offsets = [0, 384], sizes = [8, 128], strides = [1, 1]} : vector<8x512xf32> to vector<8x128xf32>
    %49 = math.tanh %48 : vector<8x128xf32>
    %50 = arith.mulf %46, %7 : vector<8x128xf32>
    %51 = arith.mulf %45, %49 : vector<8x128xf32>
    %52 = arith.addf %50, %51 : vector<8x128xf32>
    %53 = math.tanh %52 : vector<8x128xf32>
    %54 = arith.mulf %47, %53 : vector<8x128xf32>
    %c1_i32 = arith.constant 1 : i32
    %c8_i32_22 = arith.constant 8 : i32
    %55 = arith.muli %c1_i32, %c8_i32_22 : i32
    %56 = tpu.assume_multiple %55, 8 : i32
    %c0_23 = arith.constant 0 : index
    %c0_24 = arith.constant 0 : index
    %57 = vector.load %arg2[%c0_23, %c0_24] : memref<128x512xf32, #tpu.memory_space<vmem>>, vector<128x512xf32>
    %cst_25 = arith.constant dense<0.000000e+00> : vector<8x512xf32>
    %58 = tpu.matmul %30, %57, %cst_25 {dimension_numbers = #tpu.dot_dimension_numbers<[1], [0], [0], [1], [0, 0, 1, 1], [], []>} : vector<8x128xf32>, vector<128x512xf32>, vector<8x512xf32> -> vector<8x512xf32>
    %59 = arith.index_cast %56 : i32 to index
    %c0_26 = arith.constant 0 : index
    %60 = vector.load %arg10[%59, %c0_26] : memref<64x512xf32, #tpu.memory_space<vmem>>, vector<8x512xf32>
    %61 = arith.addf %58, %60 : vector<8x512xf32>
    %62 = vector.extract_strided_slice %61 {offsets = [0, 0], sizes = [8, 384], strides = [1, 1]} : vector<8x512xf32> to vector<8x384xf32>
    %63 = arith.negf %62 : vector<8x384xf32>
    %64 = math.exp %63 : vector<8x384xf32>
    %cst_27 = arith.constant 1.000000e+00 : f32
    %65 = vector.broadcast %cst_27 : f32 to vector<8x384xf32>
    %66 = arith.addf %65, %64 : vector<8x384xf32>
    %67 = arith.divf %65, %66 : vector<8x384xf32>
    %68 = vector.extract_strided_slice %67 {offsets = [0, 0], sizes = [8, 128], strides = [1, 1]} : vector<8x384xf32> to vector<8x128xf32>
    %69 = vector.extract_strided_slice %67 {offsets = [0, 128], sizes = [8, 128], strides = [1, 1]} : vector<8x384xf32> to vector<8x128xf32>
    %70 = vector.extract_strided_slice %67 {offsets = [0, 256], sizes = [8, 128], strides = [1, 1]} : vector<8x384xf32> to vector<8x128xf32>
    %71 = vector.extract_strided_slice %61 {offsets = [0, 384], sizes = [8, 128], strides = [1, 1]} : vector<8x512xf32> to vector<8x128xf32>
    %72 = math.tanh %71 : vector<8x128xf32>
    %73 = arith.mulf %69, %28 : vector<8x128xf32>
    %74 = arith.mulf %68, %72 : vector<8x128xf32>
    %75 = arith.addf %73, %74 : vector<8x128xf32>
    %76 = math.tanh %75 : vector<8x128xf32>
    %77 = arith.mulf %70, %76 : vector<8x128xf32>
    %c0_28 = arith.constant 0 : index
    %c0_29 = arith.constant 0 : index
    %78 = vector.load %arg4[%c0_28, %c0_29] : memref<128x512xf32, #tpu.memory_space<vmem>>, vector<128x512xf32>
    %cst_30 = arith.constant dense<0.000000e+00> : vector<8x512xf32>
    %79 = tpu.matmul %77, %78, %cst_30 {dimension_numbers = #tpu.dot_dimension_numbers<[1], [0], [0], [1], [0, 0, 1, 1], [], []>} : vector<8x128xf32>, vector<128x512xf32>, vector<8x512xf32> -> vector<8x512xf32>
    %c0_31 = arith.constant 0 : index
    %c0_32 = arith.constant 0 : index
    %80 = vector.load %arg6[%c0_31, %c0_32] : memref<1x512xf32, #tpu.memory_space<vmem>>, vector<1x512xf32>
    %81 = vector.broadcast %80 : vector<1x512xf32> to vector<8x512xf32>
    %82 = arith.addf %79, %81 : vector<8x512xf32>
    %c0_33 = arith.constant 0 : index
    %c0_34 = arith.constant 0 : index
    %83 = vector.load %arg5[%c0_33, %c0_34] : memref<128x512xf32, #tpu.memory_space<vmem>>, vector<128x512xf32>
    %cst_35 = arith.constant dense<0.000000e+00> : vector<8x512xf32>
    %84 = tpu.matmul %54, %83, %cst_35 {dimension_numbers = #tpu.dot_dimension_numbers<[1], [0], [0], [1], [0, 0, 1, 1], [], []>} : vector<8x128xf32>, vector<128x512xf32>, vector<8x512xf32> -> vector<8x512xf32>
    %85 = arith.addf %84, %82 : vector<8x512xf32>
    %86 = vector.extract_strided_slice %85 {offsets = [0, 0], sizes = [8, 384], strides = [1, 1]} : vector<8x512xf32> to vector<8x384xf32>
    %87 = arith.negf %86 : vector<8x384xf32>
    %88 = math.exp %87 : vector<8x384xf32>
    %cst_36 = arith.constant 1.000000e+00 : f32
    %89 = vector.broadcast %cst_36 : f32 to vector<8x384xf32>
    %90 = arith.addf %89, %88 : vector<8x384xf32>
    %91 = arith.divf %89, %90 : vector<8x384xf32>
    %92 = vector.extract_strided_slice %91 {offsets = [0, 0], sizes = [8, 128], strides = [1, 1]} : vector<8x384xf32> to vector<8x128xf32>
    %93 = vector.extract_strided_slice %91 {offsets = [0, 128], sizes = [8, 128], strides = [1, 1]} : vector<8x384xf32> to vector<8x128xf32>
    %94 = vector.extract_strided_slice %91 {offsets = [0, 256], sizes = [8, 128], strides = [1, 1]} : vector<8x384xf32> to vector<8x128xf32>
    %95 = vector.extract_strided_slice %85 {offsets = [0, 384], sizes = [8, 128], strides = [1, 1]} : vector<8x512xf32> to vector<8x128xf32>
    %96 = math.tanh %95 : vector<8x128xf32>
    %97 = arith.mulf %93, %52 : vector<8x128xf32>
    %98 = arith.mulf %92, %96 : vector<8x128xf32>
    %99 = arith.addf %97, %98 : vector<8x128xf32>
    %100 = math.tanh %99 : vector<8x128xf32>
    %101 = arith.mulf %94, %100 : vector<8x128xf32>
    %c2_i32 = arith.constant 2 : i32
    %c8_i32_37 = arith.constant 8 : i32
    %102 = arith.muli %c2_i32, %c8_i32_37 : i32
    %103 = tpu.assume_multiple %102, 8 : i32
    %c0_38 = arith.constant 0 : index
    %c0_39 = arith.constant 0 : index
    %104 = vector.load %arg2[%c0_38, %c0_39] : memref<128x512xf32, #tpu.memory_space<vmem>>, vector<128x512xf32>
    %cst_40 = arith.constant dense<0.000000e+00> : vector<8x512xf32>
    %105 = tpu.matmul %77, %104, %cst_40 {dimension_numbers = #tpu.dot_dimension_numbers<[1], [0], [0], [1], [0, 0, 1, 1], [], []>} : vector<8x128xf32>, vector<128x512xf32>, vector<8x512xf32> -> vector<8x512xf32>
    %106 = arith.index_cast %103 : i32 to index
    %c0_41 = arith.constant 0 : index
    %107 = vector.load %arg10[%106, %c0_41] : memref<64x512xf32, #tpu.memory_space<vmem>>, vector<8x512xf32>
    %108 = arith.addf %105, %107 : vector<8x512xf32>
    %109 = vector.extract_strided_slice %108 {offsets = [0, 0], sizes = [8, 384], strides = [1, 1]} : vector<8x512xf32> to vector<8x384xf32>
    %110 = arith.negf %109 : vector<8x384xf32>
    %111 = math.exp %110 : vector<8x384xf32>
    %cst_42 = arith.constant 1.000000e+00 : f32
    %112 = vector.broadcast %cst_42 : f32 to vector<8x384xf32>
    %113 = arith.addf %112, %111 : vector<8x384xf32>
    %114 = arith.divf %112, %113 : vector<8x384xf32>
    %115 = vector.extract_strided_slice %114 {offsets = [0, 0], sizes = [8, 128], strides = [1, 1]} : vector<8x384xf32> to vector<8x128xf32>
    %116 = vector.extract_strided_slice %114 {offsets = [0, 128], sizes = [8, 128], strides = [1, 1]} : vector<8x384xf32> to vector<8x128xf32>
    %117 = vector.extract_strided_slice %114 {offsets = [0, 256], sizes = [8, 128], strides = [1, 1]} : vector<8x384xf32> to vector<8x128xf32>
    %118 = vector.extract_strided_slice %108 {offsets = [0, 384], sizes = [8, 128], strides = [1, 1]} : vector<8x512xf32> to vector<8x128xf32>
    %119 = math.tanh %118 : vector<8x128xf32>
    %120 = arith.mulf %116, %75 : vector<8x128xf32>
    %121 = arith.mulf %115, %119 : vector<8x128xf32>
    %122 = arith.addf %120, %121 : vector<8x128xf32>
    %123 = math.tanh %122 : vector<8x128xf32>
    %124 = arith.mulf %117, %123 : vector<8x128xf32>
    %c0_43 = arith.constant 0 : index
    %c0_44 = arith.constant 0 : index
    %125 = vector.load %arg4[%c0_43, %c0_44] : memref<128x512xf32, #tpu.memory_space<vmem>>, vector<128x512xf32>
    %cst_45 = arith.constant dense<0.000000e+00> : vector<8x512xf32>
    %126 = tpu.matmul %124, %125, %cst_45 {dimension_numbers = #tpu.dot_dimension_numbers<[1], [0], [0], [1], [0, 0, 1, 1], [], []>} : vector<8x128xf32>, vector<128x512xf32>, vector<8x512xf32> -> vector<8x512xf32>
    %c0_46 = arith.constant 0 : index
    %c0_47 = arith.constant 0 : index
    %127 = vector.load %arg6[%c0_46, %c0_47] : memref<1x512xf32, #tpu.memory_space<vmem>>, vector<1x512xf32>
    %128 = vector.broadcast %127 : vector<1x512xf32> to vector<8x512xf32>
    %129 = arith.addf %126, %128 : vector<8x512xf32>
    %c0_48 = arith.constant 0 : index
    %c0_49 = arith.constant 0 : index
    %130 = vector.load %arg5[%c0_48, %c0_49] : memref<128x512xf32, #tpu.memory_space<vmem>>, vector<128x512xf32>
    %cst_50 = arith.constant dense<0.000000e+00> : vector<8x512xf32>
    %131 = tpu.matmul %101, %130, %cst_50 {dimension_numbers = #tpu.dot_dimension_numbers<[1], [0], [0], [1], [0, 0, 1, 1], [], []>} : vector<8x128xf32>, vector<128x512xf32>, vector<8x512xf32> -> vector<8x512xf32>
    %132 = arith.addf %131, %129 : vector<8x512xf32>
    %133 = vector.extract_strided_slice %132 {offsets = [0, 0], sizes = [8, 384], strides = [1, 1]} : vector<8x512xf32> to vector<8x384xf32>
    %134 = arith.negf %133 : vector<8x384xf32>
    %135 = math.exp %134 : vector<8x384xf32>
    %cst_51 = arith.constant 1.000000e+00 : f32
    %136 = vector.broadcast %cst_51 : f32 to vector<8x384xf32>
    %137 = arith.addf %136, %135 : vector<8x384xf32>
    %138 = arith.divf %136, %137 : vector<8x384xf32>
    %139 = vector.extract_strided_slice %138 {offsets = [0, 0], sizes = [8, 128], strides = [1, 1]} : vector<8x384xf32> to vector<8x128xf32>
    %140 = vector.extract_strided_slice %138 {offsets = [0, 128], sizes = [8, 128], strides = [1, 1]} : vector<8x384xf32> to vector<8x128xf32>
    %141 = vector.extract_strided_slice %138 {offsets = [0, 256], sizes = [8, 128], strides = [1, 1]} : vector<8x384xf32> to vector<8x128xf32>
    %142 = vector.extract_strided_slice %132 {offsets = [0, 384], sizes = [8, 128], strides = [1, 1]} : vector<8x512xf32> to vector<8x128xf32>
    %143 = math.tanh %142 : vector<8x128xf32>
    %144 = arith.mulf %140, %99 : vector<8x128xf32>
    %145 = arith.mulf %139, %143 : vector<8x128xf32>
    %146 = arith.addf %144, %145 : vector<8x128xf32>
    %147 = math.tanh %146 : vector<8x128xf32>
    %148 = arith.mulf %141, %147 : vector<8x128xf32>
    %c3_i32 = arith.constant 3 : i32
    %c8_i32_52 = arith.constant 8 : i32
    %149 = arith.muli %c3_i32, %c8_i32_52 : i32
    %150 = tpu.assume_multiple %149, 8 : i32
    %c0_53 = arith.constant 0 : index
    %c0_54 = arith.constant 0 : index
    %151 = vector.load %arg2[%c0_53, %c0_54] : memref<128x512xf32, #tpu.memory_space<vmem>>, vector<128x512xf32>
    %cst_55 = arith.constant dense<0.000000e+00> : vector<8x512xf32>
    %152 = tpu.matmul %124, %151, %cst_55 {dimension_numbers = #tpu.dot_dimension_numbers<[1], [0], [0], [1], [0, 0, 1, 1], [], []>} : vector<8x128xf32>, vector<128x512xf32>, vector<8x512xf32> -> vector<8x512xf32>
    %153 = arith.index_cast %150 : i32 to index
    %c0_56 = arith.constant 0 : index
    %154 = vector.load %arg10[%153, %c0_56] : memref<64x512xf32, #tpu.memory_space<vmem>>, vector<8x512xf32>
    %155 = arith.addf %152, %154 : vector<8x512xf32>
    %156 = vector.extract_strided_slice %155 {offsets = [0, 0], sizes = [8, 384], strides = [1, 1]} : vector<8x512xf32> to vector<8x384xf32>
    %157 = arith.negf %156 : vector<8x384xf32>
    %158 = math.exp %157 : vector<8x384xf32>
    %cst_57 = arith.constant 1.000000e+00 : f32
    %159 = vector.broadcast %cst_57 : f32 to vector<8x384xf32>
    %160 = arith.addf %159, %158 : vector<8x384xf32>
    %161 = arith.divf %159, %160 : vector<8x384xf32>
    %162 = vector.extract_strided_slice %161 {offsets = [0, 0], sizes = [8, 128], strides = [1, 1]} : vector<8x384xf32> to vector<8x128xf32>
    %163 = vector.extract_strided_slice %161 {offsets = [0, 128], sizes = [8, 128], strides = [1, 1]} : vector<8x384xf32> to vector<8x128xf32>
    %164 = vector.extract_strided_slice %161 {offsets = [0, 256], sizes = [8, 128], strides = [1, 1]} : vector<8x384xf32> to vector<8x128xf32>
    %165 = vector.extract_strided_slice %155 {offsets = [0, 384], sizes = [8, 128], strides = [1, 1]} : vector<8x512xf32> to vector<8x128xf32>
    %166 = math.tanh %165 : vector<8x128xf32>
    %167 = arith.mulf %163, %122 : vector<8x128xf32>
    %168 = arith.mulf %162, %166 : vector<8x128xf32>
    %169 = arith.addf %167, %168 : vector<8x128xf32>
    %170 = math.tanh %169 : vector<8x128xf32>
    %171 = arith.mulf %164, %170 : vector<8x128xf32>
    %c0_58 = arith.constant 0 : index
    %c0_59 = arith.constant 0 : index
    %172 = vector.load %arg4[%c0_58, %c0_59] : memref<128x512xf32, #tpu.memory_space<vmem>>, vector<128x512xf32>
    %cst_60 = arith.constant dense<0.000000e+00> : vector<8x512xf32>
    %173 = tpu.matmul %171, %172, %cst_60 {dimension_numbers = #tpu.dot_dimension_numbers<[1], [0], [0], [1], [0, 0, 1, 1], [], []>} : vector<8x128xf32>, vector<128x512xf32>, vector<8x512xf32> -> vector<8x512xf32>
    %c0_61 = arith.constant 0 : index
    %c0_62 = arith.constant 0 : index
    %174 = vector.load %arg6[%c0_61, %c0_62] : memref<1x512xf32, #tpu.memory_space<vmem>>, vector<1x512xf32>
    %175 = vector.broadcast %174 : vector<1x512xf32> to vector<8x512xf32>
    %176 = arith.addf %173, %175 : vector<8x512xf32>
    %c0_63 = arith.constant 0 : index
    %c0_64 = arith.constant 0 : index
    %177 = vector.load %arg5[%c0_63, %c0_64] : memref<128x512xf32, #tpu.memory_space<vmem>>, vector<128x512xf32>
    %cst_65 = arith.constant dense<0.000000e+00> : vector<8x512xf32>
    %178 = tpu.matmul %148, %177, %cst_65 {dimension_numbers = #tpu.dot_dimension_numbers<[1], [0], [0], [1], [0, 0, 1, 1], [], []>} : vector<8x128xf32>, vector<128x512xf32>, vector<8x512xf32> -> vector<8x512xf32>
    %179 = arith.addf %178, %176 : vector<8x512xf32>
    %180 = vector.extract_strided_slice %179 {offsets = [0, 0], sizes = [8, 384], strides = [1, 1]} : vector<8x512xf32> to vector<8x384xf32>
    %181 = arith.negf %180 : vector<8x384xf32>
    %182 = math.exp %181 : vector<8x384xf32>
    %cst_66 = arith.constant 1.000000e+00 : f32
    %183 = vector.broadcast %cst_66 : f32 to vector<8x384xf32>
    %184 = arith.addf %183, %182 : vector<8x384xf32>
    %185 = arith.divf %183, %184 : vector<8x384xf32>
    %186 = vector.extract_strided_slice %185 {offsets = [0, 0], sizes = [8, 128], strides = [1, 1]} : vector<8x384xf32> to vector<8x128xf32>
    %187 = vector.extract_strided_slice %185 {offsets = [0, 128], sizes = [8, 128], strides = [1, 1]} : vector<8x384xf32> to vector<8x128xf32>
    %188 = vector.extract_strided_slice %185 {offsets = [0, 256], sizes = [8, 128], strides = [1, 1]} : vector<8x384xf32> to vector<8x128xf32>
    %189 = vector.extract_strided_slice %179 {offsets = [0, 384], sizes = [8, 128], strides = [1, 1]} : vector<8x512xf32> to vector<8x128xf32>
    %190 = math.tanh %189 : vector<8x128xf32>
    %191 = arith.mulf %187, %146 : vector<8x128xf32>
    %192 = arith.mulf %186, %190 : vector<8x128xf32>
    %193 = arith.addf %191, %192 : vector<8x128xf32>
    %194 = math.tanh %193 : vector<8x128xf32>
    %195 = arith.mulf %188, %194 : vector<8x128xf32>
    %c4_i32 = arith.constant 4 : i32
    %c8_i32_67 = arith.constant 8 : i32
    %196 = arith.muli %c4_i32, %c8_i32_67 : i32
    %197 = tpu.assume_multiple %196, 8 : i32
    %c0_68 = arith.constant 0 : index
    %c0_69 = arith.constant 0 : index
    %198 = vector.load %arg2[%c0_68, %c0_69] : memref<128x512xf32, #tpu.memory_space<vmem>>, vector<128x512xf32>
    %cst_70 = arith.constant dense<0.000000e+00> : vector<8x512xf32>
    %199 = tpu.matmul %171, %198, %cst_70 {dimension_numbers = #tpu.dot_dimension_numbers<[1], [0], [0], [1], [0, 0, 1, 1], [], []>} : vector<8x128xf32>, vector<128x512xf32>, vector<8x512xf32> -> vector<8x512xf32>
    %200 = arith.index_cast %197 : i32 to index
    %c0_71 = arith.constant 0 : index
    %201 = vector.load %arg10[%200, %c0_71] : memref<64x512xf32, #tpu.memory_space<vmem>>, vector<8x512xf32>
    %202 = arith.addf %199, %201 : vector<8x512xf32>
    %203 = vector.extract_strided_slice %202 {offsets = [0, 0], sizes = [8, 384], strides = [1, 1]} : vector<8x512xf32> to vector<8x384xf32>
    %204 = arith.negf %203 : vector<8x384xf32>
    %205 = math.exp %204 : vector<8x384xf32>
    %cst_72 = arith.constant 1.000000e+00 : f32
    %206 = vector.broadcast %cst_72 : f32 to vector<8x384xf32>
    %207 = arith.addf %206, %205 : vector<8x384xf32>
    %208 = arith.divf %206, %207 : vector<8x384xf32>
    %209 = vector.extract_strided_slice %208 {offsets = [0, 0], sizes = [8, 128], strides = [1, 1]} : vector<8x384xf32> to vector<8x128xf32>
    %210 = vector.extract_strided_slice %208 {offsets = [0, 128], sizes = [8, 128], strides = [1, 1]} : vector<8x384xf32> to vector<8x128xf32>
    %211 = vector.extract_strided_slice %208 {offsets = [0, 256], sizes = [8, 128], strides = [1, 1]} : vector<8x384xf32> to vector<8x128xf32>
    %212 = vector.extract_strided_slice %202 {offsets = [0, 384], sizes = [8, 128], strides = [1, 1]} : vector<8x512xf32> to vector<8x128xf32>
    %213 = math.tanh %212 : vector<8x128xf32>
    %214 = arith.mulf %210, %169 : vector<8x128xf32>
    %215 = arith.mulf %209, %213 : vector<8x128xf32>
    %216 = arith.addf %214, %215 : vector<8x128xf32>
    %217 = math.tanh %216 : vector<8x128xf32>
    %218 = arith.mulf %211, %217 : vector<8x128xf32>
    %c0_73 = arith.constant 0 : index
    %c0_74 = arith.constant 0 : index
    %219 = vector.load %arg4[%c0_73, %c0_74] : memref<128x512xf32, #tpu.memory_space<vmem>>, vector<128x512xf32>
    %cst_75 = arith.constant dense<0.000000e+00> : vector<8x512xf32>
    %220 = tpu.matmul %218, %219, %cst_75 {dimension_numbers = #tpu.dot_dimension_numbers<[1], [0], [0], [1], [0, 0, 1, 1], [], []>} : vector<8x128xf32>, vector<128x512xf32>, vector<8x512xf32> -> vector<8x512xf32>
    %c0_76 = arith.constant 0 : index
    %c0_77 = arith.constant 0 : index
    %221 = vector.load %arg6[%c0_76, %c0_77] : memref<1x512xf32, #tpu.memory_space<vmem>>, vector<1x512xf32>
    %222 = vector.broadcast %221 : vector<1x512xf32> to vector<8x512xf32>
    %223 = arith.addf %220, %222 : vector<8x512xf32>
    %c0_78 = arith.constant 0 : index
    %c0_79 = arith.constant 0 : index
    %224 = vector.load %arg5[%c0_78, %c0_79] : memref<128x512xf32, #tpu.memory_space<vmem>>, vector<128x512xf32>
    %cst_80 = arith.constant dense<0.000000e+00> : vector<8x512xf32>
    %225 = tpu.matmul %195, %224, %cst_80 {dimension_numbers = #tpu.dot_dimension_numbers<[1], [0], [0], [1], [0, 0, 1, 1], [], []>} : vector<8x128xf32>, vector<128x512xf32>, vector<8x512xf32> -> vector<8x512xf32>
    %226 = arith.addf %225, %223 : vector<8x512xf32>
    %227 = vector.extract_strided_slice %226 {offsets = [0, 0], sizes = [8, 384], strides = [1, 1]} : vector<8x512xf32> to vector<8x384xf32>
    %228 = arith.negf %227 : vector<8x384xf32>
    %229 = math.exp %228 : vector<8x384xf32>
    %cst_81 = arith.constant 1.000000e+00 : f32
    %230 = vector.broadcast %cst_81 : f32 to vector<8x384xf32>
    %231 = arith.addf %230, %229 : vector<8x384xf32>
    %232 = arith.divf %230, %231 : vector<8x384xf32>
    %233 = vector.extract_strided_slice %232 {offsets = [0, 0], sizes = [8, 128], strides = [1, 1]} : vector<8x384xf32> to vector<8x128xf32>
    %234 = vector.extract_strided_slice %232 {offsets = [0, 128], sizes = [8, 128], strides = [1, 1]} : vector<8x384xf32> to vector<8x128xf32>
    %235 = vector.extract_strided_slice %232 {offsets = [0, 256], sizes = [8, 128], strides = [1, 1]} : vector<8x384xf32> to vector<8x128xf32>
    %236 = vector.extract_strided_slice %226 {offsets = [0, 384], sizes = [8, 128], strides = [1, 1]} : vector<8x512xf32> to vector<8x128xf32>
    %237 = math.tanh %236 : vector<8x128xf32>
    %238 = arith.mulf %234, %193 : vector<8x128xf32>
    %239 = arith.mulf %233, %237 : vector<8x128xf32>
    %240 = arith.addf %238, %239 : vector<8x128xf32>
    %241 = math.tanh %240 : vector<8x128xf32>
    %242 = arith.mulf %235, %241 : vector<8x128xf32>
    %c5_i32 = arith.constant 5 : i32
    %c8_i32_82 = arith.constant 8 : i32
    %243 = arith.muli %c5_i32, %c8_i32_82 : i32
    %244 = tpu.assume_multiple %243, 8 : i32
    %c0_83 = arith.constant 0 : index
    %c0_84 = arith.constant 0 : index
    %245 = vector.load %arg2[%c0_83, %c0_84] : memref<128x512xf32, #tpu.memory_space<vmem>>, vector<128x512xf32>
    %cst_85 = arith.constant dense<0.000000e+00> : vector<8x512xf32>
    %246 = tpu.matmul %218, %245, %cst_85 {dimension_numbers = #tpu.dot_dimension_numbers<[1], [0], [0], [1], [0, 0, 1, 1], [], []>} : vector<8x128xf32>, vector<128x512xf32>, vector<8x512xf32> -> vector<8x512xf32>
    %247 = arith.index_cast %244 : i32 to index
    %c0_86 = arith.constant 0 : index
    %248 = vector.load %arg10[%247, %c0_86] : memref<64x512xf32, #tpu.memory_space<vmem>>, vector<8x512xf32>
    %249 = arith.addf %246, %248 : vector<8x512xf32>
    %250 = vector.extract_strided_slice %249 {offsets = [0, 0], sizes = [8, 384], strides = [1, 1]} : vector<8x512xf32> to vector<8x384xf32>
    %251 = arith.negf %250 : vector<8x384xf32>
    %252 = math.exp %251 : vector<8x384xf32>
    %cst_87 = arith.constant 1.000000e+00 : f32
    %253 = vector.broadcast %cst_87 : f32 to vector<8x384xf32>
    %254 = arith.addf %253, %252 : vector<8x384xf32>
    %255 = arith.divf %253, %254 : vector<8x384xf32>
    %256 = vector.extract_strided_slice %255 {offsets = [0, 0], sizes = [8, 128], strides = [1, 1]} : vector<8x384xf32> to vector<8x128xf32>
    %257 = vector.extract_strided_slice %255 {offsets = [0, 128], sizes = [8, 128], strides = [1, 1]} : vector<8x384xf32> to vector<8x128xf32>
    %258 = vector.extract_strided_slice %255 {offsets = [0, 256], sizes = [8, 128], strides = [1, 1]} : vector<8x384xf32> to vector<8x128xf32>
    %259 = vector.extract_strided_slice %249 {offsets = [0, 384], sizes = [8, 128], strides = [1, 1]} : vector<8x512xf32> to vector<8x128xf32>
    %260 = math.tanh %259 : vector<8x128xf32>
    %261 = arith.mulf %257, %216 : vector<8x128xf32>
    %262 = arith.mulf %256, %260 : vector<8x128xf32>
    %263 = arith.addf %261, %262 : vector<8x128xf32>
    %264 = math.tanh %263 : vector<8x128xf32>
    %265 = arith.mulf %258, %264 : vector<8x128xf32>
    %c0_88 = arith.constant 0 : index
    %c0_89 = arith.constant 0 : index
    %266 = vector.load %arg4[%c0_88, %c0_89] : memref<128x512xf32, #tpu.memory_space<vmem>>, vector<128x512xf32>
    %cst_90 = arith.constant dense<0.000000e+00> : vector<8x512xf32>
    %267 = tpu.matmul %265, %266, %cst_90 {dimension_numbers = #tpu.dot_dimension_numbers<[1], [0], [0], [1], [0, 0, 1, 1], [], []>} : vector<8x128xf32>, vector<128x512xf32>, vector<8x512xf32> -> vector<8x512xf32>
    %c0_91 = arith.constant 0 : index
    %c0_92 = arith.constant 0 : index
    %268 = vector.load %arg6[%c0_91, %c0_92] : memref<1x512xf32, #tpu.memory_space<vmem>>, vector<1x512xf32>
    %269 = vector.broadcast %268 : vector<1x512xf32> to vector<8x512xf32>
    %270 = arith.addf %267, %269 : vector<8x512xf32>
    %c0_93 = arith.constant 0 : index
    %c0_94 = arith.constant 0 : index
    %271 = vector.load %arg5[%c0_93, %c0_94] : memref<128x512xf32, #tpu.memory_space<vmem>>, vector<128x512xf32>
    %cst_95 = arith.constant dense<0.000000e+00> : vector<8x512xf32>
    %272 = tpu.matmul %242, %271, %cst_95 {dimension_numbers = #tpu.dot_dimension_numbers<[1], [0], [0], [1], [0, 0, 1, 1], [], []>} : vector<8x128xf32>, vector<128x512xf32>, vector<8x512xf32> -> vector<8x512xf32>
    %273 = arith.addf %272, %270 : vector<8x512xf32>
    %274 = vector.extract_strided_slice %273 {offsets = [0, 0], sizes = [8, 384], strides = [1, 1]} : vector<8x512xf32> to vector<8x384xf32>
    %275 = arith.negf %274 : vector<8x384xf32>
    %276 = math.exp %275 : vector<8x384xf32>
    %cst_96 = arith.constant 1.000000e+00 : f32
    %277 = vector.broadcast %cst_96 : f32 to vector<8x384xf32>
    %278 = arith.addf %277, %276 : vector<8x384xf32>
    %279 = arith.divf %277, %278 : vector<8x384xf32>
    %280 = vector.extract_strided_slice %279 {offsets = [0, 0], sizes = [8, 128], strides = [1, 1]} : vector<8x384xf32> to vector<8x128xf32>
    %281 = vector.extract_strided_slice %279 {offsets = [0, 128], sizes = [8, 128], strides = [1, 1]} : vector<8x384xf32> to vector<8x128xf32>
    %282 = vector.extract_strided_slice %279 {offsets = [0, 256], sizes = [8, 128], strides = [1, 1]} : vector<8x384xf32> to vector<8x128xf32>
    %283 = vector.extract_strided_slice %273 {offsets = [0, 384], sizes = [8, 128], strides = [1, 1]} : vector<8x512xf32> to vector<8x128xf32>
    %284 = math.tanh %283 : vector<8x128xf32>
    %285 = arith.mulf %281, %240 : vector<8x128xf32>
    %286 = arith.mulf %280, %284 : vector<8x128xf32>
    %287 = arith.addf %285, %286 : vector<8x128xf32>
    %288 = math.tanh %287 : vector<8x128xf32>
    %289 = arith.mulf %282, %288 : vector<8x128xf32>
    %c6_i32 = arith.constant 6 : i32
    %c8_i32_97 = arith.constant 8 : i32
    %290 = arith.muli %c6_i32, %c8_i32_97 : i32
    %291 = tpu.assume_multiple %290, 8 : i32
    %c0_98 = arith.constant 0 : index
    %c0_99 = arith.constant 0 : index
    %292 = vector.load %arg2[%c0_98, %c0_99] : memref<128x512xf32, #tpu.memory_space<vmem>>, vector<128x512xf32>
    %cst_100 = arith.constant dense<0.000000e+00> : vector<8x512xf32>
    %293 = tpu.matmul %265, %292, %cst_100 {dimension_numbers = #tpu.dot_dimension_numbers<[1], [0], [0], [1], [0, 0, 1, 1], [], []>} : vector<8x128xf32>, vector<128x512xf32>, vector<8x512xf32> -> vector<8x512xf32>
    %294 = arith.index_cast %291 : i32 to index
    %c0_101 = arith.constant 0 : index
    %295 = vector.load %arg10[%294, %c0_101] : memref<64x512xf32, #tpu.memory_space<vmem>>, vector<8x512xf32>
    %296 = arith.addf %293, %295 : vector<8x512xf32>
    %297 = vector.extract_strided_slice %296 {offsets = [0, 0], sizes = [8, 384], strides = [1, 1]} : vector<8x512xf32> to vector<8x384xf32>
    %298 = arith.negf %297 : vector<8x384xf32>
    %299 = math.exp %298 : vector<8x384xf32>
    %cst_102 = arith.constant 1.000000e+00 : f32
    %300 = vector.broadcast %cst_102 : f32 to vector<8x384xf32>
    %301 = arith.addf %300, %299 : vector<8x384xf32>
    %302 = arith.divf %300, %301 : vector<8x384xf32>
    %303 = vector.extract_strided_slice %302 {offsets = [0, 0], sizes = [8, 128], strides = [1, 1]} : vector<8x384xf32> to vector<8x128xf32>
    %304 = vector.extract_strided_slice %302 {offsets = [0, 128], sizes = [8, 128], strides = [1, 1]} : vector<8x384xf32> to vector<8x128xf32>
    %305 = vector.extract_strided_slice %302 {offsets = [0, 256], sizes = [8, 128], strides = [1, 1]} : vector<8x384xf32> to vector<8x128xf32>
    %306 = vector.extract_strided_slice %296 {offsets = [0, 384], sizes = [8, 128], strides = [1, 1]} : vector<8x512xf32> to vector<8x128xf32>
    %307 = math.tanh %306 : vector<8x128xf32>
    %308 = arith.mulf %304, %263 : vector<8x128xf32>
    %309 = arith.mulf %303, %307 : vector<8x128xf32>
    %310 = arith.addf %308, %309 : vector<8x128xf32>
    %311 = math.tanh %310 : vector<8x128xf32>
    %312 = arith.mulf %305, %311 : vector<8x128xf32>
    %c0_103 = arith.constant 0 : index
    %c0_104 = arith.constant 0 : index
    %313 = vector.load %arg4[%c0_103, %c0_104] : memref<128x512xf32, #tpu.memory_space<vmem>>, vector<128x512xf32>
    %cst_105 = arith.constant dense<0.000000e+00> : vector<8x512xf32>
    %314 = tpu.matmul %312, %313, %cst_105 {dimension_numbers = #tpu.dot_dimension_numbers<[1], [0], [0], [1], [0, 0, 1, 1], [], []>} : vector<8x128xf32>, vector<128x512xf32>, vector<8x512xf32> -> vector<8x512xf32>
    %c0_106 = arith.constant 0 : index
    %c0_107 = arith.constant 0 : index
    %315 = vector.load %arg6[%c0_106, %c0_107] : memref<1x512xf32, #tpu.memory_space<vmem>>, vector<1x512xf32>
    %316 = vector.broadcast %315 : vector<1x512xf32> to vector<8x512xf32>
    %317 = arith.addf %314, %316 : vector<8x512xf32>
    %c0_108 = arith.constant 0 : index
    %c0_109 = arith.constant 0 : index
    %318 = vector.load %arg5[%c0_108, %c0_109] : memref<128x512xf32, #tpu.memory_space<vmem>>, vector<128x512xf32>
    %cst_110 = arith.constant dense<0.000000e+00> : vector<8x512xf32>
    %319 = tpu.matmul %289, %318, %cst_110 {dimension_numbers = #tpu.dot_dimension_numbers<[1], [0], [0], [1], [0, 0, 1, 1], [], []>} : vector<8x128xf32>, vector<128x512xf32>, vector<8x512xf32> -> vector<8x512xf32>
    %320 = arith.addf %319, %317 : vector<8x512xf32>
    %321 = vector.extract_strided_slice %320 {offsets = [0, 0], sizes = [8, 384], strides = [1, 1]} : vector<8x512xf32> to vector<8x384xf32>
    %322 = arith.negf %321 : vector<8x384xf32>
    %323 = math.exp %322 : vector<8x384xf32>
    %cst_111 = arith.constant 1.000000e+00 : f32
    %324 = vector.broadcast %cst_111 : f32 to vector<8x384xf32>
    %325 = arith.addf %324, %323 : vector<8x384xf32>
    %326 = arith.divf %324, %325 : vector<8x384xf32>
    %327 = vector.extract_strided_slice %326 {offsets = [0, 0], sizes = [8, 128], strides = [1, 1]} : vector<8x384xf32> to vector<8x128xf32>
    %328 = vector.extract_strided_slice %326 {offsets = [0, 128], sizes = [8, 128], strides = [1, 1]} : vector<8x384xf32> to vector<8x128xf32>
    %329 = vector.extract_strided_slice %326 {offsets = [0, 256], sizes = [8, 128], strides = [1, 1]} : vector<8x384xf32> to vector<8x128xf32>
    %330 = vector.extract_strided_slice %320 {offsets = [0, 384], sizes = [8, 128], strides = [1, 1]} : vector<8x512xf32> to vector<8x128xf32>
    %331 = math.tanh %330 : vector<8x128xf32>
    %332 = arith.mulf %328, %287 : vector<8x128xf32>
    %333 = arith.mulf %327, %331 : vector<8x128xf32>
    %334 = arith.addf %332, %333 : vector<8x128xf32>
    %335 = math.tanh %334 : vector<8x128xf32>
    %336 = arith.mulf %329, %335 : vector<8x128xf32>
    %c7_i32 = arith.constant 7 : i32
    %c8_i32_112 = arith.constant 8 : i32
    %337 = arith.muli %c7_i32, %c8_i32_112 : i32
    %338 = tpu.assume_multiple %337, 8 : i32
    %c0_113 = arith.constant 0 : index
    %c0_114 = arith.constant 0 : index
    %339 = vector.load %arg2[%c0_113, %c0_114] : memref<128x512xf32, #tpu.memory_space<vmem>>, vector<128x512xf32>
    %cst_115 = arith.constant dense<0.000000e+00> : vector<8x512xf32>
    %340 = tpu.matmul %312, %339, %cst_115 {dimension_numbers = #tpu.dot_dimension_numbers<[1], [0], [0], [1], [0, 0, 1, 1], [], []>} : vector<8x128xf32>, vector<128x512xf32>, vector<8x512xf32> -> vector<8x512xf32>
    %341 = arith.index_cast %338 : i32 to index
    %c0_116 = arith.constant 0 : index
    %342 = vector.load %arg10[%341, %c0_116] : memref<64x512xf32, #tpu.memory_space<vmem>>, vector<8x512xf32>
    %343 = arith.addf %340, %342 : vector<8x512xf32>
    %344 = vector.extract_strided_slice %343 {offsets = [0, 0], sizes = [8, 384], strides = [1, 1]} : vector<8x512xf32> to vector<8x384xf32>
    %345 = arith.negf %344 : vector<8x384xf32>
    %346 = math.exp %345 : vector<8x384xf32>
    %cst_117 = arith.constant 1.000000e+00 : f32
    %347 = vector.broadcast %cst_117 : f32 to vector<8x384xf32>
    %348 = arith.addf %347, %346 : vector<8x384xf32>
    %349 = arith.divf %347, %348 : vector<8x384xf32>
    %350 = vector.extract_strided_slice %349 {offsets = [0, 0], sizes = [8, 128], strides = [1, 1]} : vector<8x384xf32> to vector<8x128xf32>
    %351 = vector.extract_strided_slice %349 {offsets = [0, 128], sizes = [8, 128], strides = [1, 1]} : vector<8x384xf32> to vector<8x128xf32>
    %352 = vector.extract_strided_slice %349 {offsets = [0, 256], sizes = [8, 128], strides = [1, 1]} : vector<8x384xf32> to vector<8x128xf32>
    %353 = vector.extract_strided_slice %343 {offsets = [0, 384], sizes = [8, 128], strides = [1, 1]} : vector<8x512xf32> to vector<8x128xf32>
    %354 = math.tanh %353 : vector<8x128xf32>
    %355 = arith.mulf %351, %310 : vector<8x128xf32>
    %356 = arith.mulf %350, %354 : vector<8x128xf32>
    %357 = arith.addf %355, %356 : vector<8x128xf32>
    %358 = math.tanh %357 : vector<8x128xf32>
    %359 = arith.mulf %352, %358 : vector<8x128xf32>
    %c0_118 = arith.constant 0 : index
    %c0_119 = arith.constant 0 : index
    %360 = vector.load %arg4[%c0_118, %c0_119] : memref<128x512xf32, #tpu.memory_space<vmem>>, vector<128x512xf32>
    %cst_120 = arith.constant dense<0.000000e+00> : vector<8x512xf32>
    %361 = tpu.matmul %359, %360, %cst_120 {dimension_numbers = #tpu.dot_dimension_numbers<[1], [0], [0], [1], [0, 0, 1, 1], [], []>} : vector<8x128xf32>, vector<128x512xf32>, vector<8x512xf32> -> vector<8x512xf32>
    %c0_121 = arith.constant 0 : index
    %c0_122 = arith.constant 0 : index
    %362 = vector.load %arg6[%c0_121, %c0_122] : memref<1x512xf32, #tpu.memory_space<vmem>>, vector<1x512xf32>
    %363 = vector.broadcast %362 : vector<1x512xf32> to vector<8x512xf32>
    %364 = arith.addf %361, %363 : vector<8x512xf32>
    %c0_123 = arith.constant 0 : index
    %c0_124 = arith.constant 0 : index
    %365 = vector.load %arg5[%c0_123, %c0_124] : memref<128x512xf32, #tpu.memory_space<vmem>>, vector<128x512xf32>
    %cst_125 = arith.constant dense<0.000000e+00> : vector<8x512xf32>
    %366 = tpu.matmul %336, %365, %cst_125 {dimension_numbers = #tpu.dot_dimension_numbers<[1], [0], [0], [1], [0, 0, 1, 1], [], []>} : vector<8x128xf32>, vector<128x512xf32>, vector<8x512xf32> -> vector<8x512xf32>
    %367 = arith.addf %366, %364 : vector<8x512xf32>
    %368 = vector.extract_strided_slice %367 {offsets = [0, 0], sizes = [8, 384], strides = [1, 1]} : vector<8x512xf32> to vector<8x384xf32>
    %369 = arith.negf %368 : vector<8x384xf32>
    %370 = math.exp %369 : vector<8x384xf32>
    %cst_126 = arith.constant 1.000000e+00 : f32
    %371 = vector.broadcast %cst_126 : f32 to vector<8x384xf32>
    %372 = arith.addf %371, %370 : vector<8x384xf32>
    %373 = arith.divf %371, %372 : vector<8x384xf32>
    %374 = vector.extract_strided_slice %373 {offsets = [0, 0], sizes = [8, 128], strides = [1, 1]} : vector<8x384xf32> to vector<8x128xf32>
    %375 = vector.extract_strided_slice %373 {offsets = [0, 128], sizes = [8, 128], strides = [1, 1]} : vector<8x384xf32> to vector<8x128xf32>
    %376 = vector.extract_strided_slice %373 {offsets = [0, 256], sizes = [8, 128], strides = [1, 1]} : vector<8x384xf32> to vector<8x128xf32>
    %377 = vector.extract_strided_slice %367 {offsets = [0, 384], sizes = [8, 128], strides = [1, 1]} : vector<8x512xf32> to vector<8x128xf32>
    %378 = math.tanh %377 : vector<8x128xf32>
    %379 = arith.mulf %375, %334 : vector<8x128xf32>
    %380 = arith.mulf %374, %378 : vector<8x128xf32>
    %381 = arith.addf %379, %380 : vector<8x128xf32>
    %382 = math.tanh %381 : vector<8x128xf32>
    %383 = arith.mulf %376, %382 : vector<8x128xf32>
    %c8_i32_127 = arith.constant 8 : i32
    %c0_128 = arith.constant 0 : index
    %c0_129 = arith.constant 0 : index
    %384 = vector.load %arg7[%c0_128, %c0_129] : memref<128x1xf32, #tpu.memory_space<vmem>>, vector<128x1xf32>
    %cst_130 = arith.constant dense<0.000000e+00> : vector<8x1xf32>
    %385 = tpu.matmul %383, %384, %cst_130 {dimension_numbers = #tpu.dot_dimension_numbers<[1], [0], [0], [1], [0, 0, 1, 1], [], []>} : vector<8x128xf32>, vector<128x1xf32>, vector<8x1xf32> -> vector<8x1xf32>
    %c0_131 = arith.constant 0 : index
    %c0_132 = arith.constant 0 : index
    %386 = vector.load %arg8[%c0_131, %c0_132] : memref<1x1xf32, #tpu.memory_space<vmem>>, vector<1x1xf32>
    %387 = vector.broadcast %386 : vector<1x1xf32> to vector<8x1xf32>
    %388 = arith.addf %385, %387 : vector<8x1xf32>
    %c0_133 = arith.constant 0 : index
    %c0_134 = arith.constant 0 : index
    %389 = vector.load %arg9[%c0_133, %c0_134] : memref<8x1xf32, #tpu.memory_space<vmem>>, vector<8x1xf32>
    tpu.vector_store %arg9[%c0_133, %c0_134], %388 {strides = array<i32>} : memref<8x1xf32, #tpu.memory_space<vmem>>, vector<8x1xf32>,
    return
  }
}

</mosaic_0001>

<bundles_post_ra>
// kernel: tpu_custom_call.1
= control target key start
LH: loop header
LB: loop body
LE: loop exit
PB: predicated region body
PF: predicated region fallthrough
CT: control target
= control target key end

     0   :  { %s9144_s0 = inlined_call_operand.vmem [shape: f32[64,5], index: 0, kind: input, shape index: {}]   ;;  %s9145_s1 = inlined_call_operand.vmem [shape: f32[5,512], index: 1, kind: input, shape index: {}]   ;;  %s9146_s2 = inlined_call_operand.hbm [shape: f32[128,512], index: 2, kind: input, shape index: {}]   ;;  %s9147_s3 = inlined_call_operand.vmem [shape: f32[1,512], index: 3, kind: input, shape index: {}]   ;;  %s9148_s4 = inlined_call_operand.hbm [shape: f32[128,512], index: 4, kind: input, shape index: {}]   ;;  %s9149_s5 = inlined_call_operand.hbm [shape: f32[128,512], index: 5, kind: input, shape index: {}]   ;;  %s9150_s6 = inlined_call_operand.vmem [shape: f32[1,512], index: 6, kind: input, shape index: {}]   ;;  %s9151_s7 = inlined_call_operand.vmem [shape: f32[128,1], index: 7, kind: input, shape index: {}]   ;;  %s9152_s8 = inlined_call_operand.<no memory space> [shape: f32[1,1], index: 8, kind: input, shape index: {}]   ;;  %s9153_s9 = inlined_call_operand.vmem [shape: f32[8,1], index: 9, kind: output, shape index: {}]  }
   0x1   :  { %v14_v0 = vstv %s9152_s8 }
   0x2   :  { %15 = vst [vmem:[#allocation3] sm:$0x1] %v14_v0 }
   0x3   :  { %16 = vsyncpa [#allocation5], 0 }
   0x4   :  { %17 = vsyncpa [#allocation7], 0  ;;  %s5621_s11 = smov [#allocation6]   ;;  %s5622_s13 = smov [#allocation4]  }
   0x5   :  { %s41_s12 = sshll.u32 %s5621_s11, 4  ;;  %s27_s14 = sshll.u32 %s5622_s13, 4  ;;  %s42_s12 = int_to_ptr.vmem [resolvable:$true] %s41_s12  ;;  %s28_s14 = int_to_ptr.vmem [resolvable:$true] %s27_s14 }
   0x6   :  { %s5565_s15 = scalar_lea.vmem %s42_s12, 8192  ;;  %p5570_p1 = scmp.lt.s32.totalorder %s42_s12, %s42_s12 }
   0x7   :  { %p5566_p0 = scmp.ne.s32.totalorder %s42_s12, %s5565_s15  ;;  %p5571_p2 = scmp.lt.s32.totalorder %s5565_s15, %s5565_s15 }
   0x9   :  { %p5572_p3 = por %p5571_p2, %p5570_p1 }
   0xb   :  { %p5573_p4 = pnand %p5572_p3, %p5566_p0 }
   0xd   :  { %5576 = shalt.err (!%p5573_p4)
}
   0xe   :  { %s5623_s16 = smov 512   ;;  %s5624_s17 = smov 32  }
   0xf   :  { %47 = dma.hbm_to_vmem [thread:$0]  %s9148_s4, 8192, %s42_s12, [#allocation7], %s5623_s16, %s5623_s16, %s5624_s17  }
  0x10   :  { %s5585_s19 = scalar_lea.vmem %s28_s14, 8192  ;;  %p5590_p6 = scmp.lt.s32.totalorder %s28_s14, %s28_s14 }
  0x11   :  { %p5586_p5 = scmp.ne.s32.totalorder %s28_s14, %s5585_s19  ;;  %p5591_p7 = scmp.lt.s32.totalorder %s5585_s19, %s5585_s19 }
  0x13   :  { %p5592_p8 = por %p5591_p7, %p5590_p6 }
  0x15   :  { %p5593_p9 = pnand %p5592_p8, %p5586_p5 }
  0x17   :  { %5596 = shalt.err (!%p5593_p9)
}
  0x18   :  { %33 = dma.hbm_to_vmem [thread:$0]  %s9146_s2, 8192, %s28_s14, [#allocation5], %s5623_s16, %s5623_s16, %s5624_s17  }
  0x19   :  { %s5625_s22 = smov [#allocation8]  }
  0x1a   :  { %s53_s23 = sshll.u32 %s5625_s22, 4  ;;  %s54_s23 = int_to_ptr.vmem [resolvable:$true] %s53_s23 }
  0x1b   :  { %s5605_s24 = scalar_lea.vmem %s54_s23, 8192  ;;  %p5610_p11 = scmp.lt.s32.totalorder %s54_s23, %s54_s23 }
  0x1c   :  { %p5606_p10 = scmp.ne.s32.totalorder %s54_s23, %s5605_s24  ;;  %p5611_p12 = scmp.lt.s32.totalorder %s5605_s24, %s5605_s24 }
  0x1e   :  { %p5612_p13 = por %p5611_p12, %p5610_p11 }
  0x20   :  { %p5613_p0 = pnand %p5612_p13, %p5606_p10 }
  0x22   :  { %5616 = shalt.err (!%p5613_p0)
}
  0x23   :  { %59 = dma.hbm_to_vmem [thread:$0]  %s9149_s5, 8192, %s54_s23, [#allocation7], %s5623_s16, %s5623_s16, %s5624_s17  }
  0x24   :  { %5617 = dma.done.wait [#allocation5], 8192  }
  0x25   :  { %5618 = vsyncadd [#allocation5], 4294959104 }
  0x26   :  { %5619 = dma.done.wait [#allocation7], 16384  }
  0x27   :  { %5620 = vsyncadd [#allocation7], 4294950912  ;;  %v9154_v1 = vmov 0.0   ;;  %vm134_vm0 = vcmask 1044480   ;;  %vm109_vm1 = vcmask 39936   ;;  %v75_v6 = vld [vmem:[%s9144_s0] sm:$0xff] }
  0x28   :  { %211 = vmatprep.mubr.f32.mxu0 %v9154_v1  ;;  %324 = vmatprep.mubr.f32.mxu1 %v9154_v1  ;;  %v84_v2 = vld [vmem:[%s9145_s1 + $0x8] sm:$0x1f]  ;;  %v86_v3 = vld [vmem:[%s9145_s1 + $0x18] sm:$0x1f]  ;;  %v83_v4 = vld [vmem:[%s9145_s1] sm:$0x1f] }
  0x29   :  { %4575 = vmatprep.subr.msk.mxu0 %vm134_vm0, %v84_v2  ;;  %4585 = vmatprep.subr.msk.mxu1 %vm134_vm0, %v86_v3  ;;  %v85_v5 = vld [vmem:[%s9145_s1 + $0x10] sm:$0x1f]  ;;  %v468_v8 = vld [vmem:[#allocation4 + $0x1f8] sm:$0xff]  ;;  %v465_v9 = vld [vmem:[#allocation4 + $0x1e0] sm:$0xff]  ;;  %vm5627_vm2 = vmmov 0   ;;  %vm4560_vm3 = vcmask 7168  }
  0x2a   :  { %v466_v7 = vld [vmem:[#allocation4 + $0x1e8] sm:$0xff]  ;;  %4576 = vmatpush1.msk.msra.mxu0 %vm134_vm0, %v83_v4  ;;  %4586 = vmatpush1.msk.msra.mxu1 %vm134_vm0, %v85_v5  ;;  %v467_v10 = vld [vmem:[#allocation4 + $0x1f0] sm:$0xff]  ;;  %v464_v12 = vld [vmem:[#allocation4 + $0x1d8] sm:$0xff] }
  0x2b   :  { %4577 = vmatmul.mubr.msk.f32.vlgmr.msra.gmra.mxu0 %vm109_vm1, %v75_v6  ;;  %4587 = vmatmul.mubr.msk.f32.vlgmr.msra.gmra.mxu1 %vm109_vm1, %v75_v6  ;;  %v462_v11 = vld [vmem:[#allocation4 + $0x1c8] sm:$0xff]  ;;  %v461_v13 = vld [vmem:[#allocation4 + $0x1c0] sm:$0xff]  ;;  %v463_v14 = vld [vmem:[#allocation4 + $0x1d0] sm:$0xff] }
  0x2c   :  { %476 = vmatprep.subr.mxu0 %v466_v7  ;;  %547 = vmatprep.subr.mxu1 %v468_v8  ;;  %v76_v15 = vld [vmem:[%s9144_s0 + $0x8] sm:$0xff]  ;;  %v460_v17 = vld [vmem:[#allocation4 + $0x1b8] sm:$0xff]  ;;  %v459_v19 = vld [vmem:[#allocation4 + $0x1b0] sm:$0xff] }
  0x2d   :  { %477 = vmatpush1.msra.mxu0 %v465_v9  ;;  %548 = vmatpush1.msra.mxu1 %v467_v10  ;;  %v458_v16 = vld [vmem:[#allocation4 + $0x1a8] sm:$0xff]  ;;  %v457_v18 = vld [vmem:[#allocation4 + $0x1a0] sm:$0xff]  ;;  %v456_v21 = vld [vmem:[#allocation4 + $0x198] sm:$0xff] }
  0x2e   :  { %478 = vmatprep.subr.mxu0 %v462_v11  ;;  %549 = vmatprep.subr.mxu1 %v464_v12  ;;  %v454_v20 = vld [vmem:[#allocation4 + $0x188] sm:$0xff]  ;;  %v453_v22 = vld [vmem:[#allocation4 + $0x180] sm:$0xff]  ;;  %v455_v23 = vld [vmem:[#allocation4 + $0x190] sm:$0xff] }
  0x2f   :  { %217 = vmatprep.mubr.f32.mxu0 %v9154_v1  ;;  %330 = vmatprep.mubr.f32.mxu1 %v9154_v1  ;;  %v77_v24 = vld [vmem:[%s9144_s0 + $0x10] sm:$0xff]  ;;  %v452_v26 = vld [vmem:[#allocation4 + $0x178] sm:$0xff]  ;;  %v449_v27 = vld [vmem:[#allocation4 + $0x160] sm:$0xff] }
  0x30   :  { %479 = vmatpush1.msra.mxu0 %v461_v13  ;;  %550 = vmatpush1.msra.mxu1 %v463_v14  ;;  %v450_v25 = vld [vmem:[#allocation4 + $0x168] sm:$0xff]  ;;  %v451_v28 = vld [vmem:[#allocation4 + $0x170] sm:$0xff]  ;;  %v448_v30 = vld [vmem:[#allocation4 + $0x158] sm:$0xff] }
  0x31   :  { %4578 = vmatmul.mubr.msk.f32.gmra.mxu0 %vm109_vm1, %v76_v15  ;;  %4588 = vmatmul.mubr.msk.f32.gmra.mxu1 %vm109_vm1, %v76_v15  ;;  %v446_v29 = vld [vmem:[#allocation4 + $0x148] sm:$0xff]  ;;  %v5723_v31 = vld [vmem:[#allocation4 + $0x140] sm:$0xff]  ;;  %v5725_v32 = vld [vmem:[#allocation4 + $0x150] sm:$0xff] }
  0x32   :  { %480 = vmatprep.subr.mxu0 %v458_v16  ;;  %551 = vmatprep.subr.mxu1 %v460_v17  ;;  %v78_v33 = vld [vmem:[%s9144_s0 + $0x18] sm:$0xff]  ;;  %v5732_v34 = vld [vmem:[#allocation4 + $0x128] sm:$0xff]  ;;  %v5738_v36 = vld [vmem:[#allocation4 + $0x120] sm:$0xff] }
  0x33   :  { %481 = vmatpush1.msra.mxu0 %v457_v18  ;;  %552 = vmatpush1.msra.mxu1 %v459_v19  ;;  %v5734_v35 = vld [vmem:[#allocation4 + $0x138] sm:$0xff]  ;;  %v5740_v37 = vld [vmem:[#allocation4 + $0x130] sm:$0xff]  ;;  %v5744_v38 = vld [vmem:[#allocation4 + $0x108] sm:$0xff] }
  0x34   :  { %482 = vmatprep.subr.mxu0 %v454_v20  ;;  %553 = vmatprep.subr.mxu1 %v456_v21  ;;  %v5746_v39 = vld [vmem:[#allocation4 + $0x118] sm:$0xff]  ;;  %v5752_v40 = vld [vmem:[#allocation4 + $0x100] sm:$0xff]  ;;  %v5754_v41 = vld [vmem:[#allocation4 + $0x110] sm:$0xff] }
  0x35   :  { %223 = vmatprep.mubr.f32.mxu0 %v9154_v1  ;;  %336 = vmatprep.mubr.f32.mxu1 %v9154_v1  ;;  %v79_v42 = vld [vmem:[%s9144_s0 + $0x20] sm:$0xff]  ;;  %v5763_v43 = vld [vmem:[#allocation4 + $0xe8] sm:$0xff]  ;;  %v5771_v46 = vld [vmem:[#allocation4 + $0xf0] sm:$0xff] }
  0x36   :  { %483 = vmatpush1.msra.mxu0 %v453_v22  ;;  %554 = vmatpush1.msra.mxu1 %v455_v23  ;;  %v5765_v44 = vld [vmem:[#allocation4 + $0xf8] sm:$0xff]  ;;  %v5769_v45 = vld [vmem:[#allocation4 + $0xe0] sm:$0xff]  ;;  %v5775_v47 = vld [vmem:[#allocation4 + $0xc8] sm:$0xff] }
  0x37   :  { %4579 = vmatmul.mubr.msk.f32.gmra.mxu0 %vm109_vm1, %v77_v24  ;;  %4589 = vmatmul.mubr.msk.f32.gmra.mxu1 %vm109_vm1, %v77_v24  ;;  %v5777_v48 = vld [vmem:[#allocation4 + $0xd8] sm:$0xff]  ;;  %v5783_v49 = vld [vmem:[#allocation4 + $0xc0] sm:$0xff]  ;;  %v5785_v50 = vld [vmem:[#allocation4 + $0xd0] sm:$0xff] }
  0x38   :  { %484 = vmatprep.subr.mxu0 %v450_v25  ;;  %555 = vmatprep.subr.mxu1 %v452_v26  ;;  %v80_v51 = vld [vmem:[%s9144_s0 + $0x28] sm:$0xff]  ;;  %v5796_v53 = vld [vmem:[#allocation4 + $0xb8] sm:$0xff]  ;;  %v5802_v55 = vld [vmem:[#allocation4 + $0xb0] sm:$0xff] }
  0x39   :  { %485 = vmatpush1.msra.mxu0 %v449_v27  ;;  %556 = vmatpush1.msra.mxu1 %v451_v28  ;;  %v5794_v52 = vld [vmem:[#allocation4 + $0xa8] sm:$0xff]  ;;  %v5800_v54 = vld [vmem:[#allocation4 + $0xa0] sm:$0xff]  ;;  %v5808_v57 = vld [vmem:[#allocation4 + $0x98] sm:$0xff] }
  0x3a   :  { %486 = vmatprep.subr.mxu0 %v446_v29  ;;  %557 = vmatprep.subr.mxu1 %v448_v30  ;;  %v5806_v56 = vld [vmem:[#allocation4 + $0x88] sm:$0xff]  ;;  %v5814_v58 = vld [vmem:[#allocation4 + $0x80] sm:$0xff]  ;;  %v5816_v59 = vld [vmem:[#allocation4 + $0x90] sm:$0xff] }
  0x3b   :  { %229 = vmatprep.mubr.f32.mxu0 %v9154_v1  ;;  %342 = vmatprep.mubr.f32.mxu1 %v9154_v1  ;;  %v81_v60 = vld [vmem:[%s9144_s0 + $0x30] sm:$0xff]  ;;  %v5827_v62 = vld [vmem:[#allocation4 + $0x78] sm:$0xff]  ;;  %v5831_v63 = vld [vmem:[#allocation4 + $0x60] sm:$0xff] }
  0x3c   :  { %487 = vmatpush1.msra.mxu0 %v5723_v31  ;;  %558 = vmatpush1.msra.mxu1 %v5725_v32  ;;  %v5825_v61 = vld [vmem:[#allocation4 + $0x68] sm:$0xff]  ;;  %v5833_v0 = vld [vmem:[#allocation4 + $0x70] sm:$0xff]  ;;  %v5839_v3 = vld [vmem:[#allocation4 + $0x58] sm:$0xff] }
  0x3d   :  { %4580 = vmatmul.mubr.msk.f32.gmra.mxu0 %vm109_vm1, %v78_v33  ;;  %4590 = vmatmul.mubr.msk.f32.gmra.mxu1 %vm109_vm1, %v78_v33  ;;  %v5837_v2 = vld [vmem:[#allocation4 + $0x48] sm:$0xff]  ;;  %v5845_v4 = vld [vmem:[#allocation4 + $0x40] sm:$0xff]  ;;  %v5847_v5 = vld [vmem:[#allocation4 + $0x50] sm:$0xff] }
  0x3e   :  { %488 = vmatprep.subr.mxu0 %v5732_v34  ;;  %559 = vmatprep.subr.mxu1 %v5734_v35  ;;  %v82_v6 = vld [vmem:[%s9144_s0 + $0x38] sm:$0xff]  ;;  %v5856_v7 = vld [vmem:[#allocation4 + $0x28] sm:$0xff]  ;;  %v5862_v9 = vld [vmem:[#allocation4 + $0x20] sm:$0xff] }
  0x3f   :  { %489 = vmatpush1.msra.mxu0 %v5738_v36  ;;  %560 = vmatpush1.msra.mxu1 %v5740_v37  ;;  %v5858_v8 = vld [vmem:[#allocation4 + $0x38] sm:$0xff]  ;;  %v5864_v10 = vld [vmem:[#allocation4 + $0x30] sm:$0xff]  ;;  %v5868_v11 = vld [vmem:[#allocation4 + $0x8] sm:$0xff] }
  0x40   :  { %490 = vmatprep.subr.mxu0 %v5744_v38  ;;  %561 = vmatprep.subr.mxu1 %v5746_v39  ;;  %v5870_v12 = vld [vmem:[#allocation4 + $0x18] sm:$0xff]  ;;  %v5874_v13 = vld [vmem:[#allocation4] sm:$0xff]  ;;  %v5878_v14 = vld [vmem:[#allocation4 + $0x10] sm:$0xff] }
  0x41   :  { %235 = vmatprep.mubr.f32.mxu0 %v9154_v1  ;;  %348 = vmatprep.mubr.f32.mxu1 %v9154_v1  ;;  %9691 = vst [vmem:[#allocation11_spill] sm:$0xff] %v5878_v14  ;;  %v5890_v15 = vld [vmem:[#allocation6 + $0x1e8] sm:$0xff]  ;;  %v5892_v16 = vld [vmem:[#allocation6 + $0x1f8] sm:$0xff]  ;;  %v5896_v17 = vld [vmem:[#allocation6 + $0x1e0] sm:$0xff] }
  0x42   :  { %491 = vmatpush1.msra.mxu0 %v5752_v40  ;;  %562 = vmatpush1.msra.mxu1 %v5754_v41  ;;  %9692 = vst [vmem:[#allocation12_spill] sm:$0xff] %v5890_v15  ;;  %9693 = vst [vmem:[#allocation13_spill] sm:$0xff] %v5892_v16  ;;  %v5898_v18 = vld [vmem:[#allocation6 + $0x1f0] sm:$0xff]  ;;  %v5902_v19 = vld [vmem:[#allocation6 + $0x1c8] sm:$0xff] }
  0x43   :  { %4581 = vmatmul.mubr.msk.f32.gmra.mxu0 %vm109_vm1, %v79_v42  ;;  %4591 = vmatmul.mubr.msk.f32.gmra.mxu1 %vm109_vm1, %v79_v42  ;;  %9694 = vst [vmem:[#allocation14_spill] sm:$0xff] %v5896_v17  ;;  %9695 = vst [vmem:[#allocation15_spill] sm:$0xff] %v5898_v18  ;;  %v5904_v20 = vld [vmem:[#allocation6 + $0x1d8] sm:$0xff]  ;;  %v5908_v21 = vld [vmem:[#allocation6 + $0x1c0] sm:$0xff] }
  0x44   :  { %492 = vmatprep.subr.mxu0 %v5763_v43  ;;  %563 = vmatprep.subr.mxu1 %v5765_v44  ;;  %9696 = vst [vmem:[#allocation16_spill] sm:$0xff] %v5902_v19  ;;  %9697 = vst [vmem:[#allocation17_spill] sm:$0xff] %v5904_v20  ;;  %v5910_v22 = vld [vmem:[#allocation6 + $0x1d0] sm:$0xff]  ;;  %v5914_v23 = vld [vmem:[#allocation6 + $0x1a8] sm:$0xff] }
  0x45   :  { %493 = vmatpush1.msra.mxu0 %v5769_v45  ;;  %564 = vmatpush1.msra.mxu1 %v5771_v46  ;;  %9698 = vst [vmem:[#allocation18_spill] sm:$0xff] %v5908_v21  ;;  %9699 = vst [vmem:[#allocation19_spill] sm:$0xff] %v5910_v22  ;;  %v5916_v24 = vld [vmem:[#allocation6 + $0x1b8] sm:$0xff]  ;;  %v5920_v25 = vld [vmem:[#allocation6 + $0x1a0] sm:$0xff] }
  0x46   :  { %494 = vmatprep.subr.mxu0 %v5775_v47  ;;  %565 = vmatprep.subr.mxu1 %v5777_v48  ;;  %9700 = vst [vmem:[#allocation20_spill] sm:$0xff] %v5914_v23  ;;  %9701 = vst [vmem:[#allocation21_spill] sm:$0xff] %v5916_v24  ;;  %v5922_v26 = vld [vmem:[#allocation6 + $0x1b0] sm:$0xff]  ;;  %v5926_v27 = vld [vmem:[#allocation6 + $0x188] sm:$0xff] }
  0x47   :  { %241 = vmatprep.mubr.f32.mxu0 %v9154_v1  ;;  %354 = vmatprep.mubr.f32.mxu1 %v9154_v1  ;;  %9702 = vst [vmem:[#allocation22_spill] sm:$0xff] %v5920_v25  ;;  %9703 = vst [vmem:[#allocation23_spill] sm:$0xff] %v5922_v26  ;;  %v5928_v28 = vld [vmem:[#allocation6 + $0x198] sm:$0xff]  ;;  %v5932_v29 = vld [vmem:[#allocation6 + $0x180] sm:$0xff] }
  0x48   :  { %495 = vmatpush1.msra.mxu0 %v5783_v49  ;;  %566 = vmatpush1.msra.mxu1 %v5785_v50  ;;  %9704 = vst [vmem:[#allocation24_spill] sm:$0xff] %v5926_v27  ;;  %9705 = vst [vmem:[#allocation25_spill] sm:$0xff] %v5928_v28  ;;  %v5934_v30 = vld [vmem:[#allocation6 + $0x190] sm:$0xff]  ;;  %v5938_v33 = vld [vmem:[#allocation6 + $0x168] sm:$0xff] }
  0x49   :  { %4582 = vmatmul.mubr.msk.f32.gmra.mxu0 %vm109_vm1, %v80_v51  ;;  %4592 = vmatmul.mubr.msk.f32.gmra.mxu1 %vm109_vm1, %v80_v51  ;;  %9706 = vst [vmem:[#allocation26_spill] sm:$0xff] %v5932_v29  ;;  %9707 = vst [vmem:[#allocation27_spill] sm:$0xff] %v5934_v30  ;;  %v5940_v42 = vld [vmem:[#allocation6 + $0x178] sm:$0xff]  ;;  %v5944_v51 = vld [vmem:[#allocation6 + $0x160] sm:$0xff] }
  0x4a   :  { %496 = vmatprep.subr.mxu0 %v5794_v52  ;;  %567 = vmatprep.subr.mxu1 %v5796_v53  ;;  %9708 = vst [vmem:[#allocation28_spill] sm:$0xff] %v5938_v33  ;;  %9709 = vst [vmem:[#allocation29_spill] sm:$0xff] %v5940_v42 }
  0x4b   :  { %497 = vmatpush1.msra.mxu0 %v5800_v54  ;;  %568 = vmatpush1.msra.mxu1 %v5802_v55  ;;  %9710 = vst [vmem:[#allocation30_spill] sm:$0xff] %v5944_v51 }
  0x4c   :  { %498 = vmatprep.subr.mxu0 %v5806_v56  ;;  %569 = vmatprep.subr.mxu1 %v5808_v57 }
  0x4d   :  { %247 = vmatprep.mubr.f32.mxu0 %v9154_v1  ;;  %360 = vmatprep.mubr.f32.mxu1 %v9154_v1 }
  0x4e   :  { %499 = vmatpush1.msra.mxu0 %v5814_v58  ;;  %570 = vmatpush1.msra.mxu1 %v5816_v59 }
  0x4f   :  { %4583 = vmatmul.mubr.msk.f32.gmra.mxu0 %vm109_vm1, %v81_v60  ;;  %4593 = vmatmul.mubr.msk.f32.gmra.mxu1 %vm109_vm1, %v81_v60  ;;  %v5946_v60 = vld [vmem:[#allocation6 + $0x170] sm:$0xff] }
  0x50   :  { %500 = vmatprep.subr.mxu0 %v5825_v61  ;;  %571 = vmatprep.subr.mxu1 %v5827_v62  ;;  %9711 = vst [vmem:[#allocation31_spill] sm:$0xff] %v5946_v60 }
  0x51   :  { %501 = vmatpush1.msra.mxu0 %v5831_v63  ;;  %572 = vmatpush1.msra.mxu1 %v5833_v0 }
  0x52   :  { %502 = vmatprep.subr.mxu0 %v5837_v2  ;;  %573 = vmatprep.subr.mxu1 %v5839_v3 }
  0x53   :  { %253 = vmatprep.mubr.f32.mxu0 %v9154_v1  ;;  %366 = vmatprep.mubr.f32.mxu1 %v9154_v1 }
  0x54   :  { %503 = vmatpush1.msra.mxu0 %v5845_v4  ;;  %574 = vmatpush1.msra.mxu1 %v5847_v5 }
  0x55   :  { %4584 = vmatmul.mubr.msk.f32.gmra.mxu0 %vm109_vm1, %v82_v6  ;;  %4594 = vmatmul.mubr.msk.f32.gmra.mxu1 %vm109_vm1, %v82_v6  ;;  %v5950_v6 = vld [vmem:[#allocation6 + $0x148] sm:$0xff] }
  0x56   :  { %504 = vmatprep.subr.mxu0 %v5856_v7  ;;  %575 = vmatprep.subr.mxu1 %v5858_v8  ;;  %9712 = vst [vmem:[#allocation32_spill] sm:$0xff] %v5950_v6 }
  0x57   :  { %505 = vmatpush1.msra.mxu0 %v5862_v9  ;;  %576 = vmatpush1.msra.mxu1 %v5864_v10 }
  0x58   :  { %506 = vmatprep.subr.mxu0 %v5868_v11  ;;  %577 = vmatprep.subr.mxu1 %v5870_v12 }
  0x59   :  { %507 = vmatpush1.msra.mxu0 %v5874_v13  ;;  %540 = vmatprep.mubr.f32.mxu0 %v9154_v1 }
  0x5a   :  { %578 = vmatpush1.msra.mxu1 %v5878_v14  ;;  %611 = vmatprep.mubr.f32.mxu1 %v9154_v1 }
  0x5b   :  { %541 = vmatmul.mubr.f32.vlgmr.msra.gmra.mxu0 %v9154_v1  ;;  %612 = vmatmul.mubr.f32.vlgmr.msra.gmra.mxu1 %v9154_v1 }
  0x5c   :  { %792 = vmatprep.mubr.f32.mxu0 %v9154_v1  ;;  %863 = vmatprep.mubr.f32.mxu1 %v9154_v1  ;;  %v5952_v1 = vld [vmem:[#allocation6 + $0x158] sm:$0xff] }
  0x5d   :  { %728 = vmatprep.subr.mxu0 %v5890_v15  ;;  %799 = vmatprep.subr.mxu1 %v5892_v16  ;;  %9713 = vst [vmem:[#allocation33_spill] sm:$0xff] %v5952_v1 }
  0x5e   :  { %729 = vmatpush1.msra.mxu0 %v5896_v17  ;;  %800 = vmatpush1.msra.mxu1 %v5898_v18 }
  0x5f   :  { %730 = vmatprep.subr.mxu0 %v5902_v19  ;;  %801 = vmatprep.subr.mxu1 %v5904_v20 }
  0x60   :  { %731 = vmatpush1.msra.mxu0 %v5908_v21  ;;  %802 = vmatpush1.msra.mxu1 %v5910_v22 }
  0x61   :  { %732 = vmatprep.subr.mxu0 %v5914_v23  ;;  %803 = vmatprep.subr.mxu1 %v5916_v24 }
  0x62   :  { %733 = vmatpush1.msra.mxu0 %v5920_v25  ;;  %804 = vmatpush1.msra.mxu1 %v5922_v26  ;;  %v6024_v26 = vld [vmem:[#allocation6 + $0x80] sm:$0xff] }
  0x63   :  { %734 = vmatprep.subr.mxu0 %v5926_v27  ;;  %805 = vmatprep.subr.mxu1 %v5928_v28  ;;  %v6000_v28 = vld [vmem:[#allocation6 + $0xc0] sm:$0xff]  ;;  %v6008_v27 = vld [vmem:[#allocation6 + $0xb8] sm:$0xff]  ;;  %9738 = vst [vmem:[#allocation58_spill] sm:$0xff] %v6024_v26 }
  0x64   :  { %735 = vmatpush1.msra.mxu0 %v5932_v29  ;;  %806 = vmatpush1.msra.mxu1 %v5934_v30  ;;  %v5956_v30 = vld [vmem:[#allocation6 + $0x140] sm:$0xff]  ;;  %v5992_v29 = vld [vmem:[#allocation6 + $0xf0] sm:$0xff]  ;;  %9730 = vst [vmem:[#allocation50_spill] sm:$0xff] %v6000_v28  ;;  %9733 = vst [vmem:[#allocation53_spill] sm:$0xff] %v6008_v27 }
  0x65   :  { %736 = vmatprep.subr.mxu0 %v5938_v33  ;;  %807 = vmatprep.subr.mxu1 %v5940_v42  ;;  %9714 = vst [vmem:[#allocation34_spill] sm:$0xff] %v5956_v30  ;;  %v5958_v33 = vld [vmem:[#allocation6 + $0x150] sm:$0xff]  ;;  %v5962_v42 = vld [vmem:[#allocation6 + $0x128] sm:$0xff]  ;;  %9727 = vst [vmem:[#allocation47_spill] sm:$0xff] %v5992_v29 }
  0x66   :  { %737 = vmatpush1.msra.mxu0 %v5944_v51  ;;  %808 = vmatpush1.msra.mxu1 %v5946_v60  ;;  %9715 = vst [vmem:[#allocation35_spill] sm:$0xff] %v5958_v33  ;;  %9716 = vst [vmem:[#allocation36_spill] sm:$0xff] %v5962_v42  ;;  %v5964_v51 = vld [vmem:[#allocation6 + $0x138] sm:$0xff]  ;;  %v5968_v60 = vld [vmem:[#allocation6 + $0x120] sm:$0xff] }
  0x67   :  { %738 = vmatprep.subr.mxu0 %v5950_v6  ;;  %809 = vmatprep.subr.mxu1 %v5952_v1  ;;  %9717 = vst [vmem:[#allocation37_spill] sm:$0xff] %v5964_v51  ;;  %9718 = vst [vmem:[#allocation38_spill] sm:$0xff] %v5968_v60  ;;  %v5970_v6 = vld [vmem:[#allocation6 + $0x130] sm:$0xff]  ;;  %v5974_v1 = vld [vmem:[#allocation6 + $0x108] sm:$0xff] }
  0x68   :  { %739 = vmatpush1.msra.mxu0 %v5956_v30  ;;  %810 = vmatpush1.msra.mxu1 %v5958_v33  ;;  %9719 = vst [vmem:[#allocation39_spill] sm:$0xff] %v5970_v6  ;;  %9720 = vst [vmem:[#allocation40_spill] sm:$0xff] %v5974_v1  ;;  %v5976_v30 = vld [vmem:[#allocation6 + $0x118] sm:$0xff]  ;;  %v5980_v33 = vld [vmem:[#allocation6 + $0x100] sm:$0xff] }
  0x69   :  { %740 = vmatprep.subr.mxu0 %v5962_v42  ;;  %811 = vmatprep.subr.mxu1 %v5964_v51  ;;  %9721 = vst [vmem:[#allocation41_spill] sm:$0xff] %v5976_v30  ;;  %9722 = vst [vmem:[#allocation42_spill] sm:$0xff] %v5980_v33  ;;  %v5982_v42 = vld [vmem:[#allocation6 + $0x110] sm:$0xff]  ;;  %v5984_v51 = vld [vmem:[#allocation6 + $0xe8] sm:$0xff] }
  0x6a   :  { %741 = vmatpush1.msra.mxu0 %v5968_v60  ;;  %812 = vmatpush1.msra.mxu1 %v5970_v6  ;;  %9723 = vst [vmem:[#allocation43_spill] sm:$0xff] %v5982_v42  ;;  %9724 = vst [vmem:[#allocation44_spill] sm:$0xff] %v5984_v51  ;;  %v5988_v60 = vld [vmem:[#allocation6 + $0xf8] sm:$0xff]  ;;  %v5990_v6 = vld [vmem:[#allocation6 + $0xe0] sm:$0xff] }
  0x6b   :  { %742 = vmatprep.subr.mxu0 %v5974_v1  ;;  %813 = vmatprep.subr.mxu1 %v5976_v30  ;;  %9725 = vst [vmem:[#allocation45_spill] sm:$0xff] %v5988_v60  ;;  %9726 = vst [vmem:[#allocation46_spill] sm:$0xff] %v5990_v6  ;;  %v5996_v30 = vld [vmem:[#allocation6 + $0xc8] sm:$0xff]  ;;  %v5998_v1 = vld [vmem:[#allocation6 + $0xd8] sm:$0xff] }
  0x6c   :  { %743 = vmatpush1.msra.mxu0 %v5980_v33  ;;  %814 = vmatpush1.msra.mxu1 %v5982_v42  ;;  %9728 = vst [vmem:[#allocation48_spill] sm:$0xff] %v5996_v30  ;;  %9729 = vst [vmem:[#allocation49_spill] sm:$0xff] %v5998_v1  ;;  %v6004_v42 = vld [vmem:[#allocation6 + $0xd0] sm:$0xff]  ;;  %v6006_v33 = vld [vmem:[#allocation6 + $0xa8] sm:$0xff] }
  0x6d   :  { %744 = vmatprep.subr.mxu0 %v5984_v51  ;;  %815 = vmatprep.subr.mxu1 %v5988_v60  ;;  %9731 = vst [vmem:[#allocation51_spill] sm:$0xff] %v6004_v42  ;;  %9732 = vst [vmem:[#allocation52_spill] sm:$0xff] %v6006_v33  ;;  %v6012_v60 = vld [vmem:[#allocation6 + $0xa0] sm:$0xff]  ;;  %v6014_v51 = vld [vmem:[#allocation6 + $0xb0] sm:$0xff] }
  0x6e   :  { %745 = vmatpush1.msra.mxu0 %v5990_v6  ;;  %816 = vmatpush1.msra.mxu1 %v5992_v29  ;;  %9734 = vst [vmem:[#allocation54_spill] sm:$0xff] %v6012_v60  ;;  %9735 = vst [vmem:[#allocation55_spill] sm:$0xff] %v6014_v51  ;;  %v6018_v6 = vld [vmem:[#allocation6 + $0x88] sm:$0xff]  ;;  %v6020_v29 = vld [vmem:[#allocation6 + $0x98] sm:$0xff] }
  0x6f   :  { %746 = vmatprep.subr.mxu0 %v5996_v30  ;;  %817 = vmatprep.subr.mxu1 %v5998_v1  ;;  %9736 = vst [vmem:[#allocation56_spill] sm:$0xff] %v6018_v6  ;;  %9737 = vst [vmem:[#allocation57_spill] sm:$0xff] %v6020_v29  ;;  %v6026_v30 = vld [vmem:[#allocation6 + $0x90] sm:$0xff]  ;;  %v6030_v1 = vld [vmem:[#allocation6 + $0x68] sm:$0xff] }
  0x70   :  { %747 = vmatpush1.msra.mxu0 %v6000_v28  ;;  %818 = vmatpush1.msra.mxu1 %v6004_v42  ;;  %9739 = vst [vmem:[#allocation59_spill] sm:$0xff] %v6026_v30  ;;  %9740 = vst [vmem:[#allocation60_spill] sm:$0xff] %v6030_v1  ;;  %v6032_v28 = vld [vmem:[#allocation6 + $0x78] sm:$0xff]  ;;  %v6036_v42 = vld [vmem:[#allocation6 + $0x60] sm:$0xff] }
  0x71   :  { %748 = vmatprep.subr.mxu0 %v6006_v33  ;;  %819 = vmatprep.subr.mxu1 %v6008_v27  ;;  %9741 = vst [vmem:[#allocation61_spill] sm:$0xff] %v6032_v28  ;;  %9742 = vst [vmem:[#allocation62_spill] sm:$0xff] %v6036_v42  ;;  %v6038_v33 = vld [vmem:[#allocation6 + $0x70] sm:$0xff]  ;;  %v6042_v27 = vld [vmem:[#allocation6 + $0x48] sm:$0xff] }
  0x72   :  { %749 = vmatpush1.msra.mxu0 %v6012_v60  ;;  %820 = vmatpush1.msra.mxu1 %v6014_v51  ;;  %9743 = vst [vmem:[#allocation63_spill] sm:$0xff] %v6038_v33  ;;  %9744 = vst [vmem:[#allocation64_spill] sm:$0xff] %v6042_v27  ;;  %v6044_v60 = vld [vmem:[#allocation6 + $0x58] sm:$0xff]  ;;  %v6048_v51 = vld [vmem:[#allocation6 + $0x40] sm:$0xff] }
  0x73   :  { %750 = vmatprep.subr.mxu0 %v6018_v6  ;;  %821 = vmatprep.subr.mxu1 %v6020_v29  ;;  %9745 = vst [vmem:[#allocation65_spill] sm:$0xff] %v6044_v60  ;;  %9746 = vst [vmem:[#allocation66_spill] sm:$0xff] %v6048_v51  ;;  %v6050_v6 = vld [vmem:[#allocation6 + $0x50] sm:$0xff]  ;;  %v6054_v29 = vld [vmem:[#allocation6 + $0x28] sm:$0xff] }
  0x74   :  { %751 = vmatpush1.msra.mxu0 %v6024_v26  ;;  %822 = vmatpush1.msra.mxu1 %v6026_v30  ;;  %9747 = vst [vmem:[#allocation67_spill] sm:$0xff] %v6050_v6  ;;  %9748 = vst [vmem:[#allocation68_spill] sm:$0xff] %v6054_v29  ;;  %v6056_v26 = vld [vmem:[#allocation6 + $0x38] sm:$0xff]  ;;  %v6060_v30 = vld [vmem:[#allocation6 + $0x20] sm:$0xff] }
  0x75   :  { %752 = vmatprep.subr.mxu0 %v6030_v1  ;;  %823 = vmatprep.subr.mxu1 %v6032_v28  ;;  %9749 = vst [vmem:[#allocation69_spill] sm:$0xff] %v6056_v26  ;;  %9750 = vst [vmem:[#allocation70_spill] sm:$0xff] %v6060_v30  ;;  %v6062_v1 = vld [vmem:[#allocation6 + $0x30] sm:$0xff]  ;;  %v6066_v28 = vld [vmem:[#allocation6 + $0x8] sm:$0xff] }
  0x76   :  { %753 = vmatpush1.msra.mxu0 %v6036_v42  ;;  %824 = vmatpush1.msra.mxu1 %v6038_v33  ;;  %9751 = vst [vmem:[#allocation71_spill] sm:$0xff] %v6062_v1  ;;  %9752 = vst [vmem:[#allocation72_spill] sm:$0xff] %v6066_v28  ;;  %v6068_v42 = vld [vmem:[#allocation6 + $0x18] sm:$0xff]  ;;  %v6072_v33 = vld [vmem:[#allocation6] sm:$0xff] }
  0x77   :  { %754 = vmatprep.subr.mxu0 %v6042_v27  ;;  %825 = vmatprep.subr.mxu1 %v6044_v60  ;;  %9753 = vst [vmem:[#allocation73_spill] sm:$0xff] %v6068_v42  ;;  %9754 = vst [vmem:[#allocation74_spill] sm:$0xff] %v6072_v33  ;;  %v6074_v27 = vld [vmem:[#allocation6 + $0x10] sm:$0xff]  ;;  %v6078_v60 = vld [vmem:[#allocation8 + $0x1e8] sm:$0xff] }
  0x78   :  { %755 = vmatpush1.msra.mxu0 %v6048_v51  ;;  %826 = vmatpush1.msra.mxu1 %v6050_v6  ;;  %9755 = vst [vmem:[#allocation75_spill] sm:$0xff] %v6074_v27  ;;  %9756 = vst [vmem:[#allocation76_spill] sm:$0xff] %v6078_v60  ;;  %v6080_v51 = vld [vmem:[#allocation8 + $0x1f8] sm:$0xff] }
  0x79   :  { %756 = vmatprep.subr.mxu0 %v6054_v29  ;;  %827 = vmatprep.subr.mxu1 %v6056_v26  ;;  %9757 = vst [vmem:[#allocation77_spill] sm:$0xff] %v6080_v51  ;;  %v89_v26 = vlaneseq }
  0x7a   :  { %757 = vmatpush1.msra.mxu0 %v6060_v30  ;;  %828 = vmatpush1.msra.mxu1 %v6062_v1 }
  0x7b   :  { %758 = vmatprep.subr.mxu0 %v6066_v28  ;;  %829 = vmatprep.subr.mxu1 %v6068_v42  ;;  %v6088_v30 = vshrl.u32 %v89_v26, 7 }
  0x7c   :  { %759 = vmatpush1.msra.mxu0 %v6072_v33  ;;  %830 = vmatpush1.msra.mxu1 %v6074_v27  ;;  %v87_v33 = vld [vmem:[%s9147_s3] sm:$0xf] }
  0x7d   :  { %934 = vmatprep.subr.mxu0 %v6078_v60  ;;  %1005 = vmatprep.subr.mxu1 %v6080_v51  ;;  %9758 = vst [vmem:[#allocation78_spill] sm:$0xff] %v6088_v30  ;;  %v9219_v6 = vsub.s32 0, %v6088_v30  ;;  %v9221_v28 = vsub.s32 2, %v6088_v30  ;;  %v9225_v51 = vsub.s32 1, %v6088_v30  ;;  %v9226_v26 = vsub.s32 3, %v6088_v30 }
  0x7f   :  { %v92_v42 = vrot.slane %v87_v33, %v9219_v6  ;;  %v6109_v25 = vrot.slane %v87_v33, %v9221_v28  ;;  %v96_v22 = vrot.slane %v87_v33, %v9225_v51  ;;  %v6115_v21 = vrot.slane %v87_v33, %v9226_v26 }
  0xeb   :  { %v6090_v1 = vpop.f32.mrf.mxu0  ;;  %v6092_v29 = vpop.f32.mrf.mxu1 }
  0xed   :  { %v6099_v27 = vpop.f32.mrf.mxu0  ;;  %v6101_v60 = vpop.f32.mrf.mxu1 }
  0xf1   :  { %v219_v24 = vpop.f32.mrf.mxu0  ;;  %v332_v23 = vpop.f32.mrf.mxu1 }
  0xf2   :  { %v6117_v20 = vadd.f32 %v219_v24, %v92_v42  ;;  %v6120_v19 = vadd.f32 %v332_v23, %v6109_v25 }
  0xf3   :  { %v221_v18 = vpop.f32.mrf.mxu0  ;;  %v334_v6 = vpop.f32.mrf.mxu1 }
  0xf4   :  { %9759 = vst [vmem:[#allocation79_spill] sm:$0xff] %v6120_v19  ;;  %v6122_v17 = vadd.f32 %v221_v18, %v96_v22  ;;  %v6125_v28 = vadd.f32 %v334_v6, %v6115_v21 }
  0xf6   :  { %9760 = vst [vmem:[#allocation80_spill] sm:$0xff] %v6122_v17  ;;  %9761 = vst [vmem:[#allocation81_spill] sm:$0xff] %v6125_v28 }
  0xf7   :  { %v225_v16 = vpop.f32.mrf.mxu0  ;;  %v338_v15 = vpop.f32.mrf.mxu1 }
  0xf8   :  { %v6127_v14 = vadd.f32 %v225_v16, %v92_v42  ;;  %v6130_v51 = vadd.f32 %v338_v15, %v6109_v25 }
  0xf9   :  { %v227_v33 = vpop.f32.mrf.mxu0  ;;  %v340_v24 = vpop.f32.mrf.mxu1 }
  0xfa   :  { %9762 = vst [vmem:[#allocation82_spill] sm:$0xff] %v6127_v14  ;;  %9763 = vst [vmem:[#allocation83_spill] sm:$0xff] %v6130_v51  ;;  %v6132_v26 = vadd.f32 %v227_v33, %v96_v22  ;;  %v6135_v23 = vadd.f32 %v340_v24, %v6115_v21 }
  0xfc   :  { %9764 = vst [vmem:[#allocation84_spill] sm:$0xff] %v6132_v26  ;;  %9765 = vst [vmem:[#allocation85_spill] sm:$0xff] %v6135_v23 }
  0xfd   :  { %v231_v30 = vpop.f32.mrf.mxu0  ;;  %v344_v18 = vpop.f32.mrf.mxu1 }
  0xfe   :  { %v6137_v19 = vadd.f32 %v231_v30, %v92_v42  ;;  %v6140_v6 = vadd.f32 %v344_v18, %v6109_v25 }
  0xff   :  { %v233_v28 = vpop.f32.mrf.mxu0  ;;  %v346_v16 = vpop.f32.mrf.mxu1 }
 0x100   :  { %9766 = vst [vmem:[#allocation86_spill] sm:$0xff] %v6137_v19  ;;  %9767 = vst [vmem:[#allocation87_spill] sm:$0xff] %v6140_v6  ;;  %v6142_v14 = vadd.f32 %v233_v28, %v96_v22  ;;  %v6145_v15 = vadd.f32 %v346_v16, %v6115_v21 }
 0x102   :  { %9768 = vst [vmem:[#allocation88_spill] sm:$0xff] %v6142_v14  ;;  %9769 = vst [vmem:[#allocation89_spill] sm:$0xff] %v6145_v15 }
 0x103   :  { %v237_v51 = vpop.f32.mrf.mxu0  ;;  %v350_v33 = vpop.f32.mrf.mxu1 }
 0x104   :  { %v6147_v26 = vadd.f32 %v237_v51, %v92_v42  ;;  %v6150_v24 = vadd.f32 %v350_v33, %v6109_v25 }
 0x105   :  { %v239_v23 = vpop.f32.mrf.mxu0  ;;  %v352_v30 = vpop.f32.mrf.mxu1 }
 0x106   :  { %9770 = vst [vmem:[#allocation90_spill] sm:$0xff] %v6147_v26  ;;  %9771 = vst [vmem:[#allocation91_spill] sm:$0xff] %v6150_v24  ;;  %v6152_v19 = vadd.f32 %v239_v23, %v96_v22  ;;  %v6155_v18 = vadd.f32 %v352_v30, %v6115_v21 }
 0x108   :  { %9772 = vst [vmem:[#allocation92_spill] sm:$0xff] %v6152_v19  ;;  %9773 = vst [vmem:[#allocation93_spill] sm:$0xff] %v6155_v18 }
 0x109   :  { %v243_v6 = vpop.f32.mrf.mxu0  ;;  %v356_v28 = vpop.f32.mrf.mxu1 }
 0x10a   :  { %v6157_v14 = vadd.f32 %v243_v6, %v92_v42  ;;  %v6160_v16 = vadd.f32 %v356_v28, %v6109_v25 }
 0x10b   :  { %v245_v15 = vpop.f32.mrf.mxu0  ;;  %v358_v51 = vpop.f32.mrf.mxu1 }
 0x10c   :  { %9774 = vst [vmem:[#allocation94_spill] sm:$0xff] %v6157_v14  ;;  %9775 = vst [vmem:[#allocation95_spill] sm:$0xff] %v6160_v16  ;;  %v6162_v26 = vadd.f32 %v245_v15, %v96_v22  ;;  %v6165_v33 = vadd.f32 %v358_v51, %v6115_v21 }
 0x10e   :  { %9776 = vst [vmem:[#allocation96_spill] sm:$0xff] %v6162_v26  ;;  %9777 = vst [vmem:[#allocation97_spill] sm:$0xff] %v6165_v33 }
 0x10f   :  { %v249_v24 = vpop.f32.mrf.mxu0  ;;  %v362_v23 = vpop.f32.mrf.mxu1 }
 0x110   :  { %v6167_v19 = vadd.f32 %v249_v24, %v92_v42  ;;  %v6170_v30 = vadd.f32 %v362_v23, %v6109_v25 }
 0x111   :  { %v251_v18 = vpop.f32.mrf.mxu0  ;;  %v364_v6 = vpop.f32.mrf.mxu1 }
 0x112   :  { %9778 = vst [vmem:[#allocation98_spill] sm:$0xff] %v6167_v19  ;;  %9779 = vst [vmem:[#allocation99_spill] sm:$0xff] %v6170_v30  ;;  %v6172_v14 = vadd.f32 %v251_v18, %v96_v22  ;;  %v6175_v28 = vadd.f32 %v364_v6, %v6115_v21  ;;  %v214_v18 = vadd.f32 %v6090_v1, %v92_v42 }
 0x113   :  { %v216_v6 = vadd.f32 %v6099_v27, %v96_v22 }
 0x114   :  { %9780 = vst [vmem:[#allocation100_spill] sm:$0xff] %v6172_v14  ;;  %9781 = vst [vmem:[#allocation101_spill] sm:$0xff] %v6175_v28 }
 0x115   :  { %v255_v16 = vpop.f32.mrf.mxu0  ;;  %v368_v15 = vpop.f32.mrf.mxu1 }
 0x116   :  { %v6177_v26 = vadd.f32 %v255_v16, %v92_v42  ;;  %v6180_v51 = vadd.f32 %v368_v15, %v6109_v25 }
 0x117   :  { %v257_v33 = vpop.f32.mrf.mxu0  ;;  %v370_v24 = vpop.f32.mrf.mxu1 }
 0x118   :  { %9782 = vst [vmem:[#allocation102_spill] sm:$0xff] %v6177_v26  ;;  %9783 = vst [vmem:[#allocation103_spill] sm:$0xff] %v6180_v51  ;;  %v6182_v19 = vadd.f32 %v257_v33, %v96_v22  ;;  %v6185_v23 = vadd.f32 %v370_v24, %v6115_v21  ;;  %v327_v33 = vadd.f32 %v6092_v29, %v6109_v25 }
 0x119   :  { %v329_v24 = vadd.f32 %v6101_v60, %v6115_v21 }
 0x11a   :  { %9784 = vst [vmem:[#allocation104_spill] sm:$0xff] %v6182_v19  ;;  %9785 = vst [vmem:[#allocation105_spill] sm:$0xff] %v6185_v23 }
 0x11b   :  { %v542_v30 = vpop.f32.mrf.mxu0  ;;  %v613_v15 = vpop.f32.mrf.mxu1 }
 0x11c   :  { %v543_v28 = vadd.f32 %v542_v30, %v214_v18  ;;  %v614_v51 = vadd.f32 %v613_v15, %v327_v33  ;;  %v6204_v15 = vld [vmem:[#allocation8 + $0x1d8] sm:$0xff]  ;;  %v6208_v33 = vld [vmem:[#allocation8 + $0x1c0] sm:$0xff] }
 0x11d   :  { %v544_v14 = vpop.f32.mrf.mxu0  ;;  %v615_v19 = vpop.f32.mrf.mxu1 }
 0x11e   :  { %v4595_v17 = vmul.f32 -1.442695, %v543_v28  ;;  %v545_v16 = vadd.f32 %v544_v14, %v216_v6  ;;  %v4597_v1 = vmul.f32 -1.442695, %v614_v51  ;;  %v616_v23 = vadd.f32 %v615_v19, %v329_v24  ;;  %v6198_v51 = vld [vmem:[#allocation8 + $0x1e0] sm:$0xff]  ;;  %v6210_v24 = vld [vmem:[#allocation8 + $0x1d0] sm:$0xff] }
 0x120   :  { %4703 = vpow2.f32 %v4595_v17  ;;  %v4596_v26 = vmul.f32 -1.442695, %v545_v16  ;;  %v6202_v16 = vld [vmem:[#allocation8 + $0x1c8] sm:$0xff] }
 0x122   :  { %4705 = vpow2.f32 %v4596_v26 }
 0x123   :  { %4707 = vpow2.f32 %v4597_v1  ;;  %v6214_v1 = vld [vmem:[#allocation8 + $0x1a8] sm:$0xff] }
 0x12d   :  { %v4704_v42 = vpop.eup %4703 }
 0x12e   :  { %v627_v22 = vadd.f32 1.0, %v4704_v42  ;;  %v6216_v42 = vld [vmem:[#allocation8 + $0x1b8] sm:$0xff] }
 0x12f   :  { %v4706_v27 = vpop.eup %4705 }
 0x130   :  { %4709 = vrcp.f32 %v627_v22  ;;  %v628_v14 = vadd.f32 1.0, %v4706_v27  ;;  %v4708_v17 = vpop.eup %4707  ;;  %v6220_v22 = vld [vmem:[#allocation8 + $0x1a0] sm:$0xff]  ;;  %v6222_v27 = vld [vmem:[#allocation8 + $0x1b0] sm:$0xff] }
 0x131   :  { %4711 = vtanh.f32 %v616_v23  ;;  %v629_v25 = vadd.f32 1.0, %v4708_v17  ;;  %v6200_v23 = vld [vmem:[#allocation8 + $0x1f0] sm:$0xff]  ;;  %9786 = vst [vmem:[#allocation106_spill] sm:$0xff] %v6222_v27  ;;  %v6228_v17 = vld [vmem:[#allocation8 + $0x198] sm:$0xff] }
 0x132   :  { %4713 = vrcp.f32 %v628_v14  ;;  %v6226_v14 = vld [vmem:[#allocation8 + $0x188] sm:$0xff]  ;;  %9788 = vst [vmem:[#allocation108_spill] sm:$0xff] %v6228_v17 }
 0x133   :  { %4715 = vrcp.f32 %v629_v25  ;;  %9787 = vst [vmem:[#allocation107_spill] sm:$0xff] %v6226_v14  ;;  %v6240_v25 = vld [vmem:[#allocation8 + $0x178] sm:$0xff] }
 0x134   :  { %9792 = vst [vmem:[#allocation112_spill] sm:$0xff] %v6240_v25 }
 0x13d   :  { %v4710_v26 = vpop.eup %4709 }
 0x13e   :  { %v4712_v30 = vpop.eup %4711 }
 0x13f   :  { %v4714_v28 = vpop.eup %4713  ;;  %v638_v18 = vmul.f32 %v4712_v30, %v4710_v26  ;;  %v6232_v26 = vld [vmem:[#allocation8 + $0x180] sm:$0xff]  ;;  %v6234_v30 = vld [vmem:[#allocation8 + $0x190] sm:$0xff] }
 0x140   :  { %v637_v29 = vmul.f32 0.0, %v4714_v28  ;;  %v4716_v19 = vpop.eup %4715  ;;  %9789 = vst [vmem:[#allocation109_spill] sm:$0xff] %v6232_v26  ;;  %9790 = vst [vmem:[#allocation110_spill] sm:$0xff] %v6234_v30  ;;  %v6238_v28 = vld [vmem:[#allocation8 + $0x168] sm:$0xff] }
 0x141   :  { %9791 = vst [vmem:[#allocation111_spill] sm:$0xff] %v6238_v28 }
 0x142   :  { %v6193_v6 = vadd.f32 %v638_v18, %v637_v29  ;;  %v6244_v29 = vld [vmem:[#allocation8 + $0x160] sm:$0xff]  ;;  %v6246_v18 = vld [vmem:[#allocation8 + $0x170] sm:$0xff] }
 0x143   :  { %9793 = vst [vmem:[#allocation113_spill] sm:$0xff] %v6244_v29  ;;  %9794 = vst [vmem:[#allocation114_spill] sm:$0xff] %v6246_v18 }
 0x144   :  { %4717 = vtanh.f32 %v6193_v6 }
 0x151   :  { %v4718_v21 = vpop.eup %4717 }
 0x152   :  { %v6196_v60 = vmul.f32 %v4718_v21, %v4716_v19  ;;  %v6250_v19 = vld [vmem:[#allocation8 + $0x148] sm:$0xff]  ;;  %v6252_v21 = vld [vmem:[#allocation8 + $0x158] sm:$0xff] }
 0x153   :  { %9795 = vst [vmem:[#allocation115_spill] sm:$0xff] %v6250_v19  ;;  %9796 = vst [vmem:[#allocation116_spill] sm:$0xff] %v6252_v21 }
 0x154   :  { %793 = vmatmul.mubr.f32.vlgmr.msra.gmra.mxu0 %v6196_v60  ;;  %864 = vmatmul.mubr.f32.vlgmr.msra.gmra.mxu1 %v6196_v60 }
 0x155   :  { %935 = vmatpush1.msra.mxu0 %v6198_v51  ;;  %1006 = vmatpush1.msra.mxu1 %v6200_v23 }
 0x156   :  { %936 = vmatprep.subr.mxu0 %v6202_v16  ;;  %1007 = vmatprep.subr.mxu1 %v6204_v15 }
 0x157   :  { %937 = vmatpush1.msra.mxu0 %v6208_v33  ;;  %1008 = vmatpush1.msra.mxu1 %v6210_v24 }
 0x158   :  { %938 = vmatprep.subr.mxu0 %v6214_v1  ;;  %1009 = vmatprep.subr.mxu1 %v6216_v42 }
 0x159   :  { %939 = vmatpush1.msra.mxu0 %v6220_v22  ;;  %1010 = vmatpush1.msra.mxu1 %v6222_v27  ;;  %v6256_v27 = vld [vmem:[#allocation8 + $0x140] sm:$0xff] }
 0x15a   :  { %940 = vmatprep.subr.mxu0 %v6226_v14  ;;  %1011 = vmatprep.subr.mxu1 %v6228_v17  ;;  %9797 = vst [vmem:[#allocation117_spill] sm:$0xff] %v6256_v27  ;;  %v6258_v14 = vld [vmem:[#allocation8 + $0x150] sm:$0xff]  ;;  %v6262_v17 = vld [vmem:[#allocation8 + $0x128] sm:$0xff] }
 0x15b   :  { %941 = vmatpush1.msra.mxu0 %v6232_v26  ;;  %1012 = vmatpush1.msra.mxu1 %v6234_v30  ;;  %9798 = vst [vmem:[#allocation118_spill] sm:$0xff] %v6258_v14  ;;  %9799 = vst [vmem:[#allocation119_spill] sm:$0xff] %v6262_v17  ;;  %v6264_v26 = vld [vmem:[#allocation8 + $0x138] sm:$0xff]  ;;  %v6268_v30 = vld [vmem:[#allocation8 + $0x120] sm:$0xff] }
 0x15c   :  { %942 = vmatprep.subr.mxu0 %v6238_v28  ;;  %1013 = vmatprep.subr.mxu1 %v6240_v25  ;;  %9800 = vst [vmem:[#allocation120_spill] sm:$0xff] %v6264_v26  ;;  %9801 = vst [vmem:[#allocation121_spill] sm:$0xff] %v6268_v30  ;;  %v6270_v28 = vld [vmem:[#allocation8 + $0x130] sm:$0xff]  ;;  %v6274_v25 = vld [vmem:[#allocation8 + $0x108] sm:$0xff] }
 0x15d   :  { %943 = vmatpush1.msra.mxu0 %v6244_v29  ;;  %1014 = vmatpush1.msra.mxu1 %v6246_v18  ;;  %9802 = vst [vmem:[#allocation122_spill] sm:$0xff] %v6270_v28  ;;  %9803 = vst [vmem:[#allocation123_spill] sm:$0xff] %v6274_v25  ;;  %v6276_v29 = vld [vmem:[#allocation8 + $0x118] sm:$0xff]  ;;  %v6280_v18 = vld [vmem:[#allocation8 + $0x100] sm:$0xff] }
 0x15e   :  { %944 = vmatprep.subr.mxu0 %v6250_v19  ;;  %1015 = vmatprep.subr.mxu1 %v6252_v21  ;;  %9804 = vst [vmem:[#allocation124_spill] sm:$0xff] %v6276_v29  ;;  %9805 = vst [vmem:[#allocation125_spill] sm:$0xff] %v6280_v18  ;;  %v6282_v19 = vld [vmem:[#allocation8 + $0x110] sm:$0xff]  ;;  %v6286_v21 = vld [vmem:[#allocation8 + $0xe8] sm:$0xff] }
 0x15f   :  { %945 = vmatpush1.msra.mxu0 %v6256_v27  ;;  %1016 = vmatpush1.msra.mxu1 %v6258_v14  ;;  %9806 = vst [vmem:[#allocation126_spill] sm:$0xff] %v6282_v19  ;;  %9807 = vst [vmem:[#allocation127_spill] sm:$0xff] %v6286_v21  ;;  %v6288_v27 = vld [vmem:[#allocation8 + $0xf8] sm:$0xff]  ;;  %v6292_v14 = vld [vmem:[#allocation8 + $0xe0] sm:$0xff] }
 0x160   :  { %946 = vmatprep.subr.mxu0 %v6262_v17  ;;  %1017 = vmatprep.subr.mxu1 %v6264_v26  ;;  %9808 = vst [vmem:[#allocation128_spill] sm:$0xff] %v6288_v27  ;;  %9809 = vst [vmem:[#allocation129_spill] sm:$0xff] %v6292_v14  ;;  %v6294_v17 = vld [vmem:[#allocation8 + $0xf0] sm:$0xff]  ;;  %v6298_v26 = vld [vmem:[#allocation8 + $0xc8] sm:$0xff] }
 0x161   :  { %947 = vmatpush1.msra.mxu0 %v6268_v30  ;;  %1018 = vmatpush1.msra.mxu1 %v6270_v28  ;;  %9810 = vst [vmem:[#allocation130_spill] sm:$0xff] %v6294_v17  ;;  %9811 = vst [vmem:[#allocation131_spill] sm:$0xff] %v6298_v26  ;;  %v6300_v30 = vld [vmem:[#allocation8 + $0xd8] sm:$0xff]  ;;  %v6304_v28 = vld [vmem:[#allocation8 + $0xc0] sm:$0xff] }
 0x162   :  { %948 = vmatprep.subr.mxu0 %v6274_v25  ;;  %1019 = vmatprep.subr.mxu1 %v6276_v29  ;;  %9812 = vst [vmem:[#allocation132_spill] sm:$0xff] %v6300_v30  ;;  %9813 = vst [vmem:[#allocation133_spill] sm:$0xff] %v6304_v28  ;;  %v6306_v25 = vld [vmem:[#allocation8 + $0xd0] sm:$0xff]  ;;  %v6310_v29 = vld [vmem:[#allocation8 + $0xa8] sm:$0xff] }
 0x163   :  { %949 = vmatpush1.msra.mxu0 %v6280_v18  ;;  %1020 = vmatpush1.msra.mxu1 %v6282_v19  ;;  %9814 = vst [vmem:[#allocation134_spill] sm:$0xff] %v6306_v25  ;;  %9815 = vst [vmem:[#allocation135_spill] sm:$0xff] %v6310_v29  ;;  %v6312_v18 = vld [vmem:[#allocation8 + $0xb8] sm:$0xff]  ;;  %v6316_v19 = vld [vmem:[#allocation8 + $0xa0] sm:$0xff] }
 0x164   :  { %950 = vmatprep.subr.mxu0 %v6286_v21  ;;  %1021 = vmatprep.subr.mxu1 %v6288_v27  ;;  %9816 = vst [vmem:[#allocation136_spill] sm:$0xff] %v6312_v18  ;;  %9817 = vst [vmem:[#allocation137_spill] sm:$0xff] %v6316_v19  ;;  %v6318_v21 = vld [vmem:[#allocation8 + $0xb0] sm:$0xff]  ;;  %v6322_v27 = vld [vmem:[#allocation8 + $0x88] sm:$0xff] }
 0x165   :  { %951 = vmatpush1.msra.mxu0 %v6292_v14  ;;  %1022 = vmatpush1.msra.mxu1 %v6294_v17  ;;  %9818 = vst [vmem:[#allocation138_spill] sm:$0xff] %v6318_v21  ;;  %9819 = vst [vmem:[#allocation139_spill] sm:$0xff] %v6322_v27  ;;  %v6324_v14 = vld [vmem:[#allocation8 + $0x98] sm:$0xff]  ;;  %v6328_v17 = vld [vmem:[#allocation8 + $0x80] sm:$0xff] }
 0x166   :  { %952 = vmatprep.subr.mxu0 %v6298_v26  ;;  %1023 = vmatprep.subr.mxu1 %v6300_v30  ;;  %9820 = vst [vmem:[#allocation140_spill] sm:$0xff] %v6324_v14  ;;  %9821 = vst [vmem:[#allocation141_spill] sm:$0xff] %v6328_v17  ;;  %v6330_v26 = vld [vmem:[#allocation8 + $0x90] sm:$0xff]  ;;  %v6334_v30 = vld [vmem:[#allocation8 + $0x68] sm:$0xff] }
 0x167   :  { %953 = vmatpush1.msra.mxu0 %v6304_v28  ;;  %1024 = vmatpush1.msra.mxu1 %v6306_v25  ;;  %9822 = vst [vmem:[#allocation142_spill] sm:$0xff] %v6330_v26  ;;  %9823 = vst [vmem:[#allocation143_spill] sm:$0xff] %v6334_v30  ;;  %v6336_v28 = vld [vmem:[#allocation8 + $0x78] sm:$0xff]  ;;  %v6340_v25 = vld [vmem:[#allocation8 + $0x60] sm:$0xff] }
 0x168   :  { %954 = vmatprep.subr.mxu0 %v6310_v29  ;;  %1025 = vmatprep.subr.mxu1 %v6312_v18  ;;  %9824 = vst [vmem:[#allocation144_spill] sm:$0xff] %v6336_v28  ;;  %9825 = vst [vmem:[#allocation145_spill] sm:$0xff] %v6340_v25  ;;  %v6342_v29 = vld [vmem:[#allocation8 + $0x70] sm:$0xff]  ;;  %v6346_v18 = vld [vmem:[#allocation8 + $0x48] sm:$0xff] }
 0x169   :  { %955 = vmatpush1.msra.mxu0 %v6316_v19  ;;  %1026 = vmatpush1.msra.mxu1 %v6318_v21  ;;  %9826 = vst [vmem:[#allocation146_spill] sm:$0xff] %v6342_v29  ;;  %v6348_v19 = vld [vmem:[#allocation8 + $0x58] sm:$0xff]  ;;  %v6352_v21 = vld [vmem:[#allocation8 + $0x40] sm:$0xff] }
 0x16a   :  { %956 = vmatprep.subr.mxu0 %v6322_v27  ;;  %1027 = vmatprep.subr.mxu1 %v6324_v14  ;;  %9827 = vst [vmem:[#allocation147_spill] sm:$0xff] %v6348_v19  ;;  %v6354_v27 = vld [vmem:[#allocation8 + $0x50] sm:$0xff]  ;;  %v6358_v14 = vld [vmem:[#allocation8 + $0x28] sm:$0xff] }
 0x16b   :  { %957 = vmatpush1.msra.mxu0 %v6328_v17  ;;  %1028 = vmatpush1.msra.mxu1 %v6330_v26  ;;  %9828 = vst [vmem:[#allocation148_spill] sm:$0xff] %v6354_v27  ;;  %v6360_v17 = vld [vmem:[#allocation8 + $0x38] sm:$0xff]  ;;  %v6364_v26 = vld [vmem:[#allocation8 + $0x20] sm:$0xff] }
 0x16c   :  { %958 = vmatprep.subr.mxu0 %v6334_v30  ;;  %1029 = vmatprep.subr.mxu1 %v6336_v28  ;;  %9829 = vst [vmem:[#allocation149_spill] sm:$0xff] %v6364_v26  ;;  %v6366_v30 = vld [vmem:[#allocation8 + $0x30] sm:$0xff]  ;;  %v6370_v28 = vld [vmem:[#allocation8 + $0x8] sm:$0xff] }
 0x16d   :  { %959 = vmatpush1.msra.mxu0 %v6340_v25  ;;  %1030 = vmatpush1.msra.mxu1 %v6342_v29  ;;  %9830 = vst [vmem:[#allocation150_spill] sm:$0xff] %v6366_v30  ;;  %9831 = vst [vmem:[#allocation151_spill] sm:$0xff] %v6370_v28  ;;  %v6372_v25 = vld [vmem:[#allocation8 + $0x18] sm:$0xff]  ;;  %v6376_v29 = vld [vmem:[#allocation8] sm:$0xff] }
 0x16e   :  { %960 = vmatprep.subr.mxu0 %v6346_v18  ;;  %1031 = vmatprep.subr.mxu1 %v6348_v19  ;;  %9832 = vst [vmem:[#allocation152_spill] sm:$0xff] %v6372_v25  ;;  %9833 = vst [vmem:[#allocation153_spill] sm:$0xff] %v6376_v29  ;;  %v6380_v19 = vld [vmem:[#allocation8 + $0x10] sm:$0xff] }
 0x16f   :  { %961 = vmatpush1.msra.mxu0 %v6352_v21  ;;  %1032 = vmatpush1.msra.mxu1 %v6354_v27  ;;  %9834 = vst [vmem:[#allocation154_spill] sm:$0xff] %v6380_v19  ;;  %v9835_v27 = vmov 0.0  }
 0x170   :  { %962 = vmatprep.subr.mxu0 %v6358_v14  ;;  %1033 = vmatprep.subr.mxu1 %v6360_v17 }
 0x171   :  { %963 = vmatpush1.msra.mxu0 %v6364_v26  ;;  %1034 = vmatpush1.msra.mxu1 %v6366_v30  ;;  %v6390_v26 = vld [vmem:[#allocation4 + $0x1e8] sm:$0xff]  ;;  %v6393_v30 = vld [vmem:[#allocation4 + $0x1f8] sm:$0xff] }
 0x172   :  { %964 = vmatprep.subr.mxu0 %v6370_v28  ;;  %1035 = vmatprep.subr.mxu1 %v6372_v25  ;;  %9836 = vst [vmem:[#allocation155_spill] sm:$0xff] %v6390_v26  ;;  %9837 = vst [vmem:[#allocation156_spill] sm:$0xff] %v6393_v30  ;;  %v6396_v25 = vld [vmem:[#allocation4 + $0x1e0] sm:$0xff]  ;;  %v6405_v28 = vld [vmem:[#allocation4 + $0x1d8] sm:$0xff] }
 0x173   :  { %965 = vmatpush1.msra.mxu0 %v6376_v29  ;;  %998 = vmatprep.mubr.f32.mxu0 %v9835_v27  ;;  %9838 = vst [vmem:[#allocation157_spill] sm:$0xff] %v6396_v25  ;;  %v6399_v29 = vld [vmem:[#allocation4 + $0x1f0] sm:$0xff]  ;;  %9841 = vst [vmem:[#allocation160_spill] sm:$0xff] %v6405_v28 }
 0x174   :  { %1036 = vmatpush1.msra.mxu1 %v6380_v19  ;;  %1069 = vmatprep.mubr.f32.mxu1 %v9835_v27  ;;  %9839 = vst [vmem:[#allocation158_spill] sm:$0xff] %v6399_v29  ;;  %v6402_v19 = vld [vmem:[#allocation4 + $0x1c8] sm:$0xff] }
 0x175   :  { %999 = vmatmul.mubr.f32.vlgmr.msra.gmra.mxu0 %v9835_v27  ;;  %1070 = vmatmul.mubr.f32.vlgmr.msra.gmra.mxu1 %v9835_v27  ;;  %9840 = vst [vmem:[#allocation159_spill] sm:$0xff] %v6402_v19 }
 0x176   :  { %1107 = vmatprep.subr.mxu0 %v6390_v26  ;;  %1178 = vmatprep.subr.mxu1 %v6393_v30  ;;  %v6408_v26 = vld [vmem:[#allocation4 + $0x1c0] sm:$0xff]  ;;  %v6411_v30 = vld [vmem:[#allocation4 + $0x1d0] sm:$0xff] }
 0x177   :  { %1108 = vmatpush1.msra.mxu0 %v6396_v25  ;;  %1179 = vmatpush1.msra.mxu1 %v6399_v29  ;;  %9842 = vst [vmem:[#allocation161_spill] sm:$0xff] %v6408_v26  ;;  %9843 = vst [vmem:[#allocation162_spill] sm:$0xff] %v6411_v30  ;;  %v6414_v25 = vld [vmem:[#allocation4 + $0x1a8] sm:$0xff]  ;;  %v6417_v29 = vld [vmem:[#allocation4 + $0x1b8] sm:$0xff] }
 0x178   :  { %1109 = vmatprep.subr.mxu0 %v6402_v19  ;;  %1180 = vmatprep.subr.mxu1 %v6405_v28  ;;  %9844 = vst [vmem:[#allocation163_spill] sm:$0xff] %v6414_v25  ;;  %9845 = vst [vmem:[#allocation164_spill] sm:$0xff] %v6417_v29  ;;  %v6420_v19 = vld [vmem:[#allocation4 + $0x1a0] sm:$0xff]  ;;  %v6423_v28 = vld [vmem:[#allocation4 + $0x1b0] sm:$0xff] }
 0x179   :  { %1110 = vmatpush1.msra.mxu0 %v6408_v26  ;;  %1181 = vmatpush1.msra.mxu1 %v6411_v30  ;;  %9846 = vst [vmem:[#allocation165_spill] sm:$0xff] %v6420_v19  ;;  %9847 = vst [vmem:[#allocation166_spill] sm:$0xff] %v6423_v28  ;;  %v6426_v26 = vld [vmem:[#allocation4 + $0x188] sm:$0xff]  ;;  %v6429_v30 = vld [vmem:[#allocation4 + $0x198] sm:$0xff] }
 0x17a   :  { %1111 = vmatprep.subr.mxu0 %v6414_v25  ;;  %1182 = vmatprep.subr.mxu1 %v6417_v29  ;;  %9848 = vst [vmem:[#allocation167_spill] sm:$0xff] %v6426_v26  ;;  %9849 = vst [vmem:[#allocation168_spill] sm:$0xff] %v6429_v30  ;;  %v6432_v25 = vld [vmem:[#allocation4 + $0x180] sm:$0xff]  ;;  %v6435_v29 = vld [vmem:[#allocation4 + $0x190] sm:$0xff] }
 0x17b   :  { %1112 = vmatpush1.msra.mxu0 %v6420_v19  ;;  %1183 = vmatpush1.msra.mxu1 %v6423_v28  ;;  %9850 = vst [vmem:[#allocation169_spill] sm:$0xff] %v6432_v25  ;;  %9851 = vst [vmem:[#allocation170_spill] sm:$0xff] %v6435_v29  ;;  %v6438_v19 = vld [vmem:[#allocation4 + $0x168] sm:$0xff]  ;;  %v6441_v28 = vld [vmem:[#allocation4 + $0x178] sm:$0xff] }
 0x17c   :  { %1113 = vmatprep.subr.mxu0 %v6426_v26  ;;  %1184 = vmatprep.subr.mxu1 %v6429_v30  ;;  %v6444_v26 = vld [vmem:[#allocation4 + $0x160] sm:$0xff]  ;;  %v6447_v30 = vld [vmem:[#allocation4 + $0x170] sm:$0xff] }
 0x17d   :  { %1114 = vmatpush1.msra.mxu0 %v6432_v25  ;;  %1185 = vmatpush1.msra.mxu1 %v6435_v29  ;;  %v6450_v25 = vld [vmem:[#allocation4 + $0x148] sm:$0xff]  ;;  %v6453_v29 = vld [vmem:[#allocation4 + $0x158] sm:$0xff] }
 0x17e   :  { %1115 = vmatprep.subr.mxu0 %v6438_v19  ;;  %1186 = vmatprep.subr.mxu1 %v6441_v28 }
 0x17f   :  { %1116 = vmatpush1.msra.mxu0 %v6444_v26  ;;  %1187 = vmatpush1.msra.mxu1 %v6447_v30 }
 0x180   :  { %1117 = vmatprep.subr.mxu0 %v6450_v25  ;;  %1188 = vmatprep.subr.mxu1 %v6453_v29 }
 0x181   :  { %1118 = vmatpush1.msra.mxu0 %v5723_v31  ;;  %1189 = vmatpush1.msra.mxu1 %v5725_v32  ;;  %v9852_v31 = vld [vmem:[#allocation11_spill] sm:$0xff]  ;;  %v9853_v32 = vld [vmem:[#allocation12_spill] sm:$0xff] }
 0x182   :  { %1119 = vmatprep.subr.mxu0 %v5732_v34  ;;  %1190 = vmatprep.subr.mxu1 %v5734_v35  ;;  %v9854_v34 = vld [vmem:[#allocation13_spill] sm:$0xff]  ;;  %v9855_v35 = vld [vmem:[#allocation14_spill] sm:$0xff] }
 0x183   :  { %1120 = vmatpush1.msra.mxu0 %v5738_v36  ;;  %1191 = vmatpush1.msra.mxu1 %v5740_v37  ;;  %v9856_v36 = vld [vmem:[#allocation15_spill] sm:$0xff]  ;;  %v9857_v37 = vld [vmem:[#allocation16_spill] sm:$0xff] }
 0x184   :  { %1121 = vmatprep.subr.mxu0 %v5744_v38  ;;  %1192 = vmatprep.subr.mxu1 %v5746_v39  ;;  %v9858_v38 = vld [vmem:[#allocation17_spill] sm:$0xff]  ;;  %v9859_v39 = vld [vmem:[#allocation18_spill] sm:$0xff] }
 0x185   :  { %1122 = vmatpush1.msra.mxu0 %v5752_v40  ;;  %1193 = vmatpush1.msra.mxu1 %v5754_v41  ;;  %v9860_v40 = vld [vmem:[#allocation19_spill] sm:$0xff]  ;;  %v9861_v41 = vld [vmem:[#allocation20_spill] sm:$0xff] }
 0x186   :  { %1123 = vmatprep.subr.mxu0 %v5763_v43  ;;  %1194 = vmatprep.subr.mxu1 %v5765_v44  ;;  %v9862_v43 = vld [vmem:[#allocation21_spill] sm:$0xff]  ;;  %v9863_v44 = vld [vmem:[#allocation22_spill] sm:$0xff] }
 0x187   :  { %1124 = vmatpush1.msra.mxu0 %v5769_v45  ;;  %1195 = vmatpush1.msra.mxu1 %v5771_v46  ;;  %v9864_v45 = vld [vmem:[#allocation23_spill] sm:$0xff]  ;;  %v9865_v46 = vld [vmem:[#allocation24_spill] sm:$0xff] }
 0x188   :  { %1125 = vmatprep.subr.mxu0 %v5775_v47  ;;  %1196 = vmatprep.subr.mxu1 %v5777_v48  ;;  %v9866_v47 = vld [vmem:[#allocation25_spill] sm:$0xff]  ;;  %v9867_v48 = vld [vmem:[#allocation26_spill] sm:$0xff] }
 0x189   :  { %1126 = vmatpush1.msra.mxu0 %v5783_v49  ;;  %1197 = vmatpush1.msra.mxu1 %v5785_v50  ;;  %v9868_v49 = vld [vmem:[#allocation27_spill] sm:$0xff]  ;;  %v9869_v50 = vld [vmem:[#allocation28_spill] sm:$0xff] }
 0x18a   :  { %1127 = vmatprep.subr.mxu0 %v5794_v52  ;;  %1198 = vmatprep.subr.mxu1 %v5796_v53  ;;  %v9870_v52 = vld [vmem:[#allocation29_spill] sm:$0xff]  ;;  %v9871_v53 = vld [vmem:[#allocation30_spill] sm:$0xff] }
 0x18b   :  { %1128 = vmatpush1.msra.mxu0 %v5800_v54  ;;  %1199 = vmatpush1.msra.mxu1 %v5802_v55  ;;  %v9872_v54 = vld [vmem:[#allocation31_spill] sm:$0xff]  ;;  %v9873_v55 = vld [vmem:[#allocation32_spill] sm:$0xff] }
 0x18c   :  { %1129 = vmatprep.subr.mxu0 %v5806_v56  ;;  %1200 = vmatprep.subr.mxu1 %v5808_v57  ;;  %v9874_v56 = vld [vmem:[#allocation33_spill] sm:$0xff]  ;;  %v9875_v57 = vld [vmem:[#allocation34_spill] sm:$0xff] }
 0x18d   :  { %1130 = vmatpush1.msra.mxu0 %v5814_v58  ;;  %1201 = vmatpush1.msra.mxu1 %v5816_v59  ;;  %v9876_v58 = vld [vmem:[#allocation35_spill] sm:$0xff]  ;;  %v9877_v59 = vld [vmem:[#allocation36_spill] sm:$0xff] }
 0x18e   :  { %1131 = vmatprep.subr.mxu0 %v5825_v61  ;;  %1202 = vmatprep.subr.mxu1 %v5827_v62  ;;  %v9878_v61 = vld [vmem:[#allocation37_spill] sm:$0xff]  ;;  %v9879_v62 = vld [vmem:[#allocation38_spill] sm:$0xff] }
 0x18f   :  { %1132 = vmatpush1.msra.mxu0 %v5831_v63  ;;  %1203 = vmatpush1.msra.mxu1 %v5833_v0  ;;  %v9880_v63 = vld [vmem:[#allocation39_spill] sm:$0xff]  ;;  %v9881_v0 = vld [vmem:[#allocation40_spill] sm:$0xff] }
 0x190   :  { %1133 = vmatprep.subr.mxu0 %v5837_v2  ;;  %1204 = vmatprep.subr.mxu1 %v5839_v3  ;;  %v9882_v2 = vld [vmem:[#allocation41_spill] sm:$0xff]  ;;  %v9883_v3 = vld [vmem:[#allocation42_spill] sm:$0xff] }
 0x191   :  { %1134 = vmatpush1.msra.mxu0 %v5845_v4  ;;  %1205 = vmatpush1.msra.mxu1 %v5847_v5  ;;  %v9884_v4 = vld [vmem:[#allocation43_spill] sm:$0xff]  ;;  %v9885_v5 = vld [vmem:[#allocation44_spill] sm:$0xff] }
 0x192   :  { %1135 = vmatprep.subr.mxu0 %v5856_v7  ;;  %1206 = vmatprep.subr.mxu1 %v5858_v8  ;;  %v9886_v7 = vld [vmem:[#allocation45_spill] sm:$0xff]  ;;  %v9887_v8 = vld [vmem:[#allocation46_spill] sm:$0xff] }
 0x193   :  { %1136 = vmatpush1.msra.mxu0 %v5862_v9  ;;  %1207 = vmatpush1.msra.mxu1 %v5864_v10  ;;  %v9888_v9 = vld [vmem:[#allocation47_spill] sm:$0xff]  ;;  %v9889_v10 = vld [vmem:[#allocation48_spill] sm:$0xff] }
 0x194   :  { %1137 = vmatprep.subr.mxu0 %v5868_v11  ;;  %1208 = vmatprep.subr.mxu1 %v5870_v12  ;;  %v9890_v11 = vld [vmem:[#allocation49_spill] sm:$0xff]  ;;  %v9891_v12 = vld [vmem:[#allocation50_spill] sm:$0xff] }
 0x195   :  { %1138 = vmatpush1.msra.mxu0 %v5874_v13  ;;  %1171 = vmatprep.mubr.f32.mxu0 %v9835_v27  ;;  %v9892_v13 = vld [vmem:[#allocation51_spill] sm:$0xff] }
 0x196   :  { %1209 = vmatpush1.msra.mxu1 %v9852_v31  ;;  %1242 = vmatprep.mubr.f32.mxu1 %v9835_v27  ;;  %v9894_v31 = vld [vmem:[#allocation53_spill] sm:$0xff] }
 0x197   :  { %1172 = vmatmul.mubr.f32.vlgmr.msra.gmra.mxu0 %v6196_v60  ;;  %1243 = vmatmul.mubr.f32.vlgmr.msra.gmra.mxu1 %v6196_v60  ;;  %v9893_v60 = vld [vmem:[#allocation52_spill] sm:$0xff] }
 0x198   :  { %1273 = vmatprep.subr.mxu0 %v9853_v32  ;;  %1344 = vmatprep.subr.mxu1 %v9854_v34  ;;  %v9895_v32 = vld [vmem:[#allocation54_spill] sm:$0xff]  ;;  %v9896_v34 = vld [vmem:[#allocation55_spill] sm:$0xff] }
 0x199   :  { %1274 = vmatpush1.msra.mxu0 %v9855_v35  ;;  %1345 = vmatpush1.msra.mxu1 %v9856_v36  ;;  %v9897_v35 = vld [vmem:[#allocation56_spill] sm:$0xff]  ;;  %v9898_v36 = vld [vmem:[#allocation57_spill] sm:$0xff] }
 0x19a   :  { %1275 = vmatprep.subr.mxu0 %v9857_v37  ;;  %1346 = vmatprep.subr.mxu1 %v9858_v38  ;;  %v9899_v37 = vld [vmem:[#allocation58_spill] sm:$0xff]  ;;  %v9900_v38 = vld [vmem:[#allocation59_spill] sm:$0xff] }
 0x19b   :  { %1276 = vmatpush1.msra.mxu0 %v9859_v39  ;;  %1347 = vmatpush1.msra.mxu1 %v9860_v40  ;;  %v9901_v39 = vld [vmem:[#allocation60_spill] sm:$0xff]  ;;  %v9902_v40 = vld [vmem:[#allocation61_spill] sm:$0xff] }
 0x19c   :  { %1277 = vmatprep.subr.mxu0 %v9861_v41  ;;  %1348 = vmatprep.subr.mxu1 %v9862_v43  ;;  %v9903_v41 = vld [vmem:[#allocation62_spill] sm:$0xff]  ;;  %v9904_v43 = vld [vmem:[#allocation63_spill] sm:$0xff] }
 0x19d   :  { %1278 = vmatpush1.msra.mxu0 %v9863_v44  ;;  %1349 = vmatpush1.msra.mxu1 %v9864_v45  ;;  %v9905_v44 = vld [vmem:[#allocation64_spill] sm:$0xff]  ;;  %v9906_v45 = vld [vmem:[#allocation65_spill] sm:$0xff] }
 0x19e   :  { %1279 = vmatprep.subr.mxu0 %v9865_v46  ;;  %1350 = vmatprep.subr.mxu1 %v9866_v47  ;;  %v9907_v46 = vld [vmem:[#allocation66_spill] sm:$0xff]  ;;  %v9908_v47 = vld [vmem:[#allocation67_spill] sm:$0xff] }
 0x19f   :  { %1280 = vmatpush1.msra.mxu0 %v9867_v48  ;;  %1351 = vmatpush1.msra.mxu1 %v9868_v49  ;;  %v9909_v48 = vld [vmem:[#allocation68_spill] sm:$0xff]  ;;  %v9910_v49 = vld [vmem:[#allocation69_spill] sm:$0xff] }
 0x1a0   :  { %1281 = vmatprep.subr.mxu0 %v9869_v50  ;;  %1352 = vmatprep.subr.mxu1 %v9870_v52  ;;  %v9911_v50 = vld [vmem:[#allocation70_spill] sm:$0xff]  ;;  %v9912_v52 = vld [vmem:[#allocation71_spill] sm:$0xff] }
 0x1a1   :  { %1282 = vmatpush1.msra.mxu0 %v9871_v53  ;;  %1353 = vmatpush1.msra.mxu1 %v9872_v54  ;;  %v9913_v53 = vld [vmem:[#allocation72_spill] sm:$0xff]  ;;  %v9914_v54 = vld [vmem:[#allocation73_spill] sm:$0xff] }
 0x1a2   :  { %1283 = vmatprep.subr.mxu0 %v9873_v55  ;;  %1354 = vmatprep.subr.mxu1 %v9874_v56  ;;  %v9915_v55 = vld [vmem:[#allocation74_spill] sm:$0xff]  ;;  %v9916_v56 = vld [vmem:[#allocation75_spill] sm:$0xff] }
 0x1a3   :  { %1284 = vmatpush1.msra.mxu0 %v9875_v57  ;;  %1355 = vmatpush1.msra.mxu1 %v9876_v58  ;;  %v9917_v57 = vld [vmem:[#allocation76_spill] sm:$0xff]  ;;  %v9918_v58 = vld [vmem:[#allocation77_spill] sm:$0xff] }
 0x1a4   :  { %1285 = vmatprep.subr.mxu0 %v9877_v59  ;;  %1356 = vmatprep.subr.mxu1 %v9878_v61 }
 0x1a5   :  { %1286 = vmatpush1.msra.mxu0 %v9879_v62  ;;  %1357 = vmatpush1.msra.mxu1 %v9880_v63 }
 0x1a6   :  { %1287 = vmatprep.subr.mxu0 %v9881_v0  ;;  %1358 = vmatprep.subr.mxu1 %v9882_v2 }
 0x1a7   :  { %1288 = vmatpush1.msra.mxu0 %v9883_v3  ;;  %1359 = vmatpush1.msra.mxu1 %v9884_v4 }
 0x1a8   :  { %1289 = vmatprep.subr.mxu0 %v9885_v5  ;;  %1360 = vmatprep.subr.mxu1 %v9886_v7 }
 0x1a9   :  { %1290 = vmatpush1.msra.mxu0 %v9887_v8  ;;  %1361 = vmatpush1.msra.mxu1 %v9888_v9  ;;  %v9919_v9 = vld [vmem:[#allocation80_spill] sm:$0xff] }
 0x1aa   :  { %1291 = vmatprep.subr.mxu0 %v9889_v10  ;;  %1362 = vmatprep.subr.mxu1 %v9890_v11 }
 0x1ab   :  { %1292 = vmatpush1.msra.mxu0 %v9891_v12  ;;  %1363 = vmatpush1.msra.mxu1 %v9892_v13 }
 0x1ac   :  { %1293 = vmatprep.subr.mxu0 %v9893_v60  ;;  %1364 = vmatprep.subr.mxu1 %v9894_v31  ;;  %v9920_v60 = vld [vmem:[#allocation79_spill] sm:$0xff] }
 0x1ad   :  { %1294 = vmatpush1.msra.mxu0 %v9895_v32  ;;  %1365 = vmatpush1.msra.mxu1 %v9896_v34  ;;  %v706_v34 = vld [vmem:[%s9150_s6] sm:$0xf] }
 0x1ae   :  { %1295 = vmatprep.subr.mxu0 %v9897_v35  ;;  %1366 = vmatprep.subr.mxu1 %v9898_v36  ;;  %v9921_v35 = vld [vmem:[#allocation78_spill] sm:$0xff] }
 0x1af   :  { %1296 = vmatpush1.msra.mxu0 %v9899_v37  ;;  %1367 = vmatpush1.msra.mxu1 %v9900_v38  ;;  %v9922_v36 = vsub.s32 1, %v9921_v35  ;;  %v9923_v38 = vld [vmem:[#allocation81_spill] sm:$0xff] }
 0x1b0   :  { %1297 = vmatprep.subr.mxu0 %v9901_v39  ;;  %1368 = vmatprep.subr.mxu1 %v9902_v40  ;;  %v9924_v40 = vsub.s32 0, %v9921_v35 }
 0x1b1   :  { %1298 = vmatpush1.msra.mxu0 %v9903_v41  ;;  %1369 = vmatpush1.msra.mxu1 %v9904_v43 }
 0x1b2   :  { %1299 = vmatprep.subr.mxu0 %v9905_v44  ;;  %1370 = vmatprep.subr.mxu1 %v9906_v45  ;;  %v6583_v41 = vrot.slane %v706_v34, %v9924_v40  ;;  %v9937_v40 = vld [vmem:[#allocation116_spill] sm:$0xff] }
 0x1b3   :  { %1300 = vmatpush1.msra.mxu0 %v9907_v46  ;;  %1371 = vmatpush1.msra.mxu1 %v9908_v47 }
 0x1b4   :  { %1301 = vmatprep.subr.mxu0 %v9909_v48  ;;  %1372 = vmatprep.subr.mxu1 %v9910_v49 }
 0x1b5   :  { %1302 = vmatpush1.msra.mxu0 %v9911_v50  ;;  %1373 = vmatpush1.msra.mxu1 %v9912_v52 }
 0x1b6   :  { %1303 = vmatprep.subr.mxu0 %v9913_v53  ;;  %1374 = vmatprep.subr.mxu1 %v9914_v54 }
 0x1b7   :  { %1304 = vmatpush1.msra.mxu0 %v9915_v55  ;;  %1375 = vmatpush1.msra.mxu1 %v9916_v56 }
 0x1b8   :  { %1337 = vmatprep.mubr.f32.mxu0 %v9835_v27  ;;  %1408 = vmatprep.mubr.f32.mxu1 %v9835_v27 }
 0x1b9   :  { %1415 = vmatprep.subr.mxu0 %v9917_v57  ;;  %1486 = vmatprep.subr.mxu1 %v9918_v58 }
 0x214   :  { %v794_v59 = vpop.f32.mrf.mxu0  ;;  %v865_v63 = vpop.f32.mrf.mxu1 }
 0x215   :  { %v795_v47 = vadd.f32 %v794_v59, %v6583_v41  ;;  %v9925_v59 = vsub.s32 2, %v9921_v35 }
 0x216   :  { %v796_v61 = vpop.f32.mrf.mxu0  ;;  %v867_v2 = vpop.f32.mrf.mxu1 }
 0x235   :  { %v1000_v62 = vpop.f32.mrf.mxu0  ;;  %v1071_v5 = vpop.f32.mrf.mxu1 }
 0x236   :  { %v1001_v50 = vadd.f32 %v1000_v62, %v795_v47  ;;  %v9941_v47 = vld [vmem:[#allocation120_spill] sm:$0xff] }
 0x237   :  { %v1002_v0 = vpop.f32.mrf.mxu0  ;;  %v1073_v12 = vpop.f32.mrf.mxu1 }
 0x238   :  { %v4598_v53 = vmul.f32 -1.442695, %v1001_v50  ;;  %v9943_v50 = vld [vmem:[#allocation122_spill] sm:$0xff] }
 0x257   :  { %v1173_v3 = vpop.f32.mrf.mxu0  ;;  %v1244_v13 = vpop.f32.mrf.mxu1 }
 0x258   :  { %v1174_v4 = vadd.f32 %v1173_v3, %v6117_v20  ;;  %v1245_v31 = vadd.f32 %v1244_v13, %v9920_v60  ;;  %v6578_v20 = vrot.slane %v706_v34, %v9922_v36 }
 0x259   :  { %v1175_v7 = vpop.f32.mrf.mxu0  ;;  %v1246_v32 = vpop.f32.mrf.mxu1 }
 0x25a   :  { %v4601_v8 = vmul.f32 -1.442695, %v1174_v4  ;;  %v1176_v10 = vadd.f32 %v1175_v7, %v9919_v9  ;;  %v4603_v37 = vmul.f32 -1.442695, %v1245_v31  ;;  %v1247_v39 = vadd.f32 %v1246_v32, %v9923_v38 }
 0x25b   :  { %v797_v44 = vadd.f32 %v796_v61, %v6578_v20  ;;  %v9926_v7 = vsub.s32 3, %v9921_v35 }
 0x25c   :  { %4719 = vpow2.f32 %v4601_v8  ;;  %v4602_v11 = vmul.f32 -1.442695, %v1176_v10 }
 0x25d   :  { %v1003_v48 = vadd.f32 %v1002_v0, %v797_v44  ;;  %v6592_v0 = vrot.slane %v706_v34, %v9925_v59  ;;  %v6597_v8 = vrot.slane %v706_v34, %v9926_v7  ;;  %v9934_v34 = vld [vmem:[#allocation113_spill] sm:$0xff]  ;;  %v9953_v59 = vld [vmem:[#allocation132_spill] sm:$0xff]  ;;  %v9955_v7 = vld [vmem:[#allocation134_spill] sm:$0xff] }
 0x25e   :  { %4721 = vpow2.f32 %v4602_v11  ;;  %v9938_v44 = vld [vmem:[#allocation117_spill] sm:$0xff] }
 0x25f   :  { %4723 = vpow2.f32 %v4603_v37  ;;  %v4599_v52 = vmul.f32 -1.442695, %v1003_v48  ;;  %v866_v10 = vadd.f32 %v865_v63, %v6592_v0 }
 0x260   :  { %4725 = vtanh.f32 %v1247_v39  ;;  %v9936_v39 = vld [vmem:[#allocation115_spill] sm:$0xff] }
 0x261   :  { %v1072_v60 = vadd.f32 %v1071_v5, %v866_v10  ;;  %v9928_v5 = vld [vmem:[#allocation107_spill] sm:$0xff]  ;;  %v9957_v10 = vld [vmem:[#allocation136_spill] sm:$0xff] }
 0x263   :  { %v4600_v32 = vmul.f32 -1.442695, %v1072_v60  ;;  %v9961_v60 = vld [vmem:[#allocation140_spill] sm:$0xff] }
 0x269   :  { %v4720_v43 = vpop.eup %4719 }
 0x26a   :  { %v1258_v45 = vadd.f32 1.0, %v4720_v43 }
 0x26b   :  { %v4722_v46 = vpop.eup %4721 }
 0x26c   :  { %4727 = vrcp.f32 %v1258_v45  ;;  %v1259_v49 = vadd.f32 1.0, %v4722_v46  ;;  %v4724_v54 = vpop.eup %4723  ;;  %v9939_v45 = vld [vmem:[#allocation118_spill] sm:$0xff]  ;;  %v9940_v46 = vld [vmem:[#allocation119_spill] sm:$0xff] }
 0x26d   :  { %v4726_v55 = vpop.eup %4725  ;;  %v1260_v61 = vadd.f32 1.0, %v4724_v54  ;;  %v9946_v54 = vld [vmem:[#allocation125_spill] sm:$0xff] }
 0x26e   :  { %4729 = vrcp.f32 %v1259_v49  ;;  %v9942_v49 = vld [vmem:[#allocation121_spill] sm:$0xff] }
 0x26f   :  { %4731 = vpow2.f32 %v4599_v52  ;;  %v9944_v52 = vld [vmem:[#allocation123_spill] sm:$0xff] }
 0x270   :  { %4733 = vpow2.f32 %v4598_v53  ;;  %v9945_v53 = vld [vmem:[#allocation124_spill] sm:$0xff] }
 0x271   :  { %4735 = vrcp.f32 %v1260_v61  ;;  %v9951_v61 = vld [vmem:[#allocation130_spill] sm:$0xff] }
 0x279   :  { %v4728_v56 = vpop.eup %4727 }
 0x27a   :  { %v1269_v57 = vmul.f32 %v4728_v56, %v4726_v55  ;;  %v9947_v55 = vld [vmem:[#allocation126_spill] sm:$0xff]  ;;  %v9948_v56 = vld [vmem:[#allocation127_spill] sm:$0xff] }
 0x27b   :  { %v4730_v58 = vpop.eup %4729 }
 0x27c   :  { %v1268_v3 = vmul.f32 %v4730_v58, %v6193_v6  ;;  %v4732_v62 = vpop.eup %4731  ;;  %v868_v6 = vadd.f32 %v867_v2, %v6597_v8  ;;  %v9927_v2 = vld [vmem:[#allocation106_spill] sm:$0xff]  ;;  %v9950_v58 = vld [vmem:[#allocation129_spill] sm:$0xff] }
 0x27d   :  { %v4734_v9 = vpop.eup %4733  ;;  %v1086_v11 = vadd.f32 1.0, %v4732_v62  ;;  %v9954_v62 = vld [vmem:[#allocation133_spill] sm:$0xff] }
 0x27e   :  { %v6588_v4 = vadd.f32 %v1269_v57, %v1268_v3  ;;  %v1085_v13 = vadd.f32 1.0, %v4734_v9  ;;  %v1074_v31 = vadd.f32 %v1073_v12, %v868_v6  ;;  %v4736_v36 = vpop.eup %4735  ;;  %v9932_v12 = vld [vmem:[#allocation111_spill] sm:$0xff]  ;;  %v9949_v57 = vld [vmem:[#allocation128_spill] sm:$0xff]  ;;  %v9959_v6 = vld [vmem:[#allocation138_spill] sm:$0xff] }
 0x27f   :  { %v9952_v3 = vld [vmem:[#allocation131_spill] sm:$0xff] }
 0x280   :  { %4737 = vtanh.f32 %v6588_v4  ;;  %v9956_v9 = vld [vmem:[#allocation135_spill] sm:$0xff] }
 0x281   :  { %4739 = vrcp.f32 %v1086_v11  ;;  %v9958_v11 = vld [vmem:[#allocation137_spill] sm:$0xff] }
 0x282   :  { %4741 = vrcp.f32 %v1085_v13  ;;  %v9960_v13 = vld [vmem:[#allocation139_spill] sm:$0xff] }
 0x283   :  { %4743 = vtanh.f32 %v1074_v31  ;;  %v9962_v31 = vld [vmem:[#allocation141_spill] sm:$0xff] }
 0x284   :  { %4745 = vpow2.f32 %v4600_v32  ;;  %v9963_v32 = vld [vmem:[#allocation142_spill] sm:$0xff] }
 0x28d   :  { %v4738_v37 = vpop.eup %4737 }
 0x28e   :  { %v6601_v38 = vmul.f32 %v4738_v37, %v4736_v36  ;;  %v4740_v63 = vpop.eup %4739  ;;  %v9964_v36 = vld [vmem:[#allocation143_spill] sm:$0xff]  ;;  %v9965_v37 = vld [vmem:[#allocation144_spill] sm:$0xff] }
 0x290   :  { %1338 = vmatmul.mubr.f32.vlgmr.msra.gmra.mxu0 %v6601_v38  ;;  %1409 = vmatmul.mubr.f32.vlgmr.msra.gmra.mxu1 %v6601_v38 }
 0x291   :  { %1416 = vmatpush1.msra.mxu0 %v6198_v51  ;;  %1487 = vmatpush1.msra.mxu1 %v6200_v23  ;;  %v4742_v51 = vpop.eup %4741  ;;  %v9929_v23 = vld [vmem:[#allocation108_spill] sm:$0xff] }
 0x292   :  { %1417 = vmatprep.subr.mxu0 %v6202_v16  ;;  %1488 = vmatprep.subr.mxu1 %v6204_v15  ;;  %v1095_v16 = vmul.f32 0.0, %v4740_v63  ;;  %v9930_v15 = vld [vmem:[#allocation109_spill] sm:$0xff] }
 0x293   :  { %1418 = vmatpush1.msra.mxu0 %v6208_v33  ;;  %1489 = vmatpush1.msra.mxu1 %v6210_v24  ;;  %v9931_v33 = vld [vmem:[#allocation110_spill] sm:$0xff]  ;;  %v4744_v24 = vpop.eup %4743  ;;  %v9966_v63 = vld [vmem:[#allocation145_spill] sm:$0xff] }
 0x294   :  { %1419 = vmatprep.subr.mxu0 %v6214_v1  ;;  %1490 = vmatprep.subr.mxu1 %v6216_v42  ;;  %v9933_v1 = vld [vmem:[#allocation112_spill] sm:$0xff]  ;;  %v1096_v42 = vmul.f32 %v4744_v24, %v4742_v51  ;;  %v4746_v35 = vpop.eup %4745  ;;  %v9968_v51 = vld [vmem:[#allocation147_spill] sm:$0xff] }
 0x295   :  { %1420 = vmatpush1.msra.mxu0 %v6220_v22  ;;  %1491 = vmatpush1.msra.mxu1 %v9927_v2  ;;  %v9935_v22 = vld [vmem:[#allocation114_spill] sm:$0xff]  ;;  %v1087_v48 = vadd.f32 1.0, %v4746_v35  ;;  %v9972_v24 = vld [vmem:[#allocation151_spill] sm:$0xff]  ;;  %v9981_v35 = vld [vmem:[#allocation160_spill] sm:$0xff] }
 0x296   :  { %1421 = vmatprep.subr.mxu0 %v9928_v5  ;;  %1492 = vmatprep.subr.mxu1 %v9929_v23  ;;  %v6625_v43 = vadd.f32 %v1096_v42, %v1095_v16  ;;  %v9967_v2 = vld [vmem:[#allocation146_spill] sm:$0xff]  ;;  %v9969_v5 = vld [vmem:[#allocation148_spill] sm:$0xff]  ;;  %v9970_v16 = vld [vmem:[#allocation149_spill] sm:$0xff] }
 0x297   :  { %1422 = vmatpush1.msra.mxu0 %v9930_v15  ;;  %1493 = vmatpush1.msra.mxu1 %v9931_v33  ;;  %v9971_v15 = vld [vmem:[#allocation150_spill] sm:$0xff]  ;;  %v9978_v42 = vld [vmem:[#allocation157_spill] sm:$0xff] }
 0x298   :  { %1423 = vmatprep.subr.mxu0 %v9932_v12  ;;  %1494 = vmatprep.subr.mxu1 %v9933_v1  ;;  %4747 = vtanh.f32 %v6625_v43  ;;  %v9973_v12 = vld [vmem:[#allocation152_spill] sm:$0xff]  ;;  %v9975_v1 = vld [vmem:[#allocation154_spill] sm:$0xff] }
 0x299   :  { %1424 = vmatpush1.msra.mxu0 %v9934_v34  ;;  %1495 = vmatpush1.msra.mxu1 %v9935_v22  ;;  %4749 = vrcp.f32 %v1087_v48  ;;  %v9979_v34 = vld [vmem:[#allocation158_spill] sm:$0xff]  ;;  %v9980_v22 = vld [vmem:[#allocation159_spill] sm:$0xff] }
 0x29a   :  { %1425 = vmatprep.subr.mxu0 %v9936_v39  ;;  %1496 = vmatprep.subr.mxu1 %v9937_v40  ;;  %v9982_v39 = vld [vmem:[#allocation161_spill] sm:$0xff]  ;;  %v9983_v40 = vld [vmem:[#allocation162_spill] sm:$0xff]  ;;  %v9988_v48 = vld [vmem:[#allocation167_spill] sm:$0xff] }
 0x29b   :  { %1426 = vmatpush1.msra.mxu0 %v9938_v44  ;;  %1497 = vmatpush1.msra.mxu1 %v9939_v45  ;;  %v9984_v44 = vld [vmem:[#allocation163_spill] sm:$0xff]  ;;  %v9985_v45 = vld [vmem:[#allocation164_spill] sm:$0xff] }
 0x29c   :  { %1427 = vmatprep.subr.mxu0 %v9940_v46  ;;  %1498 = vmatprep.subr.mxu1 %v9941_v47  ;;  %v9986_v46 = vld [vmem:[#allocation165_spill] sm:$0xff]  ;;  %v9987_v47 = vld [vmem:[#allocation166_spill] sm:$0xff] }
 0x29d   :  { %1428 = vmatpush1.msra.mxu0 %v9942_v49  ;;  %1499 = vmatpush1.msra.mxu1 %v9943_v50  ;;  %v9989_v49 = vld [vmem:[#allocation168_spill] sm:$0xff]  ;;  %v9990_v50 = vld [vmem:[#allocation169_spill] sm:$0xff] }
 0x29e   :  { %1429 = vmatprep.subr.mxu0 %v9944_v52  ;;  %1500 = vmatprep.subr.mxu1 %v9945_v53  ;;  %v9991_v52 = vld [vmem:[#allocation170_spill] sm:$0xff]  ;;  %v6694_v53 = vld [vmem:[#allocation4 + $0x140] sm:$0xff] }
 0x29f   :  { %1430 = vmatpush1.msra.mxu0 %v9946_v54  ;;  %1501 = vmatpush1.msra.mxu1 %v9947_v55  ;;  %v6697_v54 = vld [vmem:[#allocation4 + $0x150] sm:$0xff]  ;;  %v6700_v55 = vld [vmem:[#allocation4 + $0x128] sm:$0xff] }
 0x2a0   :  { %1431 = vmatprep.subr.mxu0 %v9948_v56  ;;  %1502 = vmatprep.subr.mxu1 %v9949_v57  ;;  %v6721_v56 = vld [vmem:[#allocation4 + $0x110] sm:$0xff]  ;;  %v6724_v57 = vld [vmem:[#allocation4 + $0xe8] sm:$0xff] }
 0x2a1   :  { %1432 = vmatpush1.msra.mxu0 %v9950_v58  ;;  %1503 = vmatpush1.msra.mxu1 %v9951_v61  ;;  %v6727_v58 = vld [vmem:[#allocation4 + $0xf8] sm:$0xff]  ;;  %v6730_v61 = vld [vmem:[#allocation4 + $0xe0] sm:$0xff] }
 0x2a2   :  { %1433 = vmatprep.subr.mxu0 %v9952_v3  ;;  %1504 = vmatprep.subr.mxu1 %v9953_v59  ;;  %v6733_v3 = vld [vmem:[#allocation4 + $0xf0] sm:$0xff]  ;;  %v6736_v59 = vld [vmem:[#allocation4 + $0xc8] sm:$0xff] }
 0x2a3   :  { %1434 = vmatpush1.msra.mxu0 %v9954_v62  ;;  %1505 = vmatpush1.msra.mxu1 %v9955_v7  ;;  %v6739_v62 = vld [vmem:[#allocation4 + $0xd8] sm:$0xff]  ;;  %v6742_v7 = vld [vmem:[#allocation4 + $0xc0] sm:$0xff] }
 0x2a4   :  { %1435 = vmatprep.subr.mxu0 %v9956_v9  ;;  %1506 = vmatprep.subr.mxu1 %v9957_v10  ;;  %v6745_v9 = vld [vmem:[#allocation4 + $0xd0] sm:$0xff]  ;;  %v6748_v10 = vld [vmem:[#allocation4 + $0xa8] sm:$0xff] }
 0x2a5   :  { %1436 = vmatpush1.msra.mxu0 %v9958_v11  ;;  %1507 = vmatpush1.msra.mxu1 %v9959_v6  ;;  %v4748_v23 = vpop.eup %4747  ;;  %v6751_v11 = vld [vmem:[#allocation4 + $0xb8] sm:$0xff]  ;;  %v6754_v6 = vld [vmem:[#allocation4 + $0xa0] sm:$0xff] }
 0x2a6   :  { %1437 = vmatprep.subr.mxu0 %v9960_v13  ;;  %1508 = vmatprep.subr.mxu1 %v9961_v60  ;;  %v4750_v33 = vpop.eup %4749  ;;  %v6757_v13 = vld [vmem:[#allocation4 + $0xb0] sm:$0xff]  ;;  %v6760_v60 = vld [vmem:[#allocation4 + $0x88] sm:$0xff] }
 0x2a7   :  { %1438 = vmatpush1.msra.mxu0 %v9962_v31  ;;  %1509 = vmatpush1.msra.mxu1 %v9963_v32  ;;  %v6763_v31 = vld [vmem:[#allocation4 + $0x98] sm:$0xff]  ;;  %v6766_v32 = vld [vmem:[#allocation4 + $0x80] sm:$0xff] }
 0x2a8   :  { %1439 = vmatprep.subr.mxu0 %v9964_v36  ;;  %1510 = vmatprep.subr.mxu1 %v9965_v37  ;;  %v6769_v36 = vld [vmem:[#allocation4 + $0x90] sm:$0xff]  ;;  %v6772_v37 = vld [vmem:[#allocation4 + $0x68] sm:$0xff] }
 0x2a9   :  { %1440 = vmatpush1.msra.mxu0 %v9966_v63  ;;  %1511 = vmatpush1.msra.mxu1 %v9967_v2  ;;  %v6775_v63 = vld [vmem:[#allocation4 + $0x78] sm:$0xff]  ;;  %v6778_v2 = vld [vmem:[#allocation4 + $0x60] sm:$0xff] }
 0x2aa   :  { %1441 = vmatprep.subr.mxu0 %v6346_v18  ;;  %1512 = vmatprep.subr.mxu1 %v9968_v51  ;;  %v9974_v18 = vld [vmem:[#allocation153_spill] sm:$0xff] }
 0x2ab   :  { %1442 = vmatpush1.msra.mxu0 %v6352_v21  ;;  %1513 = vmatpush1.msra.mxu1 %v9969_v5  ;;  %v1099_v21 = vmul.f32 %v4750_v33, %v4748_v23  ;;  %v6781_v51 = vld [vmem:[#allocation4 + $0x70] sm:$0xff]  ;;  %v6784_v5 = vld [vmem:[#allocation4 + $0x48] sm:$0xff]  ;;  %v6787_v23 = vld [vmem:[#allocation4 + $0x58] sm:$0xff] }
 0x2ac   :  { %1443 = vmatprep.subr.mxu0 %v6358_v14  ;;  %1514 = vmatprep.subr.mxu1 %v6360_v17  ;;  %v9976_v14 = vld [vmem:[#allocation155_spill] sm:$0xff]  ;;  %v9977_v17 = vld [vmem:[#allocation156_spill] sm:$0xff] }
 0x2ad   :  { %1444 = vmatpush1.msra.mxu0 %v9970_v16  ;;  %1515 = vmatpush1.msra.mxu1 %v9971_v15  ;;  %v6790_v16 = vld [vmem:[#allocation4 + $0x40] sm:$0xff]  ;;  %v6793_v15 = vld [vmem:[#allocation4 + $0x50] sm:$0xff]  ;;  %v6796_v33 = vld [vmem:[#allocation4 + $0x28] sm:$0xff] }
 0x2ae   :  { %1445 = vmatprep.subr.mxu0 %v9972_v24  ;;  %1516 = vmatprep.subr.mxu1 %v9973_v12  ;;  %9992 = vst [vmem:[#allocation11_spill] sm:$0xff] %v6790_v16  ;;  %9993 = vst [vmem:[#allocation12_spill] sm:$0xff] %v6793_v15  ;;  %v6799_v24 = vld [vmem:[#allocation4 + $0x38] sm:$0xff]  ;;  %v6802_v12 = vld [vmem:[#allocation4 + $0x20] sm:$0xff] }
 0x2af   :  { %1446 = vmatpush1.msra.mxu0 %v9974_v18  ;;  %1479 = vmatprep.mubr.f32.mxu0 %v9835_v27  ;;  %9994 = vst [vmem:[#allocation13_spill] sm:$0xff] %v6796_v33  ;;  %9995 = vst [vmem:[#allocation14_spill] sm:$0xff] %v6799_v24  ;;  %v6805_v18 = vld [vmem:[#allocation4 + $0x30] sm:$0xff] }
 0x2b0   :  { %1517 = vmatpush1.msra.mxu1 %v9975_v1  ;;  %1550 = vmatprep.mubr.f32.mxu1 %v9835_v27  ;;  %9996 = vst [vmem:[#allocation15_spill] sm:$0xff] %v6802_v12  ;;  %9997 = vst [vmem:[#allocation16_spill] sm:$0xff] %v6805_v18  ;;  %v6811_v1 = vld [vmem:[#allocation4 + $0x18] sm:$0xff] }
 0x2b1   :  { %1480 = vmatmul.mubr.f32.vlgmr.msra.gmra.mxu0 %v1099_v21  ;;  %1551 = vmatmul.mubr.f32.vlgmr.msra.gmra.mxu1 %v1099_v21  ;;  %v6808_v21 = vld [vmem:[#allocation4 + $0x8] sm:$0xff]  ;;  %9999 = vst [vmem:[#allocation18_spill] sm:$0xff] %v6811_v1 }
 0x2b2   :  { %1588 = vmatprep.subr.mxu0 %v9976_v14  ;;  %1659 = vmatprep.subr.mxu1 %v9977_v17  ;;  %9998 = vst [vmem:[#allocation17_spill] sm:$0xff] %v6808_v21  ;;  %v6814_v14 = vld [vmem:[#allocation4] sm:$0xff]  ;;  %v6818_v17 = vld [vmem:[#allocation4 + $0x10] sm:$0xff] }
 0x2b3   :  { %1589 = vmatpush1.msra.mxu0 %v9978_v42  ;;  %1660 = vmatpush1.msra.mxu1 %v9979_v34  ;;  %10000 = vst [vmem:[#allocation19_spill] sm:$0xff] %v6814_v14  ;;  %10001 = vst [vmem:[#allocation20_spill] sm:$0xff] %v6818_v17  ;;  %v6824_v42 = vld [vmem:[#allocation6 + $0x1e8] sm:$0xff]  ;;  %v6827_v34 = vld [vmem:[#allocation6 + $0x1f8] sm:$0xff] }
 0x2b4   :  { %1590 = vmatprep.subr.mxu0 %v9980_v22  ;;  %1661 = vmatprep.subr.mxu1 %v9981_v35  ;;  %10002 = vst [vmem:[#allocation21_spill] sm:$0xff] %v6824_v42  ;;  %10003 = vst [vmem:[#allocation22_spill] sm:$0xff] %v6827_v34  ;;  %v6830_v22 = vld [vmem:[#allocation6 + $0x1e0] sm:$0xff]  ;;  %v6833_v35 = vld [vmem:[#allocation6 + $0x1f0] sm:$0xff] }
 0x2b5   :  { %1591 = vmatpush1.msra.mxu0 %v9982_v39  ;;  %1662 = vmatpush1.msra.mxu1 %v9983_v40  ;;  %10004 = vst [vmem:[#allocation23_spill] sm:$0xff] %v6830_v22  ;;  %10005 = vst [vmem:[#allocation24_spill] sm:$0xff] %v6833_v35  ;;  %v6836_v39 = vld [vmem:[#allocation6 + $0x1c8] sm:$0xff]  ;;  %v6842_v40 = vld [vmem:[#allocation6 + $0x1c0] sm:$0xff] }
 0x2b6   :  { %1592 = vmatprep.subr.mxu0 %v9984_v44  ;;  %1663 = vmatprep.subr.mxu1 %v9985_v45  ;;  %10006 = vst [vmem:[#allocation25_spill] sm:$0xff] %v6836_v39  ;;  %10008 = vst [vmem:[#allocation27_spill] sm:$0xff] %v6842_v40  ;;  %v6845_v44 = vld [vmem:[#allocation6 + $0x1d0] sm:$0xff]  ;;  %v6848_v45 = vld [vmem:[#allocation6 + $0x1a8] sm:$0xff] }
 0x2b7   :  { %1593 = vmatpush1.msra.mxu0 %v9986_v46  ;;  %1664 = vmatpush1.msra.mxu1 %v9987_v47  ;;  %10009 = vst [vmem:[#allocation28_spill] sm:$0xff] %v6845_v44  ;;  %10010 = vst [vmem:[#allocation29_spill] sm:$0xff] %v6848_v45  ;;  %v6851_v46 = vld [vmem:[#allocation6 + $0x1b8] sm:$0xff]  ;;  %v6854_v47 = vld [vmem:[#allocation6 + $0x1a0] sm:$0xff] }
 0x2b8   :  { %1594 = vmatprep.subr.mxu0 %v9988_v48  ;;  %1665 = vmatprep.subr.mxu1 %v9989_v49  ;;  %10011 = vst [vmem:[#allocation30_spill] sm:$0xff] %v6851_v46  ;;  %10012 = vst [vmem:[#allocation31_spill] sm:$0xff] %v6854_v47  ;;  %v6857_v48 = vld [vmem:[#allocation6 + $0x1b0] sm:$0xff]  ;;  %v6860_v49 = vld [vmem:[#allocation6 + $0x188] sm:$0xff] }
 0x2b9   :  { %1595 = vmatpush1.msra.mxu0 %v9990_v50  ;;  %1666 = vmatpush1.msra.mxu1 %v9991_v52  ;;  %10013 = vst [vmem:[#allocation32_spill] sm:$0xff] %v6857_v48  ;;  %10014 = vst [vmem:[#allocation33_spill] sm:$0xff] %v6860_v49  ;;  %v6863_v50 = vld [vmem:[#allocation6 + $0x198] sm:$0xff]  ;;  %v6866_v52 = vld [vmem:[#allocation6 + $0x180] sm:$0xff] }
 0x2ba   :  { %1596 = vmatprep.subr.mxu0 %v6438_v19  ;;  %1667 = vmatprep.subr.mxu1 %v6441_v28  ;;  %v6703_v28 = vld [vmem:[#allocation4 + $0x138] sm:$0xff]  ;;  %v6718_v19 = vld [vmem:[#allocation4 + $0x100] sm:$0xff]  ;;  %10015 = vst [vmem:[#allocation34_spill] sm:$0xff] %v6863_v50  ;;  %10016 = vst [vmem:[#allocation35_spill] sm:$0xff] %v6866_v52 }
 0x2bb   :  { %1597 = vmatpush1.msra.mxu0 %v6444_v26  ;;  %1668 = vmatpush1.msra.mxu1 %v6447_v30  ;;  %v6706_v26 = vld [vmem:[#allocation4 + $0x120] sm:$0xff]  ;;  %v6709_v30 = vld [vmem:[#allocation4 + $0x130] sm:$0xff] }
 0x2bc   :  { %1598 = vmatprep.subr.mxu0 %v6450_v25  ;;  %1669 = vmatprep.subr.mxu1 %v6453_v29  ;;  %v6712_v25 = vld [vmem:[#allocation4 + $0x108] sm:$0xff]  ;;  %v6715_v29 = vld [vmem:[#allocation4 + $0x118] sm:$0xff] }
 0x2bd   :  { %1599 = vmatpush1.msra.mxu0 %v6694_v53  ;;  %1670 = vmatpush1.msra.mxu1 %v6697_v54 }
 0x2be   :  { %1600 = vmatprep.subr.mxu0 %v6700_v55  ;;  %1671 = vmatprep.subr.mxu1 %v6703_v28 }
 0x2bf   :  { %1601 = vmatpush1.msra.mxu0 %v6706_v26  ;;  %1672 = vmatpush1.msra.mxu1 %v6709_v30 }
 0x2c0   :  { %1602 = vmatprep.subr.mxu0 %v6712_v25  ;;  %1673 = vmatprep.subr.mxu1 %v6715_v29 }
 0x2c1   :  { %1603 = vmatpush1.msra.mxu0 %v6718_v19  ;;  %1674 = vmatpush1.msra.mxu1 %v6721_v56 }
 0x2c2   :  { %1604 = vmatprep.subr.mxu0 %v6724_v57  ;;  %1675 = vmatprep.subr.mxu1 %v6727_v58 }
 0x2c3   :  { %1605 = vmatpush1.msra.mxu0 %v6730_v61  ;;  %1676 = vmatpush1.msra.mxu1 %v6733_v3 }
 0x2c4   :  { %1606 = vmatprep.subr.mxu0 %v6736_v59  ;;  %1677 = vmatprep.subr.mxu1 %v6739_v62 }
 0x2c5   :  { %1607 = vmatpush1.msra.mxu0 %v6742_v7  ;;  %1678 = vmatpush1.msra.mxu1 %v6745_v9 }
 0x2c6   :  { %1608 = vmatprep.subr.mxu0 %v6748_v10  ;;  %1679 = vmatprep.subr.mxu1 %v6751_v11 }
 0x2c7   :  { %1609 = vmatpush1.msra.mxu0 %v6754_v6  ;;  %1680 = vmatpush1.msra.mxu1 %v6757_v13 }
 0x2c8   :  { %1610 = vmatprep.subr.mxu0 %v6760_v60  ;;  %1681 = vmatprep.subr.mxu1 %v6763_v31 }
 0x2c9   :  { %1611 = vmatpush1.msra.mxu0 %v6766_v32  ;;  %1682 = vmatpush1.msra.mxu1 %v6769_v36 }
 0x2ca   :  { %1612 = vmatprep.subr.mxu0 %v6772_v37  ;;  %1683 = vmatprep.subr.mxu1 %v6775_v63 }
 0x2cb   :  { %1613 = vmatpush1.msra.mxu0 %v6778_v2  ;;  %1684 = vmatpush1.msra.mxu1 %v6781_v51 }
 0x2cc   :  { %1614 = vmatprep.subr.mxu0 %v6784_v5  ;;  %1685 = vmatprep.subr.mxu1 %v6787_v23 }
 0x2cd   :  { %1615 = vmatpush1.msra.mxu0 %v6790_v16  ;;  %1686 = vmatpush1.msra.mxu1 %v6793_v15 }
 0x2ce   :  { %1616 = vmatprep.subr.mxu0 %v6796_v33  ;;  %1687 = vmatprep.subr.mxu1 %v6799_v24  ;;  %v10071_v24 = vld [vmem:[#allocation85_spill] sm:$0xff] }
 0x2cf   :  { %1617 = vmatpush1.msra.mxu0 %v6802_v12  ;;  %1688 = vmatpush1.msra.mxu1 %v6805_v18 }
 0x2d0   :  { %1618 = vmatprep.subr.mxu0 %v6808_v21  ;;  %1689 = vmatprep.subr.mxu1 %v6811_v1 }
 0x2d1   :  { %1619 = vmatpush1.msra.mxu0 %v6814_v14  ;;  %1652 = vmatprep.mubr.f32.mxu0 %v9835_v27 }
 0x2d2   :  { %1690 = vmatpush1.msra.mxu1 %v6818_v17  ;;  %1723 = vmatprep.mubr.f32.mxu1 %v9835_v27 }
 0x2d3   :  { %1653 = vmatmul.mubr.f32.vlgmr.msra.gmra.mxu0 %v6601_v38  ;;  %1724 = vmatmul.mubr.f32.vlgmr.msra.gmra.mxu1 %v6601_v38  ;;  %v6839_v38 = vld [vmem:[#allocation6 + $0x1d8] sm:$0xff] }
 0x2d4   :  { %1754 = vmatprep.subr.mxu0 %v6824_v42  ;;  %1825 = vmatprep.subr.mxu1 %v6827_v34  ;;  %10007 = vst [vmem:[#allocation26_spill] sm:$0xff] %v6839_v38  ;;  %v10069_v42 = vld [vmem:[#allocation84_spill] sm:$0xff] }
 0x2d5   :  { %1755 = vmatpush1.msra.mxu0 %v6830_v22  ;;  %1826 = vmatpush1.msra.mxu1 %v6833_v35 }
 0x2d6   :  { %1756 = vmatprep.subr.mxu0 %v6836_v39  ;;  %1827 = vmatprep.subr.mxu1 %v6839_v38 }
 0x2d7   :  { %1757 = vmatpush1.msra.mxu0 %v6842_v40  ;;  %1828 = vmatpush1.msra.mxu1 %v6845_v44 }
 0x2d8   :  { %1758 = vmatprep.subr.mxu0 %v6848_v45  ;;  %1829 = vmatprep.subr.mxu1 %v6851_v46  ;;  %v6869_v46 = vld [vmem:[#allocation6 + $0x190] sm:$0xff] }
 0x2d9   :  { %1759 = vmatpush1.msra.mxu0 %v6854_v47  ;;  %1830 = vmatpush1.msra.mxu1 %v6857_v48  ;;  %10017 = vst [vmem:[#allocation36_spill] sm:$0xff] %v6869_v46  ;;  %v6872_v47 = vld [vmem:[#allocation6 + $0x168] sm:$0xff]  ;;  %v6875_v48 = vld [vmem:[#allocation6 + $0x178] sm:$0xff] }
 0x2da   :  { %1760 = vmatprep.subr.mxu0 %v6860_v49  ;;  %1831 = vmatprep.subr.mxu1 %v6863_v50  ;;  %10018 = vst [vmem:[#allocation37_spill] sm:$0xff] %v6872_v47  ;;  %10019 = vst [vmem:[#allocation38_spill] sm:$0xff] %v6875_v48  ;;  %v6878_v49 = vld [vmem:[#allocation6 + $0x160] sm:$0xff]  ;;  %v6881_v50 = vld [vmem:[#allocation6 + $0x170] sm:$0xff] }
 0x2db   :  { %1761 = vmatpush1.msra.mxu0 %v6866_v52  ;;  %1832 = vmatpush1.msra.mxu1 %v6869_v46  ;;  %10020 = vst [vmem:[#allocation39_spill] sm:$0xff] %v6878_v49  ;;  %10021 = vst [vmem:[#allocation40_spill] sm:$0xff] %v6881_v50  ;;  %v6884_v52 = vld [vmem:[#allocation6 + $0x148] sm:$0xff]  ;;  %v6887_v46 = vld [vmem:[#allocation6 + $0x158] sm:$0xff] }
 0x2dc   :  { %1762 = vmatprep.subr.mxu0 %v6872_v47  ;;  %1833 = vmatprep.subr.mxu1 %v6875_v48  ;;  %10022 = vst [vmem:[#allocation41_spill] sm:$0xff] %v6884_v52  ;;  %10023 = vst [vmem:[#allocation42_spill] sm:$0xff] %v6887_v46  ;;  %v6890_v47 = vld [vmem:[#allocation6 + $0x140] sm:$0xff]  ;;  %v6893_v48 = vld [vmem:[#allocation6 + $0x150] sm:$0xff] }
 0x2dd   :  { %1763 = vmatpush1.msra.mxu0 %v6878_v49  ;;  %1834 = vmatpush1.msra.mxu1 %v6881_v50  ;;  %10024 = vst [vmem:[#allocation43_spill] sm:$0xff] %v6890_v47  ;;  %10025 = vst [vmem:[#allocation44_spill] sm:$0xff] %v6893_v48  ;;  %v6896_v49 = vld [vmem:[#allocation6 + $0x128] sm:$0xff]  ;;  %v6899_v50 = vld [vmem:[#allocation6 + $0x138] sm:$0xff] }
 0x2de   :  { %1764 = vmatprep.subr.mxu0 %v6884_v52  ;;  %1835 = vmatprep.subr.mxu1 %v6887_v46  ;;  %10026 = vst [vmem:[#allocation45_spill] sm:$0xff] %v6896_v49  ;;  %10027 = vst [vmem:[#allocation46_spill] sm:$0xff] %v6899_v50  ;;  %v6902_v52 = vld [vmem:[#allocation6 + $0x120] sm:$0xff]  ;;  %v6905_v46 = vld [vmem:[#allocation6 + $0x130] sm:$0xff] }
 0x2df   :  { %1765 = vmatpush1.msra.mxu0 %v6890_v47  ;;  %1836 = vmatpush1.msra.mxu1 %v6893_v48  ;;  %10028 = vst [vmem:[#allocation47_spill] sm:$0xff] %v6902_v52  ;;  %10029 = vst [vmem:[#allocation48_spill] sm:$0xff] %v6905_v46  ;;  %v6908_v47 = vld [vmem:[#allocation6 + $0x108] sm:$0xff]  ;;  %v6911_v48 = vld [vmem:[#allocation6 + $0x118] sm:$0xff] }
 0x2e0   :  { %1766 = vmatprep.subr.mxu0 %v6896_v49  ;;  %1837 = vmatprep.subr.mxu1 %v6899_v50  ;;  %10030 = vst [vmem:[#allocation49_spill] sm:$0xff] %v6908_v47  ;;  %10031 = vst [vmem:[#allocation50_spill] sm:$0xff] %v6911_v48  ;;  %v6914_v49 = vld [vmem:[#allocation6 + $0x100] sm:$0xff]  ;;  %v6917_v50 = vld [vmem:[#allocation6 + $0x110] sm:$0xff] }
 0x2e1   :  { %1767 = vmatpush1.msra.mxu0 %v6902_v52  ;;  %1838 = vmatpush1.msra.mxu1 %v6905_v46  ;;  %10032 = vst [vmem:[#allocation51_spill] sm:$0xff] %v6914_v49  ;;  %10033 = vst [vmem:[#allocation52_spill] sm:$0xff] %v6917_v50  ;;  %v6920_v52 = vld [vmem:[#allocation6 + $0xe8] sm:$0xff]  ;;  %v6923_v46 = vld [vmem:[#allocation6 + $0xf8] sm:$0xff] }
 0x2e2   :  { %1768 = vmatprep.subr.mxu0 %v6908_v47  ;;  %1839 = vmatprep.subr.mxu1 %v6911_v48  ;;  %10034 = vst [vmem:[#allocation53_spill] sm:$0xff] %v6920_v52  ;;  %10035 = vst [vmem:[#allocation54_spill] sm:$0xff] %v6923_v46  ;;  %v6926_v47 = vld [vmem:[#allocation6 + $0xe0] sm:$0xff]  ;;  %v6929_v48 = vld [vmem:[#allocation6 + $0xf0] sm:$0xff] }
 0x2e3   :  { %1769 = vmatpush1.msra.mxu0 %v6914_v49  ;;  %1840 = vmatpush1.msra.mxu1 %v6917_v50  ;;  %10036 = vst [vmem:[#allocation55_spill] sm:$0xff] %v6926_v47  ;;  %10037 = vst [vmem:[#allocation56_spill] sm:$0xff] %v6929_v48  ;;  %v6932_v49 = vld [vmem:[#allocation6 + $0xc8] sm:$0xff]  ;;  %v6935_v50 = vld [vmem:[#allocation6 + $0xd8] sm:$0xff] }
 0x2e4   :  { %1770 = vmatprep.subr.mxu0 %v6920_v52  ;;  %1841 = vmatprep.subr.mxu1 %v6923_v46  ;;  %10038 = vst [vmem:[#allocation57_spill] sm:$0xff] %v6932_v49  ;;  %10039 = vst [vmem:[#allocation58_spill] sm:$0xff] %v6935_v50  ;;  %v6938_v52 = vld [vmem:[#allocation6 + $0xc0] sm:$0xff]  ;;  %v6941_v46 = vld [vmem:[#allocation6 + $0xd0] sm:$0xff] }
 0x2e5   :  { %1771 = vmatpush1.msra.mxu0 %v6926_v47  ;;  %1842 = vmatpush1.msra.mxu1 %v6929_v48  ;;  %10040 = vst [vmem:[#allocation59_spill] sm:$0xff] %v6938_v52  ;;  %10041 = vst [vmem:[#allocation60_spill] sm:$0xff] %v6941_v46  ;;  %v6944_v47 = vld [vmem:[#allocation6 + $0xa8] sm:$0xff]  ;;  %v6947_v48 = vld [vmem:[#allocation6 + $0xb8] sm:$0xff] }
 0x2e6   :  { %1772 = vmatprep.subr.mxu0 %v6932_v49  ;;  %1843 = vmatprep.subr.mxu1 %v6935_v50  ;;  %10042 = vst [vmem:[#allocation61_spill] sm:$0xff] %v6944_v47  ;;  %10043 = vst [vmem:[#allocation62_spill] sm:$0xff] %v6947_v48  ;;  %v6950_v49 = vld [vmem:[#allocation6 + $0xa0] sm:$0xff]  ;;  %v6953_v50 = vld [vmem:[#allocation6 + $0xb0] sm:$0xff] }
 0x2e7   :  { %1773 = vmatpush1.msra.mxu0 %v6938_v52  ;;  %1844 = vmatpush1.msra.mxu1 %v6941_v46  ;;  %10044 = vst [vmem:[#allocation63_spill] sm:$0xff] %v6950_v49  ;;  %10045 = vst [vmem:[#allocation64_spill] sm:$0xff] %v6953_v50  ;;  %v6956_v52 = vld [vmem:[#allocation6 + $0x88] sm:$0xff]  ;;  %v6959_v46 = vld [vmem:[#allocation6 + $0x98] sm:$0xff] }
 0x2e8   :  { %1774 = vmatprep.subr.mxu0 %v6944_v47  ;;  %1845 = vmatprep.subr.mxu1 %v6947_v48  ;;  %10046 = vst [vmem:[#allocation65_spill] sm:$0xff] %v6956_v52  ;;  %10047 = vst [vmem:[#allocation66_spill] sm:$0xff] %v6959_v46  ;;  %v6962_v47 = vld [vmem:[#allocation6 + $0x80] sm:$0xff]  ;;  %v6965_v48 = vld [vmem:[#allocation6 + $0x90] sm:$0xff] }
 0x2e9   :  { %1775 = vmatpush1.msra.mxu0 %v6950_v49  ;;  %1846 = vmatpush1.msra.mxu1 %v6953_v50  ;;  %10048 = vst [vmem:[#allocation67_spill] sm:$0xff] %v6962_v47  ;;  %10049 = vst [vmem:[#allocation68_spill] sm:$0xff] %v6965_v48  ;;  %v6968_v49 = vld [vmem:[#allocation6 + $0x68] sm:$0xff]  ;;  %v6971_v50 = vld [vmem:[#allocation6 + $0x78] sm:$0xff] }
 0x2ea   :  { %1776 = vmatprep.subr.mxu0 %v6956_v52  ;;  %1847 = vmatprep.subr.mxu1 %v6959_v46  ;;  %10050 = vst [vmem:[#allocation69_spill] sm:$0xff] %v6968_v49  ;;  %10051 = vst [vmem:[#allocation70_spill] sm:$0xff] %v6971_v50  ;;  %v6974_v52 = vld [vmem:[#allocation6 + $0x60] sm:$0xff]  ;;  %v6977_v46 = vld [vmem:[#allocation6 + $0x70] sm:$0xff] }
 0x2eb   :  { %1777 = vmatpush1.msra.mxu0 %v6962_v47  ;;  %1848 = vmatpush1.msra.mxu1 %v6965_v48  ;;  %10052 = vst [vmem:[#allocation71_spill] sm:$0xff] %v6974_v52  ;;  %10053 = vst [vmem:[#allocation72_spill] sm:$0xff] %v6977_v46  ;;  %v6980_v47 = vld [vmem:[#allocation6 + $0x48] sm:$0xff]  ;;  %v6983_v48 = vld [vmem:[#allocation6 + $0x58] sm:$0xff] }
 0x2ec   :  { %1778 = vmatprep.subr.mxu0 %v6968_v49  ;;  %1849 = vmatprep.subr.mxu1 %v6971_v50  ;;  %10054 = vst [vmem:[#allocation73_spill] sm:$0xff] %v6980_v47  ;;  %10055 = vst [vmem:[#allocation74_spill] sm:$0xff] %v6983_v48  ;;  %v6986_v49 = vld [vmem:[#allocation6 + $0x40] sm:$0xff]  ;;  %v6989_v50 = vld [vmem:[#allocation6 + $0x50] sm:$0xff] }
 0x2ed   :  { %1779 = vmatpush1.msra.mxu0 %v6974_v52  ;;  %1850 = vmatpush1.msra.mxu1 %v6977_v46  ;;  %10056 = vst [vmem:[#allocation75_spill] sm:$0xff] %v6986_v49  ;;  %10057 = vst [vmem:[#allocation76_spill] sm:$0xff] %v6989_v50  ;;  %v6992_v52 = vld [vmem:[#allocation6 + $0x28] sm:$0xff]  ;;  %v6995_v46 = vld [vmem:[#allocation6 + $0x38] sm:$0xff] }
 0x2ee   :  { %1780 = vmatprep.subr.mxu0 %v6980_v47  ;;  %1851 = vmatprep.subr.mxu1 %v6983_v48  ;;  %10058 = vst [vmem:[#allocation77_spill] sm:$0xff] %v6992_v52  ;;  %10059 = vst [vmem:[#allocation80_spill] sm:$0xff] %v6995_v46  ;;  %v6998_v47 = vld [vmem:[#allocation6 + $0x20] sm:$0xff]  ;;  %v7001_v48 = vld [vmem:[#allocation6 + $0x30] sm:$0xff] }
 0x2ef   :  { %1781 = vmatpush1.msra.mxu0 %v6986_v49  ;;  %1852 = vmatpush1.msra.mxu1 %v6989_v50  ;;  %10060 = vst [vmem:[#allocation79_spill] sm:$0xff] %v6998_v47  ;;  %10061 = vst [vmem:[#allocation78_spill] sm:$0xff] %v7001_v48  ;;  %v7004_v49 = vld [vmem:[#allocation6 + $0x8] sm:$0xff]  ;;  %v7007_v50 = vld [vmem:[#allocation6 + $0x18] sm:$0xff] }
 0x2f0   :  { %1782 = vmatprep.subr.mxu0 %v6992_v52  ;;  %1853 = vmatprep.subr.mxu1 %v6995_v46  ;;  %10062 = vst [vmem:[#allocation81_spill] sm:$0xff] %v7004_v49  ;;  %10063 = vst [vmem:[#allocation106_spill] sm:$0xff] %v7007_v50  ;;  %v7010_v52 = vld [vmem:[#allocation6] sm:$0xff]  ;;  %v7013_v46 = vld [vmem:[#allocation6 + $0x10] sm:$0xff] }
 0x2f1   :  { %1783 = vmatpush1.msra.mxu0 %v6998_v47  ;;  %1854 = vmatpush1.msra.mxu1 %v7001_v48  ;;  %10064 = vst [vmem:[#allocation107_spill] sm:$0xff] %v7010_v52  ;;  %10065 = vst [vmem:[#allocation108_spill] sm:$0xff] %v7013_v46  ;;  %v7018_v48 = vld [vmem:[#allocation8 + $0x1e8] sm:$0xff] }
 0x2f2   :  { %1784 = vmatprep.subr.mxu0 %v7004_v49  ;;  %1855 = vmatprep.subr.mxu1 %v7007_v50  ;;  %10066 = vst [vmem:[#allocation109_spill] sm:$0xff] %v7018_v48  ;;  %v7021_v49 = vld [vmem:[#allocation8 + $0x1f8] sm:$0xff] }
 0x2f3   :  { %1785 = vmatpush1.msra.mxu0 %v7010_v52  ;;  %1856 = vmatpush1.msra.mxu1 %v7013_v46  ;;  %10067 = vst [vmem:[#allocation110_spill] sm:$0xff] %v7021_v49  ;;  %v10068_v46 = vld [vmem:[#allocation82_spill] sm:$0xff] }
 0x2f4   :  { %1818 = vmatprep.mubr.f32.mxu0 %v9835_v27  ;;  %1889 = vmatprep.mubr.f32.mxu1 %v9835_v27 }
 0x2f5   :  { %1896 = vmatprep.subr.mxu0 %v7018_v48  ;;  %1967 = vmatprep.subr.mxu1 %v7021_v49  ;;  %v10070_v49 = vld [vmem:[#allocation83_spill] sm:$0xff] }
 0x350   :  { %v1339_v50 = vpop.f32.mrf.mxu0  ;;  %v1410_v52 = vpop.f32.mrf.mxu1 }
 0x352   :  { %v1341_v47 = vpop.f32.mrf.mxu0  ;;  %v1412_v40 = vpop.f32.mrf.mxu1 }
 0x353   :  { %v1342_v16 = vadd.f32 %v1341_v47, %v6578_v20 }
 0x371   :  { %v1481_v45 = vpop.f32.mrf.mxu0  ;;  %v1552_v35 = vpop.f32.mrf.mxu1 }
 0x373   :  { %v1483_v44 = vpop.f32.mrf.mxu0  ;;  %v1554_v14 = vpop.f32.mrf.mxu1 }
 0x393   :  { %v1654_v38 = vpop.f32.mrf.mxu0  ;;  %v1725_v1 = vpop.f32.mrf.mxu1 }
 0x394   :  { %v1655_v39 = vadd.f32 %v1654_v38, %v10068_v46  ;;  %v1726_v21 = vadd.f32 %v1725_v1, %v10070_v49 }
 0x395   :  { %v1656_v22 = vpop.f32.mrf.mxu0  ;;  %v1727_v18 = vpop.f32.mrf.mxu1 }
 0x396   :  { %v4607_v34 = vmul.f32 -1.442695, %v1655_v39  ;;  %v1657_v17 = vadd.f32 %v1656_v22, %v10069_v42  ;;  %v4609_v12 = vmul.f32 -1.442695, %v1726_v21  ;;  %v1728_v33 = vadd.f32 %v1727_v18, %v10071_v24 }
 0x397   :  { %v1340_v42 = vadd.f32 %v1339_v50, %v6583_v41  ;;  %v1413_v50 = vadd.f32 %v1412_v40, %v6597_v8  ;;  %v7043_v40 = vld [vmem:[#allocation8 + $0x1f0] sm:$0xff] }
 0x398   :  { %4751 = vpow2.f32 %v4607_v34  ;;  %v4608_v48 = vmul.f32 -1.442695, %v1657_v17  ;;  %v1484_v34 = vadd.f32 %v1483_v44, %v1342_v16 }
 0x399   :  { %v1482_v22 = vadd.f32 %v1481_v45, %v1340_v42  ;;  %v1411_v45 = vadd.f32 %v1410_v52, %v6592_v0  ;;  %v1555_v42 = vadd.f32 %v1554_v14, %v1413_v50  ;;  %v7040_v52 = vld [vmem:[#allocation8 + $0x1e0] sm:$0xff]  ;;  %v7046_v14 = vld [vmem:[#allocation8 + $0x1c8] sm:$0xff] }
 0x39a   :  { %4753 = vpow2.f32 %v4608_v48  ;;  %v4605_v46 = vmul.f32 -1.442695, %v1484_v34 }
 0x39b   :  { %4755 = vpow2.f32 %v4609_v12  ;;  %v4604_v1 = vmul.f32 -1.442695, %v1482_v22 }
 0x39c   :  { %4757 = vtanh.f32 %v1728_v33 }
 0x3a5   :  { %v4752_v15 = vpop.eup %4751 }
 0x3a6   :  { %v1739_v38 = vadd.f32 1.0, %v4752_v15 }
 0x3a7   :  { %v4754_v39 = vpop.eup %4753 }
 0x3a8   :  { %4759 = vrcp.f32 %v1739_v38  ;;  %v1740_v17 = vadd.f32 1.0, %v4754_v39  ;;  %v4756_v21 = vpop.eup %4755  ;;  %v1553_v39 = vadd.f32 %v1552_v35, %v1411_v45  ;;  %v7049_v35 = vld [vmem:[#allocation8 + $0x1d8] sm:$0xff]  ;;  %v7077_v45 = vld [vmem:[#allocation8 + $0x180] sm:$0xff] }
 0x3a9   :  { %v4758_v24 = vpop.eup %4757  ;;  %v1741_v15 = vadd.f32 1.0, %v4756_v21 }
 0x3aa   :  { %4761 = vrcp.f32 %v1740_v17  ;;  %v4606_v34 = vmul.f32 -1.442695, %v1553_v39  ;;  %v7086_v39 = vld [vmem:[#allocation8 + $0x178] sm:$0xff] }
 0x3ab   :  { %4763 = vpow2.f32 %v4605_v46  ;;  %v7052_v46 = vld [vmem:[#allocation8 + $0x1c0] sm:$0xff] }
 0x3ac   :  { %4765 = vpow2.f32 %v4604_v1  ;;  %v7055_v1 = vld [vmem:[#allocation8 + $0x1d0] sm:$0xff] }
 0x3ad   :  { %4767 = vrcp.f32 %v1741_v15 }
 0x3b5   :  { %v4760_v18 = vpop.eup %4759 }
 0x3b6   :  { %v1750_v48 = vmul.f32 %v4760_v18, %v4758_v24  ;;  %v7058_v24 = vld [vmem:[#allocation8 + $0x1a8] sm:$0xff]  ;;  %v7061_v18 = vld [vmem:[#allocation8 + $0x1b8] sm:$0xff] }
 0x3b7   :  { %v4762_v47 = vpop.eup %4761 }
 0x3b8   :  { %v1749_v33 = vmul.f32 %v4762_v47, %v6588_v4  ;;  %v4764_v16 = vpop.eup %4763  ;;  %v7067_v47 = vld [vmem:[#allocation8 + $0x1b0] sm:$0xff] }
 0x3b9   :  { %v4766_v44 = vpop.eup %4765  ;;  %v1567_v49 = vadd.f32 1.0, %v4764_v16  ;;  %v7073_v16 = vld [vmem:[#allocation8 + $0x198] sm:$0xff] }
 0x3ba   :  { %v7031_v12 = vadd.f32 %v1750_v48, %v1749_v33  ;;  %v1566_v38 = vadd.f32 1.0, %v4766_v44  ;;  %v4768_v4 = vpop.eup %4767  ;;  %v7064_v48 = vld [vmem:[#allocation8 + $0x1a0] sm:$0xff]  ;;  %v7070_v33 = vld [vmem:[#allocation8 + $0x188] sm:$0xff] }
 0x3bc   :  { %4769 = vtanh.f32 %v7031_v12 }
 0x3bd   :  { %4771 = vrcp.f32 %v1567_v49  ;;  %v7080_v49 = vld [vmem:[#allocation8 + $0x190] sm:$0xff] }
 0x3be   :  { %4773 = vrcp.f32 %v1566_v38  ;;  %v7083_v38 = vld [vmem:[#allocation8 + $0x168] sm:$0xff] }
 0x3bf   :  { %4775 = vtanh.f32 %v1555_v42  ;;  %10072 = vst [vmem:[#allocation111_spill] sm:$0xff] %v7083_v38 }
 0x3c0   :  { %4777 = vpow2.f32 %v4606_v34  ;;  %v7089_v34 = vld [vmem:[#allocation8 + $0x160] sm:$0xff] }
 0x3c1   :  { %10073 = vst [vmem:[#allocation112_spill] sm:$0xff] %v7089_v34 }
 0x3c9   :  { %v4770_v17 = vpop.eup %4769 }
 0x3ca   :  { %v7036_v22 = vmul.f32 %v4770_v17, %v4768_v4  ;;  %v4772_v21 = vpop.eup %4771  ;;  %v7095_v17 = vld [vmem:[#allocation8 + $0x148] sm:$0xff] }
 0x3cb   :  { %v4774_v15 = vpop.eup %4773  ;;  %v1576_v44 = vmul.f32 %v4772_v21, %v6625_v43  ;;  %v7092_v43 = vld [vmem:[#allocation8 + $0x170] sm:$0xff]  ;;  %10075 = vst [vmem:[#allocation114_spill] sm:$0xff] %v7095_v17  ;;  %v7098_v21 = vld [vmem:[#allocation8 + $0x158] sm:$0xff] }
 0x3cc   :  { %1819 = vmatmul.mubr.f32.vlgmr.msra.gmra.mxu0 %v7036_v22  ;;  %1890 = vmatmul.mubr.f32.vlgmr.msra.gmra.mxu1 %v7036_v22  ;;  %v4776_v50 = vpop.eup %4775  ;;  %10074 = vst [vmem:[#allocation113_spill] sm:$0xff] %v7092_v43  ;;  %10076 = vst [vmem:[#allocation115_spill] sm:$0xff] %v7098_v21 }
 0x3cd   :  { %1897 = vmatpush1.msra.mxu0 %v7040_v52  ;;  %1968 = vmatpush1.msra.mxu1 %v7043_v40  ;;  %v1577_v42 = vmul.f32 %v4776_v50, %v4774_v15  ;;  %v4778_v4 = vpop.eup %4777  ;;  %v7103_v15 = vld [vmem:[#allocation8 + $0x140] sm:$0xff]  ;;  %v7106_v50 = vld [vmem:[#allocation8 + $0x150] sm:$0xff] }
 0x3ce   :  { %1898 = vmatprep.subr.mxu0 %v7046_v14  ;;  %1969 = vmatprep.subr.mxu1 %v7049_v35  ;;  %10077 = vst [vmem:[#allocation116_spill] sm:$0xff] %v7106_v50 }
 0x3cf   :  { %1899 = vmatpush1.msra.mxu0 %v7052_v46  ;;  %1970 = vmatpush1.msra.mxu1 %v7055_v1 }
 0x3d0   :  { %1900 = vmatprep.subr.mxu0 %v7058_v24  ;;  %1971 = vmatprep.subr.mxu1 %v7061_v18 }
 0x3d1   :  { %1901 = vmatpush1.msra.mxu0 %v7064_v48  ;;  %1972 = vmatpush1.msra.mxu1 %v7067_v47 }
 0x3d2   :  { %1902 = vmatprep.subr.mxu0 %v7070_v33  ;;  %1973 = vmatprep.subr.mxu1 %v7073_v16 }
 0x3d3   :  { %1903 = vmatpush1.msra.mxu0 %v7077_v45  ;;  %1974 = vmatpush1.msra.mxu1 %v7080_v49 }
 0x3d4   :  { %1904 = vmatprep.subr.mxu0 %v7083_v38  ;;  %1975 = vmatprep.subr.mxu1 %v7086_v39  ;;  %v7101_v38 = vadd.f32 %v1577_v42, %v1576_v44  ;;  %v7118_v44 = vld [vmem:[#allocation8 + $0x130] sm:$0xff]  ;;  %v7121_v42 = vld [vmem:[#allocation8 + $0x108] sm:$0xff] }
 0x3d5   :  { %1905 = vmatpush1.msra.mxu0 %v7089_v34  ;;  %1976 = vmatpush1.msra.mxu1 %v7092_v43  ;;  %v7109_v43 = vld [vmem:[#allocation8 + $0x128] sm:$0xff]  ;;  %v7112_v34 = vld [vmem:[#allocation8 + $0x138] sm:$0xff]  ;;  %10081 = vst [vmem:[#allocation120_spill] sm:$0xff] %v7118_v44  ;;  %10082 = vst [vmem:[#allocation121_spill] sm:$0xff] %v7121_v42 }
 0x3d6   :  { %1906 = vmatprep.subr.mxu0 %v7095_v17  ;;  %1977 = vmatprep.subr.mxu1 %v7098_v21  ;;  %10078 = vst [vmem:[#allocation117_spill] sm:$0xff] %v7109_v43  ;;  %10079 = vst [vmem:[#allocation118_spill] sm:$0xff] %v7112_v34  ;;  %v1568_v17 = vadd.f32 1.0, %v4778_v4  ;;  %v7115_v21 = vld [vmem:[#allocation8 + $0x120] sm:$0xff]  ;;  %4779 = vtanh.f32 %v7101_v38  ;;  %v7131_v4 = vld [vmem:[#allocation8 + $0x110] sm:$0xff] }
 0x3d7   :  { %1907 = vmatpush1.msra.mxu0 %v7103_v15  ;;  %1978 = vmatpush1.msra.mxu1 %v7106_v50  ;;  %10080 = vst [vmem:[#allocation119_spill] sm:$0xff] %v7115_v21  ;;  %v7124_v50 = vld [vmem:[#allocation8 + $0x118] sm:$0xff]  ;;  %10085 = vst [vmem:[#allocation124_spill] sm:$0xff] %v7131_v4 }
 0x3d8   :  { %1908 = vmatprep.subr.mxu0 %v7109_v43  ;;  %1979 = vmatprep.subr.mxu1 %v7112_v34  ;;  %10083 = vst [vmem:[#allocation122_spill] sm:$0xff] %v7124_v50  ;;  %v7128_v34 = vld [vmem:[#allocation8 + $0x100] sm:$0xff]  ;;  %4781 = vrcp.f32 %v1568_v17  ;;  %v7155_v17 = vld [vmem:[#allocation8 + $0xd0] sm:$0xff]  ;;  %v7218_v43 = vld [vmem:[#allocation8 + $0x8] sm:$0xff] }
 0x3d9   :  { %1909 = vmatpush1.msra.mxu0 %v7115_v21  ;;  %1980 = vmatpush1.msra.mxu1 %v7118_v44  ;;  %10084 = vst [vmem:[#allocation123_spill] sm:$0xff] %v7128_v34  ;;  %v7134_v21 = vld [vmem:[#allocation8 + $0xe8] sm:$0xff]  ;;  %v7137_v44 = vld [vmem:[#allocation8 + $0xf8] sm:$0xff]  ;;  %10093 = vst [vmem:[#allocation132_spill] sm:$0xff] %v7155_v17 }
 0x3da   :  { %1910 = vmatprep.subr.mxu0 %v7121_v42  ;;  %1981 = vmatprep.subr.mxu1 %v7124_v50  ;;  %10086 = vst [vmem:[#allocation125_spill] sm:$0xff] %v7134_v21  ;;  %10087 = vst [vmem:[#allocation126_spill] sm:$0xff] %v7137_v44  ;;  %v7140_v50 = vld [vmem:[#allocation8 + $0xe0] sm:$0xff]  ;;  %v7143_v42 = vld [vmem:[#allocation8 + $0xf0] sm:$0xff] }
 0x3db   :  { %1911 = vmatpush1.msra.mxu0 %v7128_v34  ;;  %1982 = vmatpush1.msra.mxu1 %v7131_v4  ;;  %10088 = vst [vmem:[#allocation127_spill] sm:$0xff] %v7140_v50  ;;  %10089 = vst [vmem:[#allocation128_spill] sm:$0xff] %v7143_v42  ;;  %v7146_v34 = vld [vmem:[#allocation8 + $0xc8] sm:$0xff]  ;;  %v7149_v4 = vld [vmem:[#allocation8 + $0xd8] sm:$0xff] }
 0x3dc   :  { %1912 = vmatprep.subr.mxu0 %v7134_v21  ;;  %1983 = vmatprep.subr.mxu1 %v7137_v44  ;;  %10090 = vst [vmem:[#allocation129_spill] sm:$0xff] %v7146_v34  ;;  %10091 = vst [vmem:[#allocation130_spill] sm:$0xff] %v7149_v4  ;;  %v7152_v21 = vld [vmem:[#allocation8 + $0xc0] sm:$0xff]  ;;  %v7206_v44 = vld [vmem:[#allocation8 + $0x28] sm:$0xff] }
 0x3dd   :  { %1913 = vmatpush1.msra.mxu0 %v7140_v50  ;;  %1984 = vmatpush1.msra.mxu1 %v7143_v42  ;;  %10092 = vst [vmem:[#allocation131_spill] sm:$0xff] %v7152_v21  ;;  %v7158_v50 = vld [vmem:[#allocation8 + $0xa8] sm:$0xff]  ;;  %v7161_v42 = vld [vmem:[#allocation8 + $0xb8] sm:$0xff]  ;;  %10110 = vst [vmem:[#allocation149_spill] sm:$0xff] %v7206_v44 }
 0x3de   :  { %1914 = vmatprep.subr.mxu0 %v7146_v34  ;;  %1985 = vmatprep.subr.mxu1 %v7149_v4  ;;  %10094 = vst [vmem:[#allocation133_spill] sm:$0xff] %v7158_v50  ;;  %10095 = vst [vmem:[#allocation134_spill] sm:$0xff] %v7161_v42  ;;  %v7164_v34 = vld [vmem:[#allocation8 + $0xa0] sm:$0xff]  ;;  %v7167_v4 = vld [vmem:[#allocation8 + $0xb0] sm:$0xff] }
 0x3df   :  { %1915 = vmatpush1.msra.mxu0 %v7152_v21  ;;  %1986 = vmatpush1.msra.mxu1 %v7155_v17  ;;  %10096 = vst [vmem:[#allocation135_spill] sm:$0xff] %v7164_v34  ;;  %10097 = vst [vmem:[#allocation136_spill] sm:$0xff] %v7167_v4  ;;  %v7170_v21 = vld [vmem:[#allocation8 + $0x88] sm:$0xff]  ;;  %v7173_v17 = vld [vmem:[#allocation8 + $0x98] sm:$0xff] }
 0x3e0   :  { %1916 = vmatprep.subr.mxu0 %v7158_v50  ;;  %1987 = vmatprep.subr.mxu1 %v7161_v42  ;;  %10098 = vst [vmem:[#allocation137_spill] sm:$0xff] %v7170_v21  ;;  %10099 = vst [vmem:[#allocation138_spill] sm:$0xff] %v7173_v17  ;;  %v7176_v50 = vld [vmem:[#allocation8 + $0x80] sm:$0xff]  ;;  %v7179_v42 = vld [vmem:[#allocation8 + $0x90] sm:$0xff] }
 0x3e1   :  { %1917 = vmatpush1.msra.mxu0 %v7164_v34  ;;  %1988 = vmatpush1.msra.mxu1 %v7167_v4  ;;  %10100 = vst [vmem:[#allocation139_spill] sm:$0xff] %v7176_v50  ;;  %10101 = vst [vmem:[#allocation140_spill] sm:$0xff] %v7179_v42  ;;  %v7182_v34 = vld [vmem:[#allocation8 + $0x68] sm:$0xff]  ;;  %v7185_v4 = vld [vmem:[#allocation8 + $0x78] sm:$0xff] }
 0x3e2   :  { %1918 = vmatprep.subr.mxu0 %v7170_v21  ;;  %1989 = vmatprep.subr.mxu1 %v7173_v17  ;;  %10102 = vst [vmem:[#allocation141_spill] sm:$0xff] %v7182_v34  ;;  %10103 = vst [vmem:[#allocation142_spill] sm:$0xff] %v7185_v4  ;;  %v7188_v21 = vld [vmem:[#allocation8 + $0x60] sm:$0xff]  ;;  %v7191_v17 = vld [vmem:[#allocation8 + $0x70] sm:$0xff] }
 0x3e3   :  { %1919 = vmatpush1.msra.mxu0 %v7176_v50  ;;  %1990 = vmatpush1.msra.mxu1 %v7179_v42  ;;  %10104 = vst [vmem:[#allocation143_spill] sm:$0xff] %v7188_v21  ;;  %10105 = vst [vmem:[#allocation144_spill] sm:$0xff] %v7191_v17  ;;  %v7194_v50 = vld [vmem:[#allocation8 + $0x48] sm:$0xff]  ;;  %v7197_v42 = vld [vmem:[#allocation8 + $0x58] sm:$0xff] }
 0x3e4   :  { %1920 = vmatprep.subr.mxu0 %v7182_v34  ;;  %1991 = vmatprep.subr.mxu1 %v7185_v4  ;;  %10106 = vst [vmem:[#allocation145_spill] sm:$0xff] %v7194_v50  ;;  %10107 = vst [vmem:[#allocation146_spill] sm:$0xff] %v7197_v42  ;;  %v7200_v34 = vld [vmem:[#allocation8 + $0x40] sm:$0xff]  ;;  %v7203_v4 = vld [vmem:[#allocation8 + $0x50] sm:$0xff] }
 0x3e5   :  { %1921 = vmatpush1.msra.mxu0 %v7188_v21  ;;  %1992 = vmatpush1.msra.mxu1 %v7191_v17  ;;  %10108 = vst [vmem:[#allocation147_spill] sm:$0xff] %v7200_v34  ;;  %10109 = vst [vmem:[#allocation148_spill] sm:$0xff] %v7203_v4  ;;  %v4780_v21 = vpop.eup %4779  ;;  %v7209_v17 = vld [vmem:[#allocation8 + $0x38] sm:$0xff] }
 0x3e6   :  { %1922 = vmatprep.subr.mxu0 %v7194_v50  ;;  %1993 = vmatprep.subr.mxu1 %v7197_v42  ;;  %10111 = vst [vmem:[#allocation150_spill] sm:$0xff] %v7209_v17  ;;  %v7212_v50 = vld [vmem:[#allocation8 + $0x20] sm:$0xff]  ;;  %v7215_v42 = vld [vmem:[#allocation8 + $0x30] sm:$0xff]  ;;  %10113 = vst [vmem:[#allocation152_spill] sm:$0xff] %v7218_v43 }
 0x3e7   :  { %1923 = vmatpush1.msra.mxu0 %v7200_v34  ;;  %1994 = vmatpush1.msra.mxu1 %v7203_v4  ;;  %10112 = vst [vmem:[#allocation151_spill] sm:$0xff] %v7212_v50  ;;  %v4782_v34 = vpop.eup %4781  ;;  %v7221_v4 = vld [vmem:[#allocation8 + $0x18] sm:$0xff] }
 0x3e8   :  { %1924 = vmatprep.subr.mxu0 %v7206_v44  ;;  %1995 = vmatprep.subr.mxu1 %v7209_v17  ;;  %10114 = vst [vmem:[#allocation153_spill] sm:$0xff] %v7221_v4  ;;  %v7224_v44 = vld [vmem:[#allocation8] sm:$0xff]  ;;  %v7228_v17 = vld [vmem:[#allocation8 + $0x10] sm:$0xff] }
 0x3e9   :  { %1925 = vmatpush1.msra.mxu0 %v7212_v50  ;;  %1996 = vmatpush1.msra.mxu1 %v7215_v42  ;;  %10115 = vst [vmem:[#allocation154_spill] sm:$0xff] %v7224_v44  ;;  %v1580_v50 = vmul.f32 %v4782_v34, %v4780_v21  ;;  %v7241_v34 = vld [vmem:[#allocation4 + $0x1f0] sm:$0xff]  ;;  %v7244_v21 = vld [vmem:[#allocation4 + $0x1c8] sm:$0xff] }
 0x3ea   :  { %1926 = vmatprep.subr.mxu0 %v7218_v43  ;;  %1997 = vmatprep.subr.mxu1 %v7221_v4  ;;  %v7232_v43 = vld [vmem:[#allocation4 + $0x1e8] sm:$0xff]  ;;  %v7235_v4 = vld [vmem:[#allocation4 + $0x1f8] sm:$0xff]  ;;  %10119 = vst [vmem:[#allocation158_spill] sm:$0xff] %v7241_v34  ;;  %10120 = vst [vmem:[#allocation159_spill] sm:$0xff] %v7244_v21 }
 0x3eb   :  { %1927 = vmatpush1.msra.mxu0 %v7224_v44  ;;  %1960 = vmatprep.mubr.f32.mxu0 %v9835_v27  ;;  %10116 = vst [vmem:[#allocation155_spill] sm:$0xff] %v7232_v43  ;;  %10117 = vst [vmem:[#allocation156_spill] sm:$0xff] %v7235_v4  ;;  %v7238_v44 = vld [vmem:[#allocation4 + $0x1e0] sm:$0xff] }
 0x3ec   :  { %1998 = vmatpush1.msra.mxu1 %v7228_v17  ;;  %2031 = vmatprep.mubr.f32.mxu1 %v9835_v27  ;;  %10118 = vst [vmem:[#allocation157_spill] sm:$0xff] %v7238_v44 }
 0x3ed   :  { %1961 = vmatmul.mubr.f32.vlgmr.msra.gmra.mxu0 %v1580_v50  ;;  %2032 = vmatmul.mubr.f32.vlgmr.msra.gmra.mxu1 %v1580_v50  ;;  %v7247_v50 = vld [vmem:[#allocation4 + $0x1d8] sm:$0xff] }
 0x3ee   :  { %2069 = vmatprep.subr.mxu0 %v7232_v43  ;;  %2140 = vmatprep.subr.mxu1 %v7235_v4  ;;  %10121 = vst [vmem:[#allocation160_spill] sm:$0xff] %v7247_v50  ;;  %v7250_v43 = vld [vmem:[#allocation4 + $0x1c0] sm:$0xff]  ;;  %v7253_v4 = vld [vmem:[#allocation4 + $0x1d0] sm:$0xff] }
 0x3ef   :  { %2070 = vmatpush1.msra.mxu0 %v7238_v44  ;;  %2141 = vmatpush1.msra.mxu1 %v7241_v34  ;;  %10122 = vst [vmem:[#allocation161_spill] sm:$0xff] %v7250_v43  ;;  %10123 = vst [vmem:[#allocation162_spill] sm:$0xff] %v7253_v4  ;;  %v7256_v44 = vld [vmem:[#allocation4 + $0x1a8] sm:$0xff]  ;;  %v7259_v34 = vld [vmem:[#allocation4 + $0x1b8] sm:$0xff] }
 0x3f0   :  { %2071 = vmatprep.subr.mxu0 %v7244_v21  ;;  %2142 = vmatprep.subr.mxu1 %v7247_v50  ;;  %10124 = vst [vmem:[#allocation163_spill] sm:$0xff] %v7256_v44  ;;  %10125 = vst [vmem:[#allocation164_spill] sm:$0xff] %v7259_v34  ;;  %v7262_v21 = vld [vmem:[#allocation4 + $0x1a0] sm:$0xff]  ;;  %v7265_v50 = vld [vmem:[#allocation4 + $0x1b0] sm:$0xff] }
 0x3f1   :  { %2072 = vmatpush1.msra.mxu0 %v7250_v43  ;;  %2143 = vmatpush1.msra.mxu1 %v7253_v4  ;;  %10126 = vst [vmem:[#allocation165_spill] sm:$0xff] %v7262_v21  ;;  %10127 = vst [vmem:[#allocation166_spill] sm:$0xff] %v7265_v50  ;;  %v7268_v43 = vld [vmem:[#allocation4 + $0x188] sm:$0xff]  ;;  %v7271_v4 = vld [vmem:[#allocation4 + $0x198] sm:$0xff] }
 0x3f2   :  { %2073 = vmatprep.subr.mxu0 %v7256_v44  ;;  %2144 = vmatprep.subr.mxu1 %v7259_v34  ;;  %10128 = vst [vmem:[#allocation167_spill] sm:$0xff] %v7268_v43  ;;  %10129 = vst [vmem:[#allocation168_spill] sm:$0xff] %v7271_v4  ;;  %v7274_v44 = vld [vmem:[#allocation4 + $0x180] sm:$0xff]  ;;  %v7277_v34 = vld [vmem:[#allocation4 + $0x190] sm:$0xff] }
 0x3f3   :  { %2074 = vmatpush1.msra.mxu0 %v7262_v21  ;;  %2145 = vmatpush1.msra.mxu1 %v7265_v50  ;;  %10130 = vst [vmem:[#allocation169_spill] sm:$0xff] %v7274_v44  ;;  %10131 = vst [vmem:[#allocation170_spill] sm:$0xff] %v7277_v34  ;;  %v7280_v21 = vld [vmem:[#allocation4 + $0x168] sm:$0xff]  ;;  %v7283_v50 = vld [vmem:[#allocation4 + $0x178] sm:$0xff] }
 0x3f4   :  { %2075 = vmatprep.subr.mxu0 %v7268_v43  ;;  %2146 = vmatprep.subr.mxu1 %v7271_v4  ;;  %v7286_v43 = vld [vmem:[#allocation4 + $0x160] sm:$0xff]  ;;  %v7289_v4 = vld [vmem:[#allocation4 + $0x170] sm:$0xff] }
 0x3f5   :  { %2076 = vmatpush1.msra.mxu0 %v7274_v44  ;;  %2147 = vmatpush1.msra.mxu1 %v7277_v34  ;;  %v7292_v44 = vld [vmem:[#allocation4 + $0x148] sm:$0xff]  ;;  %v7295_v34 = vld [vmem:[#allocation4 + $0x158] sm:$0xff] }
 0x3f6   :  { %2077 = vmatprep.subr.mxu0 %v7280_v21  ;;  %2148 = vmatprep.subr.mxu1 %v7283_v50 }
 0x3f7   :  { %2078 = vmatpush1.msra.mxu0 %v7286_v43  ;;  %2149 = vmatpush1.msra.mxu1 %v7289_v4 }
 0x3f8   :  { %2079 = vmatprep.subr.mxu0 %v7292_v44  ;;  %2150 = vmatprep.subr.mxu1 %v7295_v34 }
 0x3f9   :  { %2080 = vmatpush1.msra.mxu0 %v6694_v53  ;;  %2151 = vmatpush1.msra.mxu1 %v6697_v54  ;;  %v10132_v53 = vld [vmem:[#allocation11_spill] sm:$0xff]  ;;  %v10133_v54 = vld [vmem:[#allocation12_spill] sm:$0xff] }
 0x3fa   :  { %2081 = vmatprep.subr.mxu0 %v6700_v55  ;;  %2152 = vmatprep.subr.mxu1 %v6703_v28  ;;  %v10134_v55 = vld [vmem:[#allocation13_spill] sm:$0xff]  ;;  %v10135_v28 = vld [vmem:[#allocation14_spill] sm:$0xff] }
 0x3fb   :  { %2082 = vmatpush1.msra.mxu0 %v6706_v26  ;;  %2153 = vmatpush1.msra.mxu1 %v6709_v30  ;;  %v10136_v26 = vld [vmem:[#allocation15_spill] sm:$0xff]  ;;  %v10137_v30 = vld [vmem:[#allocation16_spill] sm:$0xff] }
 0x3fc   :  { %2083 = vmatprep.subr.mxu0 %v6712_v25  ;;  %2154 = vmatprep.subr.mxu1 %v6715_v29  ;;  %v10138_v25 = vld [vmem:[#allocation17_spill] sm:$0xff]  ;;  %v10139_v29 = vld [vmem:[#allocation18_spill] sm:$0xff] }
 0x3fd   :  { %2084 = vmatpush1.msra.mxu0 %v6718_v19  ;;  %2155 = vmatpush1.msra.mxu1 %v6721_v56  ;;  %v10140_v19 = vld [vmem:[#allocation19_spill] sm:$0xff]  ;;  %v10141_v56 = vld [vmem:[#allocation20_spill] sm:$0xff] }
 0x3fe   :  { %2085 = vmatprep.subr.mxu0 %v6724_v57  ;;  %2156 = vmatprep.subr.mxu1 %v6727_v58  ;;  %v10142_v57 = vld [vmem:[#allocation21_spill] sm:$0xff]  ;;  %v10143_v58 = vld [vmem:[#allocation22_spill] sm:$0xff] }
 0x3ff   :  { %2086 = vmatpush1.msra.mxu0 %v6730_v61  ;;  %2157 = vmatpush1.msra.mxu1 %v6733_v3  ;;  %v10144_v61 = vld [vmem:[#allocation23_spill] sm:$0xff]  ;;  %v10145_v3 = vld [vmem:[#allocation24_spill] sm:$0xff] }
 0x400   :  { %2087 = vmatprep.subr.mxu0 %v6736_v59  ;;  %2158 = vmatprep.subr.mxu1 %v6739_v62  ;;  %v10146_v59 = vld [vmem:[#allocation25_spill] sm:$0xff]  ;;  %v10147_v62 = vld [vmem:[#allocation26_spill] sm:$0xff] }
 0x401   :  { %2088 = vmatpush1.msra.mxu0 %v6742_v7  ;;  %2159 = vmatpush1.msra.mxu1 %v6745_v9  ;;  %v10148_v7 = vld [vmem:[#allocation27_spill] sm:$0xff]  ;;  %v10149_v9 = vld [vmem:[#allocation28_spill] sm:$0xff] }
 0x402   :  { %2089 = vmatprep.subr.mxu0 %v6748_v10  ;;  %2160 = vmatprep.subr.mxu1 %v6751_v11  ;;  %v10150_v10 = vld [vmem:[#allocation29_spill] sm:$0xff]  ;;  %v10151_v11 = vld [vmem:[#allocation30_spill] sm:$0xff] }
 0x403   :  { %2090 = vmatpush1.msra.mxu0 %v6754_v6  ;;  %2161 = vmatpush1.msra.mxu1 %v6757_v13  ;;  %v10152_v6 = vld [vmem:[#allocation31_spill] sm:$0xff]  ;;  %v10153_v13 = vld [vmem:[#allocation32_spill] sm:$0xff] }
 0x404   :  { %2091 = vmatprep.subr.mxu0 %v6760_v60  ;;  %2162 = vmatprep.subr.mxu1 %v6763_v31  ;;  %v10154_v60 = vld [vmem:[#allocation33_spill] sm:$0xff]  ;;  %v10155_v31 = vld [vmem:[#allocation34_spill] sm:$0xff] }
 0x405   :  { %2092 = vmatpush1.msra.mxu0 %v6766_v32  ;;  %2163 = vmatpush1.msra.mxu1 %v6769_v36  ;;  %v10156_v32 = vld [vmem:[#allocation35_spill] sm:$0xff]  ;;  %v10157_v36 = vld [vmem:[#allocation36_spill] sm:$0xff] }
 0x406   :  { %2093 = vmatprep.subr.mxu0 %v6772_v37  ;;  %2164 = vmatprep.subr.mxu1 %v6775_v63  ;;  %v10158_v37 = vld [vmem:[#allocation37_spill] sm:$0xff]  ;;  %v10159_v63 = vld [vmem:[#allocation38_spill] sm:$0xff] }
 0x407   :  { %2094 = vmatpush1.msra.mxu0 %v6778_v2  ;;  %2165 = vmatpush1.msra.mxu1 %v6781_v51  ;;  %v10160_v2 = vld [vmem:[#allocation39_spill] sm:$0xff]  ;;  %v10161_v51 = vld [vmem:[#allocation40_spill] sm:$0xff] }
 0x408   :  { %2095 = vmatprep.subr.mxu0 %v6784_v5  ;;  %2166 = vmatprep.subr.mxu1 %v6787_v23  ;;  %v10162_v5 = vld [vmem:[#allocation41_spill] sm:$0xff]  ;;  %v10163_v23 = vld [vmem:[#allocation42_spill] sm:$0xff] }
 0x409   :  { %2096 = vmatpush1.msra.mxu0 %v10132_v53  ;;  %2167 = vmatpush1.msra.mxu1 %v10133_v54  ;;  %v10165_v53 = vld [vmem:[#allocation44_spill] sm:$0xff]  ;;  %v10166_v54 = vld [vmem:[#allocation45_spill] sm:$0xff] }
 0x40a   :  { %2097 = vmatprep.subr.mxu0 %v10134_v55  ;;  %2168 = vmatprep.subr.mxu1 %v10135_v28  ;;  %v10167_v55 = vld [vmem:[#allocation46_spill] sm:$0xff]  ;;  %v10168_v28 = vld [vmem:[#allocation47_spill] sm:$0xff] }
 0x40b   :  { %2098 = vmatpush1.msra.mxu0 %v10136_v26  ;;  %2169 = vmatpush1.msra.mxu1 %v10137_v30  ;;  %v10169_v26 = vld [vmem:[#allocation48_spill] sm:$0xff]  ;;  %v10170_v30 = vld [vmem:[#allocation49_spill] sm:$0xff] }
 0x40c   :  { %2099 = vmatprep.subr.mxu0 %v10138_v25  ;;  %2170 = vmatprep.subr.mxu1 %v10139_v29  ;;  %v10171_v25 = vld [vmem:[#allocation50_spill] sm:$0xff]  ;;  %v10172_v29 = vld [vmem:[#allocation51_spill] sm:$0xff] }
 0x40d   :  { %2100 = vmatpush1.msra.mxu0 %v10140_v19  ;;  %2133 = vmatprep.mubr.f32.mxu0 %v9835_v27  ;;  %v10173_v19 = vld [vmem:[#allocation52_spill] sm:$0xff] }
 0x40e   :  { %2171 = vmatpush1.msra.mxu1 %v10141_v56  ;;  %2204 = vmatprep.mubr.f32.mxu1 %v9835_v27  ;;  %v10174_v56 = vld [vmem:[#allocation53_spill] sm:$0xff] }
 0x40f   :  { %2134 = vmatmul.mubr.f32.vlgmr.msra.gmra.mxu0 %v7036_v22  ;;  %2205 = vmatmul.mubr.f32.vlgmr.msra.gmra.mxu1 %v7036_v22  ;;  %v10164_v22 = vld [vmem:[#allocation43_spill] sm:$0xff] }
 0x410   :  { %2235 = vmatprep.subr.mxu0 %v10142_v57  ;;  %2306 = vmatprep.subr.mxu1 %v10143_v58  ;;  %v10175_v57 = vld [vmem:[#allocation54_spill] sm:$0xff]  ;;  %v10176_v58 = vld [vmem:[#allocation55_spill] sm:$0xff] }
 0x411   :  { %2236 = vmatpush1.msra.mxu0 %v10144_v61  ;;  %2307 = vmatpush1.msra.mxu1 %v10145_v3  ;;  %v10177_v61 = vld [vmem:[#allocation56_spill] sm:$0xff]  ;;  %v10178_v3 = vld [vmem:[#allocation57_spill] sm:$0xff] }
 0x412   :  { %2237 = vmatprep.subr.mxu0 %v10146_v59  ;;  %2308 = vmatprep.subr.mxu1 %v10147_v62  ;;  %v10179_v59 = vld [vmem:[#allocation58_spill] sm:$0xff]  ;;  %v10180_v62 = vld [vmem:[#allocation59_spill] sm:$0xff] }
 0x413   :  { %2238 = vmatpush1.msra.mxu0 %v10148_v7  ;;  %2309 = vmatpush1.msra.mxu1 %v10149_v9  ;;  %v10181_v7 = vld [vmem:[#allocation60_spill] sm:$0xff]  ;;  %v10182_v9 = vld [vmem:[#allocation61_spill] sm:$0xff] }
 0x414   :  { %2239 = vmatprep.subr.mxu0 %v10150_v10  ;;  %2310 = vmatprep.subr.mxu1 %v10151_v11  ;;  %v10183_v10 = vld [vmem:[#allocation62_spill] sm:$0xff]  ;;  %v10184_v11 = vld [vmem:[#allocation63_spill] sm:$0xff] }
 0x415   :  { %2240 = vmatpush1.msra.mxu0 %v10152_v6  ;;  %2311 = vmatpush1.msra.mxu1 %v10153_v13  ;;  %v10185_v6 = vld [vmem:[#allocation64_spill] sm:$0xff]  ;;  %v10186_v13 = vld [vmem:[#allocation65_spill] sm:$0xff] }
 0x416   :  { %2241 = vmatprep.subr.mxu0 %v10154_v60  ;;  %2312 = vmatprep.subr.mxu1 %v10155_v31  ;;  %v10187_v60 = vld [vmem:[#allocation66_spill] sm:$0xff]  ;;  %v10188_v31 = vld [vmem:[#allocation67_spill] sm:$0xff] }
 0x417   :  { %2242 = vmatpush1.msra.mxu0 %v10156_v32  ;;  %2313 = vmatpush1.msra.mxu1 %v10157_v36  ;;  %v10189_v32 = vld [vmem:[#allocation68_spill] sm:$0xff]  ;;  %v10190_v36 = vld [vmem:[#allocation69_spill] sm:$0xff] }
 0x418   :  { %2243 = vmatprep.subr.mxu0 %v10158_v37  ;;  %2314 = vmatprep.subr.mxu1 %v10159_v63  ;;  %v10191_v37 = vld [vmem:[#allocation70_spill] sm:$0xff]  ;;  %v10192_v63 = vld [vmem:[#allocation71_spill] sm:$0xff] }
 0x419   :  { %2244 = vmatpush1.msra.mxu0 %v10160_v2  ;;  %2315 = vmatpush1.msra.mxu1 %v10161_v51  ;;  %v10193_v2 = vld [vmem:[#allocation72_spill] sm:$0xff]  ;;  %v10194_v51 = vld [vmem:[#allocation73_spill] sm:$0xff] }
 0x41a   :  { %2245 = vmatprep.subr.mxu0 %v10162_v5  ;;  %2316 = vmatprep.subr.mxu1 %v10163_v23  ;;  %v10195_v5 = vld [vmem:[#allocation74_spill] sm:$0xff]  ;;  %v10196_v23 = vld [vmem:[#allocation75_spill] sm:$0xff] }
 0x41b   :  { %2246 = vmatpush1.msra.mxu0 %v10164_v22  ;;  %2317 = vmatpush1.msra.mxu1 %v10165_v53  ;;  %v10197_v22 = vld [vmem:[#allocation76_spill] sm:$0xff]  ;;  %v10198_v53 = vld [vmem:[#allocation77_spill] sm:$0xff] }
 0x41c   :  { %2247 = vmatprep.subr.mxu0 %v10166_v54  ;;  %2318 = vmatprep.subr.mxu1 %v10167_v55  ;;  %v10199_v54 = vld [vmem:[#allocation80_spill] sm:$0xff]  ;;  %v10200_v55 = vld [vmem:[#allocation79_spill] sm:$0xff] }
 0x41d   :  { %2248 = vmatpush1.msra.mxu0 %v10168_v28  ;;  %2319 = vmatpush1.msra.mxu1 %v10169_v26  ;;  %v10201_v28 = vld [vmem:[#allocation78_spill] sm:$0xff]  ;;  %v10202_v26 = vld [vmem:[#allocation81_spill] sm:$0xff] }
 0x41e   :  { %2249 = vmatprep.subr.mxu0 %v10170_v30  ;;  %2320 = vmatprep.subr.mxu1 %v10171_v25  ;;  %v10203_v30 = vld [vmem:[#allocation106_spill] sm:$0xff]  ;;  %v10204_v25 = vld [vmem:[#allocation107_spill] sm:$0xff] }
 0x41f   :  { %2250 = vmatpush1.msra.mxu0 %v10172_v29  ;;  %2321 = vmatpush1.msra.mxu1 %v10173_v19  ;;  %v10205_v29 = vld [vmem:[#allocation108_spill] sm:$0xff]  ;;  %v10206_v19 = vld [vmem:[#allocation109_spill] sm:$0xff] }
 0x420   :  { %2251 = vmatprep.subr.mxu0 %v10174_v56  ;;  %2322 = vmatprep.subr.mxu1 %v10175_v57  ;;  %v10207_v56 = vld [vmem:[#allocation110_spill] sm:$0xff] }
 0x421   :  { %2252 = vmatpush1.msra.mxu0 %v10176_v58  ;;  %2323 = vmatpush1.msra.mxu1 %v10177_v61 }
 0x422   :  { %2253 = vmatprep.subr.mxu0 %v10178_v3  ;;  %2324 = vmatprep.subr.mxu1 %v10179_v59 }
 0x423   :  { %2254 = vmatpush1.msra.mxu0 %v10180_v62  ;;  %2325 = vmatpush1.msra.mxu1 %v10181_v7 }
 0x424   :  { %2255 = vmatprep.subr.mxu0 %v10182_v9  ;;  %2326 = vmatprep.subr.mxu1 %v10183_v10  ;;  %v10208_v9 = vld [vmem:[#allocation86_spill] sm:$0xff] }
 0x425   :  { %2256 = vmatpush1.msra.mxu0 %v10184_v11  ;;  %2327 = vmatpush1.msra.mxu1 %v10185_v6 }
 0x426   :  { %2257 = vmatprep.subr.mxu0 %v10186_v13  ;;  %2328 = vmatprep.subr.mxu1 %v10187_v60  ;;  %v10209_v60 = vld [vmem:[#allocation88_spill] sm:$0xff] }
 0x427   :  { %2258 = vmatpush1.msra.mxu0 %v10188_v31  ;;  %2329 = vmatpush1.msra.mxu1 %v10189_v32 }
 0x428   :  { %2259 = vmatprep.subr.mxu0 %v10190_v36  ;;  %2330 = vmatprep.subr.mxu1 %v10191_v37 }
 0x429   :  { %2260 = vmatpush1.msra.mxu0 %v10192_v63  ;;  %2331 = vmatpush1.msra.mxu1 %v10193_v2  ;;  %v10210_v63 = vld [vmem:[#allocation87_spill] sm:$0xff] }
 0x42a   :  { %2261 = vmatprep.subr.mxu0 %v10194_v51  ;;  %2332 = vmatprep.subr.mxu1 %v10195_v5 }
 0x42b   :  { %2262 = vmatpush1.msra.mxu0 %v10196_v23  ;;  %2333 = vmatpush1.msra.mxu1 %v10197_v22  ;;  %v10211_v23 = vld [vmem:[#allocation89_spill] sm:$0xff] }
 0x42c   :  { %2263 = vmatprep.subr.mxu0 %v10198_v53  ;;  %2334 = vmatprep.subr.mxu1 %v10199_v54 }
 0x42d   :  { %2264 = vmatpush1.msra.mxu0 %v10200_v55  ;;  %2335 = vmatpush1.msra.mxu1 %v10201_v28 }
 0x42e   :  { %2265 = vmatprep.subr.mxu0 %v10202_v26  ;;  %2336 = vmatprep.subr.mxu1 %v10203_v30 }
 0x42f   :  { %2266 = vmatpush1.msra.mxu0 %v10204_v25  ;;  %2337 = vmatpush1.msra.mxu1 %v10205_v29 }
 0x430   :  { %2299 = vmatprep.mubr.f32.mxu0 %v9835_v27  ;;  %2370 = vmatprep.mubr.f32.mxu1 %v9835_v27 }
 0x431   :  { %2377 = vmatprep.subr.mxu0 %v10206_v19  ;;  %2448 = vmatprep.subr.mxu1 %v10207_v56 }
 0x48c   :  { %v1820_v57 = vpop.f32.mrf.mxu0  ;;  %v1891_v3 = vpop.f32.mrf.mxu1 }
 0x48d   :  { %v1821_v26 = vadd.f32 %v1820_v57, %v6583_v41 }
 0x48e   :  { %v1822_v58 = vpop.f32.mrf.mxu0  ;;  %v1893_v62 = vpop.f32.mrf.mxu1 }
 0x48f   :  { %v1823_v54 = vadd.f32 %v1822_v58, %v6578_v20 }
 0x4ad   :  { %v1962_v61 = vpop.f32.mrf.mxu0  ;;  %v2033_v11 = vpop.f32.mrf.mxu1 }
 0x4ae   :  { %v1963_v29 = vadd.f32 %v1962_v61, %v1821_v26  ;;  %v10229_v26 = vld [vmem:[#allocation128_spill] sm:$0xff] }
 0x4af   :  { %v1964_v59 = vpop.f32.mrf.mxu0  ;;  %v2035_v36 = vpop.f32.mrf.mxu1 }
 0x4b0   :  { %v1965_v30 = vadd.f32 %v1964_v59, %v1823_v54  ;;  %v4610_v56 = vmul.f32 -1.442695, %v1963_v29  ;;  %v1892_v59 = vadd.f32 %v1891_v3, %v6592_v0  ;;  %v10226_v54 = vld [vmem:[#allocation125_spill] sm:$0xff]  ;;  %v10232_v29 = vld [vmem:[#allocation131_spill] sm:$0xff] }
 0x4b2   :  { %v4611_v19 = vmul.f32 -1.442695, %v1965_v30  ;;  %v10230_v30 = vld [vmem:[#allocation129_spill] sm:$0xff] }
 0x4cf   :  { %v2135_v7 = vpop.f32.mrf.mxu0  ;;  %v2206_v37 = vpop.f32.mrf.mxu1 }
 0x4d0   :  { %v2136_v10 = vadd.f32 %v2135_v7, %v10208_v9  ;;  %v2207_v2 = vadd.f32 %v2206_v37, %v10210_v63  ;;  %v1894_v37 = vadd.f32 %v1893_v62, %v6597_v8  ;;  %v10221_v62 = vld [vmem:[#allocation120_spill] sm:$0xff] }
 0x4d1   :  { %v2137_v6 = vpop.f32.mrf.mxu0  ;;  %v2208_v51 = vpop.f32.mrf.mxu1 }
 0x4d2   :  { %v4613_v13 = vmul.f32 -1.442695, %v2136_v10  ;;  %v2138_v31 = vadd.f32 %v2137_v6, %v10209_v60  ;;  %v4615_v5 = vmul.f32 -1.442695, %v2207_v2  ;;  %v2209_v22 = vadd.f32 %v2208_v51, %v10211_v23 }
 0x4d3   :  { %v2034_v2 = vadd.f32 %v2033_v11, %v1892_v59  ;;  %v2036_v51 = vadd.f32 %v2035_v36, %v1894_v37  ;;  %v10222_v11 = vld [vmem:[#allocation121_spill] sm:$0xff]  ;;  %v10223_v36 = vld [vmem:[#allocation122_spill] sm:$0xff]  ;;  %v10244_v59 = vld [vmem:[#allocation143_spill] sm:$0xff] }
 0x4d4   :  { %4783 = vpow2.f32 %v4613_v13  ;;  %v4614_v32 = vmul.f32 -1.442695, %v2138_v31  ;;  %v10246_v37 = vld [vmem:[#allocation145_spill] sm:$0xff] }
 0x4d6   :  { %4785 = vpow2.f32 %v4614_v32 }
 0x4d7   :  { %4787 = vpow2.f32 %v4615_v5  ;;  %v4612_v5 = vmul.f32 -1.442695, %v2034_v2  ;;  %v10248_v2 = vld [vmem:[#allocation147_spill] sm:$0xff] }
 0x4d8   :  { %4789 = vtanh.f32 %v2209_v22 }
 0x4e1   :  { %v4784_v53 = vpop.eup %4783 }
 0x4e2   :  { %v2220_v55 = vadd.f32 1.0, %v4784_v53  ;;  %v10224_v53 = vld [vmem:[#allocation123_spill] sm:$0xff] }
 0x4e3   :  { %v4786_v28 = vpop.eup %4785 }
 0x4e4   :  { %4791 = vrcp.f32 %v2220_v55  ;;  %v2221_v25 = vadd.f32 1.0, %v4786_v28  ;;  %v4788_v7 = vpop.eup %4787  ;;  %v10227_v55 = vld [vmem:[#allocation126_spill] sm:$0xff]  ;;  %v10228_v28 = vld [vmem:[#allocation127_spill] sm:$0xff] }
 0x4e5   :  { %v4790_v9 = vpop.eup %4789  ;;  %v2222_v13 = vadd.f32 1.0, %v4788_v7  ;;  %v10235_v7 = vld [vmem:[#allocation134_spill] sm:$0xff] }
 0x4e6   :  { %4793 = vrcp.f32 %v2221_v25  ;;  %v10231_v25 = vld [vmem:[#allocation130_spill] sm:$0xff] }
 0x4e7   :  { %4795 = vpow2.f32 %v4611_v19  ;;  %v10233_v19 = vld [vmem:[#allocation132_spill] sm:$0xff] }
 0x4e8   :  { %4797 = vpow2.f32 %v4610_v56  ;;  %v10234_v56 = vld [vmem:[#allocation133_spill] sm:$0xff] }
 0x4e9   :  { %4799 = vrcp.f32 %v2222_v13  ;;  %v10240_v13 = vld [vmem:[#allocation139_spill] sm:$0xff] }
 0x4f1   :  { %v4792_v10 = vpop.eup %4791 }
 0x4f2   :  { %v2231_v6 = vmul.f32 %v4792_v10, %v4790_v9  ;;  %v10236_v9 = vld [vmem:[#allocation135_spill] sm:$0xff]  ;;  %v10237_v10 = vld [vmem:[#allocation136_spill] sm:$0xff] }
 0x4f3   :  { %v4794_v58 = vpop.eup %4793 }
 0x4f4   :  { %v2230_v60 = vmul.f32 %v4794_v58, %v7031_v12  ;;  %v4796_v57 = vpop.eup %4795  ;;  %v10239_v58 = vld [vmem:[#allocation138_spill] sm:$0xff] }
 0x4f5   :  { %v4798_v61 = vpop.eup %4797  ;;  %v2048_v32 = vadd.f32 1.0, %v4796_v57  ;;  %v10242_v57 = vld [vmem:[#allocation141_spill] sm:$0xff] }
 0x4f6   :  { %v7419_v31 = vadd.f32 %v2231_v6, %v2230_v60  ;;  %v2047_v63 = vadd.f32 1.0, %v4798_v61  ;;  %v4800_v12 = vpop.eup %4799  ;;  %v10238_v6 = vld [vmem:[#allocation137_spill] sm:$0xff]  ;;  %v10241_v60 = vld [vmem:[#allocation140_spill] sm:$0xff]  ;;  %v10243_v61 = vld [vmem:[#allocation142_spill] sm:$0xff] }
 0x4f8   :  { %4801 = vtanh.f32 %v7419_v31 }
 0x4f9   :  { %4803 = vrcp.f32 %v2048_v32  ;;  %v10245_v32 = vld [vmem:[#allocation144_spill] sm:$0xff] }
 0x4fa   :  { %4805 = vrcp.f32 %v2047_v63  ;;  %v10247_v63 = vld [vmem:[#allocation146_spill] sm:$0xff] }
 0x4fb   :  { %4807 = vtanh.f32 %v2036_v51  ;;  %v10249_v51 = vld [vmem:[#allocation148_spill] sm:$0xff] }
 0x4fc   :  { %4809 = vpow2.f32 %v4612_v5 }
 0x505   :  { %v4802_v23 = vpop.eup %4801 }
 0x506   :  { %v7424_v22 = vmul.f32 %v4802_v23, %v4800_v12  ;;  %v4804_v3 = vpop.eup %4803  ;;  %v10250_v12 = vld [vmem:[#allocation149_spill] sm:$0xff]  ;;  %v10251_v23 = vld [vmem:[#allocation150_spill] sm:$0xff] }
 0x508   :  { %2300 = vmatmul.mubr.f32.vlgmr.msra.gmra.mxu0 %v7424_v22  ;;  %2371 = vmatmul.mubr.f32.vlgmr.msra.gmra.mxu1 %v7424_v22 }
 0x509   :  { %2378 = vmatpush1.msra.mxu0 %v7040_v52  ;;  %2449 = vmatpush1.msra.mxu1 %v7043_v40  ;;  %v4806_v52 = vpop.eup %4805  ;;  %v2057_v40 = vmul.f32 %v4804_v3, %v7101_v38  ;;  %v10252_v3 = vld [vmem:[#allocation151_spill] sm:$0xff] }
 0x50a   :  { %2379 = vmatprep.subr.mxu0 %v7046_v14  ;;  %2450 = vmatprep.subr.mxu1 %v7049_v35  ;;  %v4808_v14 = vpop.eup %4807  ;;  %v10212_v35 = vld [vmem:[#allocation111_spill] sm:$0xff] }
 0x50b   :  { %2380 = vmatpush1.msra.mxu0 %v7052_v46  ;;  %2451 = vmatpush1.msra.mxu1 %v7055_v1  ;;  %v2058_v46 = vmul.f32 %v4808_v14, %v4806_v52  ;;  %v10213_v1 = vld [vmem:[#allocation112_spill] sm:$0xff]  ;;  %v10254_v14 = vld [vmem:[#allocation153_spill] sm:$0xff] }
 0x50c   :  { %2381 = vmatprep.subr.mxu0 %v7058_v24  ;;  %2452 = vmatprep.subr.mxu1 %v7061_v18  ;;  %v10214_v24 = vld [vmem:[#allocation113_spill] sm:$0xff]  ;;  %v4810_v18 = vpop.eup %4809 }
 0x50d   :  { %2382 = vmatpush1.msra.mxu0 %v7064_v48  ;;  %2453 = vmatpush1.msra.mxu1 %v7067_v47  ;;  %v10215_v48 = vld [vmem:[#allocation114_spill] sm:$0xff]  ;;  %v10216_v47 = vld [vmem:[#allocation115_spill] sm:$0xff]  ;;  %v2049_v38 = vadd.f32 1.0, %v4810_v18 }
 0x50e   :  { %2383 = vmatprep.subr.mxu0 %v7070_v33  ;;  %2454 = vmatprep.subr.mxu1 %v7073_v16  ;;  %v7449_v33 = vadd.f32 %v2058_v46, %v2057_v40  ;;  %v10217_v16 = vld [vmem:[#allocation116_spill] sm:$0xff]  ;;  %v10259_v18 = vld [vmem:[#allocation158_spill] sm:$0xff] }
 0x50f   :  { %2384 = vmatpush1.msra.mxu0 %v7077_v45  ;;  %2455 = vmatpush1.msra.mxu1 %v7080_v49  ;;  %v10218_v45 = vld [vmem:[#allocation117_spill] sm:$0xff]  ;;  %v10219_v49 = vld [vmem:[#allocation118_spill] sm:$0xff]  ;;  %v10253_v40 = vld [vmem:[#allocation152_spill] sm:$0xff] }
 0x510   :  { %2385 = vmatprep.subr.mxu0 %v10212_v35  ;;  %2456 = vmatprep.subr.mxu1 %v7086_v39  ;;  %v10220_v39 = vld [vmem:[#allocation119_spill] sm:$0xff]  ;;  %4811 = vtanh.f32 %v7449_v33  ;;  %v10255_v35 = vld [vmem:[#allocation154_spill] sm:$0xff] }
 0x511   :  { %2386 = vmatpush1.msra.mxu0 %v10213_v1  ;;  %2457 = vmatpush1.msra.mxu1 %v10214_v24  ;;  %4813 = vrcp.f32 %v2049_v38  ;;  %v10256_v1 = vld [vmem:[#allocation155_spill] sm:$0xff]  ;;  %v10257_v24 = vld [vmem:[#allocation156_spill] sm:$0xff]  ;;  %v10266_v38 = vld [vmem:[#allocation165_spill] sm:$0xff] }
 0x512   :  { %2387 = vmatprep.subr.mxu0 %v10215_v48  ;;  %2458 = vmatprep.subr.mxu1 %v10216_v47  ;;  %v10260_v48 = vld [vmem:[#allocation159_spill] sm:$0xff]  ;;  %v10261_v47 = vld [vmem:[#allocation160_spill] sm:$0xff] }
 0x513   :  { %2388 = vmatpush1.msra.mxu0 %v7103_v15  ;;  %2459 = vmatpush1.msra.mxu1 %v10217_v16  ;;  %v10225_v15 = vld [vmem:[#allocation124_spill] sm:$0xff]  ;;  %v10262_v16 = vld [vmem:[#allocation161_spill] sm:$0xff] }
 0x514   :  { %2389 = vmatprep.subr.mxu0 %v10218_v45  ;;  %2460 = vmatprep.subr.mxu1 %v10219_v49  ;;  %v10263_v45 = vld [vmem:[#allocation162_spill] sm:$0xff]  ;;  %v10265_v49 = vld [vmem:[#allocation164_spill] sm:$0xff] }
 0x515   :  { %2390 = vmatpush1.msra.mxu0 %v10220_v39  ;;  %2461 = vmatpush1.msra.mxu1 %v10221_v62  ;;  %v10267_v39 = vld [vmem:[#allocation166_spill] sm:$0xff]  ;;  %v10268_v62 = vld [vmem:[#allocation167_spill] sm:$0xff] }
 0x516   :  { %2391 = vmatprep.subr.mxu0 %v10222_v11  ;;  %2462 = vmatprep.subr.mxu1 %v10223_v36  ;;  %v10269_v11 = vld [vmem:[#allocation168_spill] sm:$0xff]  ;;  %v10270_v36 = vld [vmem:[#allocation169_spill] sm:$0xff] }
 0x517   :  { %2392 = vmatpush1.msra.mxu0 %v10224_v53  ;;  %2463 = vmatpush1.msra.mxu1 %v10225_v15  ;;  %v10271_v53 = vld [vmem:[#allocation170_spill] sm:$0xff]  ;;  %v7518_v15 = vld [vmem:[#allocation4 + $0x140] sm:$0xff] }
 0x518   :  { %2393 = vmatprep.subr.mxu0 %v10226_v54  ;;  %2464 = vmatprep.subr.mxu1 %v10227_v55  ;;  %v7521_v54 = vld [vmem:[#allocation4 + $0x150] sm:$0xff]  ;;  %v7524_v55 = vld [vmem:[#allocation4 + $0x128] sm:$0xff] }
 0x519   :  { %2394 = vmatpush1.msra.mxu0 %v10228_v28  ;;  %2465 = vmatpush1.msra.mxu1 %v10229_v26  ;;  %v7545_v28 = vld [vmem:[#allocation4 + $0x110] sm:$0xff]  ;;  %v7548_v26 = vld [vmem:[#allocation4 + $0xe8] sm:$0xff] }
 0x51a   :  { %2395 = vmatprep.subr.mxu0 %v10230_v30  ;;  %2466 = vmatprep.subr.mxu1 %v10231_v25  ;;  %v7551_v30 = vld [vmem:[#allocation4 + $0xf8] sm:$0xff]  ;;  %v7554_v25 = vld [vmem:[#allocation4 + $0xe0] sm:$0xff] }
 0x51b   :  { %2396 = vmatpush1.msra.mxu0 %v10232_v29  ;;  %2467 = vmatpush1.msra.mxu1 %v10233_v19  ;;  %v7557_v29 = vld [vmem:[#allocation4 + $0xf0] sm:$0xff]  ;;  %v7560_v19 = vld [vmem:[#allocation4 + $0xc8] sm:$0xff] }
 0x51c   :  { %2397 = vmatprep.subr.mxu0 %v10234_v56  ;;  %2468 = vmatprep.subr.mxu1 %v10235_v7  ;;  %v7563_v56 = vld [vmem:[#allocation4 + $0xd8] sm:$0xff]  ;;  %v7566_v7 = vld [vmem:[#allocation4 + $0xc0] sm:$0xff] }
 0x51d   :  { %2398 = vmatpush1.msra.mxu0 %v10236_v9  ;;  %2469 = vmatpush1.msra.mxu1 %v10237_v10  ;;  %v4812_v5 = vpop.eup %4811  ;;  %v7569_v9 = vld [vmem:[#allocation4 + $0xd0] sm:$0xff]  ;;  %v7572_v10 = vld [vmem:[#allocation4 + $0xa8] sm:$0xff] }
 0x51e   :  { %2399 = vmatprep.subr.mxu0 %v10238_v6  ;;  %2470 = vmatprep.subr.mxu1 %v10239_v58  ;;  %v4814_v52 = vpop.eup %4813  ;;  %v7575_v6 = vld [vmem:[#allocation4 + $0xb8] sm:$0xff]  ;;  %v7578_v58 = vld [vmem:[#allocation4 + $0xa0] sm:$0xff] }
 0x51f   :  { %2400 = vmatpush1.msra.mxu0 %v10240_v13  ;;  %2471 = vmatpush1.msra.mxu1 %v10241_v60  ;;  %v2061_v46 = vmul.f32 %v4814_v52, %v4812_v5  ;;  %v7581_v13 = vld [vmem:[#allocation4 + $0xb0] sm:$0xff]  ;;  %v7584_v60 = vld [vmem:[#allocation4 + $0x88] sm:$0xff]  ;;  %v7611_v5 = vld [vmem:[#allocation4 + $0x58] sm:$0xff] }
 0x520   :  { %2401 = vmatprep.subr.mxu0 %v10242_v57  ;;  %2472 = vmatprep.subr.mxu1 %v10243_v61  ;;  %v7587_v57 = vld [vmem:[#allocation4 + $0x98] sm:$0xff]  ;;  %v7590_v61 = vld [vmem:[#allocation4 + $0x80] sm:$0xff] }
 0x521   :  { %2402 = vmatpush1.msra.mxu0 %v10244_v59  ;;  %2473 = vmatpush1.msra.mxu1 %v10245_v32  ;;  %v7593_v59 = vld [vmem:[#allocation4 + $0x90] sm:$0xff]  ;;  %v7596_v32 = vld [vmem:[#allocation4 + $0x68] sm:$0xff]  ;;  %v7623_v52 = vld [vmem:[#allocation4 + $0x38] sm:$0xff] }
 0x522   :  { %2403 = vmatprep.subr.mxu0 %v10246_v37  ;;  %2474 = vmatprep.subr.mxu1 %v10247_v63  ;;  %v7599_v37 = vld [vmem:[#allocation4 + $0x78] sm:$0xff]  ;;  %v7602_v63 = vld [vmem:[#allocation4 + $0x60] sm:$0xff]  ;;  %10275 = vst [vmem:[#allocation85_spill] sm:$0xff] %v7623_v52 }
 0x523   :  { %2404 = vmatpush1.msra.mxu0 %v10248_v2  ;;  %2475 = vmatpush1.msra.mxu1 %v10249_v51  ;;  %v7605_v2 = vld [vmem:[#allocation4 + $0x70] sm:$0xff]  ;;  %v7608_v51 = vld [vmem:[#allocation4 + $0x48] sm:$0xff] }
 0x524   :  { %2405 = vmatprep.subr.mxu0 %v10250_v12  ;;  %2476 = vmatprep.subr.mxu1 %v10251_v23  ;;  %v7614_v12 = vld [vmem:[#allocation4 + $0x40] sm:$0xff]  ;;  %v7617_v23 = vld [vmem:[#allocation4 + $0x50] sm:$0xff] }
 0x525   :  { %2406 = vmatpush1.msra.mxu0 %v10252_v3  ;;  %2477 = vmatpush1.msra.mxu1 %v7215_v42  ;;  %v10258_v42 = vld [vmem:[#allocation157_spill] sm:$0xff]  ;;  %10272 = vst [vmem:[#allocation82_spill] sm:$0xff] %v7614_v12  ;;  %10273 = vst [vmem:[#allocation84_spill] sm:$0xff] %v7617_v23  ;;  %v7620_v3 = vld [vmem:[#allocation4 + $0x28] sm:$0xff] }
 0x526   :  { %2407 = vmatprep.subr.mxu0 %v10253_v40  ;;  %2478 = vmatprep.subr.mxu1 %v10254_v14  ;;  %10274 = vst [vmem:[#allocation83_spill] sm:$0xff] %v7620_v3  ;;  %v7626_v40 = vld [vmem:[#allocation4 + $0x20] sm:$0xff]  ;;  %v7629_v14 = vld [vmem:[#allocation4 + $0x30] sm:$0xff] }
 0x527   :  { %2408 = vmatpush1.msra.mxu0 %v10255_v35  ;;  %2441 = vmatprep.mubr.f32.mxu0 %v9835_v27  ;;  %10276 = vst [vmem:[#allocation11_spill] sm:$0xff] %v7626_v40  ;;  %10277 = vst [vmem:[#allocation12_spill] sm:$0xff] %v7629_v14  ;;  %v7632_v35 = vld [vmem:[#allocation4 + $0x8] sm:$0xff] }
 0x528   :  { %2479 = vmatpush1.msra.mxu1 %v7228_v17  ;;  %2512 = vmatprep.mubr.f32.mxu1 %v9835_v27  ;;  %v10264_v17 = vld [vmem:[#allocation163_spill] sm:$0xff]  ;;  %10278 = vst [vmem:[#allocation13_spill] sm:$0xff] %v7632_v35 }
 0x529   :  { %2442 = vmatmul.mubr.f32.vlgmr.msra.gmra.mxu0 %v2061_v46  ;;  %2513 = vmatmul.mubr.f32.vlgmr.msra.gmra.mxu1 %v2061_v46  ;;  %v7635_v46 = vld [vmem:[#allocation4 + $0x18] sm:$0xff] }
 0x52a   :  { %2550 = vmatprep.subr.mxu0 %v10256_v1  ;;  %2621 = vmatprep.subr.mxu1 %v10257_v24  ;;  %10279 = vst [vmem:[#allocation14_spill] sm:$0xff] %v7635_v46  ;;  %v7638_v1 = vld [vmem:[#allocation4] sm:$0xff]  ;;  %v7642_v24 = vld [vmem:[#allocation4 + $0x10] sm:$0xff] }
 0x52b   :  { %2551 = vmatpush1.msra.mxu0 %v10258_v42  ;;  %2622 = vmatpush1.msra.mxu1 %v10259_v18  ;;  %10280 = vst [vmem:[#allocation15_spill] sm:$0xff] %v7638_v1  ;;  %10281 = vst [vmem:[#allocation16_spill] sm:$0xff] %v7642_v24  ;;  %v7648_v42 = vld [vmem:[#allocation6 + $0x1e8] sm:$0xff]  ;;  %v7651_v18 = vld [vmem:[#allocation6 + $0x1f8] sm:$0xff] }
 0x52c   :  { %2552 = vmatprep.subr.mxu0 %v10260_v48  ;;  %2623 = vmatprep.subr.mxu1 %v10261_v47  ;;  %10282 = vst [vmem:[#allocation17_spill] sm:$0xff] %v7648_v42  ;;  %10283 = vst [vmem:[#allocation18_spill] sm:$0xff] %v7651_v18  ;;  %v7654_v48 = vld [vmem:[#allocation6 + $0x1e0] sm:$0xff]  ;;  %v7657_v47 = vld [vmem:[#allocation6 + $0x1f0] sm:$0xff] }
 0x52d   :  { %2553 = vmatpush1.msra.mxu0 %v10262_v16  ;;  %2624 = vmatpush1.msra.mxu1 %v10263_v45  ;;  %10284 = vst [vmem:[#allocation19_spill] sm:$0xff] %v7654_v48  ;;  %10285 = vst [vmem:[#allocation20_spill] sm:$0xff] %v7657_v47  ;;  %v7660_v16 = vld [vmem:[#allocation6 + $0x1c8] sm:$0xff]  ;;  %v7666_v45 = vld [vmem:[#allocation6 + $0x1c0] sm:$0xff] }
 0x52e   :  { %2554 = vmatprep.subr.mxu0 %v10264_v17  ;;  %2625 = vmatprep.subr.mxu1 %v10265_v49  ;;  %10286 = vst [vmem:[#allocation21_spill] sm:$0xff] %v7660_v16  ;;  %10288 = vst [vmem:[#allocation23_spill] sm:$0xff] %v7666_v45  ;;  %v7669_v17 = vld [vmem:[#allocation6 + $0x1d0] sm:$0xff]  ;;  %v7672_v49 = vld [vmem:[#allocation6 + $0x1a8] sm:$0xff] }
 0x52f   :  { %2555 = vmatpush1.msra.mxu0 %v10266_v38  ;;  %2626 = vmatpush1.msra.mxu1 %v10267_v39  ;;  %10289 = vst [vmem:[#allocation24_spill] sm:$0xff] %v7669_v17  ;;  %10290 = vst [vmem:[#allocation25_spill] sm:$0xff] %v7672_v49  ;;  %v7675_v38 = vld [vmem:[#allocation6 + $0x1b8] sm:$0xff]  ;;  %v7678_v39 = vld [vmem:[#allocation6 + $0x1a0] sm:$0xff] }
 0x530   :  { %2556 = vmatprep.subr.mxu0 %v10268_v62  ;;  %2627 = vmatprep.subr.mxu1 %v10269_v11  ;;  %10291 = vst [vmem:[#allocation26_spill] sm:$0xff] %v7675_v38  ;;  %10292 = vst [vmem:[#allocation27_spill] sm:$0xff] %v7678_v39  ;;  %v7681_v62 = vld [vmem:[#allocation6 + $0x1b0] sm:$0xff]  ;;  %v7684_v11 = vld [vmem:[#allocation6 + $0x188] sm:$0xff] }
 0x531   :  { %2557 = vmatpush1.msra.mxu0 %v10270_v36  ;;  %2628 = vmatpush1.msra.mxu1 %v10271_v53  ;;  %10293 = vst [vmem:[#allocation28_spill] sm:$0xff] %v7681_v62  ;;  %10294 = vst [vmem:[#allocation29_spill] sm:$0xff] %v7684_v11  ;;  %v7687_v36 = vld [vmem:[#allocation6 + $0x198] sm:$0xff]  ;;  %v7690_v53 = vld [vmem:[#allocation6 + $0x180] sm:$0xff] }
 0x532   :  { %2558 = vmatprep.subr.mxu0 %v7280_v21  ;;  %2629 = vmatprep.subr.mxu1 %v7283_v50  ;;  %v7527_v21 = vld [vmem:[#allocation4 + $0x138] sm:$0xff]  ;;  %v7542_v50 = vld [vmem:[#allocation4 + $0x100] sm:$0xff]  ;;  %10295 = vst [vmem:[#allocation30_spill] sm:$0xff] %v7687_v36  ;;  %10296 = vst [vmem:[#allocation31_spill] sm:$0xff] %v7690_v53 }
 0x533   :  { %2559 = vmatpush1.msra.mxu0 %v7286_v43  ;;  %2630 = vmatpush1.msra.mxu1 %v7289_v4  ;;  %v7530_v43 = vld [vmem:[#allocation4 + $0x120] sm:$0xff]  ;;  %v7536_v4 = vld [vmem:[#allocation4 + $0x108] sm:$0xff] }
 0x534   :  { %2560 = vmatprep.subr.mxu0 %v7292_v44  ;;  %2631 = vmatprep.subr.mxu1 %v7295_v34  ;;  %v7533_v44 = vld [vmem:[#allocation4 + $0x130] sm:$0xff]  ;;  %v7539_v34 = vld [vmem:[#allocation4 + $0x118] sm:$0xff] }
 0x535   :  { %2561 = vmatpush1.msra.mxu0 %v7518_v15  ;;  %2632 = vmatpush1.msra.mxu1 %v7521_v54 }
 0x536   :  { %2562 = vmatprep.subr.mxu0 %v7524_v55  ;;  %2633 = vmatprep.subr.mxu1 %v7527_v21 }
 0x537   :  { %2563 = vmatpush1.msra.mxu0 %v7530_v43  ;;  %2634 = vmatpush1.msra.mxu1 %v7533_v44 }
 0x538   :  { %2564 = vmatprep.subr.mxu0 %v7536_v4  ;;  %2635 = vmatprep.subr.mxu1 %v7539_v34 }
 0x539   :  { %2565 = vmatpush1.msra.mxu0 %v7542_v50  ;;  %2636 = vmatpush1.msra.mxu1 %v7545_v28 }
 0x53a   :  { %2566 = vmatprep.subr.mxu0 %v7548_v26  ;;  %2637 = vmatprep.subr.mxu1 %v7551_v30 }
 0x53b   :  { %2567 = vmatpush1.msra.mxu0 %v7554_v25  ;;  %2638 = vmatpush1.msra.mxu1 %v7557_v29 }
 0x53c   :  { %2568 = vmatprep.subr.mxu0 %v7560_v19  ;;  %2639 = vmatprep.subr.mxu1 %v7563_v56 }
 0x53d   :  { %2569 = vmatpush1.msra.mxu0 %v7566_v7  ;;  %2640 = vmatpush1.msra.mxu1 %v7569_v9 }
 0x53e   :  { %2570 = vmatprep.subr.mxu0 %v7572_v10  ;;  %2641 = vmatprep.subr.mxu1 %v7575_v6 }
 0x53f   :  { %2571 = vmatpush1.msra.mxu0 %v7578_v58  ;;  %2642 = vmatpush1.msra.mxu1 %v7581_v13 }
 0x540   :  { %2572 = vmatprep.subr.mxu0 %v7584_v60  ;;  %2643 = vmatprep.subr.mxu1 %v7587_v57 }
 0x541   :  { %2573 = vmatpush1.msra.mxu0 %v7590_v61  ;;  %2644 = vmatpush1.msra.mxu1 %v7593_v59 }
 0x542   :  { %2574 = vmatprep.subr.mxu0 %v7596_v32  ;;  %2645 = vmatprep.subr.mxu1 %v7599_v37 }
 0x543   :  { %2575 = vmatpush1.msra.mxu0 %v7602_v63  ;;  %2646 = vmatpush1.msra.mxu1 %v7605_v2 }
 0x544   :  { %2576 = vmatprep.subr.mxu0 %v7608_v51  ;;  %2647 = vmatprep.subr.mxu1 %v7611_v5 }
 0x545   :  { %2577 = vmatpush1.msra.mxu0 %v7614_v12  ;;  %2648 = vmatpush1.msra.mxu1 %v7617_v23 }
 0x546   :  { %2578 = vmatprep.subr.mxu0 %v7620_v3  ;;  %2649 = vmatprep.subr.mxu1 %v7623_v52  ;;  %v10351_v52 = vld [vmem:[#allocation93_spill] sm:$0xff] }
 0x547   :  { %2579 = vmatpush1.msra.mxu0 %v7626_v40  ;;  %2650 = vmatpush1.msra.mxu1 %v7629_v14 }
 0x548   :  { %2580 = vmatprep.subr.mxu0 %v7632_v35  ;;  %2651 = vmatprep.subr.mxu1 %v7635_v46 }
 0x549   :  { %2581 = vmatpush1.msra.mxu0 %v7638_v1  ;;  %2614 = vmatprep.mubr.f32.mxu0 %v9835_v27 }
 0x54a   :  { %2652 = vmatpush1.msra.mxu1 %v7642_v24  ;;  %2685 = vmatprep.mubr.f32.mxu1 %v9835_v27 }
 0x54b   :  { %2615 = vmatmul.mubr.f32.vlgmr.msra.gmra.mxu0 %v7424_v22  ;;  %2686 = vmatmul.mubr.f32.vlgmr.msra.gmra.mxu1 %v7424_v22  ;;  %v7663_v22 = vld [vmem:[#allocation6 + $0x1d8] sm:$0xff] }
 0x54c   :  { %2716 = vmatprep.subr.mxu0 %v7648_v42  ;;  %2787 = vmatprep.subr.mxu1 %v7651_v18  ;;  %10287 = vst [vmem:[#allocation22_spill] sm:$0xff] %v7663_v22  ;;  %v10349_v42 = vld [vmem:[#allocation92_spill] sm:$0xff] }
 0x54d   :  { %2717 = vmatpush1.msra.mxu0 %v7654_v48  ;;  %2788 = vmatpush1.msra.mxu1 %v7657_v47 }
 0x54e   :  { %2718 = vmatprep.subr.mxu0 %v7660_v16  ;;  %2789 = vmatprep.subr.mxu1 %v7663_v22 }
 0x54f   :  { %2719 = vmatpush1.msra.mxu0 %v7666_v45  ;;  %2790 = vmatpush1.msra.mxu1 %v7669_v17 }
 0x550   :  { %2720 = vmatprep.subr.mxu0 %v7672_v49  ;;  %2791 = vmatprep.subr.mxu1 %v7675_v38  ;;  %v7693_v38 = vld [vmem:[#allocation6 + $0x190] sm:$0xff] }
 0x551   :  { %2721 = vmatpush1.msra.mxu0 %v7678_v39  ;;  %2792 = vmatpush1.msra.mxu1 %v7681_v62  ;;  %10297 = vst [vmem:[#allocation32_spill] sm:$0xff] %v7693_v38  ;;  %v7696_v39 = vld [vmem:[#allocation6 + $0x168] sm:$0xff]  ;;  %v7699_v62 = vld [vmem:[#allocation6 + $0x178] sm:$0xff] }
 0x552   :  { %2722 = vmatprep.subr.mxu0 %v7684_v11  ;;  %2793 = vmatprep.subr.mxu1 %v7687_v36  ;;  %10298 = vst [vmem:[#allocation33_spill] sm:$0xff] %v7696_v39  ;;  %10299 = vst [vmem:[#allocation34_spill] sm:$0xff] %v7699_v62  ;;  %v7702_v11 = vld [vmem:[#allocation6 + $0x160] sm:$0xff]  ;;  %v7705_v36 = vld [vmem:[#allocation6 + $0x170] sm:$0xff] }
 0x553   :  { %2723 = vmatpush1.msra.mxu0 %v7690_v53  ;;  %2794 = vmatpush1.msra.mxu1 %v7693_v38  ;;  %10300 = vst [vmem:[#allocation35_spill] sm:$0xff] %v7702_v11  ;;  %10301 = vst [vmem:[#allocation36_spill] sm:$0xff] %v7705_v36  ;;  %v7708_v53 = vld [vmem:[#allocation6 + $0x148] sm:$0xff]  ;;  %v7711_v38 = vld [vmem:[#allocation6 + $0x158] sm:$0xff] }
 0x554   :  { %2724 = vmatprep.subr.mxu0 %v7696_v39  ;;  %2795 = vmatprep.subr.mxu1 %v7699_v62  ;;  %10302 = vst [vmem:[#allocation37_spill] sm:$0xff] %v7708_v53  ;;  %10303 = vst [vmem:[#allocation38_spill] sm:$0xff] %v7711_v38  ;;  %v7714_v39 = vld [vmem:[#allocation6 + $0x140] sm:$0xff]  ;;  %v7717_v62 = vld [vmem:[#allocation6 + $0x150] sm:$0xff] }
 0x555   :  { %2725 = vmatpush1.msra.mxu0 %v7702_v11  ;;  %2796 = vmatpush1.msra.mxu1 %v7705_v36  ;;  %10304 = vst [vmem:[#allocation39_spill] sm:$0xff] %v7714_v39  ;;  %10305 = vst [vmem:[#allocation40_spill] sm:$0xff] %v7717_v62  ;;  %v7720_v11 = vld [vmem:[#allocation6 + $0x128] sm:$0xff]  ;;  %v7723_v36 = vld [vmem:[#allocation6 + $0x138] sm:$0xff] }
 0x556   :  { %2726 = vmatprep.subr.mxu0 %v7708_v53  ;;  %2797 = vmatprep.subr.mxu1 %v7711_v38  ;;  %10306 = vst [vmem:[#allocation41_spill] sm:$0xff] %v7720_v11  ;;  %10307 = vst [vmem:[#allocation42_spill] sm:$0xff] %v7723_v36  ;;  %v7726_v53 = vld [vmem:[#allocation6 + $0x120] sm:$0xff]  ;;  %v7729_v38 = vld [vmem:[#allocation6 + $0x130] sm:$0xff] }
 0x557   :  { %2727 = vmatpush1.msra.mxu0 %v7714_v39  ;;  %2798 = vmatpush1.msra.mxu1 %v7717_v62  ;;  %10308 = vst [vmem:[#allocation43_spill] sm:$0xff] %v7726_v53  ;;  %10309 = vst [vmem:[#allocation44_spill] sm:$0xff] %v7729_v38  ;;  %v7732_v39 = vld [vmem:[#allocation6 + $0x108] sm:$0xff]  ;;  %v7735_v62 = vld [vmem:[#allocation6 + $0x118] sm:$0xff] }
 0x558   :  { %2728 = vmatprep.subr.mxu0 %v7720_v11  ;;  %2799 = vmatprep.subr.mxu1 %v7723_v36  ;;  %10310 = vst [vmem:[#allocation45_spill] sm:$0xff] %v7732_v39  ;;  %10311 = vst [vmem:[#allocation46_spill] sm:$0xff] %v7735_v62  ;;  %v7738_v11 = vld [vmem:[#allocation6 + $0x100] sm:$0xff]  ;;  %v7741_v36 = vld [vmem:[#allocation6 + $0x110] sm:$0xff] }
 0x559   :  { %2729 = vmatpush1.msra.mxu0 %v7726_v53  ;;  %2800 = vmatpush1.msra.mxu1 %v7729_v38  ;;  %10312 = vst [vmem:[#allocation47_spill] sm:$0xff] %v7738_v11  ;;  %10313 = vst [vmem:[#allocation48_spill] sm:$0xff] %v7741_v36  ;;  %v7744_v53 = vld [vmem:[#allocation6 + $0xe8] sm:$0xff]  ;;  %v7747_v38 = vld [vmem:[#allocation6 + $0xf8] sm:$0xff] }
 0x55a   :  { %2730 = vmatprep.subr.mxu0 %v7732_v39  ;;  %2801 = vmatprep.subr.mxu1 %v7735_v62  ;;  %10314 = vst [vmem:[#allocation49_spill] sm:$0xff] %v7744_v53  ;;  %10315 = vst [vmem:[#allocation50_spill] sm:$0xff] %v7747_v38  ;;  %v7750_v39 = vld [vmem:[#allocation6 + $0xe0] sm:$0xff]  ;;  %v7753_v62 = vld [vmem:[#allocation6 + $0xf0] sm:$0xff] }
 0x55b   :  { %2731 = vmatpush1.msra.mxu0 %v7738_v11  ;;  %2802 = vmatpush1.msra.mxu1 %v7741_v36  ;;  %10316 = vst [vmem:[#allocation51_spill] sm:$0xff] %v7750_v39  ;;  %10317 = vst [vmem:[#allocation52_spill] sm:$0xff] %v7753_v62  ;;  %v7756_v11 = vld [vmem:[#allocation6 + $0xc8] sm:$0xff]  ;;  %v7759_v36 = vld [vmem:[#allocation6 + $0xd8] sm:$0xff] }
 0x55c   :  { %2732 = vmatprep.subr.mxu0 %v7744_v53  ;;  %2803 = vmatprep.subr.mxu1 %v7747_v38  ;;  %10318 = vst [vmem:[#allocation53_spill] sm:$0xff] %v7756_v11  ;;  %10319 = vst [vmem:[#allocation54_spill] sm:$0xff] %v7759_v36  ;;  %v7762_v53 = vld [vmem:[#allocation6 + $0xc0] sm:$0xff]  ;;  %v7765_v38 = vld [vmem:[#allocation6 + $0xd0] sm:$0xff] }
 0x55d   :  { %2733 = vmatpush1.msra.mxu0 %v7750_v39  ;;  %2804 = vmatpush1.msra.mxu1 %v7753_v62  ;;  %10320 = vst [vmem:[#allocation55_spill] sm:$0xff] %v7762_v53  ;;  %10321 = vst [vmem:[#allocation56_spill] sm:$0xff] %v7765_v38  ;;  %v7768_v39 = vld [vmem:[#allocation6 + $0xa8] sm:$0xff]  ;;  %v7771_v62 = vld [vmem:[#allocation6 + $0xb8] sm:$0xff] }
 0x55e   :  { %2734 = vmatprep.subr.mxu0 %v7756_v11  ;;  %2805 = vmatprep.subr.mxu1 %v7759_v36  ;;  %10322 = vst [vmem:[#allocation57_spill] sm:$0xff] %v7768_v39  ;;  %10323 = vst [vmem:[#allocation58_spill] sm:$0xff] %v7771_v62  ;;  %v7774_v11 = vld [vmem:[#allocation6 + $0xa0] sm:$0xff]  ;;  %v7777_v36 = vld [vmem:[#allocation6 + $0xb0] sm:$0xff] }
 0x55f   :  { %2735 = vmatpush1.msra.mxu0 %v7762_v53  ;;  %2806 = vmatpush1.msra.mxu1 %v7765_v38  ;;  %10324 = vst [vmem:[#allocation59_spill] sm:$0xff] %v7774_v11  ;;  %10325 = vst [vmem:[#allocation60_spill] sm:$0xff] %v7777_v36  ;;  %v7780_v53 = vld [vmem:[#allocation6 + $0x88] sm:$0xff]  ;;  %v7783_v38 = vld [vmem:[#allocation6 + $0x98] sm:$0xff] }
 0x560   :  { %2736 = vmatprep.subr.mxu0 %v7768_v39  ;;  %2807 = vmatprep.subr.mxu1 %v7771_v62  ;;  %10326 = vst [vmem:[#allocation61_spill] sm:$0xff] %v7780_v53  ;;  %10327 = vst [vmem:[#allocation62_spill] sm:$0xff] %v7783_v38  ;;  %v7786_v39 = vld [vmem:[#allocation6 + $0x80] sm:$0xff]  ;;  %v7789_v62 = vld [vmem:[#allocation6 + $0x90] sm:$0xff] }
 0x561   :  { %2737 = vmatpush1.msra.mxu0 %v7774_v11  ;;  %2808 = vmatpush1.msra.mxu1 %v7777_v36  ;;  %10328 = vst [vmem:[#allocation63_spill] sm:$0xff] %v7786_v39  ;;  %10329 = vst [vmem:[#allocation64_spill] sm:$0xff] %v7789_v62  ;;  %v7792_v11 = vld [vmem:[#allocation6 + $0x68] sm:$0xff]  ;;  %v7795_v36 = vld [vmem:[#allocation6 + $0x78] sm:$0xff] }
 0x562   :  { %2738 = vmatprep.subr.mxu0 %v7780_v53  ;;  %2809 = vmatprep.subr.mxu1 %v7783_v38  ;;  %10330 = vst [vmem:[#allocation65_spill] sm:$0xff] %v7792_v11  ;;  %10331 = vst [vmem:[#allocation66_spill] sm:$0xff] %v7795_v36  ;;  %v7798_v53 = vld [vmem:[#allocation6 + $0x60] sm:$0xff]  ;;  %v7801_v38 = vld [vmem:[#allocation6 + $0x70] sm:$0xff] }
 0x563   :  { %2739 = vmatpush1.msra.mxu0 %v7786_v39  ;;  %2810 = vmatpush1.msra.mxu1 %v7789_v62  ;;  %10332 = vst [vmem:[#allocation67_spill] sm:$0xff] %v7798_v53  ;;  %10333 = vst [vmem:[#allocation68_spill] sm:$0xff] %v7801_v38  ;;  %v7804_v39 = vld [vmem:[#allocation6 + $0x48] sm:$0xff]  ;;  %v7807_v62 = vld [vmem:[#allocation6 + $0x58] sm:$0xff] }
 0x564   :  { %2740 = vmatprep.subr.mxu0 %v7792_v11  ;;  %2811 = vmatprep.subr.mxu1 %v7795_v36  ;;  %10334 = vst [vmem:[#allocation69_spill] sm:$0xff] %v7804_v39  ;;  %10335 = vst [vmem:[#allocation70_spill] sm:$0xff] %v7807_v62  ;;  %v7810_v11 = vld [vmem:[#allocation6 + $0x40] sm:$0xff]  ;;  %v7813_v36 = vld [vmem:[#allocation6 + $0x50] sm:$0xff] }
 0x565   :  { %2741 = vmatpush1.msra.mxu0 %v7798_v53  ;;  %2812 = vmatpush1.msra.mxu1 %v7801_v38  ;;  %10336 = vst [vmem:[#allocation71_spill] sm:$0xff] %v7810_v11  ;;  %10337 = vst [vmem:[#allocation72_spill] sm:$0xff] %v7813_v36  ;;  %v7816_v53 = vld [vmem:[#allocation6 + $0x28] sm:$0xff]  ;;  %v7819_v38 = vld [vmem:[#allocation6 + $0x38] sm:$0xff] }
 0x566   :  { %2742 = vmatprep.subr.mxu0 %v7804_v39  ;;  %2813 = vmatprep.subr.mxu1 %v7807_v62  ;;  %10338 = vst [vmem:[#allocation73_spill] sm:$0xff] %v7816_v53  ;;  %10339 = vst [vmem:[#allocation74_spill] sm:$0xff] %v7819_v38  ;;  %v7822_v39 = vld [vmem:[#allocation6 + $0x20] sm:$0xff]  ;;  %v7825_v62 = vld [vmem:[#allocation6 + $0x30] sm:$0xff] }
 0x567   :  { %2743 = vmatpush1.msra.mxu0 %v7810_v11  ;;  %2814 = vmatpush1.msra.mxu1 %v7813_v36  ;;  %10340 = vst [vmem:[#allocation75_spill] sm:$0xff] %v7822_v39  ;;  %10341 = vst [vmem:[#allocation76_spill] sm:$0xff] %v7825_v62  ;;  %v7828_v11 = vld [vmem:[#allocation6 + $0x8] sm:$0xff]  ;;  %v7831_v36 = vld [vmem:[#allocation6 + $0x18] sm:$0xff] }
 0x568   :  { %2744 = vmatprep.subr.mxu0 %v7816_v53  ;;  %2815 = vmatprep.subr.mxu1 %v7819_v38  ;;  %10342 = vst [vmem:[#allocation77_spill] sm:$0xff] %v7828_v11  ;;  %10343 = vst [vmem:[#allocation80_spill] sm:$0xff] %v7831_v36  ;;  %v7834_v53 = vld [vmem:[#allocation6] sm:$0xff]  ;;  %v7837_v38 = vld [vmem:[#allocation6 + $0x10] sm:$0xff] }
 0x569   :  { %2745 = vmatpush1.msra.mxu0 %v7822_v39  ;;  %2816 = vmatpush1.msra.mxu1 %v7825_v62  ;;  %10344 = vst [vmem:[#allocation79_spill] sm:$0xff] %v7834_v53  ;;  %10345 = vst [vmem:[#allocation78_spill] sm:$0xff] %v7837_v38  ;;  %v7842_v62 = vld [vmem:[#allocation8 + $0x1e8] sm:$0xff] }
 0x56a   :  { %2746 = vmatprep.subr.mxu0 %v7828_v11  ;;  %2817 = vmatprep.subr.mxu1 %v7831_v36  ;;  %10346 = vst [vmem:[#allocation81_spill] sm:$0xff] %v7842_v62  ;;  %v7845_v11 = vld [vmem:[#allocation8 + $0x1f8] sm:$0xff] }
 0x56b   :  { %2747 = vmatpush1.msra.mxu0 %v7834_v53  ;;  %2818 = vmatpush1.msra.mxu1 %v7837_v38  ;;  %10347 = vst [vmem:[#allocation106_spill] sm:$0xff] %v7845_v11  ;;  %v10348_v38 = vld [vmem:[#allocation90_spill] sm:$0xff] }
 0x56c   :  { %2780 = vmatprep.mubr.f32.mxu0 %v9835_v27  ;;  %2851 = vmatprep.mubr.f32.mxu1 %v9835_v27 }
 0x56d   :  { %2858 = vmatprep.subr.mxu0 %v7842_v62  ;;  %2929 = vmatprep.subr.mxu1 %v7845_v11  ;;  %v10350_v11 = vld [vmem:[#allocation91_spill] sm:$0xff] }
 0x5c8   :  { %v2301_v36 = vpop.f32.mrf.mxu0  ;;  %v2372_v53 = vpop.f32.mrf.mxu1 }
 0x5ca   :  { %v2303_v39 = vpop.f32.mrf.mxu0  ;;  %v2374_v45 = vpop.f32.mrf.mxu1 }
 0x5cb   :  { %v2304_v12 = vadd.f32 %v2303_v39, %v6578_v20 }
 0x5e9   :  { %v2443_v49 = vpop.f32.mrf.mxu0  ;;  %v2514_v47 = vpop.f32.mrf.mxu1 }
 0x5eb   :  { %v2445_v17 = vpop.f32.mrf.mxu0  ;;  %v2516_v1 = vpop.f32.mrf.mxu1 }
 0x60b   :  { %v2616_v22 = vpop.f32.mrf.mxu0  ;;  %v2687_v46 = vpop.f32.mrf.mxu1 }
 0x60c   :  { %v2617_v16 = vadd.f32 %v2616_v22, %v10348_v38  ;;  %v2688_v35 = vadd.f32 %v2687_v46, %v10350_v11 }
 0x60d   :  { %v2618_v48 = vpop.f32.mrf.mxu0  ;;  %v2689_v14 = vpop.f32.mrf.mxu1 }
 0x60e   :  { %v4619_v18 = vmul.f32 -1.442695, %v2617_v16  ;;  %v2619_v24 = vadd.f32 %v2618_v48, %v10349_v42  ;;  %v4621_v40 = vmul.f32 -1.442695, %v2688_v35  ;;  %v2690_v3 = vadd.f32 %v2689_v14, %v10351_v52 }
 0x60f   :  { %v2302_v42 = vadd.f32 %v2301_v36, %v6583_v41  ;;  %v2375_v36 = vadd.f32 %v2374_v45, %v6597_v8  ;;  %v7867_v45 = vld [vmem:[#allocation8 + $0x1f0] sm:$0xff] }
 0x610   :  { %4815 = vpow2.f32 %v4619_v18  ;;  %v4620_v62 = vmul.f32 -1.442695, %v2619_v24  ;;  %v2446_v18 = vadd.f32 %v2445_v17, %v2304_v12 }
 0x611   :  { %v2444_v48 = vadd.f32 %v2443_v49, %v2302_v42  ;;  %v2373_v49 = vadd.f32 %v2372_v53, %v6592_v0  ;;  %v2517_v42 = vadd.f32 %v2516_v1, %v2375_v36  ;;  %v7864_v53 = vld [vmem:[#allocation8 + $0x1e0] sm:$0xff]  ;;  %v7870_v1 = vld [vmem:[#allocation8 + $0x1c8] sm:$0xff] }
 0x612   :  { %4817 = vpow2.f32 %v4620_v62  ;;  %v4617_v38 = vmul.f32 -1.442695, %v2446_v18 }
 0x613   :  { %4819 = vpow2.f32 %v4621_v40  ;;  %v4616_v46 = vmul.f32 -1.442695, %v2444_v48 }
 0x614   :  { %4821 = vtanh.f32 %v2690_v3 }
 0x61d   :  { %v4816_v23 = vpop.eup %4815 }
 0x61e   :  { %v2701_v22 = vadd.f32 1.0, %v4816_v23 }
 0x61f   :  { %v4818_v16 = vpop.eup %4817 }
 0x620   :  { %4823 = vrcp.f32 %v2701_v22  ;;  %v2702_v24 = vadd.f32 1.0, %v4818_v16  ;;  %v4820_v35 = vpop.eup %4819  ;;  %v2515_v16 = vadd.f32 %v2514_v47, %v2373_v49  ;;  %v7873_v47 = vld [vmem:[#allocation8 + $0x1d8] sm:$0xff]  ;;  %v7901_v49 = vld [vmem:[#allocation8 + $0x180] sm:$0xff] }
 0x621   :  { %v4822_v52 = vpop.eup %4821  ;;  %v2703_v23 = vadd.f32 1.0, %v4820_v35 }
 0x622   :  { %4825 = vrcp.f32 %v2702_v24  ;;  %v4618_v18 = vmul.f32 -1.442695, %v2515_v16  ;;  %v7910_v16 = vld [vmem:[#allocation8 + $0x178] sm:$0xff] }
 0x623   :  { %4827 = vpow2.f32 %v4617_v38  ;;  %v7876_v38 = vld [vmem:[#allocation8 + $0x1c0] sm:$0xff] }
 0x624   :  { %4829 = vpow2.f32 %v4616_v46  ;;  %v7879_v46 = vld [vmem:[#allocation8 + $0x1d0] sm:$0xff] }
 0x625   :  { %4831 = vrcp.f32 %v2703_v23 }
 0x62d   :  { %v4824_v14 = vpop.eup %4823 }
 0x62e   :  { %v2712_v62 = vmul.f32 %v4824_v14, %v4822_v52  ;;  %v7882_v52 = vld [vmem:[#allocation8 + $0x1a8] sm:$0xff]  ;;  %v7885_v14 = vld [vmem:[#allocation8 + $0x1b8] sm:$0xff] }
 0x62f   :  { %v4826_v39 = vpop.eup %4825 }
 0x630   :  { %v2711_v3 = vmul.f32 %v4826_v39, %v7419_v31  ;;  %v4828_v12 = vpop.eup %4827  ;;  %v7891_v39 = vld [vmem:[#allocation8 + $0x1b0] sm:$0xff] }
 0x631   :  { %v4830_v17 = vpop.eup %4829  ;;  %v2529_v11 = vadd.f32 1.0, %v4828_v12  ;;  %v7897_v12 = vld [vmem:[#allocation8 + $0x198] sm:$0xff] }
 0x632   :  { %v7855_v40 = vadd.f32 %v2712_v62, %v2711_v3  ;;  %v2528_v22 = vadd.f32 1.0, %v4830_v17  ;;  %v4832_v31 = vpop.eup %4831  ;;  %v7888_v62 = vld [vmem:[#allocation8 + $0x1a0] sm:$0xff]  ;;  %v7894_v3 = vld [vmem:[#allocation8 + $0x188] sm:$0xff] }
 0x634   :  { %4833 = vtanh.f32 %v7855_v40 }
 0x635   :  { %4835 = vrcp.f32 %v2529_v11  ;;  %v7904_v11 = vld [vmem:[#allocation8 + $0x190] sm:$0xff] }
 0x636   :  { %4837 = vrcp.f32 %v2528_v22  ;;  %v7907_v22 = vld [vmem:[#allocation8 + $0x168] sm:$0xff] }
 0x637   :  { %4839 = vtanh.f32 %v2517_v42  ;;  %10352 = vst [vmem:[#allocation107_spill] sm:$0xff] %v7907_v22 }
 0x638   :  { %4841 = vpow2.f32 %v4618_v18  ;;  %v7913_v18 = vld [vmem:[#allocation8 + $0x160] sm:$0xff] }
 0x639   :  { %10353 = vst [vmem:[#allocation108_spill] sm:$0xff] %v7913_v18 }
 0x641   :  { %v4834_v24 = vpop.eup %4833 }
 0x642   :  { %v7860_v48 = vmul.f32 %v4834_v24, %v4832_v31  ;;  %v4836_v35 = vpop.eup %4835  ;;  %v7919_v24 = vld [vmem:[#allocation8 + $0x148] sm:$0xff] }
 0x643   :  { %v4838_v23 = vpop.eup %4837  ;;  %v2538_v17 = vmul.f32 %v4836_v35, %v7449_v33  ;;  %v7916_v33 = vld [vmem:[#allocation8 + $0x170] sm:$0xff]  ;;  %10355 = vst [vmem:[#allocation110_spill] sm:$0xff] %v7919_v24  ;;  %v7922_v35 = vld [vmem:[#allocation8 + $0x158] sm:$0xff] }
 0x644   :  { %2781 = vmatmul.mubr.f32.vlgmr.msra.gmra.mxu0 %v7860_v48  ;;  %2852 = vmatmul.mubr.f32.vlgmr.msra.gmra.mxu1 %v7860_v48  ;;  %v4840_v36 = vpop.eup %4839  ;;  %10354 = vst [vmem:[#allocation109_spill] sm:$0xff] %v7916_v33  ;;  %10356 = vst [vmem:[#allocation86_spill] sm:$0xff] %v7922_v35 }
 0x645   :  { %2859 = vmatpush1.msra.mxu0 %v7864_v53  ;;  %2930 = vmatpush1.msra.mxu1 %v7867_v45  ;;  %v2539_v42 = vmul.f32 %v4840_v36, %v4838_v23  ;;  %v4842_v31 = vpop.eup %4841  ;;  %v7927_v23 = vld [vmem:[#allocation8 + $0x140] sm:$0xff]  ;;  %v7930_v36 = vld [vmem:[#allocation8 + $0x150] sm:$0xff] }
 0x646   :  { %2860 = vmatprep.subr.mxu0 %v7870_v1  ;;  %2931 = vmatprep.subr.mxu1 %v7873_v47  ;;  %10357 = vst [vmem:[#allocation88_spill] sm:$0xff] %v7930_v36 }
 0x647   :  { %2861 = vmatpush1.msra.mxu0 %v7876_v38  ;;  %2932 = vmatpush1.msra.mxu1 %v7879_v46 }
 0x648   :  { %2862 = vmatprep.subr.mxu0 %v7882_v52  ;;  %2933 = vmatprep.subr.mxu1 %v7885_v14 }
 0x649   :  { %2863 = vmatpush1.msra.mxu0 %v7888_v62  ;;  %2934 = vmatpush1.msra.mxu1 %v7891_v39 }
 0x64a   :  { %2864 = vmatprep.subr.mxu0 %v7894_v3  ;;  %2935 = vmatprep.subr.mxu1 %v7897_v12 }
 0x64b   :  { %2865 = vmatpush1.msra.mxu0 %v7901_v49  ;;  %2936 = vmatpush1.msra.mxu1 %v7904_v11 }
 0x64c   :  { %2866 = vmatprep.subr.mxu0 %v7907_v22  ;;  %2937 = vmatprep.subr.mxu1 %v7910_v16  ;;  %v7925_v22 = vadd.f32 %v2539_v42, %v2538_v17  ;;  %v7942_v17 = vld [vmem:[#allocation8 + $0x130] sm:$0xff]  ;;  %v7945_v42 = vld [vmem:[#allocation8 + $0x108] sm:$0xff] }
 0x64d   :  { %2867 = vmatpush1.msra.mxu0 %v7913_v18  ;;  %2938 = vmatpush1.msra.mxu1 %v7916_v33  ;;  %v7933_v33 = vld [vmem:[#allocation8 + $0x128] sm:$0xff]  ;;  %v7936_v18 = vld [vmem:[#allocation8 + $0x138] sm:$0xff]  ;;  %10361 = vst [vmem:[#allocation112_spill] sm:$0xff] %v7942_v17  ;;  %10362 = vst [vmem:[#allocation113_spill] sm:$0xff] %v7945_v42 }
 0x64e   :  { %2868 = vmatprep.subr.mxu0 %v7919_v24  ;;  %2939 = vmatprep.subr.mxu1 %v7922_v35  ;;  %10358 = vst [vmem:[#allocation87_spill] sm:$0xff] %v7933_v33  ;;  %10359 = vst [vmem:[#allocation89_spill] sm:$0xff] %v7936_v18  ;;  %v2530_v24 = vadd.f32 1.0, %v4842_v31  ;;  %v7939_v35 = vld [vmem:[#allocation8 + $0x120] sm:$0xff]  ;;  %4843 = vtanh.f32 %v7925_v22  ;;  %v7955_v31 = vld [vmem:[#allocation8 + $0x110] sm:$0xff] }
 0x64f   :  { %2869 = vmatpush1.msra.mxu0 %v7927_v23  ;;  %2940 = vmatpush1.msra.mxu1 %v7930_v36  ;;  %10360 = vst [vmem:[#allocation111_spill] sm:$0xff] %v7939_v35  ;;  %v7948_v36 = vld [vmem:[#allocation8 + $0x118] sm:$0xff]  ;;  %10365 = vst [vmem:[#allocation116_spill] sm:$0xff] %v7955_v31 }
 0x650   :  { %2870 = vmatprep.subr.mxu0 %v7933_v33  ;;  %2941 = vmatprep.subr.mxu1 %v7936_v18  ;;  %10363 = vst [vmem:[#allocation114_spill] sm:$0xff] %v7948_v36  ;;  %v7952_v18 = vld [vmem:[#allocation8 + $0x100] sm:$0xff]  ;;  %4845 = vrcp.f32 %v2530_v24  ;;  %v7979_v24 = vld [vmem:[#allocation8 + $0xd0] sm:$0xff]  ;;  %v8042_v33 = vld [vmem:[#allocation8 + $0x8] sm:$0xff] }
 0x651   :  { %2871 = vmatpush1.msra.mxu0 %v7939_v35  ;;  %2942 = vmatpush1.msra.mxu1 %v7942_v17  ;;  %10364 = vst [vmem:[#allocation115_spill] sm:$0xff] %v7952_v18  ;;  %v7958_v35 = vld [vmem:[#allocation8 + $0xe8] sm:$0xff]  ;;  %v7961_v17 = vld [vmem:[#allocation8 + $0xf8] sm:$0xff]  ;;  %10373 = vst [vmem:[#allocation124_spill] sm:$0xff] %v7979_v24 }
 0x652   :  { %2872 = vmatprep.subr.mxu0 %v7945_v42  ;;  %2943 = vmatprep.subr.mxu1 %v7948_v36  ;;  %10366 = vst [vmem:[#allocation117_spill] sm:$0xff] %v7958_v35  ;;  %10367 = vst [vmem:[#allocation118_spill] sm:$0xff] %v7961_v17  ;;  %v7964_v36 = vld [vmem:[#allocation8 + $0xe0] sm:$0xff]  ;;  %v7967_v42 = vld [vmem:[#allocation8 + $0xf0] sm:$0xff] }
 0x653   :  { %2873 = vmatpush1.msra.mxu0 %v7952_v18  ;;  %2944 = vmatpush1.msra.mxu1 %v7955_v31  ;;  %10368 = vst [vmem:[#allocation119_spill] sm:$0xff] %v7964_v36  ;;  %10369 = vst [vmem:[#allocation120_spill] sm:$0xff] %v7967_v42  ;;  %v7970_v18 = vld [vmem:[#allocation8 + $0xc8] sm:$0xff]  ;;  %v7973_v31 = vld [vmem:[#allocation8 + $0xd8] sm:$0xff] }
 0x654   :  { %2874 = vmatprep.subr.mxu0 %v7958_v35  ;;  %2945 = vmatprep.subr.mxu1 %v7961_v17  ;;  %10370 = vst [vmem:[#allocation121_spill] sm:$0xff] %v7970_v18  ;;  %10371 = vst [vmem:[#allocation122_spill] sm:$0xff] %v7973_v31  ;;  %v7976_v35 = vld [vmem:[#allocation8 + $0xc0] sm:$0xff]  ;;  %v8030_v17 = vld [vmem:[#allocation8 + $0x28] sm:$0xff] }
 0x655   :  { %2875 = vmatpush1.msra.mxu0 %v7964_v36  ;;  %2946 = vmatpush1.msra.mxu1 %v7967_v42  ;;  %10372 = vst [vmem:[#allocation123_spill] sm:$0xff] %v7976_v35  ;;  %v7982_v36 = vld [vmem:[#allocation8 + $0xa8] sm:$0xff]  ;;  %v7985_v42 = vld [vmem:[#allocation8 + $0xb8] sm:$0xff]  ;;  %10390 = vst [vmem:[#allocation141_spill] sm:$0xff] %v8030_v17 }
 0x656   :  { %2876 = vmatprep.subr.mxu0 %v7970_v18  ;;  %2947 = vmatprep.subr.mxu1 %v7973_v31  ;;  %10374 = vst [vmem:[#allocation125_spill] sm:$0xff] %v7982_v36  ;;  %10375 = vst [vmem:[#allocation126_spill] sm:$0xff] %v7985_v42  ;;  %v7988_v18 = vld [vmem:[#allocation8 + $0xa0] sm:$0xff]  ;;  %v7991_v31 = vld [vmem:[#allocation8 + $0xb0] sm:$0xff] }
 0x657   :  { %2877 = vmatpush1.msra.mxu0 %v7976_v35  ;;  %2948 = vmatpush1.msra.mxu1 %v7979_v24  ;;  %10376 = vst [vmem:[#allocation127_spill] sm:$0xff] %v7988_v18  ;;  %10377 = vst [vmem:[#allocation128_spill] sm:$0xff] %v7991_v31  ;;  %v7994_v35 = vld [vmem:[#allocation8 + $0x88] sm:$0xff]  ;;  %v7997_v24 = vld [vmem:[#allocation8 + $0x98] sm:$0xff] }
 0x658   :  { %2878 = vmatprep.subr.mxu0 %v7982_v36  ;;  %2949 = vmatprep.subr.mxu1 %v7985_v42  ;;  %10378 = vst [vmem:[#allocation129_spill] sm:$0xff] %v7994_v35  ;;  %10379 = vst [vmem:[#allocation130_spill] sm:$0xff] %v7997_v24  ;;  %v8000_v36 = vld [vmem:[#allocation8 + $0x80] sm:$0xff]  ;;  %v8003_v42 = vld [vmem:[#allocation8 + $0x90] sm:$0xff] }
 0x659   :  { %2879 = vmatpush1.msra.mxu0 %v7988_v18  ;;  %2950 = vmatpush1.msra.mxu1 %v7991_v31  ;;  %10380 = vst [vmem:[#allocation131_spill] sm:$0xff] %v8000_v36  ;;  %10381 = vst [vmem:[#allocation132_spill] sm:$0xff] %v8003_v42  ;;  %v8006_v18 = vld [vmem:[#allocation8 + $0x68] sm:$0xff]  ;;  %v8009_v31 = vld [vmem:[#allocation8 + $0x78] sm:$0xff] }
 0x65a   :  { %2880 = vmatprep.subr.mxu0 %v7994_v35  ;;  %2951 = vmatprep.subr.mxu1 %v7997_v24  ;;  %10382 = vst [vmem:[#allocation133_spill] sm:$0xff] %v8006_v18  ;;  %10383 = vst [vmem:[#allocation134_spill] sm:$0xff] %v8009_v31  ;;  %v8012_v35 = vld [vmem:[#allocation8 + $0x60] sm:$0xff]  ;;  %v8015_v24 = vld [vmem:[#allocation8 + $0x70] sm:$0xff] }
 0x65b   :  { %2881 = vmatpush1.msra.mxu0 %v8000_v36  ;;  %2952 = vmatpush1.msra.mxu1 %v8003_v42  ;;  %10384 = vst [vmem:[#allocation135_spill] sm:$0xff] %v8012_v35  ;;  %10385 = vst [vmem:[#allocation136_spill] sm:$0xff] %v8015_v24  ;;  %v8018_v36 = vld [vmem:[#allocation8 + $0x48] sm:$0xff]  ;;  %v8021_v42 = vld [vmem:[#allocation8 + $0x58] sm:$0xff] }
 0x65c   :  { %2882 = vmatprep.subr.mxu0 %v8006_v18  ;;  %2953 = vmatprep.subr.mxu1 %v8009_v31  ;;  %10386 = vst [vmem:[#allocation137_spill] sm:$0xff] %v8018_v36  ;;  %10387 = vst [vmem:[#allocation138_spill] sm:$0xff] %v8021_v42  ;;  %v8024_v18 = vld [vmem:[#allocation8 + $0x40] sm:$0xff]  ;;  %v8027_v31 = vld [vmem:[#allocation8 + $0x50] sm:$0xff] }
 0x65d   :  { %2883 = vmatpush1.msra.mxu0 %v8012_v35  ;;  %2954 = vmatpush1.msra.mxu1 %v8015_v24  ;;  %10388 = vst [vmem:[#allocation139_spill] sm:$0xff] %v8024_v18  ;;  %10389 = vst [vmem:[#allocation140_spill] sm:$0xff] %v8027_v31  ;;  %v4844_v35 = vpop.eup %4843  ;;  %v8033_v24 = vld [vmem:[#allocation8 + $0x38] sm:$0xff] }
 0x65e   :  { %2884 = vmatprep.subr.mxu0 %v8018_v36  ;;  %2955 = vmatprep.subr.mxu1 %v8021_v42  ;;  %10391 = vst [vmem:[#allocation142_spill] sm:$0xff] %v8033_v24  ;;  %v8036_v36 = vld [vmem:[#allocation8 + $0x20] sm:$0xff]  ;;  %v8039_v42 = vld [vmem:[#allocation8 + $0x30] sm:$0xff]  ;;  %10393 = vst [vmem:[#allocation144_spill] sm:$0xff] %v8042_v33 }
 0x65f   :  { %2885 = vmatpush1.msra.mxu0 %v8024_v18  ;;  %2956 = vmatpush1.msra.mxu1 %v8027_v31  ;;  %10392 = vst [vmem:[#allocation143_spill] sm:$0xff] %v8036_v36  ;;  %v4846_v18 = vpop.eup %4845  ;;  %v8045_v31 = vld [vmem:[#allocation8 + $0x18] sm:$0xff] }
 0x660   :  { %2886 = vmatprep.subr.mxu0 %v8030_v17  ;;  %2957 = vmatprep.subr.mxu1 %v8033_v24  ;;  %10394 = vst [vmem:[#allocation145_spill] sm:$0xff] %v8045_v31  ;;  %v8048_v17 = vld [vmem:[#allocation8] sm:$0xff]  ;;  %v8052_v24 = vld [vmem:[#allocation8 + $0x10] sm:$0xff] }
 0x661   :  { %2887 = vmatpush1.msra.mxu0 %v8036_v36  ;;  %2958 = vmatpush1.msra.mxu1 %v8039_v42  ;;  %10395 = vst [vmem:[#allocation146_spill] sm:$0xff] %v8048_v17  ;;  %v2542_v36 = vmul.f32 %v4846_v18, %v4844_v35  ;;  %v8065_v18 = vld [vmem:[#allocation4 + $0x1f0] sm:$0xff]  ;;  %v8068_v35 = vld [vmem:[#allocation4 + $0x1c8] sm:$0xff] }
 0x662   :  { %2888 = vmatprep.subr.mxu0 %v8042_v33  ;;  %2959 = vmatprep.subr.mxu1 %v8045_v31  ;;  %v8056_v33 = vld [vmem:[#allocation4 + $0x1e8] sm:$0xff]  ;;  %v8059_v31 = vld [vmem:[#allocation4 + $0x1f8] sm:$0xff]  ;;  %10399 = vst [vmem:[#allocation150_spill] sm:$0xff] %v8065_v18  ;;  %10400 = vst [vmem:[#allocation151_spill] sm:$0xff] %v8068_v35 }
 0x663   :  { %2889 = vmatpush1.msra.mxu0 %v8048_v17  ;;  %2922 = vmatprep.mubr.f32.mxu0 %v9835_v27  ;;  %10396 = vst [vmem:[#allocation147_spill] sm:$0xff] %v8056_v33  ;;  %10397 = vst [vmem:[#allocation148_spill] sm:$0xff] %v8059_v31  ;;  %v8062_v17 = vld [vmem:[#allocation4 + $0x1e0] sm:$0xff] }
 0x664   :  { %2960 = vmatpush1.msra.mxu1 %v8052_v24  ;;  %2993 = vmatprep.mubr.f32.mxu1 %v9835_v27  ;;  %10398 = vst [vmem:[#allocation149_spill] sm:$0xff] %v8062_v17 }
 0x665   :  { %2923 = vmatmul.mubr.f32.vlgmr.msra.gmra.mxu0 %v2542_v36  ;;  %2994 = vmatmul.mubr.f32.vlgmr.msra.gmra.mxu1 %v2542_v36  ;;  %v8071_v36 = vld [vmem:[#allocation4 + $0x1d8] sm:$0xff] }
 0x666   :  { %3031 = vmatprep.subr.mxu0 %v8056_v33  ;;  %3102 = vmatprep.subr.mxu1 %v8059_v31  ;;  %10401 = vst [vmem:[#allocation152_spill] sm:$0xff] %v8071_v36  ;;  %v8074_v33 = vld [vmem:[#allocation4 + $0x1c0] sm:$0xff]  ;;  %v8077_v31 = vld [vmem:[#allocation4 + $0x1d0] sm:$0xff] }
 0x667   :  { %3032 = vmatpush1.msra.mxu0 %v8062_v17  ;;  %3103 = vmatpush1.msra.mxu1 %v8065_v18  ;;  %10402 = vst [vmem:[#allocation153_spill] sm:$0xff] %v8074_v33  ;;  %10403 = vst [vmem:[#allocation154_spill] sm:$0xff] %v8077_v31  ;;  %v8080_v17 = vld [vmem:[#allocation4 + $0x1a8] sm:$0xff]  ;;  %v8083_v18 = vld [vmem:[#allocation4 + $0x1b8] sm:$0xff] }
 0x668   :  { %3033 = vmatprep.subr.mxu0 %v8068_v35  ;;  %3104 = vmatprep.subr.mxu1 %v8071_v36  ;;  %10404 = vst [vmem:[#allocation155_spill] sm:$0xff] %v8080_v17  ;;  %10405 = vst [vmem:[#allocation156_spill] sm:$0xff] %v8083_v18  ;;  %v8086_v35 = vld [vmem:[#allocation4 + $0x1a0] sm:$0xff]  ;;  %v8089_v36 = vld [vmem:[#allocation4 + $0x1b0] sm:$0xff] }
 0x669   :  { %3034 = vmatpush1.msra.mxu0 %v8074_v33  ;;  %3105 = vmatpush1.msra.mxu1 %v8077_v31  ;;  %10406 = vst [vmem:[#allocation157_spill] sm:$0xff] %v8086_v35  ;;  %10407 = vst [vmem:[#allocation158_spill] sm:$0xff] %v8089_v36  ;;  %v8092_v33 = vld [vmem:[#allocation4 + $0x188] sm:$0xff]  ;;  %v8095_v31 = vld [vmem:[#allocation4 + $0x198] sm:$0xff] }
 0x66a   :  { %3035 = vmatprep.subr.mxu0 %v8080_v17  ;;  %3106 = vmatprep.subr.mxu1 %v8083_v18  ;;  %10408 = vst [vmem:[#allocation159_spill] sm:$0xff] %v8092_v33  ;;  %10409 = vst [vmem:[#allocation160_spill] sm:$0xff] %v8095_v31  ;;  %v8098_v17 = vld [vmem:[#allocation4 + $0x180] sm:$0xff]  ;;  %v8101_v18 = vld [vmem:[#allocation4 + $0x190] sm:$0xff] }
 0x66b   :  { %3036 = vmatpush1.msra.mxu0 %v8086_v35  ;;  %3107 = vmatpush1.msra.mxu1 %v8089_v36  ;;  %10410 = vst [vmem:[#allocation161_spill] sm:$0xff] %v8098_v17  ;;  %10411 = vst [vmem:[#allocation162_spill] sm:$0xff] %v8101_v18  ;;  %v8104_v35 = vld [vmem:[#allocation4 + $0x168] sm:$0xff]  ;;  %v8107_v36 = vld [vmem:[#allocation4 + $0x178] sm:$0xff] }
 0x66c   :  { %3037 = vmatprep.subr.mxu0 %v8092_v33  ;;  %3108 = vmatprep.subr.mxu1 %v8095_v31  ;;  %v8110_v33 = vld [vmem:[#allocation4 + $0x160] sm:$0xff]  ;;  %v8113_v31 = vld [vmem:[#allocation4 + $0x170] sm:$0xff] }
 0x66d   :  { %3038 = vmatpush1.msra.mxu0 %v8098_v17  ;;  %3109 = vmatpush1.msra.mxu1 %v8101_v18  ;;  %v8116_v17 = vld [vmem:[#allocation4 + $0x148] sm:$0xff]  ;;  %v8119_v18 = vld [vmem:[#allocation4 + $0x158] sm:$0xff] }
 0x66e   :  { %3039 = vmatprep.subr.mxu0 %v8104_v35  ;;  %3110 = vmatprep.subr.mxu1 %v8107_v36 }
 0x66f   :  { %3040 = vmatpush1.msra.mxu0 %v8110_v33  ;;  %3111 = vmatpush1.msra.mxu1 %v8113_v31 }
 0x670   :  { %3041 = vmatprep.subr.mxu0 %v8116_v17  ;;  %3112 = vmatprep.subr.mxu1 %v8119_v18 }
 0x671   :  { %3042 = vmatpush1.msra.mxu0 %v7518_v15  ;;  %3113 = vmatpush1.msra.mxu1 %v7521_v54  ;;  %v10412_v15 = vld [vmem:[#allocation82_spill] sm:$0xff]  ;;  %v10413_v54 = vld [vmem:[#allocation84_spill] sm:$0xff] }
 0x672   :  { %3043 = vmatprep.subr.mxu0 %v7524_v55  ;;  %3114 = vmatprep.subr.mxu1 %v7527_v21  ;;  %v10414_v55 = vld [vmem:[#allocation83_spill] sm:$0xff]  ;;  %v10415_v21 = vld [vmem:[#allocation85_spill] sm:$0xff] }
 0x673   :  { %3044 = vmatpush1.msra.mxu0 %v7530_v43  ;;  %3115 = vmatpush1.msra.mxu1 %v7533_v44  ;;  %v10416_v43 = vld [vmem:[#allocation11_spill] sm:$0xff]  ;;  %v10417_v44 = vld [vmem:[#allocation12_spill] sm:$0xff] }
 0x674   :  { %3045 = vmatprep.subr.mxu0 %v7536_v4  ;;  %3116 = vmatprep.subr.mxu1 %v7539_v34  ;;  %v10418_v4 = vld [vmem:[#allocation13_spill] sm:$0xff]  ;;  %v10419_v34 = vld [vmem:[#allocation14_spill] sm:$0xff] }
 0x675   :  { %3046 = vmatpush1.msra.mxu0 %v7542_v50  ;;  %3117 = vmatpush1.msra.mxu1 %v7545_v28  ;;  %v10420_v50 = vld [vmem:[#allocation15_spill] sm:$0xff]  ;;  %v10421_v28 = vld [vmem:[#allocation16_spill] sm:$0xff] }
 0x676   :  { %3047 = vmatprep.subr.mxu0 %v7548_v26  ;;  %3118 = vmatprep.subr.mxu1 %v7551_v30  ;;  %v10422_v26 = vld [vmem:[#allocation17_spill] sm:$0xff]  ;;  %v10423_v30 = vld [vmem:[#allocation18_spill] sm:$0xff] }
 0x677   :  { %3048 = vmatpush1.msra.mxu0 %v7554_v25  ;;  %3119 = vmatpush1.msra.mxu1 %v7557_v29  ;;  %v10424_v25 = vld [vmem:[#allocation19_spill] sm:$0xff]  ;;  %v10425_v29 = vld [vmem:[#allocation20_spill] sm:$0xff] }
 0x678   :  { %3049 = vmatprep.subr.mxu0 %v7560_v19  ;;  %3120 = vmatprep.subr.mxu1 %v7563_v56  ;;  %v10426_v19 = vld [vmem:[#allocation21_spill] sm:$0xff]  ;;  %v10427_v56 = vld [vmem:[#allocation22_spill] sm:$0xff] }
 0x679   :  { %3050 = vmatpush1.msra.mxu0 %v7566_v7  ;;  %3121 = vmatpush1.msra.mxu1 %v7569_v9  ;;  %v10428_v7 = vld [vmem:[#allocation23_spill] sm:$0xff]  ;;  %v10429_v9 = vld [vmem:[#allocation24_spill] sm:$0xff] }
 0x67a   :  { %3051 = vmatprep.subr.mxu0 %v7572_v10  ;;  %3122 = vmatprep.subr.mxu1 %v7575_v6  ;;  %v10430_v10 = vld [vmem:[#allocation25_spill] sm:$0xff]  ;;  %v10431_v6 = vld [vmem:[#allocation26_spill] sm:$0xff] }
 0x67b   :  { %3052 = vmatpush1.msra.mxu0 %v7578_v58  ;;  %3123 = vmatpush1.msra.mxu1 %v7581_v13  ;;  %v10432_v58 = vld [vmem:[#allocation27_spill] sm:$0xff]  ;;  %v10433_v13 = vld [vmem:[#allocation28_spill] sm:$0xff] }
 0x67c   :  { %3053 = vmatprep.subr.mxu0 %v7584_v60  ;;  %3124 = vmatprep.subr.mxu1 %v7587_v57  ;;  %v10434_v60 = vld [vmem:[#allocation29_spill] sm:$0xff]  ;;  %v10435_v57 = vld [vmem:[#allocation30_spill] sm:$0xff] }
 0x67d   :  { %3054 = vmatpush1.msra.mxu0 %v7590_v61  ;;  %3125 = vmatpush1.msra.mxu1 %v7593_v59  ;;  %v10436_v61 = vld [vmem:[#allocation31_spill] sm:$0xff]  ;;  %v10437_v59 = vld [vmem:[#allocation32_spill] sm:$0xff] }
 0x67e   :  { %3055 = vmatprep.subr.mxu0 %v7596_v32  ;;  %3126 = vmatprep.subr.mxu1 %v7599_v37  ;;  %v10438_v32 = vld [vmem:[#allocation33_spill] sm:$0xff]  ;;  %v10439_v37 = vld [vmem:[#allocation34_spill] sm:$0xff] }
 0x67f   :  { %3056 = vmatpush1.msra.mxu0 %v7602_v63  ;;  %3127 = vmatpush1.msra.mxu1 %v7605_v2  ;;  %v10440_v63 = vld [vmem:[#allocation35_spill] sm:$0xff]  ;;  %v10441_v2 = vld [vmem:[#allocation36_spill] sm:$0xff] }
 0x680   :  { %3057 = vmatprep.subr.mxu0 %v7608_v51  ;;  %3128 = vmatprep.subr.mxu1 %v7611_v5  ;;  %v10442_v51 = vld [vmem:[#allocation37_spill] sm:$0xff]  ;;  %v10443_v5 = vld [vmem:[#allocation38_spill] sm:$0xff] }
 0x681   :  { %3058 = vmatpush1.msra.mxu0 %v10412_v15  ;;  %3129 = vmatpush1.msra.mxu1 %v10413_v54  ;;  %v10445_v15 = vld [vmem:[#allocation40_spill] sm:$0xff]  ;;  %v10446_v54 = vld [vmem:[#allocation41_spill] sm:$0xff] }
 0x682   :  { %3059 = vmatprep.subr.mxu0 %v10414_v55  ;;  %3130 = vmatprep.subr.mxu1 %v10415_v21  ;;  %v10447_v55 = vld [vmem:[#allocation42_spill] sm:$0xff]  ;;  %v10448_v21 = vld [vmem:[#allocation43_spill] sm:$0xff] }
 0x683   :  { %3060 = vmatpush1.msra.mxu0 %v10416_v43  ;;  %3131 = vmatpush1.msra.mxu1 %v10417_v44  ;;  %v10449_v43 = vld [vmem:[#allocation44_spill] sm:$0xff]  ;;  %v10450_v44 = vld [vmem:[#allocation45_spill] sm:$0xff] }
 0x684   :  { %3061 = vmatprep.subr.mxu0 %v10418_v4  ;;  %3132 = vmatprep.subr.mxu1 %v10419_v34  ;;  %v10451_v4 = vld [vmem:[#allocation46_spill] sm:$0xff]  ;;  %v10452_v34 = vld [vmem:[#allocation47_spill] sm:$0xff] }
 0x685   :  { %3062 = vmatpush1.msra.mxu0 %v10420_v50  ;;  %3095 = vmatprep.mubr.f32.mxu0 %v9835_v27  ;;  %v10453_v50 = vld [vmem:[#allocation48_spill] sm:$0xff] }
 0x686   :  { %3133 = vmatpush1.msra.mxu1 %v10421_v28  ;;  %3166 = vmatprep.mubr.f32.mxu1 %v9835_v27  ;;  %v10454_v28 = vld [vmem:[#allocation49_spill] sm:$0xff] }
 0x687   :  { %3096 = vmatmul.mubr.f32.vlgmr.msra.gmra.mxu0 %v7860_v48  ;;  %3167 = vmatmul.mubr.f32.vlgmr.msra.gmra.mxu1 %v7860_v48  ;;  %v10444_v48 = vld [vmem:[#allocation39_spill] sm:$0xff] }
 0x688   :  { %3197 = vmatprep.subr.mxu0 %v10422_v26  ;;  %3268 = vmatprep.subr.mxu1 %v10423_v30  ;;  %v10455_v26 = vld [vmem:[#allocation50_spill] sm:$0xff]  ;;  %v10456_v30 = vld [vmem:[#allocation51_spill] sm:$0xff] }
 0x689   :  { %3198 = vmatpush1.msra.mxu0 %v10424_v25  ;;  %3269 = vmatpush1.msra.mxu1 %v10425_v29  ;;  %v10457_v25 = vld [vmem:[#allocation52_spill] sm:$0xff]  ;;  %v10458_v29 = vld [vmem:[#allocation53_spill] sm:$0xff] }
 0x68a   :  { %3199 = vmatprep.subr.mxu0 %v10426_v19  ;;  %3270 = vmatprep.subr.mxu1 %v10427_v56  ;;  %v10459_v19 = vld [vmem:[#allocation54_spill] sm:$0xff]  ;;  %v10460_v56 = vld [vmem:[#allocation55_spill] sm:$0xff] }
 0x68b   :  { %3200 = vmatpush1.msra.mxu0 %v10428_v7  ;;  %3271 = vmatpush1.msra.mxu1 %v10429_v9  ;;  %v10461_v7 = vld [vmem:[#allocation56_spill] sm:$0xff]  ;;  %v10462_v9 = vld [vmem:[#allocation57_spill] sm:$0xff] }
 0x68c   :  { %3201 = vmatprep.subr.mxu0 %v10430_v10  ;;  %3272 = vmatprep.subr.mxu1 %v10431_v6  ;;  %v10463_v10 = vld [vmem:[#allocation58_spill] sm:$0xff]  ;;  %v10464_v6 = vld [vmem:[#allocation59_spill] sm:$0xff] }
 0x68d   :  { %3202 = vmatpush1.msra.mxu0 %v10432_v58  ;;  %3273 = vmatpush1.msra.mxu1 %v10433_v13  ;;  %v10465_v58 = vld [vmem:[#allocation60_spill] sm:$0xff]  ;;  %v10466_v13 = vld [vmem:[#allocation61_spill] sm:$0xff] }
 0x68e   :  { %3203 = vmatprep.subr.mxu0 %v10434_v60  ;;  %3274 = vmatprep.subr.mxu1 %v10435_v57  ;;  %v10467_v60 = vld [vmem:[#allocation62_spill] sm:$0xff]  ;;  %v10468_v57 = vld [vmem:[#allocation63_spill] sm:$0xff] }
 0x68f   :  { %3204 = vmatpush1.msra.mxu0 %v10436_v61  ;;  %3275 = vmatpush1.msra.mxu1 %v10437_v59  ;;  %v10469_v61 = vld [vmem:[#allocation64_spill] sm:$0xff]  ;;  %v10470_v59 = vld [vmem:[#allocation65_spill] sm:$0xff] }
 0x690   :  { %3205 = vmatprep.subr.mxu0 %v10438_v32  ;;  %3276 = vmatprep.subr.mxu1 %v10439_v37  ;;  %v10471_v32 = vld [vmem:[#allocation66_spill] sm:$0xff]  ;;  %v10472_v37 = vld [vmem:[#allocation67_spill] sm:$0xff] }
 0x691   :  { %3206 = vmatpush1.msra.mxu0 %v10440_v63  ;;  %3277 = vmatpush1.msra.mxu1 %v10441_v2  ;;  %v10473_v63 = vld [vmem:[#allocation68_spill] sm:$0xff]  ;;  %v10474_v2 = vld [vmem:[#allocation69_spill] sm:$0xff] }
 0x692   :  { %3207 = vmatprep.subr.mxu0 %v10442_v51  ;;  %3278 = vmatprep.subr.mxu1 %v10443_v5  ;;  %v10475_v51 = vld [vmem:[#allocation70_spill] sm:$0xff]  ;;  %v10476_v5 = vld [vmem:[#allocation71_spill] sm:$0xff] }
 0x693   :  { %3208 = vmatpush1.msra.mxu0 %v10444_v48  ;;  %3279 = vmatpush1.msra.mxu1 %v10445_v15  ;;  %v10477_v48 = vld [vmem:[#allocation72_spill] sm:$0xff]  ;;  %v10478_v15 = vld [vmem:[#allocation73_spill] sm:$0xff] }
 0x694   :  { %3209 = vmatprep.subr.mxu0 %v10446_v54  ;;  %3280 = vmatprep.subr.mxu1 %v10447_v55  ;;  %v10479_v54 = vld [vmem:[#allocation74_spill] sm:$0xff]  ;;  %v10480_v55 = vld [vmem:[#allocation75_spill] sm:$0xff] }
 0x695   :  { %3210 = vmatpush1.msra.mxu0 %v10448_v21  ;;  %3281 = vmatpush1.msra.mxu1 %v10449_v43  ;;  %v10481_v21 = vld [vmem:[#allocation76_spill] sm:$0xff]  ;;  %v10482_v43 = vld [vmem:[#allocation77_spill] sm:$0xff] }
 0x696   :  { %3211 = vmatprep.subr.mxu0 %v10450_v44  ;;  %3282 = vmatprep.subr.mxu1 %v10451_v4  ;;  %v10483_v44 = vld [vmem:[#allocation80_spill] sm:$0xff]  ;;  %v10484_v4 = vld [vmem:[#allocation79_spill] sm:$0xff] }
 0x697   :  { %3212 = vmatpush1.msra.mxu0 %v10452_v34  ;;  %3283 = vmatpush1.msra.mxu1 %v10453_v50  ;;  %v10485_v34 = vld [vmem:[#allocation78_spill] sm:$0xff]  ;;  %v10486_v50 = vld [vmem:[#allocation81_spill] sm:$0xff] }
 0x698   :  { %3213 = vmatprep.subr.mxu0 %v10454_v28  ;;  %3284 = vmatprep.subr.mxu1 %v10455_v26  ;;  %v10487_v28 = vld [vmem:[#allocation106_spill] sm:$0xff] }
 0x699   :  { %3214 = vmatpush1.msra.mxu0 %v10456_v30  ;;  %3285 = vmatpush1.msra.mxu1 %v10457_v25 }
 0x69a   :  { %3215 = vmatprep.subr.mxu0 %v10458_v29  ;;  %3286 = vmatprep.subr.mxu1 %v10459_v19 }
 0x69b   :  { %3216 = vmatpush1.msra.mxu0 %v10460_v56  ;;  %3287 = vmatpush1.msra.mxu1 %v10461_v7 }
 0x69c   :  { %3217 = vmatprep.subr.mxu0 %v10462_v9  ;;  %3288 = vmatprep.subr.mxu1 %v10463_v10  ;;  %v10488_v9 = vld [vmem:[#allocation94_spill] sm:$0xff] }
 0x69d   :  { %3218 = vmatpush1.msra.mxu0 %v10464_v6  ;;  %3289 = vmatpush1.msra.mxu1 %v10465_v58 }
 0x69e   :  { %3219 = vmatprep.subr.mxu0 %v10466_v13  ;;  %3290 = vmatprep.subr.mxu1 %v10467_v60  ;;  %v10489_v60 = vld [vmem:[#allocation96_spill] sm:$0xff] }
 0x69f   :  { %3220 = vmatpush1.msra.mxu0 %v10468_v57  ;;  %3291 = vmatpush1.msra.mxu1 %v10469_v61 }
 0x6a0   :  { %3221 = vmatprep.subr.mxu0 %v10470_v59  ;;  %3292 = vmatprep.subr.mxu1 %v10471_v32 }
 0x6a1   :  { %3222 = vmatpush1.msra.mxu0 %v10472_v37  ;;  %3293 = vmatpush1.msra.mxu1 %v10473_v63  ;;  %v10490_v37 = vld [vmem:[#allocation95_spill] sm:$0xff] }
 0x6a2   :  { %3223 = vmatprep.subr.mxu0 %v10474_v2  ;;  %3294 = vmatprep.subr.mxu1 %v10475_v51 }
 0x6a3   :  { %3224 = vmatpush1.msra.mxu0 %v10476_v5  ;;  %3295 = vmatpush1.msra.mxu1 %v10477_v48  ;;  %v10491_v5 = vld [vmem:[#allocation97_spill] sm:$0xff] }
 0x6a4   :  { %3225 = vmatprep.subr.mxu0 %v10478_v15  ;;  %3296 = vmatprep.subr.mxu1 %v10479_v54 }
 0x6a5   :  { %3226 = vmatpush1.msra.mxu0 %v10480_v55  ;;  %3297 = vmatpush1.msra.mxu1 %v10481_v21 }
 0x6a6   :  { %3227 = vmatprep.subr.mxu0 %v10482_v43  ;;  %3298 = vmatprep.subr.mxu1 %v10483_v44 }
 0x6a7   :  { %3228 = vmatpush1.msra.mxu0 %v10484_v4  ;;  %3299 = vmatpush1.msra.mxu1 %v10485_v34 }
 0x6a8   :  { %3261 = vmatprep.mubr.f32.mxu0 %v9835_v27  ;;  %3332 = vmatprep.mubr.f32.mxu1 %v9835_v27 }
 0x6a9   :  { %3339 = vmatprep.subr.mxu0 %v10486_v50  ;;  %3410 = vmatprep.subr.mxu1 %v10487_v28 }
 0x704   :  { %v2782_v26 = vpop.f32.mrf.mxu0  ;;  %v2853_v29 = vpop.f32.mrf.mxu1 }
 0x705   :  { %v2783_v43 = vadd.f32 %v2782_v26, %v6583_v41 }
 0x706   :  { %v2784_v30 = vpop.f32.mrf.mxu0  ;;  %v2855_v56 = vpop.f32.mrf.mxu1 }
 0x707   :  { %v2785_v54 = vadd.f32 %v2784_v30, %v6578_v20 }
 0x725   :  { %v2924_v25 = vpop.f32.mrf.mxu0  ;;  %v2995_v6 = vpop.f32.mrf.mxu1 }
 0x726   :  { %v2925_v34 = vadd.f32 %v2924_v25, %v2783_v43  ;;  %v10509_v43 = vld [vmem:[#allocation120_spill] sm:$0xff] }
 0x727   :  { %v2926_v19 = vpop.f32.mrf.mxu0  ;;  %v2997_v59 = vpop.f32.mrf.mxu1 }
 0x728   :  { %v2927_v44 = vadd.f32 %v2926_v19, %v2785_v54  ;;  %v4622_v28 = vmul.f32 -1.442695, %v2925_v34  ;;  %v2854_v19 = vadd.f32 %v2853_v29, %v6592_v0  ;;  %v10506_v54 = vld [vmem:[#allocation117_spill] sm:$0xff]  ;;  %v10512_v34 = vld [vmem:[#allocation123_spill] sm:$0xff] }
 0x72a   :  { %v4623_v50 = vmul.f32 -1.442695, %v2927_v44  ;;  %v10510_v44 = vld [vmem:[#allocation121_spill] sm:$0xff] }
 0x747   :  { %v3097_v7 = vpop.f32.mrf.mxu0  ;;  %v3168_v32 = vpop.f32.mrf.mxu1 }
 0x748   :  { %v3098_v10 = vadd.f32 %v3097_v7, %v10488_v9  ;;  %v3169_v63 = vadd.f32 %v3168_v32, %v10490_v37  ;;  %v2856_v32 = vadd.f32 %v2855_v56, %v6597_v8  ;;  %v10501_v56 = vld [vmem:[#allocation112_spill] sm:$0xff] }
 0x749   :  { %v3099_v58 = vpop.f32.mrf.mxu0  ;;  %v3170_v2 = vpop.f32.mrf.mxu1 }
 0x74a   :  { %v4625_v13 = vmul.f32 -1.442695, %v3098_v10  ;;  %v3100_v57 = vadd.f32 %v3099_v58, %v10489_v60  ;;  %v4627_v51 = vmul.f32 -1.442695, %v3169_v63  ;;  %v3171_v48 = vadd.f32 %v3170_v2, %v10491_v5 }
 0x74b   :  { %v2996_v63 = vadd.f32 %v2995_v6, %v2854_v19  ;;  %v2998_v2 = vadd.f32 %v2997_v59, %v2856_v32  ;;  %v10502_v6 = vld [vmem:[#allocation113_spill] sm:$0xff]  ;;  %v10503_v59 = vld [vmem:[#allocation114_spill] sm:$0xff]  ;;  %v10524_v19 = vld [vmem:[#allocation135_spill] sm:$0xff] }
 0x74c   :  { %4847 = vpow2.f32 %v4625_v13  ;;  %v4626_v61 = vmul.f32 -1.442695, %v3100_v57  ;;  %v10526_v32 = vld [vmem:[#allocation137_spill] sm:$0xff] }
 0x74e   :  { %4849 = vpow2.f32 %v4626_v61 }
 0x74f   :  { %4851 = vpow2.f32 %v4627_v51  ;;  %v4624_v51 = vmul.f32 -1.442695, %v2996_v63  ;;  %v10528_v63 = vld [vmem:[#allocation139_spill] sm:$0xff] }
 0x750   :  { %4853 = vtanh.f32 %v3171_v48 }
 0x759   :  { %v4848_v15 = vpop.eup %4847 }
 0x75a   :  { %v3182_v55 = vadd.f32 1.0, %v4848_v15  ;;  %v10504_v15 = vld [vmem:[#allocation115_spill] sm:$0xff] }
 0x75b   :  { %v4850_v21 = vpop.eup %4849 }
 0x75c   :  { %4855 = vrcp.f32 %v3182_v55  ;;  %v3183_v4 = vadd.f32 1.0, %v4850_v21  ;;  %v4852_v7 = vpop.eup %4851  ;;  %v10507_v55 = vld [vmem:[#allocation118_spill] sm:$0xff]  ;;  %v10508_v21 = vld [vmem:[#allocation119_spill] sm:$0xff] }
 0x75d   :  { %v4854_v9 = vpop.eup %4853  ;;  %v3184_v13 = vadd.f32 1.0, %v4852_v7  ;;  %v10515_v7 = vld [vmem:[#allocation126_spill] sm:$0xff] }
 0x75e   :  { %4857 = vrcp.f32 %v3183_v4  ;;  %v10511_v4 = vld [vmem:[#allocation122_spill] sm:$0xff] }
 0x75f   :  { %4859 = vpow2.f32 %v4623_v50  ;;  %v10513_v50 = vld [vmem:[#allocation124_spill] sm:$0xff] }
 0x760   :  { %4861 = vpow2.f32 %v4622_v28  ;;  %v10514_v28 = vld [vmem:[#allocation125_spill] sm:$0xff] }
 0x761   :  { %4863 = vrcp.f32 %v3184_v13  ;;  %v10520_v13 = vld [vmem:[#allocation131_spill] sm:$0xff] }
 0x769   :  { %v4856_v10 = vpop.eup %4855 }
 0x76a   :  { %v3193_v58 = vmul.f32 %v4856_v10, %v4854_v9  ;;  %v10516_v9 = vld [vmem:[#allocation127_spill] sm:$0xff]  ;;  %v10517_v10 = vld [vmem:[#allocation128_spill] sm:$0xff] }
 0x76b   :  { %v4858_v30 = vpop.eup %4857 }
 0x76c   :  { %v3192_v60 = vmul.f32 %v4858_v30, %v7855_v40  ;;  %v4860_v26 = vpop.eup %4859  ;;  %v10519_v30 = vld [vmem:[#allocation130_spill] sm:$0xff] }
 0x76d   :  { %v4862_v25 = vpop.eup %4861  ;;  %v3010_v61 = vadd.f32 1.0, %v4860_v26  ;;  %v10522_v26 = vld [vmem:[#allocation133_spill] sm:$0xff] }
 0x76e   :  { %v8243_v57 = vadd.f32 %v3193_v58, %v3192_v60  ;;  %v3009_v37 = vadd.f32 1.0, %v4862_v25  ;;  %v4864_v40 = vpop.eup %4863  ;;  %v10518_v58 = vld [vmem:[#allocation129_spill] sm:$0xff]  ;;  %v10521_v60 = vld [vmem:[#allocation132_spill] sm:$0xff]  ;;  %v10523_v25 = vld [vmem:[#allocation134_spill] sm:$0xff] }
 0x770   :  { %4865 = vtanh.f32 %v8243_v57 }
 0x771   :  { %4867 = vrcp.f32 %v3010_v61  ;;  %v10525_v61 = vld [vmem:[#allocation136_spill] sm:$0xff] }
 0x772   :  { %4869 = vrcp.f32 %v3009_v37  ;;  %v10527_v37 = vld [vmem:[#allocation138_spill] sm:$0xff] }
 0x773   :  { %4871 = vtanh.f32 %v2998_v2  ;;  %v10529_v2 = vld [vmem:[#allocation140_spill] sm:$0xff] }
 0x774   :  { %4873 = vpow2.f32 %v4624_v51 }
 0x77d   :  { %v4866_v5 = vpop.eup %4865 }
 0x77e   :  { %v8248_v48 = vmul.f32 %v4866_v5, %v4864_v40  ;;  %v4868_v29 = vpop.eup %4867  ;;  %v10530_v40 = vld [vmem:[#allocation141_spill] sm:$0xff]  ;;  %v10531_v5 = vld [vmem:[#allocation142_spill] sm:$0xff] }
 0x780   :  { %3262 = vmatmul.mubr.f32.vlgmr.msra.gmra.mxu0 %v8248_v48  ;;  %3333 = vmatmul.mubr.f32.vlgmr.msra.gmra.mxu1 %v8248_v48 }
 0x781   :  { %3340 = vmatpush1.msra.mxu0 %v7864_v53  ;;  %3411 = vmatpush1.msra.mxu1 %v7867_v45  ;;  %v4870_v53 = vpop.eup %4869  ;;  %v3019_v45 = vmul.f32 %v4868_v29, %v7925_v22  ;;  %v10532_v29 = vld [vmem:[#allocation143_spill] sm:$0xff] }
 0x782   :  { %3341 = vmatprep.subr.mxu0 %v7870_v1  ;;  %3412 = vmatprep.subr.mxu1 %v7873_v47  ;;  %v4872_v1 = vpop.eup %4871  ;;  %v10492_v47 = vld [vmem:[#allocation107_spill] sm:$0xff] }
 0x783   :  { %3342 = vmatpush1.msra.mxu0 %v7876_v38  ;;  %3413 = vmatpush1.msra.mxu1 %v7879_v46  ;;  %v3020_v38 = vmul.f32 %v4872_v1, %v4870_v53  ;;  %v10493_v46 = vld [vmem:[#allocation108_spill] sm:$0xff]  ;;  %v10534_v1 = vld [vmem:[#allocation145_spill] sm:$0xff] }
 0x784   :  { %3343 = vmatprep.subr.mxu0 %v7882_v52  ;;  %3414 = vmatprep.subr.mxu1 %v7885_v14  ;;  %v10494_v52 = vld [vmem:[#allocation109_spill] sm:$0xff]  ;;  %v4874_v14 = vpop.eup %4873 }
 0x785   :  { %3344 = vmatpush1.msra.mxu0 %v7888_v62  ;;  %3415 = vmatpush1.msra.mxu1 %v7891_v39  ;;  %v10495_v62 = vld [vmem:[#allocation110_spill] sm:$0xff]  ;;  %v3011_v22 = vadd.f32 1.0, %v4874_v14 }
 0x786   :  { %3345 = vmatprep.subr.mxu0 %v7894_v3  ;;  %3416 = vmatprep.subr.mxu1 %v7897_v12  ;;  %v10496_v39 = vld [vmem:[#allocation86_spill] sm:$0xff]  ;;  %v8273_v3 = vadd.f32 %v3020_v38, %v3019_v45  ;;  %v10497_v12 = vld [vmem:[#allocation88_spill] sm:$0xff] }
 0x787   :  { %3346 = vmatpush1.msra.mxu0 %v7901_v49  ;;  %3417 = vmatpush1.msra.mxu1 %v7904_v11  ;;  %v10498_v49 = vld [vmem:[#allocation87_spill] sm:$0xff]  ;;  %v10499_v11 = vld [vmem:[#allocation89_spill] sm:$0xff]  ;;  %v10533_v45 = vld [vmem:[#allocation144_spill] sm:$0xff] }
 0x788   :  { %3347 = vmatprep.subr.mxu0 %v10492_v47  ;;  %3418 = vmatprep.subr.mxu1 %v7910_v16  ;;  %v10500_v16 = vld [vmem:[#allocation111_spill] sm:$0xff]  ;;  %4875 = vtanh.f32 %v8273_v3  ;;  %v10535_v47 = vld [vmem:[#allocation146_spill] sm:$0xff] }
 0x789   :  { %3348 = vmatpush1.msra.mxu0 %v10493_v46  ;;  %3419 = vmatpush1.msra.mxu1 %v10494_v52  ;;  %4877 = vrcp.f32 %v3011_v22  ;;  %v10536_v46 = vld [vmem:[#allocation147_spill] sm:$0xff]  ;;  %v10537_v52 = vld [vmem:[#allocation148_spill] sm:$0xff]  ;;  %v10539_v14 = vld [vmem:[#allocation150_spill] sm:$0xff] }
 0x78a   :  { %3349 = vmatprep.subr.mxu0 %v10495_v62  ;;  %3420 = vmatprep.subr.mxu1 %v10496_v39  ;;  %v10540_v62 = vld [vmem:[#allocation151_spill] sm:$0xff]  ;;  %v10541_v39 = vld [vmem:[#allocation152_spill] sm:$0xff]  ;;  %v10546_v22 = vld [vmem:[#allocation157_spill] sm:$0xff] }
 0x78b   :  { %3350 = vmatpush1.msra.mxu0 %v7927_v23  ;;  %3421 = vmatpush1.msra.mxu1 %v10497_v12  ;;  %v10505_v23 = vld [vmem:[#allocation116_spill] sm:$0xff]  ;;  %v10542_v12 = vld [vmem:[#allocation153_spill] sm:$0xff] }
 0x78c   :  { %3351 = vmatprep.subr.mxu0 %v10498_v49  ;;  %3422 = vmatprep.subr.mxu1 %v10499_v11  ;;  %v10543_v49 = vld [vmem:[#allocation154_spill] sm:$0xff]  ;;  %v10545_v11 = vld [vmem:[#allocation156_spill] sm:$0xff] }
 0x78d   :  { %3352 = vmatpush1.msra.mxu0 %v10500_v16  ;;  %3423 = vmatpush1.msra.mxu1 %v10501_v56  ;;  %v10547_v16 = vld [vmem:[#allocation158_spill] sm:$0xff]  ;;  %v10548_v56 = vld [vmem:[#allocation159_spill] sm:$0xff] }
 0x78e   :  { %3353 = vmatprep.subr.mxu0 %v10502_v6  ;;  %3424 = vmatprep.subr.mxu1 %v10503_v59  ;;  %v10549_v6 = vld [vmem:[#allocation160_spill] sm:$0xff]  ;;  %v10550_v59 = vld [vmem:[#allocation161_spill] sm:$0xff] }
 0x78f   :  { %3354 = vmatpush1.msra.mxu0 %v10504_v15  ;;  %3425 = vmatpush1.msra.mxu1 %v10505_v23  ;;  %v10551_v15 = vld [vmem:[#allocation162_spill] sm:$0xff]  ;;  %v8342_v23 = vld [vmem:[#allocation4 + $0x140] sm:$0xff] }
 0x790   :  { %3355 = vmatprep.subr.mxu0 %v10506_v54  ;;  %3426 = vmatprep.subr.mxu1 %v10507_v55  ;;  %v8345_v54 = vld [vmem:[#allocation4 + $0x150] sm:$0xff]  ;;  %v8348_v55 = vld [vmem:[#allocation4 + $0x128] sm:$0xff] }
 0x791   :  { %3356 = vmatpush1.msra.mxu0 %v10508_v21  ;;  %3427 = vmatpush1.msra.mxu1 %v10509_v43  ;;  %v8369_v21 = vld [vmem:[#allocation4 + $0x110] sm:$0xff]  ;;  %v8372_v43 = vld [vmem:[#allocation4 + $0xe8] sm:$0xff] }
 0x792   :  { %3357 = vmatprep.subr.mxu0 %v10510_v44  ;;  %3428 = vmatprep.subr.mxu1 %v10511_v4  ;;  %v8375_v44 = vld [vmem:[#allocation4 + $0xf8] sm:$0xff]  ;;  %v8378_v4 = vld [vmem:[#allocation4 + $0xe0] sm:$0xff] }
 0x793   :  { %3358 = vmatpush1.msra.mxu0 %v10512_v34  ;;  %3429 = vmatpush1.msra.mxu1 %v10513_v50  ;;  %v8381_v34 = vld [vmem:[#allocation4 + $0xf0] sm:$0xff]  ;;  %v8384_v50 = vld [vmem:[#allocation4 + $0xc8] sm:$0xff] }
 0x794   :  { %3359 = vmatprep.subr.mxu0 %v10514_v28  ;;  %3430 = vmatprep.subr.mxu1 %v10515_v7  ;;  %v8387_v28 = vld [vmem:[#allocation4 + $0xd8] sm:$0xff]  ;;  %v8390_v7 = vld [vmem:[#allocation4 + $0xc0] sm:$0xff] }
 0x795   :  { %3360 = vmatpush1.msra.mxu0 %v10516_v9  ;;  %3431 = vmatpush1.msra.mxu1 %v10517_v10  ;;  %v4876_v51 = vpop.eup %4875  ;;  %v8393_v9 = vld [vmem:[#allocation4 + $0xd0] sm:$0xff]  ;;  %v8396_v10 = vld [vmem:[#allocation4 + $0xa8] sm:$0xff] }
 0x796   :  { %3361 = vmatprep.subr.mxu0 %v10518_v58  ;;  %3432 = vmatprep.subr.mxu1 %v10519_v30  ;;  %v4878_v53 = vpop.eup %4877  ;;  %v8399_v58 = vld [vmem:[#allocation4 + $0xb8] sm:$0xff]  ;;  %v8402_v30 = vld [vmem:[#allocation4 + $0xa0] sm:$0xff] }
 0x797   :  { %3362 = vmatpush1.msra.mxu0 %v10520_v13  ;;  %3433 = vmatpush1.msra.mxu1 %v10521_v60  ;;  %v3023_v38 = vmul.f32 %v4878_v53, %v4876_v51  ;;  %v8405_v13 = vld [vmem:[#allocation4 + $0xb0] sm:$0xff]  ;;  %v8408_v60 = vld [vmem:[#allocation4 + $0x88] sm:$0xff]  ;;  %v8435_v51 = vld [vmem:[#allocation4 + $0x58] sm:$0xff] }
 0x798   :  { %3363 = vmatprep.subr.mxu0 %v10522_v26  ;;  %3434 = vmatprep.subr.mxu1 %v10523_v25  ;;  %v8411_v26 = vld [vmem:[#allocation4 + $0x98] sm:$0xff]  ;;  %v8414_v25 = vld [vmem:[#allocation4 + $0x80] sm:$0xff] }
 0x799   :  { %3364 = vmatpush1.msra.mxu0 %v10524_v19  ;;  %3435 = vmatpush1.msra.mxu1 %v10525_v61  ;;  %v8417_v19 = vld [vmem:[#allocation4 + $0x90] sm:$0xff]  ;;  %v8420_v61 = vld [vmem:[#allocation4 + $0x68] sm:$0xff]  ;;  %v8447_v53 = vld [vmem:[#allocation4 + $0x38] sm:$0xff] }
 0x79a   :  { %3365 = vmatprep.subr.mxu0 %v10526_v32  ;;  %3436 = vmatprep.subr.mxu1 %v10527_v37  ;;  %v8423_v32 = vld [vmem:[#allocation4 + $0x78] sm:$0xff]  ;;  %v8426_v37 = vld [vmem:[#allocation4 + $0x60] sm:$0xff]  ;;  %10555 = vst [vmem:[#allocation166_spill] sm:$0xff] %v8447_v53 }
 0x79b   :  { %3366 = vmatpush1.msra.mxu0 %v10528_v63  ;;  %3437 = vmatpush1.msra.mxu1 %v10529_v2  ;;  %v8429_v63 = vld [vmem:[#allocation4 + $0x70] sm:$0xff]  ;;  %v8432_v2 = vld [vmem:[#allocation4 + $0x48] sm:$0xff] }
 0x79c   :  { %3367 = vmatprep.subr.mxu0 %v10530_v40  ;;  %3438 = vmatprep.subr.mxu1 %v10531_v5  ;;  %v8438_v40 = vld [vmem:[#allocation4 + $0x40] sm:$0xff]  ;;  %v8441_v5 = vld [vmem:[#allocation4 + $0x50] sm:$0xff] }
 0x79d   :  { %3368 = vmatpush1.msra.mxu0 %v10532_v29  ;;  %3439 = vmatpush1.msra.mxu1 %v8039_v42  ;;  %v10538_v42 = vld [vmem:[#allocation149_spill] sm:$0xff]  ;;  %10552 = vst [vmem:[#allocation163_spill] sm:$0xff] %v8438_v40  ;;  %10553 = vst [vmem:[#allocation164_spill] sm:$0xff] %v8441_v5  ;;  %v8444_v29 = vld [vmem:[#allocation4 + $0x28] sm:$0xff] }
 0x79e   :  { %3369 = vmatprep.subr.mxu0 %v10533_v45  ;;  %3440 = vmatprep.subr.mxu1 %v10534_v1  ;;  %10554 = vst [vmem:[#allocation165_spill] sm:$0xff] %v8444_v29  ;;  %v8450_v45 = vld [vmem:[#allocation4 + $0x20] sm:$0xff]  ;;  %v8453_v1 = vld [vmem:[#allocation4 + $0x30] sm:$0xff] }
 0x79f   :  { %3370 = vmatpush1.msra.mxu0 %v10535_v47  ;;  %3403 = vmatprep.mubr.f32.mxu0 %v9835_v27  ;;  %10556 = vst [vmem:[#allocation167_spill] sm:$0xff] %v8450_v45  ;;  %10557 = vst [vmem:[#allocation168_spill] sm:$0xff] %v8453_v1  ;;  %v8456_v47 = vld [vmem:[#allocation4 + $0x8] sm:$0xff] }
 0x7a0   :  { %3441 = vmatpush1.msra.mxu1 %v8052_v24  ;;  %3474 = vmatprep.mubr.f32.mxu1 %v9835_v27  ;;  %v10544_v24 = vld [vmem:[#allocation155_spill] sm:$0xff]  ;;  %10558 = vst [vmem:[#allocation169_spill] sm:$0xff] %v8456_v47 }
 0x7a1   :  { %3404 = vmatmul.mubr.f32.vlgmr.msra.gmra.mxu0 %v3023_v38  ;;  %3475 = vmatmul.mubr.f32.vlgmr.msra.gmra.mxu1 %v3023_v38  ;;  %v8459_v38 = vld [vmem:[#allocation4 + $0x18] sm:$0xff] }
 0x7a2   :  { %3512 = vmatprep.subr.mxu0 %v10536_v46  ;;  %3583 = vmatprep.subr.mxu1 %v10537_v52  ;;  %10559 = vst [vmem:[#allocation170_spill] sm:$0xff] %v8459_v38  ;;  %v8462_v46 = vld [vmem:[#allocation4] sm:$0xff]  ;;  %v8466_v52 = vld [vmem:[#allocation4 + $0x10] sm:$0xff] }
 0x7a3   :  { %3513 = vmatpush1.msra.mxu0 %v10538_v42  ;;  %3584 = vmatpush1.msra.mxu1 %v10539_v14  ;;  %10560 = vst [vmem:[#allocation90_spill] sm:$0xff] %v8462_v46  ;;  %10561 = vst [vmem:[#allocation92_spill] sm:$0xff] %v8466_v52  ;;  %v8472_v42 = vld [vmem:[#allocation6 + $0x1e8] sm:$0xff]  ;;  %v8475_v14 = vld [vmem:[#allocation6 + $0x1f8] sm:$0xff] }
 0x7a4   :  { %3514 = vmatprep.subr.mxu0 %v10540_v62  ;;  %3585 = vmatprep.subr.mxu1 %v10541_v39  ;;  %10562 = vst [vmem:[#allocation91_spill] sm:$0xff] %v8472_v42  ;;  %10563 = vst [vmem:[#allocation93_spill] sm:$0xff] %v8475_v14  ;;  %v8478_v62 = vld [vmem:[#allocation6 + $0x1e0] sm:$0xff]  ;;  %v8481_v39 = vld [vmem:[#allocation6 + $0x1f0] sm:$0xff] }
 0x7a5   :  { %3515 = vmatpush1.msra.mxu0 %v10542_v12  ;;  %3586 = vmatpush1.msra.mxu1 %v10543_v49  ;;  %10564 = vst [vmem:[#allocation82_spill] sm:$0xff] %v8478_v62  ;;  %10565 = vst [vmem:[#allocation84_spill] sm:$0xff] %v8481_v39  ;;  %v8484_v12 = vld [vmem:[#allocation6 + $0x1c8] sm:$0xff]  ;;  %v8490_v49 = vld [vmem:[#allocation6 + $0x1c0] sm:$0xff] }
 0x7a6   :  { %3516 = vmatprep.subr.mxu0 %v10544_v24  ;;  %3587 = vmatprep.subr.mxu1 %v10545_v11  ;;  %10566 = vst [vmem:[#allocation83_spill] sm:$0xff] %v8484_v12  ;;  %10568 = vst [vmem:[#allocation11_spill] sm:$0xff] %v8490_v49  ;;  %v8493_v24 = vld [vmem:[#allocation6 + $0x1d0] sm:$0xff]  ;;  %v8496_v11 = vld [vmem:[#allocation6 + $0x1a8] sm:$0xff] }
 0x7a7   :  { %3517 = vmatpush1.msra.mxu0 %v10546_v22  ;;  %3588 = vmatpush1.msra.mxu1 %v10547_v16  ;;  %10569 = vst [vmem:[#allocation12_spill] sm:$0xff] %v8493_v24  ;;  %10570 = vst [vmem:[#allocation13_spill] sm:$0xff] %v8496_v11  ;;  %v8499_v22 = vld [vmem:[#allocation6 + $0x1b8] sm:$0xff]  ;;  %v8502_v16 = vld [vmem:[#allocation6 + $0x1a0] sm:$0xff] }
 0x7a8   :  { %3518 = vmatprep.subr.mxu0 %v10548_v56  ;;  %3589 = vmatprep.subr.mxu1 %v10549_v6  ;;  %10571 = vst [vmem:[#allocation14_spill] sm:$0xff] %v8499_v22  ;;  %10572 = vst [vmem:[#allocation15_spill] sm:$0xff] %v8502_v16  ;;  %v8505_v56 = vld [vmem:[#allocation6 + $0x1b0] sm:$0xff]  ;;  %v8508_v6 = vld [vmem:[#allocation6 + $0x188] sm:$0xff] }
 0x7a9   :  { %3519 = vmatpush1.msra.mxu0 %v10550_v59  ;;  %3590 = vmatpush1.msra.mxu1 %v10551_v15  ;;  %10573 = vst [vmem:[#allocation16_spill] sm:$0xff] %v8505_v56  ;;  %10574 = vst [vmem:[#allocation17_spill] sm:$0xff] %v8508_v6  ;;  %v8511_v59 = vld [vmem:[#allocation6 + $0x198] sm:$0xff]  ;;  %v8514_v15 = vld [vmem:[#allocation6 + $0x180] sm:$0xff] }
 0x7aa   :  { %3520 = vmatprep.subr.mxu0 %v8104_v35  ;;  %3591 = vmatprep.subr.mxu1 %v8107_v36  ;;  %v8351_v35 = vld [vmem:[#allocation4 + $0x138] sm:$0xff]  ;;  %v8366_v36 = vld [vmem:[#allocation4 + $0x100] sm:$0xff]  ;;  %10575 = vst [vmem:[#allocation18_spill] sm:$0xff] %v8511_v59  ;;  %10576 = vst [vmem:[#allocation19_spill] sm:$0xff] %v8514_v15 }
 0x7ab   :  { %3521 = vmatpush1.msra.mxu0 %v8110_v33  ;;  %3592 = vmatpush1.msra.mxu1 %v8113_v31  ;;  %v8354_v33 = vld [vmem:[#allocation4 + $0x120] sm:$0xff]  ;;  %v8360_v31 = vld [vmem:[#allocation4 + $0x108] sm:$0xff] }
 0x7ac   :  { %3522 = vmatprep.subr.mxu0 %v8116_v17  ;;  %3593 = vmatprep.subr.mxu1 %v8119_v18  ;;  %v8357_v17 = vld [vmem:[#allocation4 + $0x130] sm:$0xff]  ;;  %v8363_v18 = vld [vmem:[#allocation4 + $0x118] sm:$0xff] }
 0x7ad   :  { %3523 = vmatpush1.msra.mxu0 %v8342_v23  ;;  %3594 = vmatpush1.msra.mxu1 %v8345_v54 }
 0x7ae   :  { %3524 = vmatprep.subr.mxu0 %v8348_v55  ;;  %3595 = vmatprep.subr.mxu1 %v8351_v35 }
 0x7af   :  { %3525 = vmatpush1.msra.mxu0 %v8354_v33  ;;  %3596 = vmatpush1.msra.mxu1 %v8357_v17 }
 0x7b0   :  { %3526 = vmatprep.subr.mxu0 %v8360_v31  ;;  %3597 = vmatprep.subr.mxu1 %v8363_v18 }
 0x7b1   :  { %3527 = vmatpush1.msra.mxu0 %v8366_v36  ;;  %3598 = vmatpush1.msra.mxu1 %v8369_v21 }
 0x7b2   :  { %3528 = vmatprep.subr.mxu0 %v8372_v43  ;;  %3599 = vmatprep.subr.mxu1 %v8375_v44 }
 0x7b3   :  { %3529 = vmatpush1.msra.mxu0 %v8378_v4  ;;  %3600 = vmatpush1.msra.mxu1 %v8381_v34 }
 0x7b4   :  { %3530 = vmatprep.subr.mxu0 %v8384_v50  ;;  %3601 = vmatprep.subr.mxu1 %v8387_v28 }
 0x7b5   :  { %3531 = vmatpush1.msra.mxu0 %v8390_v7  ;;  %3602 = vmatpush1.msra.mxu1 %v8393_v9 }
 0x7b6   :  { %3532 = vmatprep.subr.mxu0 %v8396_v10  ;;  %3603 = vmatprep.subr.mxu1 %v8399_v58 }
 0x7b7   :  { %3533 = vmatpush1.msra.mxu0 %v8402_v30  ;;  %3604 = vmatpush1.msra.mxu1 %v8405_v13 }
 0x7b8   :  { %3534 = vmatprep.subr.mxu0 %v8408_v60  ;;  %3605 = vmatprep.subr.mxu1 %v8411_v26 }
 0x7b9   :  { %3535 = vmatpush1.msra.mxu0 %v8414_v25  ;;  %3606 = vmatpush1.msra.mxu1 %v8417_v19 }
 0x7ba   :  { %3536 = vmatprep.subr.mxu0 %v8420_v61  ;;  %3607 = vmatprep.subr.mxu1 %v8423_v32 }
 0x7bb   :  { %3537 = vmatpush1.msra.mxu0 %v8426_v37  ;;  %3608 = vmatpush1.msra.mxu1 %v8429_v63 }
 0x7bc   :  { %3538 = vmatprep.subr.mxu0 %v8432_v2  ;;  %3609 = vmatprep.subr.mxu1 %v8435_v51 }
 0x7bd   :  { %3539 = vmatpush1.msra.mxu0 %v8438_v40  ;;  %3610 = vmatpush1.msra.mxu1 %v8441_v5 }
 0x7be   :  { %3540 = vmatprep.subr.mxu0 %v8444_v29  ;;  %3611 = vmatprep.subr.mxu1 %v8447_v53  ;;  %v10631_v53 = vld [vmem:[#allocation101_spill] sm:$0xff] }
 0x7bf   :  { %3541 = vmatpush1.msra.mxu0 %v8450_v45  ;;  %3612 = vmatpush1.msra.mxu1 %v8453_v1 }
 0x7c0   :  { %3542 = vmatprep.subr.mxu0 %v8456_v47  ;;  %3613 = vmatprep.subr.mxu1 %v8459_v38 }
 0x7c1   :  { %3543 = vmatpush1.msra.mxu0 %v8462_v46  ;;  %3576 = vmatprep.mubr.f32.mxu0 %v9835_v27 }
 0x7c2   :  { %3614 = vmatpush1.msra.mxu1 %v8466_v52  ;;  %3647 = vmatprep.mubr.f32.mxu1 %v9835_v27 }
 0x7c3   :  { %3577 = vmatmul.mubr.f32.vlgmr.msra.gmra.mxu0 %v8248_v48  ;;  %3648 = vmatmul.mubr.f32.vlgmr.msra.gmra.mxu1 %v8248_v48  ;;  %v8487_v48 = vld [vmem:[#allocation6 + $0x1d8] sm:$0xff] }
 0x7c4   :  { %3678 = vmatprep.subr.mxu0 %v8472_v42  ;;  %3749 = vmatprep.subr.mxu1 %v8475_v14  ;;  %10567 = vst [vmem:[#allocation85_spill] sm:$0xff] %v8487_v48  ;;  %v10629_v42 = vld [vmem:[#allocation100_spill] sm:$0xff] }
 0x7c5   :  { %3679 = vmatpush1.msra.mxu0 %v8478_v62  ;;  %3750 = vmatpush1.msra.mxu1 %v8481_v39 }
 0x7c6   :  { %3680 = vmatprep.subr.mxu0 %v8484_v12  ;;  %3751 = vmatprep.subr.mxu1 %v8487_v48 }
 0x7c7   :  { %3681 = vmatpush1.msra.mxu0 %v8490_v49  ;;  %3752 = vmatpush1.msra.mxu1 %v8493_v24 }
 0x7c8   :  { %3682 = vmatprep.subr.mxu0 %v8496_v11  ;;  %3753 = vmatprep.subr.mxu1 %v8499_v22  ;;  %v8517_v22 = vld [vmem:[#allocation6 + $0x190] sm:$0xff] }
 0x7c9   :  { %3683 = vmatpush1.msra.mxu0 %v8502_v16  ;;  %3754 = vmatpush1.msra.mxu1 %v8505_v56  ;;  %10577 = vst [vmem:[#allocation20_spill] sm:$0xff] %v8517_v22  ;;  %v8520_v16 = vld [vmem:[#allocation6 + $0x168] sm:$0xff]  ;;  %v8523_v56 = vld [vmem:[#allocation6 + $0x178] sm:$0xff] }
 0x7ca   :  { %3684 = vmatprep.subr.mxu0 %v8508_v6  ;;  %3755 = vmatprep.subr.mxu1 %v8511_v59  ;;  %10578 = vst [vmem:[#allocation21_spill] sm:$0xff] %v8520_v16  ;;  %10579 = vst [vmem:[#allocation22_spill] sm:$0xff] %v8523_v56  ;;  %v8526_v6 = vld [vmem:[#allocation6 + $0x160] sm:$0xff]  ;;  %v8529_v59 = vld [vmem:[#allocation6 + $0x170] sm:$0xff] }
 0x7cb   :  { %3685 = vmatpush1.msra.mxu0 %v8514_v15  ;;  %3756 = vmatpush1.msra.mxu1 %v8517_v22  ;;  %10580 = vst [vmem:[#allocation23_spill] sm:$0xff] %v8526_v6  ;;  %10581 = vst [vmem:[#allocation24_spill] sm:$0xff] %v8529_v59  ;;  %v8532_v15 = vld [vmem:[#allocation6 + $0x148] sm:$0xff]  ;;  %v8535_v22 = vld [vmem:[#allocation6 + $0x158] sm:$0xff] }
 0x7cc   :  { %3686 = vmatprep.subr.mxu0 %v8520_v16  ;;  %3757 = vmatprep.subr.mxu1 %v8523_v56  ;;  %10582 = vst [vmem:[#allocation25_spill] sm:$0xff] %v8532_v15  ;;  %10583 = vst [vmem:[#allocation26_spill] sm:$0xff] %v8535_v22  ;;  %v8538_v16 = vld [vmem:[#allocation6 + $0x140] sm:$0xff]  ;;  %v8541_v56 = vld [vmem:[#allocation6 + $0x150] sm:$0xff] }
 0x7cd   :  { %3687 = vmatpush1.msra.mxu0 %v8526_v6  ;;  %3758 = vmatpush1.msra.mxu1 %v8529_v59  ;;  %10584 = vst [vmem:[#allocation27_spill] sm:$0xff] %v8538_v16  ;;  %10585 = vst [vmem:[#allocation28_spill] sm:$0xff] %v8541_v56  ;;  %v8544_v6 = vld [vmem:[#allocation6 + $0x128] sm:$0xff]  ;;  %v8547_v59 = vld [vmem:[#allocation6 + $0x138] sm:$0xff] }
 0x7ce   :  { %3688 = vmatprep.subr.mxu0 %v8532_v15  ;;  %3759 = vmatprep.subr.mxu1 %v8535_v22  ;;  %10586 = vst [vmem:[#allocation29_spill] sm:$0xff] %v8544_v6  ;;  %10587 = vst [vmem:[#allocation30_spill] sm:$0xff] %v8547_v59  ;;  %v8550_v15 = vld [vmem:[#allocation6 + $0x120] sm:$0xff]  ;;  %v8553_v22 = vld [vmem:[#allocation6 + $0x130] sm:$0xff] }
 0x7cf   :  { %3689 = vmatpush1.msra.mxu0 %v8538_v16  ;;  %3760 = vmatpush1.msra.mxu1 %v8541_v56  ;;  %10588 = vst [vmem:[#allocation31_spill] sm:$0xff] %v8550_v15  ;;  %10589 = vst [vmem:[#allocation32_spill] sm:$0xff] %v8553_v22  ;;  %v8556_v16 = vld [vmem:[#allocation6 + $0x108] sm:$0xff]  ;;  %v8559_v56 = vld [vmem:[#allocation6 + $0x118] sm:$0xff] }
 0x7d0   :  { %3690 = vmatprep.subr.mxu0 %v8544_v6  ;;  %3761 = vmatprep.subr.mxu1 %v8547_v59  ;;  %10590 = vst [vmem:[#allocation33_spill] sm:$0xff] %v8556_v16  ;;  %10591 = vst [vmem:[#allocation34_spill] sm:$0xff] %v8559_v56  ;;  %v8562_v6 = vld [vmem:[#allocation6 + $0x100] sm:$0xff]  ;;  %v8565_v59 = vld [vmem:[#allocation6 + $0x110] sm:$0xff] }
 0x7d1   :  { %3691 = vmatpush1.msra.mxu0 %v8550_v15  ;;  %3762 = vmatpush1.msra.mxu1 %v8553_v22  ;;  %10592 = vst [vmem:[#allocation35_spill] sm:$0xff] %v8562_v6  ;;  %10593 = vst [vmem:[#allocation36_spill] sm:$0xff] %v8565_v59  ;;  %v8568_v15 = vld [vmem:[#allocation6 + $0xe8] sm:$0xff]  ;;  %v8571_v22 = vld [vmem:[#allocation6 + $0xf8] sm:$0xff] }
 0x7d2   :  { %3692 = vmatprep.subr.mxu0 %v8556_v16  ;;  %3763 = vmatprep.subr.mxu1 %v8559_v56  ;;  %10594 = vst [vmem:[#allocation37_spill] sm:$0xff] %v8568_v15  ;;  %10595 = vst [vmem:[#allocation38_spill] sm:$0xff] %v8571_v22  ;;  %v8574_v16 = vld [vmem:[#allocation6 + $0xe0] sm:$0xff]  ;;  %v8577_v56 = vld [vmem:[#allocation6 + $0xf0] sm:$0xff] }
 0x7d3   :  { %3693 = vmatpush1.msra.mxu0 %v8562_v6  ;;  %3764 = vmatpush1.msra.mxu1 %v8565_v59  ;;  %10596 = vst [vmem:[#allocation39_spill] sm:$0xff] %v8574_v16  ;;  %10597 = vst [vmem:[#allocation40_spill] sm:$0xff] %v8577_v56  ;;  %v8580_v6 = vld [vmem:[#allocation6 + $0xc8] sm:$0xff]  ;;  %v8583_v59 = vld [vmem:[#allocation6 + $0xd8] sm:$0xff] }
 0x7d4   :  { %3694 = vmatprep.subr.mxu0 %v8568_v15  ;;  %3765 = vmatprep.subr.mxu1 %v8571_v22  ;;  %10598 = vst [vmem:[#allocation41_spill] sm:$0xff] %v8580_v6  ;;  %10599 = vst [vmem:[#allocation42_spill] sm:$0xff] %v8583_v59  ;;  %v8586_v15 = vld [vmem:[#allocation6 + $0xc0] sm:$0xff]  ;;  %v8589_v22 = vld [vmem:[#allocation6 + $0xd0] sm:$0xff] }
 0x7d5   :  { %3695 = vmatpush1.msra.mxu0 %v8574_v16  ;;  %3766 = vmatpush1.msra.mxu1 %v8577_v56  ;;  %10600 = vst [vmem:[#allocation43_spill] sm:$0xff] %v8586_v15  ;;  %10601 = vst [vmem:[#allocation44_spill] sm:$0xff] %v8589_v22  ;;  %v8592_v16 = vld [vmem:[#allocation6 + $0xa8] sm:$0xff]  ;;  %v8595_v56 = vld [vmem:[#allocation6 + $0xb8] sm:$0xff] }
 0x7d6   :  { %3696 = vmatprep.subr.mxu0 %v8580_v6  ;;  %3767 = vmatprep.subr.mxu1 %v8583_v59  ;;  %10602 = vst [vmem:[#allocation45_spill] sm:$0xff] %v8592_v16  ;;  %10603 = vst [vmem:[#allocation46_spill] sm:$0xff] %v8595_v56  ;;  %v8598_v6 = vld [vmem:[#allocation6 + $0xa0] sm:$0xff]  ;;  %v8601_v59 = vld [vmem:[#allocation6 + $0xb0] sm:$0xff] }
 0x7d7   :  { %3697 = vmatpush1.msra.mxu0 %v8586_v15  ;;  %3768 = vmatpush1.msra.mxu1 %v8589_v22  ;;  %10604 = vst [vmem:[#allocation47_spill] sm:$0xff] %v8598_v6  ;;  %10605 = vst [vmem:[#allocation48_spill] sm:$0xff] %v8601_v59  ;;  %v8604_v15 = vld [vmem:[#allocation6 + $0x88] sm:$0xff]  ;;  %v8607_v22 = vld [vmem:[#allocation6 + $0x98] sm:$0xff] }
 0x7d8   :  { %3698 = vmatprep.subr.mxu0 %v8592_v16  ;;  %3769 = vmatprep.subr.mxu1 %v8595_v56  ;;  %10606 = vst [vmem:[#allocation49_spill] sm:$0xff] %v8604_v15  ;;  %10607 = vst [vmem:[#allocation50_spill] sm:$0xff] %v8607_v22  ;;  %v8610_v16 = vld [vmem:[#allocation6 + $0x80] sm:$0xff]  ;;  %v8613_v56 = vld [vmem:[#allocation6 + $0x90] sm:$0xff] }
 0x7d9   :  { %3699 = vmatpush1.msra.mxu0 %v8598_v6  ;;  %3770 = vmatpush1.msra.mxu1 %v8601_v59  ;;  %10608 = vst [vmem:[#allocation51_spill] sm:$0xff] %v8610_v16  ;;  %10609 = vst [vmem:[#allocation52_spill] sm:$0xff] %v8613_v56  ;;  %v8616_v6 = vld [vmem:[#allocation6 + $0x68] sm:$0xff]  ;;  %v8619_v59 = vld [vmem:[#allocation6 + $0x78] sm:$0xff] }
 0x7da   :  { %3700 = vmatprep.subr.mxu0 %v8604_v15  ;;  %3771 = vmatprep.subr.mxu1 %v8607_v22  ;;  %10610 = vst [vmem:[#allocation53_spill] sm:$0xff] %v8616_v6  ;;  %10611 = vst [vmem:[#allocation54_spill] sm:$0xff] %v8619_v59  ;;  %v8622_v15 = vld [vmem:[#allocation6 + $0x60] sm:$0xff]  ;;  %v8625_v22 = vld [vmem:[#allocation6 + $0x70] sm:$0xff] }
 0x7db   :  { %3701 = vmatpush1.msra.mxu0 %v8610_v16  ;;  %3772 = vmatpush1.msra.mxu1 %v8613_v56  ;;  %10612 = vst [vmem:[#allocation55_spill] sm:$0xff] %v8622_v15  ;;  %10613 = vst [vmem:[#allocation56_spill] sm:$0xff] %v8625_v22  ;;  %v8628_v16 = vld [vmem:[#allocation6 + $0x48] sm:$0xff]  ;;  %v8631_v56 = vld [vmem:[#allocation6 + $0x58] sm:$0xff] }
 0x7dc   :  { %3702 = vmatprep.subr.mxu0 %v8616_v6  ;;  %3773 = vmatprep.subr.mxu1 %v8619_v59  ;;  %10614 = vst [vmem:[#allocation57_spill] sm:$0xff] %v8628_v16  ;;  %10615 = vst [vmem:[#allocation58_spill] sm:$0xff] %v8631_v56  ;;  %v8634_v6 = vld [vmem:[#allocation6 + $0x40] sm:$0xff]  ;;  %v8637_v59 = vld [vmem:[#allocation6 + $0x50] sm:$0xff] }
 0x7dd   :  { %3703 = vmatpush1.msra.mxu0 %v8622_v15  ;;  %3774 = vmatpush1.msra.mxu1 %v8625_v22  ;;  %10616 = vst [vmem:[#allocation59_spill] sm:$0xff] %v8634_v6  ;;  %10617 = vst [vmem:[#allocation60_spill] sm:$0xff] %v8637_v59  ;;  %v8640_v15 = vld [vmem:[#allocation6 + $0x28] sm:$0xff]  ;;  %v8643_v22 = vld [vmem:[#allocation6 + $0x38] sm:$0xff] }
 0x7de   :  { %3704 = vmatprep.subr.mxu0 %v8628_v16  ;;  %3775 = vmatprep.subr.mxu1 %v8631_v56  ;;  %10618 = vst [vmem:[#allocation61_spill] sm:$0xff] %v8640_v15  ;;  %10619 = vst [vmem:[#allocation62_spill] sm:$0xff] %v8643_v22  ;;  %v8646_v16 = vld [vmem:[#allocation6 + $0x20] sm:$0xff]  ;;  %v8649_v56 = vld [vmem:[#allocation6 + $0x30] sm:$0xff] }
 0x7df   :  { %3705 = vmatpush1.msra.mxu0 %v8634_v6  ;;  %3776 = vmatpush1.msra.mxu1 %v8637_v59  ;;  %10620 = vst [vmem:[#allocation63_spill] sm:$0xff] %v8646_v16  ;;  %10621 = vst [vmem:[#allocation64_spill] sm:$0xff] %v8649_v56  ;;  %v8652_v6 = vld [vmem:[#allocation6 + $0x8] sm:$0xff]  ;;  %v8655_v59 = vld [vmem:[#allocation6 + $0x18] sm:$0xff] }
 0x7e0   :  { %3706 = vmatprep.subr.mxu0 %v8640_v15  ;;  %3777 = vmatprep.subr.mxu1 %v8643_v22  ;;  %10622 = vst [vmem:[#allocation65_spill] sm:$0xff] %v8652_v6  ;;  %10623 = vst [vmem:[#allocation66_spill] sm:$0xff] %v8655_v59  ;;  %v8658_v15 = vld [vmem:[#allocation6] sm:$0xff]  ;;  %v8661_v22 = vld [vmem:[#allocation6 + $0x10] sm:$0xff] }
 0x7e1   :  { %3707 = vmatpush1.msra.mxu0 %v8646_v16  ;;  %3778 = vmatpush1.msra.mxu1 %v8649_v56  ;;  %10624 = vst [vmem:[#allocation67_spill] sm:$0xff] %v8658_v15  ;;  %10625 = vst [vmem:[#allocation68_spill] sm:$0xff] %v8661_v22  ;;  %v8666_v56 = vld [vmem:[#allocation8 + $0x1e8] sm:$0xff] }
 0x7e2   :  { %3708 = vmatprep.subr.mxu0 %v8652_v6  ;;  %3779 = vmatprep.subr.mxu1 %v8655_v59  ;;  %10626 = vst [vmem:[#allocation69_spill] sm:$0xff] %v8666_v56  ;;  %v8669_v6 = vld [vmem:[#allocation8 + $0x1f8] sm:$0xff] }
 0x7e3   :  { %3709 = vmatpush1.msra.mxu0 %v8658_v15  ;;  %3780 = vmatpush1.msra.mxu1 %v8661_v22  ;;  %10627 = vst [vmem:[#allocation70_spill] sm:$0xff] %v8669_v6  ;;  %v10628_v22 = vld [vmem:[#allocation98_spill] sm:$0xff] }
 0x7e4   :  { %3742 = vmatprep.mubr.f32.mxu0 %v9835_v27  ;;  %3813 = vmatprep.mubr.f32.mxu1 %v9835_v27 }
 0x7e5   :  { %3820 = vmatprep.subr.mxu0 %v8666_v56  ;;  %3891 = vmatprep.subr.mxu1 %v8669_v6  ;;  %v10630_v6 = vld [vmem:[#allocation99_spill] sm:$0xff] }
 0x840   :  { %v3263_v59 = vpop.f32.mrf.mxu0  ;;  %v3334_v15 = vpop.f32.mrf.mxu1 }
 0x842   :  { %v3265_v16 = vpop.f32.mrf.mxu0  ;;  %v3336_v49 = vpop.f32.mrf.mxu1 }
 0x843   :  { %v3266_v40 = vadd.f32 %v3265_v16, %v6578_v20 }
 0x861   :  { %v3405_v11 = vpop.f32.mrf.mxu0  ;;  %v3476_v39 = vpop.f32.mrf.mxu1 }
 0x863   :  { %v3407_v24 = vpop.f32.mrf.mxu0  ;;  %v3478_v46 = vpop.f32.mrf.mxu1 }
 0x883   :  { %v3578_v48 = vpop.f32.mrf.mxu0  ;;  %v3649_v38 = vpop.f32.mrf.mxu1 }
 0x884   :  { %v3579_v12 = vadd.f32 %v3578_v48, %v10628_v22  ;;  %v3650_v47 = vadd.f32 %v3649_v38, %v10630_v6 }
 0x885   :  { %v3580_v62 = vpop.f32.mrf.mxu0  ;;  %v3651_v1 = vpop.f32.mrf.mxu1 }
 0x886   :  { %v4631_v14 = vmul.f32 -1.442695, %v3579_v12  ;;  %v3581_v52 = vadd.f32 %v3580_v62, %v10629_v42  ;;  %v4633_v45 = vmul.f32 -1.442695, %v3650_v47  ;;  %v3652_v29 = vadd.f32 %v3651_v1, %v10631_v53 }
 0x887   :  { %v3264_v42 = vadd.f32 %v3263_v59, %v6583_v41  ;;  %v3337_v59 = vadd.f32 %v3336_v49, %v6597_v8  ;;  %v8691_v49 = vld [vmem:[#allocation8 + $0x1f0] sm:$0xff] }
 0x888   :  { %4879 = vpow2.f32 %v4631_v14  ;;  %v4632_v56 = vmul.f32 -1.442695, %v3581_v52  ;;  %v3408_v14 = vadd.f32 %v3407_v24, %v3266_v40 }
 0x889   :  { %v3406_v62 = vadd.f32 %v3405_v11, %v3264_v42  ;;  %v3335_v11 = vadd.f32 %v3334_v15, %v6592_v0  ;;  %v3479_v42 = vadd.f32 %v3478_v46, %v3337_v59  ;;  %v8688_v15 = vld [vmem:[#allocation8 + $0x1e0] sm:$0xff]  ;;  %v8694_v46 = vld [vmem:[#allocation8 + $0x1c8] sm:$0xff] }
 0x88a   :  { %4881 = vpow2.f32 %v4632_v56  ;;  %v4629_v22 = vmul.f32 -1.442695, %v3408_v14 }
 0x88b   :  { %4883 = vpow2.f32 %v4633_v45  ;;  %v4628_v38 = vmul.f32 -1.442695, %v3406_v62 }
 0x88c   :  { %4885 = vtanh.f32 %v3652_v29 }
 0x895   :  { %v4880_v5 = vpop.eup %4879 }
 0x896   :  { %v3663_v48 = vadd.f32 1.0, %v4880_v5 }
 0x897   :  { %v4882_v12 = vpop.eup %4881 }
 0x898   :  { %4887 = vrcp.f32 %v3663_v48  ;;  %v3664_v52 = vadd.f32 1.0, %v4882_v12  ;;  %v4884_v47 = vpop.eup %4883  ;;  %v3477_v12 = vadd.f32 %v3476_v39, %v3335_v11  ;;  %v8697_v39 = vld [vmem:[#allocation8 + $0x1d8] sm:$0xff]  ;;  %v8725_v11 = vld [vmem:[#allocation8 + $0x180] sm:$0xff] }
 0x899   :  { %v4886_v53 = vpop.eup %4885  ;;  %v3665_v5 = vadd.f32 1.0, %v4884_v47 }
 0x89a   :  { %4889 = vrcp.f32 %v3664_v52  ;;  %v4630_v14 = vmul.f32 -1.442695, %v3477_v12  ;;  %v8734_v12 = vld [vmem:[#allocation8 + $0x178] sm:$0xff] }
 0x89b   :  { %4891 = vpow2.f32 %v4629_v22  ;;  %v8700_v22 = vld [vmem:[#allocation8 + $0x1c0] sm:$0xff]  ;;  %10634 = vst [vmem:[#allocation73_spill] sm:$0xff] %v8734_v12 }
 0x89c   :  { %4893 = vpow2.f32 %v4628_v38  ;;  %v8703_v38 = vld [vmem:[#allocation8 + $0x1d0] sm:$0xff] }
 0x89d   :  { %4895 = vrcp.f32 %v3665_v5 }
 0x8a5   :  { %v4888_v1 = vpop.eup %4887 }
 0x8a6   :  { %v3674_v56 = vmul.f32 %v4888_v1, %v4886_v53  ;;  %v8706_v53 = vld [vmem:[#allocation8 + $0x1a8] sm:$0xff]  ;;  %v8709_v1 = vld [vmem:[#allocation8 + $0x1b8] sm:$0xff] }
 0x8a7   :  { %v4890_v16 = vpop.eup %4889 }
 0x8a8   :  { %v3673_v29 = vmul.f32 %v4890_v16, %v8243_v57  ;;  %v4892_v40 = vpop.eup %4891  ;;  %v8715_v16 = vld [vmem:[#allocation8 + $0x1b0] sm:$0xff] }
 0x8a9   :  { %v4894_v24 = vpop.eup %4893  ;;  %v3491_v6 = vadd.f32 1.0, %v4892_v40  ;;  %v8721_v40 = vld [vmem:[#allocation8 + $0x198] sm:$0xff] }
 0x8aa   :  { %v8679_v45 = vadd.f32 %v3674_v56, %v3673_v29  ;;  %v3490_v48 = vadd.f32 1.0, %v4894_v24  ;;  %v4896_v57 = vpop.eup %4895  ;;  %v8712_v56 = vld [vmem:[#allocation8 + $0x1a0] sm:$0xff]  ;;  %v8718_v29 = vld [vmem:[#allocation8 + $0x188] sm:$0xff] }
 0x8ac   :  { %4897 = vtanh.f32 %v8679_v45 }
 0x8ad   :  { %4899 = vrcp.f32 %v3491_v6  ;;  %v8728_v6 = vld [vmem:[#allocation8 + $0x190] sm:$0xff] }
 0x8ae   :  { %4901 = vrcp.f32 %v3490_v48  ;;  %10632 = vst [vmem:[#allocation71_spill] sm:$0xff] %v8728_v6  ;;  %v8731_v48 = vld [vmem:[#allocation8 + $0x168] sm:$0xff] }
 0x8af   :  { %4903 = vtanh.f32 %v3479_v42  ;;  %10633 = vst [vmem:[#allocation72_spill] sm:$0xff] %v8731_v48 }
 0x8b0   :  { %4905 = vpow2.f32 %v4630_v14  ;;  %v8737_v14 = vld [vmem:[#allocation8 + $0x160] sm:$0xff] }
 0x8b1   :  { %10635 = vst [vmem:[#allocation74_spill] sm:$0xff] %v8737_v14 }
 0x8b9   :  { %v4898_v52 = vpop.eup %4897 }
 0x8ba   :  { %v8684_v62 = vmul.f32 %v4898_v52, %v4896_v57  ;;  %v4900_v47 = vpop.eup %4899  ;;  %v8743_v52 = vld [vmem:[#allocation8 + $0x148] sm:$0xff] }
 0x8bb   :  { %v4902_v5 = vpop.eup %4901  ;;  %v3500_v24 = vmul.f32 %v4900_v47, %v8273_v3  ;;  %v8740_v3 = vld [vmem:[#allocation8 + $0x170] sm:$0xff]  ;;  %10637 = vst [vmem:[#allocation76_spill] sm:$0xff] %v8743_v52  ;;  %v8746_v47 = vld [vmem:[#allocation8 + $0x158] sm:$0xff] }
 0x8bc   :  { %3743 = vmatmul.mubr.f32.vlgmr.msra.gmra.mxu0 %v8684_v62  ;;  %3814 = vmatmul.mubr.f32.vlgmr.msra.gmra.mxu1 %v8684_v62  ;;  %v4904_v59 = vpop.eup %4903  ;;  %10636 = vst [vmem:[#allocation75_spill] sm:$0xff] %v8740_v3  ;;  %10638 = vst [vmem:[#allocation77_spill] sm:$0xff] %v8746_v47 }
 0x8bd   :  { %3821 = vmatpush1.msra.mxu0 %v8688_v15  ;;  %3892 = vmatpush1.msra.mxu1 %v8691_v49  ;;  %v3501_v42 = vmul.f32 %v4904_v59, %v4902_v5  ;;  %v4906_v57 = vpop.eup %4905  ;;  %v8751_v5 = vld [vmem:[#allocation8 + $0x140] sm:$0xff]  ;;  %v8754_v59 = vld [vmem:[#allocation8 + $0x150] sm:$0xff] }
 0x8be   :  { %3822 = vmatprep.subr.mxu0 %v8694_v46  ;;  %3893 = vmatprep.subr.mxu1 %v8697_v39  ;;  %10639 = vst [vmem:[#allocation80_spill] sm:$0xff] %v8751_v5  ;;  %10640 = vst [vmem:[#allocation79_spill] sm:$0xff] %v8754_v59 }
 0x8bf   :  { %3823 = vmatpush1.msra.mxu0 %v8700_v22  ;;  %3894 = vmatpush1.msra.mxu1 %v8703_v38 }
 0x8c0   :  { %3824 = vmatprep.subr.mxu0 %v8706_v53  ;;  %3895 = vmatprep.subr.mxu1 %v8709_v1 }
 0x8c1   :  { %3825 = vmatpush1.msra.mxu0 %v8712_v56  ;;  %3896 = vmatpush1.msra.mxu1 %v8715_v16 }
 0x8c2   :  { %3826 = vmatprep.subr.mxu0 %v8718_v29  ;;  %3897 = vmatprep.subr.mxu1 %v8721_v40 }
 0x8c3   :  { %3827 = vmatpush1.msra.mxu0 %v8725_v11  ;;  %3898 = vmatpush1.msra.mxu1 %v8728_v6  ;;  %v5544_v6 = vld [vmem:[#allocation4 + $0x1b8] sm:$0xff] }
 0x8c4   :  { %3828 = vmatprep.subr.mxu0 %v8731_v48  ;;  %3899 = vmatprep.subr.mxu1 %v8734_v12  ;;  %v8749_v48 = vadd.f32 %v3501_v42, %v3500_v24  ;;  %v8766_v24 = vld [vmem:[#allocation8 + $0x130] sm:$0xff]  ;;  %v8769_v42 = vld [vmem:[#allocation8 + $0x108] sm:$0xff]  ;;  %v5540_v12 = vld [vmem:[#allocation4 + $0x1d8] sm:$0xff] }
 0x8c5   :  { %3829 = vmatpush1.msra.mxu0 %v8737_v14  ;;  %3900 = vmatpush1.msra.mxu1 %v8740_v3  ;;  %v8757_v3 = vld [vmem:[#allocation8 + $0x128] sm:$0xff]  ;;  %v8760_v14 = vld [vmem:[#allocation8 + $0x138] sm:$0xff]  ;;  %10644 = vst [vmem:[#allocation94_spill] sm:$0xff] %v8766_v24  ;;  %10645 = vst [vmem:[#allocation96_spill] sm:$0xff] %v8769_v42 }
 0x8c6   :  { %3830 = vmatprep.subr.mxu0 %v8743_v52  ;;  %3901 = vmatprep.subr.mxu1 %v8746_v47  ;;  %10641 = vst [vmem:[#allocation78_spill] sm:$0xff] %v8757_v3  ;;  %10642 = vst [vmem:[#allocation81_spill] sm:$0xff] %v8760_v14  ;;  %v3492_v52 = vadd.f32 1.0, %v4906_v57  ;;  %v8763_v47 = vld [vmem:[#allocation8 + $0x120] sm:$0xff]  ;;  %4907 = vtanh.f32 %v8749_v48  ;;  %v8779_v57 = vld [vmem:[#allocation8 + $0x110] sm:$0xff] }
 0x8c7   :  { %3831 = vmatpush1.msra.mxu0 %v8751_v5  ;;  %3902 = vmatpush1.msra.mxu1 %v8754_v59  ;;  %10643 = vst [vmem:[#allocation106_spill] sm:$0xff] %v8763_v47  ;;  %v8772_v59 = vld [vmem:[#allocation8 + $0x118] sm:$0xff]  ;;  %10648 = vst [vmem:[#allocation107_spill] sm:$0xff] %v8779_v57  ;;  %v5538_v5 = vld [vmem:[#allocation4 + $0x1f0] sm:$0xff] }
 0x8c8   :  { %3832 = vmatprep.subr.mxu0 %v8757_v3  ;;  %3903 = vmatprep.subr.mxu1 %v8760_v14  ;;  %10646 = vst [vmem:[#allocation95_spill] sm:$0xff] %v8772_v59  ;;  %v8776_v14 = vld [vmem:[#allocation8 + $0x100] sm:$0xff]  ;;  %4909 = vrcp.f32 %v3492_v52  ;;  %v8803_v52 = vld [vmem:[#allocation8 + $0xd0] sm:$0xff]  ;;  %v8866_v3 = vld [vmem:[#allocation8 + $0x8] sm:$0xff] }
 0x8c9   :  { %3833 = vmatpush1.msra.mxu0 %v8763_v47  ;;  %3904 = vmatpush1.msra.mxu1 %v8766_v24  ;;  %10647 = vst [vmem:[#allocation97_spill] sm:$0xff] %v8776_v14  ;;  %v8782_v47 = vld [vmem:[#allocation8 + $0xe8] sm:$0xff]  ;;  %v8785_v24 = vld [vmem:[#allocation8 + $0xf8] sm:$0xff]  ;;  %10656 = vst [vmem:[#allocation111_spill] sm:$0xff] %v8803_v52 }
 0x8ca   :  { %3834 = vmatprep.subr.mxu0 %v8769_v42  ;;  %3905 = vmatprep.subr.mxu1 %v8772_v59  ;;  %10649 = vst [vmem:[#allocation108_spill] sm:$0xff] %v8782_v47  ;;  %10650 = vst [vmem:[#allocation109_spill] sm:$0xff] %v8785_v24  ;;  %v8788_v59 = vld [vmem:[#allocation8 + $0xe0] sm:$0xff]  ;;  %v8791_v42 = vld [vmem:[#allocation8 + $0xf0] sm:$0xff] }
 0x8cb   :  { %3835 = vmatpush1.msra.mxu0 %v8776_v14  ;;  %3906 = vmatpush1.msra.mxu1 %v8779_v57  ;;  %10651 = vst [vmem:[#allocation110_spill] sm:$0xff] %v8788_v59  ;;  %10652 = vst [vmem:[#allocation86_spill] sm:$0xff] %v8791_v42  ;;  %v8794_v14 = vld [vmem:[#allocation8 + $0xc8] sm:$0xff]  ;;  %v8797_v57 = vld [vmem:[#allocation8 + $0xd8] sm:$0xff] }
 0x8cc   :  { %3836 = vmatprep.subr.mxu0 %v8782_v47  ;;  %3907 = vmatprep.subr.mxu1 %v8785_v24  ;;  %10653 = vst [vmem:[#allocation88_spill] sm:$0xff] %v8794_v14  ;;  %10654 = vst [vmem:[#allocation87_spill] sm:$0xff] %v8797_v57  ;;  %v8800_v47 = vld [vmem:[#allocation8 + $0xc0] sm:$0xff]  ;;  %v8854_v24 = vld [vmem:[#allocation8 + $0x28] sm:$0xff] }
 0x8cd   :  { %3837 = vmatpush1.msra.mxu0 %v8788_v59  ;;  %3908 = vmatpush1.msra.mxu1 %v8791_v42  ;;  %10655 = vst [vmem:[#allocation89_spill] sm:$0xff] %v8800_v47  ;;  %v8806_v59 = vld [vmem:[#allocation8 + $0xa8] sm:$0xff]  ;;  %v8809_v42 = vld [vmem:[#allocation8 + $0xb8] sm:$0xff]  ;;  %10673 = vst [vmem:[#allocation128_spill] sm:$0xff] %v8854_v24 }
 0x8ce   :  { %3838 = vmatprep.subr.mxu0 %v8794_v14  ;;  %3909 = vmatprep.subr.mxu1 %v8797_v57  ;;  %10657 = vst [vmem:[#allocation112_spill] sm:$0xff] %v8806_v59  ;;  %10658 = vst [vmem:[#allocation113_spill] sm:$0xff] %v8809_v42  ;;  %v8812_v14 = vld [vmem:[#allocation8 + $0xa0] sm:$0xff]  ;;  %v8815_v57 = vld [vmem:[#allocation8 + $0xb0] sm:$0xff] }
 0x8cf   :  { %3839 = vmatpush1.msra.mxu0 %v8800_v47  ;;  %3910 = vmatpush1.msra.mxu1 %v8803_v52  ;;  %10659 = vst [vmem:[#allocation114_spill] sm:$0xff] %v8812_v14  ;;  %10660 = vst [vmem:[#allocation115_spill] sm:$0xff] %v8815_v57  ;;  %v8818_v47 = vld [vmem:[#allocation8 + $0x88] sm:$0xff]  ;;  %v8821_v52 = vld [vmem:[#allocation8 + $0x98] sm:$0xff] }
 0x8d0   :  { %3840 = vmatprep.subr.mxu0 %v8806_v59  ;;  %3911 = vmatprep.subr.mxu1 %v8809_v42  ;;  %10661 = vst [vmem:[#allocation116_spill] sm:$0xff] %v8818_v47  ;;  %10662 = vst [vmem:[#allocation117_spill] sm:$0xff] %v8821_v52  ;;  %v8824_v59 = vld [vmem:[#allocation8 + $0x80] sm:$0xff]  ;;  %v8827_v42 = vld [vmem:[#allocation8 + $0x90] sm:$0xff] }
 0x8d1   :  { %3841 = vmatpush1.msra.mxu0 %v8812_v14  ;;  %3912 = vmatpush1.msra.mxu1 %v8815_v57  ;;  %10663 = vst [vmem:[#allocation118_spill] sm:$0xff] %v8824_v59  ;;  %10664 = vst [vmem:[#allocation119_spill] sm:$0xff] %v8827_v42  ;;  %v8830_v14 = vld [vmem:[#allocation8 + $0x68] sm:$0xff]  ;;  %v8833_v57 = vld [vmem:[#allocation8 + $0x78] sm:$0xff] }
 0x8d2   :  { %3842 = vmatprep.subr.mxu0 %v8818_v47  ;;  %3913 = vmatprep.subr.mxu1 %v8821_v52  ;;  %10665 = vst [vmem:[#allocation120_spill] sm:$0xff] %v8830_v14  ;;  %10666 = vst [vmem:[#allocation121_spill] sm:$0xff] %v8833_v57  ;;  %v8836_v47 = vld [vmem:[#allocation8 + $0x60] sm:$0xff]  ;;  %v8839_v52 = vld [vmem:[#allocation8 + $0x70] sm:$0xff] }
 0x8d3   :  { %3843 = vmatpush1.msra.mxu0 %v8824_v59  ;;  %3914 = vmatpush1.msra.mxu1 %v8827_v42  ;;  %10667 = vst [vmem:[#allocation122_spill] sm:$0xff] %v8836_v47  ;;  %10668 = vst [vmem:[#allocation123_spill] sm:$0xff] %v8839_v52  ;;  %v8842_v59 = vld [vmem:[#allocation8 + $0x48] sm:$0xff]  ;;  %v8845_v42 = vld [vmem:[#allocation8 + $0x58] sm:$0xff] }
 0x8d4   :  { %3844 = vmatprep.subr.mxu0 %v8830_v14  ;;  %3915 = vmatprep.subr.mxu1 %v8833_v57  ;;  %10669 = vst [vmem:[#allocation124_spill] sm:$0xff] %v8842_v59  ;;  %10670 = vst [vmem:[#allocation125_spill] sm:$0xff] %v8845_v42  ;;  %v8848_v14 = vld [vmem:[#allocation8 + $0x40] sm:$0xff]  ;;  %v8851_v57 = vld [vmem:[#allocation8 + $0x50] sm:$0xff] }
 0x8d5   :  { %3845 = vmatpush1.msra.mxu0 %v8836_v47  ;;  %3916 = vmatpush1.msra.mxu1 %v8839_v52  ;;  %10671 = vst [vmem:[#allocation126_spill] sm:$0xff] %v8848_v14  ;;  %10672 = vst [vmem:[#allocation127_spill] sm:$0xff] %v8851_v57  ;;  %v4908_v47 = vpop.eup %4907  ;;  %v8857_v52 = vld [vmem:[#allocation8 + $0x38] sm:$0xff] }
 0x8d6   :  { %3846 = vmatprep.subr.mxu0 %v8842_v59  ;;  %3917 = vmatprep.subr.mxu1 %v8845_v42  ;;  %10674 = vst [vmem:[#allocation129_spill] sm:$0xff] %v8857_v52  ;;  %v8860_v59 = vld [vmem:[#allocation8 + $0x20] sm:$0xff]  ;;  %v8863_v42 = vld [vmem:[#allocation8 + $0x30] sm:$0xff]  ;;  %10677 = vst [vmem:[#allocation132_spill] sm:$0xff] %v8866_v3 }
 0x8d7   :  { %3847 = vmatpush1.msra.mxu0 %v8848_v14  ;;  %3918 = vmatpush1.msra.mxu1 %v8851_v57  ;;  %10675 = vst [vmem:[#allocation130_spill] sm:$0xff] %v8860_v59  ;;  %10676 = vst [vmem:[#allocation131_spill] sm:$0xff] %v8863_v42  ;;  %v4910_v14 = vpop.eup %4909  ;;  %v8869_v57 = vld [vmem:[#allocation8 + $0x18] sm:$0xff] }
 0x8d8   :  { %3848 = vmatprep.subr.mxu0 %v8854_v24  ;;  %3919 = vmatprep.subr.mxu1 %v8857_v52  ;;  %10678 = vst [vmem:[#allocation133_spill] sm:$0xff] %v8869_v57  ;;  %v8872_v24 = vld [vmem:[#allocation8] sm:$0xff]  ;;  %v8876_v52 = vld [vmem:[#allocation8 + $0x10] sm:$0xff] }
 0x8d9   :  { %3849 = vmatpush1.msra.mxu0 %v8860_v59  ;;  %3920 = vmatpush1.msra.mxu1 %v8863_v42  ;;  %10679 = vst [vmem:[#allocation134_spill] sm:$0xff] %v8872_v24  ;;  %v3504_v59 = vmul.f32 %v4910_v14, %v4908_v47  ;;  %10680 = vst [vmem:[#allocation135_spill] sm:$0xff] %v8876_v52  ;;  %v5536_v42 = vld [vmem:[#allocation4 + $0x1f8] sm:$0xff]  ;;  %v5541_v14 = vld [vmem:[#allocation4 + $0x1c0] sm:$0xff] }
 0x8da   :  { %3850 = vmatprep.subr.mxu0 %v8866_v3  ;;  %3921 = vmatprep.subr.mxu1 %v8869_v57  ;;  %v5535_v3 = vld [vmem:[#allocation4 + $0x1e8] sm:$0xff]  ;;  %v5537_v57 = vld [vmem:[#allocation4 + $0x1e0] sm:$0xff]  ;;  %v5542_v47 = vld [vmem:[#allocation4 + $0x1d0] sm:$0xff] }
 0x8db   :  { %3851 = vmatpush1.msra.mxu0 %v8872_v24  ;;  %3884 = vmatprep.mubr.f32.mxu0 %v9835_v27  ;;  %v5539_v24 = vld [vmem:[#allocation4 + $0x1c8] sm:$0xff] }
 0x8dc   :  { %3922 = vmatpush1.msra.mxu1 %v8876_v52  ;;  %3955 = vmatprep.mubr.f32.mxu1 %v9835_v27  ;;  %v5543_v52 = vld [vmem:[#allocation4 + $0x1a8] sm:$0xff] }
 0x8dd   :  { %3885 = vmatmul.mubr.f32.vlgmr.msra.gmra.mxu0 %v3504_v59  ;;  %3956 = vmatmul.mubr.f32.vlgmr.msra.gmra.mxu1 %v3504_v59  ;;  %v5545_v59 = vld [vmem:[#allocation4 + $0x1a0] sm:$0xff] }
 0x8de   :  { %3993 = vmatprep.subr.mxu0 %v5535_v3  ;;  %4064 = vmatprep.subr.mxu1 %v5536_v42  ;;  %v5546_v3 = vld [vmem:[#allocation4 + $0x1b0] sm:$0xff]  ;;  %v5547_v42 = vld [vmem:[#allocation4 + $0x188] sm:$0xff] }
 0x8df   :  { %3994 = vmatpush1.msra.mxu0 %v5537_v57  ;;  %4065 = vmatpush1.msra.mxu1 %v5538_v5  ;;  %v5548_v57 = vld [vmem:[#allocation4 + $0x198] sm:$0xff]  ;;  %v5549_v5 = vld [vmem:[#allocation4 + $0x180] sm:$0xff] }
 0x8e0   :  { %3995 = vmatprep.subr.mxu0 %v5539_v24  ;;  %4066 = vmatprep.subr.mxu1 %v5540_v12  ;;  %v5550_v24 = vld [vmem:[#allocation4 + $0x190] sm:$0xff]  ;;  %v5551_v12 = vld [vmem:[#allocation4 + $0x168] sm:$0xff] }
 0x8e1   :  { %3996 = vmatpush1.msra.mxu0 %v5541_v14  ;;  %4067 = vmatpush1.msra.mxu1 %v5542_v47  ;;  %v5552_v14 = vld [vmem:[#allocation4 + $0x178] sm:$0xff]  ;;  %v5553_v47 = vld [vmem:[#allocation4 + $0x160] sm:$0xff] }
 0x8e2   :  { %3997 = vmatprep.subr.mxu0 %v5543_v52  ;;  %4068 = vmatprep.subr.mxu1 %v5544_v6  ;;  %v5554_v52 = vld [vmem:[#allocation4 + $0x170] sm:$0xff]  ;;  %v5555_v6 = vld [vmem:[#allocation4 + $0x148] sm:$0xff] }
 0x8e3   :  { %3998 = vmatpush1.msra.mxu0 %v5545_v59  ;;  %4069 = vmatpush1.msra.mxu1 %v5546_v3  ;;  %v5556_v59 = vld [vmem:[#allocation4 + $0x158] sm:$0xff]  ;;  %v10714_v3 = vld [vmem:[#allocation28_spill] sm:$0xff] }
 0x8e4   :  { %3999 = vmatprep.subr.mxu0 %v5547_v42  ;;  %4070 = vmatprep.subr.mxu1 %v5548_v57  ;;  %v10715_v42 = vld [vmem:[#allocation29_spill] sm:$0xff]  ;;  %v10716_v57 = vld [vmem:[#allocation30_spill] sm:$0xff] }
 0x8e5   :  { %4000 = vmatpush1.msra.mxu0 %v5549_v5  ;;  %4071 = vmatpush1.msra.mxu1 %v5550_v24  ;;  %v10717_v5 = vld [vmem:[#allocation31_spill] sm:$0xff]  ;;  %v10718_v24 = vld [vmem:[#allocation32_spill] sm:$0xff] }
 0x8e6   :  { %4001 = vmatprep.subr.mxu0 %v5551_v12  ;;  %4072 = vmatprep.subr.mxu1 %v5552_v14  ;;  %v10719_v12 = vld [vmem:[#allocation33_spill] sm:$0xff]  ;;  %v10720_v14 = vld [vmem:[#allocation34_spill] sm:$0xff] }
 0x8e7   :  { %4002 = vmatpush1.msra.mxu0 %v5553_v47  ;;  %4073 = vmatpush1.msra.mxu1 %v5554_v52  ;;  %v10721_v47 = vld [vmem:[#allocation35_spill] sm:$0xff]  ;;  %v10722_v52 = vld [vmem:[#allocation36_spill] sm:$0xff] }
 0x8e8   :  { %4003 = vmatprep.subr.mxu0 %v5555_v6  ;;  %4074 = vmatprep.subr.mxu1 %v5556_v59  ;;  %v10723_v6 = vld [vmem:[#allocation37_spill] sm:$0xff]  ;;  %v10724_v59 = vld [vmem:[#allocation38_spill] sm:$0xff] }
 0x8e9   :  { %4004 = vmatpush1.msra.mxu0 %v8342_v23  ;;  %4075 = vmatpush1.msra.mxu1 %v8345_v54  ;;  %v10681_v23 = vld [vmem:[#allocation163_spill] sm:$0xff]  ;;  %v10682_v54 = vld [vmem:[#allocation164_spill] sm:$0xff] }
 0x8ea   :  { %4005 = vmatprep.subr.mxu0 %v8348_v55  ;;  %4076 = vmatprep.subr.mxu1 %v8351_v35  ;;  %v10683_v55 = vld [vmem:[#allocation165_spill] sm:$0xff]  ;;  %v10684_v35 = vld [vmem:[#allocation166_spill] sm:$0xff] }
 0x8eb   :  { %4006 = vmatpush1.msra.mxu0 %v8354_v33  ;;  %4077 = vmatpush1.msra.mxu1 %v8357_v17  ;;  %v10685_v33 = vld [vmem:[#allocation167_spill] sm:$0xff]  ;;  %v10686_v17 = vld [vmem:[#allocation168_spill] sm:$0xff] }
 0x8ec   :  { %4007 = vmatprep.subr.mxu0 %v8360_v31  ;;  %4078 = vmatprep.subr.mxu1 %v8363_v18  ;;  %v10687_v31 = vld [vmem:[#allocation169_spill] sm:$0xff]  ;;  %v10688_v18 = vld [vmem:[#allocation170_spill] sm:$0xff] }
 0x8ed   :  { %4008 = vmatpush1.msra.mxu0 %v8366_v36  ;;  %4079 = vmatpush1.msra.mxu1 %v8369_v21  ;;  %v10689_v36 = vld [vmem:[#allocation90_spill] sm:$0xff]  ;;  %v10690_v21 = vld [vmem:[#allocation92_spill] sm:$0xff] }
 0x8ee   :  { %4009 = vmatprep.subr.mxu0 %v8372_v43  ;;  %4080 = vmatprep.subr.mxu1 %v8375_v44  ;;  %v10691_v43 = vld [vmem:[#allocation91_spill] sm:$0xff]  ;;  %v10692_v44 = vld [vmem:[#allocation93_spill] sm:$0xff] }
 0x8ef   :  { %4010 = vmatpush1.msra.mxu0 %v8378_v4  ;;  %4081 = vmatpush1.msra.mxu1 %v8381_v34  ;;  %v10693_v4 = vld [vmem:[#allocation82_spill] sm:$0xff]  ;;  %v10694_v34 = vld [vmem:[#allocation84_spill] sm:$0xff] }
 0x8f0   :  { %4011 = vmatprep.subr.mxu0 %v8384_v50  ;;  %4082 = vmatprep.subr.mxu1 %v8387_v28  ;;  %v10695_v50 = vld [vmem:[#allocation83_spill] sm:$0xff]  ;;  %v10696_v28 = vld [vmem:[#allocation85_spill] sm:$0xff] }
 0x8f1   :  { %4012 = vmatpush1.msra.mxu0 %v8390_v7  ;;  %4083 = vmatpush1.msra.mxu1 %v8393_v9  ;;  %v10697_v7 = vld [vmem:[#allocation11_spill] sm:$0xff]  ;;  %v10698_v9 = vld [vmem:[#allocation12_spill] sm:$0xff] }
 0x8f2   :  { %4013 = vmatprep.subr.mxu0 %v8396_v10  ;;  %4084 = vmatprep.subr.mxu1 %v8399_v58  ;;  %v10699_v10 = vld [vmem:[#allocation13_spill] sm:$0xff]  ;;  %v10700_v58 = vld [vmem:[#allocation14_spill] sm:$0xff] }
 0x8f3   :  { %4014 = vmatpush1.msra.mxu0 %v8402_v30  ;;  %4085 = vmatpush1.msra.mxu1 %v8405_v13  ;;  %v10701_v30 = vld [vmem:[#allocation15_spill] sm:$0xff]  ;;  %v10702_v13 = vld [vmem:[#allocation16_spill] sm:$0xff] }
 0x8f4   :  { %4015 = vmatprep.subr.mxu0 %v8408_v60  ;;  %4086 = vmatprep.subr.mxu1 %v8411_v26  ;;  %v10703_v60 = vld [vmem:[#allocation17_spill] sm:$0xff]  ;;  %v10704_v26 = vld [vmem:[#allocation18_spill] sm:$0xff] }
 0x8f5   :  { %4016 = vmatpush1.msra.mxu0 %v8414_v25  ;;  %4087 = vmatpush1.msra.mxu1 %v8417_v19  ;;  %v10705_v25 = vld [vmem:[#allocation19_spill] sm:$0xff]  ;;  %v10706_v19 = vld [vmem:[#allocation20_spill] sm:$0xff] }
 0x8f6   :  { %4017 = vmatprep.subr.mxu0 %v8420_v61  ;;  %4088 = vmatprep.subr.mxu1 %v8423_v32  ;;  %v10707_v61 = vld [vmem:[#allocation21_spill] sm:$0xff]  ;;  %v10708_v32 = vld [vmem:[#allocation22_spill] sm:$0xff] }
 0x8f7   :  { %4018 = vmatpush1.msra.mxu0 %v8426_v37  ;;  %4089 = vmatpush1.msra.mxu1 %v8429_v63  ;;  %v10709_v37 = vld [vmem:[#allocation23_spill] sm:$0xff]  ;;  %v10710_v63 = vld [vmem:[#allocation24_spill] sm:$0xff] }
 0x8f8   :  { %4019 = vmatprep.subr.mxu0 %v8432_v2  ;;  %4090 = vmatprep.subr.mxu1 %v8435_v51  ;;  %v10711_v2 = vld [vmem:[#allocation25_spill] sm:$0xff]  ;;  %v10712_v51 = vld [vmem:[#allocation26_spill] sm:$0xff] }
 0x8f9   :  { %4020 = vmatpush1.msra.mxu0 %v10681_v23  ;;  %4091 = vmatpush1.msra.mxu1 %v10682_v54  ;;  %v10725_v23 = vld [vmem:[#allocation39_spill] sm:$0xff]  ;;  %v10726_v54 = vld [vmem:[#allocation40_spill] sm:$0xff] }
 0x8fa   :  { %4021 = vmatprep.subr.mxu0 %v10683_v55  ;;  %4092 = vmatprep.subr.mxu1 %v10684_v35  ;;  %v10727_v55 = vld [vmem:[#allocation41_spill] sm:$0xff]  ;;  %v10728_v35 = vld [vmem:[#allocation42_spill] sm:$0xff] }
 0x8fb   :  { %4022 = vmatpush1.msra.mxu0 %v10685_v33  ;;  %4093 = vmatpush1.msra.mxu1 %v10686_v17  ;;  %v10729_v33 = vld [vmem:[#allocation43_spill] sm:$0xff]  ;;  %v10730_v17 = vld [vmem:[#allocation44_spill] sm:$0xff] }
 0x8fc   :  { %4023 = vmatprep.subr.mxu0 %v10687_v31  ;;  %4094 = vmatprep.subr.mxu1 %v10688_v18  ;;  %v10731_v31 = vld [vmem:[#allocation45_spill] sm:$0xff]  ;;  %v10732_v18 = vld [vmem:[#allocation46_spill] sm:$0xff] }
 0x8fd   :  { %4024 = vmatpush1.msra.mxu0 %v10689_v36  ;;  %4057 = vmatprep.mubr.f32.mxu0 %v9835_v27  ;;  %v10733_v36 = vld [vmem:[#allocation47_spill] sm:$0xff] }
 0x8fe   :  { %4095 = vmatpush1.msra.mxu1 %v10690_v21  ;;  %4128 = vmatprep.mubr.f32.mxu1 %v9835_v27  ;;  %v10734_v21 = vld [vmem:[#allocation48_spill] sm:$0xff] }
 0x8ff   :  { %4058 = vmatmul.mubr.f32.vlgmr.msra.gmra.mxu0 %v8684_v62  ;;  %4129 = vmatmul.mubr.f32.vlgmr.msra.gmra.mxu1 %v8684_v62  ;;  %v10713_v62 = vld [vmem:[#allocation27_spill] sm:$0xff] }
 0x900   :  { %4159 = vmatprep.subr.mxu0 %v10691_v43  ;;  %4230 = vmatprep.subr.mxu1 %v10692_v44  ;;  %v10735_v43 = vld [vmem:[#allocation49_spill] sm:$0xff]  ;;  %v10736_v44 = vld [vmem:[#allocation50_spill] sm:$0xff] }
 0x901   :  { %4160 = vmatpush1.msra.mxu0 %v10693_v4  ;;  %4231 = vmatpush1.msra.mxu1 %v10694_v34  ;;  %v10737_v4 = vld [vmem:[#allocation51_spill] sm:$0xff]  ;;  %v10738_v34 = vld [vmem:[#allocation52_spill] sm:$0xff] }
 0x902   :  { %4161 = vmatprep.subr.mxu0 %v10695_v50  ;;  %4232 = vmatprep.subr.mxu1 %v10696_v28  ;;  %v10739_v50 = vld [vmem:[#allocation53_spill] sm:$0xff]  ;;  %v10740_v28 = vld [vmem:[#allocation54_spill] sm:$0xff] }
 0x903   :  { %4162 = vmatpush1.msra.mxu0 %v10697_v7  ;;  %4233 = vmatpush1.msra.mxu1 %v10698_v9  ;;  %v10741_v7 = vld [vmem:[#allocation55_spill] sm:$0xff]  ;;  %v10742_v9 = vld [vmem:[#allocation56_spill] sm:$0xff] }
 0x904   :  { %4163 = vmatprep.subr.mxu0 %v10699_v10  ;;  %4234 = vmatprep.subr.mxu1 %v10700_v58  ;;  %v10743_v10 = vld [vmem:[#allocation57_spill] sm:$0xff]  ;;  %v10744_v58 = vld [vmem:[#allocation58_spill] sm:$0xff] }
 0x905   :  { %4164 = vmatpush1.msra.mxu0 %v10701_v30  ;;  %4235 = vmatpush1.msra.mxu1 %v10702_v13  ;;  %v10745_v30 = vld [vmem:[#allocation59_spill] sm:$0xff]  ;;  %v10746_v13 = vld [vmem:[#allocation60_spill] sm:$0xff] }
 0x906   :  { %4165 = vmatprep.subr.mxu0 %v10703_v60  ;;  %4236 = vmatprep.subr.mxu1 %v10704_v26  ;;  %v10747_v60 = vld [vmem:[#allocation61_spill] sm:$0xff]  ;;  %v10748_v26 = vld [vmem:[#allocation62_spill] sm:$0xff] }
 0x907   :  { %4166 = vmatpush1.msra.mxu0 %v10705_v25  ;;  %4237 = vmatpush1.msra.mxu1 %v10706_v19  ;;  %v10749_v25 = vld [vmem:[#allocation63_spill] sm:$0xff]  ;;  %v10750_v19 = vld [vmem:[#allocation64_spill] sm:$0xff] }
 0x908   :  { %4167 = vmatprep.subr.mxu0 %v10707_v61  ;;  %4238 = vmatprep.subr.mxu1 %v10708_v32  ;;  %v10751_v61 = vld [vmem:[#allocation65_spill] sm:$0xff]  ;;  %v10752_v32 = vld [vmem:[#allocation66_spill] sm:$0xff] }
 0x909   :  { %4168 = vmatpush1.msra.mxu0 %v10709_v37  ;;  %4239 = vmatpush1.msra.mxu1 %v10710_v63  ;;  %v10753_v37 = vld [vmem:[#allocation67_spill] sm:$0xff]  ;;  %v10754_v63 = vld [vmem:[#allocation68_spill] sm:$0xff] }
 0x90a   :  { %4169 = vmatprep.subr.mxu0 %v10711_v2  ;;  %4240 = vmatprep.subr.mxu1 %v10712_v51  ;;  %v10755_v2 = vld [vmem:[#allocation69_spill] sm:$0xff]  ;;  %v10756_v51 = vld [vmem:[#allocation70_spill] sm:$0xff] }
 0x90b   :  { %4170 = vmatpush1.msra.mxu0 %v10713_v62  ;;  %4241 = vmatpush1.msra.mxu1 %v10714_v3 }
 0x90c   :  { %4171 = vmatprep.subr.mxu0 %v10715_v42  ;;  %4242 = vmatprep.subr.mxu1 %v10716_v57 }
 0x90d   :  { %4172 = vmatpush1.msra.mxu0 %v10717_v5  ;;  %4243 = vmatpush1.msra.mxu1 %v10718_v24 }
 0x90e   :  { %4173 = vmatprep.subr.mxu0 %v10719_v12  ;;  %4244 = vmatprep.subr.mxu1 %v10720_v14  ;;  %v10757_v14 = vld [vmem:[#allocation102_spill] sm:$0xff] }
 0x90f   :  { %4174 = vmatpush1.msra.mxu0 %v10721_v47  ;;  %4245 = vmatpush1.msra.mxu1 %v10722_v52 }
 0x910   :  { %4175 = vmatprep.subr.mxu0 %v10723_v6  ;;  %4246 = vmatprep.subr.mxu1 %v10724_v59 }
 0x911   :  { %4176 = vmatpush1.msra.mxu0 %v10725_v23  ;;  %4247 = vmatpush1.msra.mxu1 %v10726_v54  ;;  %v10758_v23 = vld [vmem:[#allocation104_spill] sm:$0xff] }
 0x912   :  { %4177 = vmatprep.subr.mxu0 %v10727_v55  ;;  %4248 = vmatprep.subr.mxu1 %v10728_v35 }
 0x913   :  { %4178 = vmatpush1.msra.mxu0 %v10729_v33  ;;  %4249 = vmatpush1.msra.mxu1 %v10730_v17  ;;  %v10759_v17 = vld [vmem:[#allocation103_spill] sm:$0xff] }
 0x914   :  { %4179 = vmatprep.subr.mxu0 %v10731_v31  ;;  %4250 = vmatprep.subr.mxu1 %v10732_v18 }
 0x915   :  { %4180 = vmatpush1.msra.mxu0 %v10733_v36  ;;  %4251 = vmatpush1.msra.mxu1 %v10734_v21  ;;  %v10760_v21 = vld [vmem:[#allocation105_spill] sm:$0xff] }
 0x916   :  { %4181 = vmatprep.subr.mxu0 %v10735_v43  ;;  %4252 = vmatprep.subr.mxu1 %v10736_v44 }
 0x917   :  { %4182 = vmatpush1.msra.mxu0 %v10737_v4  ;;  %4253 = vmatpush1.msra.mxu1 %v10738_v34 }
 0x918   :  { %4183 = vmatprep.subr.mxu0 %v10739_v50  ;;  %4254 = vmatprep.subr.mxu1 %v10740_v28 }
 0x919   :  { %4184 = vmatpush1.msra.mxu0 %v10741_v7  ;;  %4255 = vmatpush1.msra.mxu1 %v10742_v9 }
 0x91a   :  { %4185 = vmatprep.subr.mxu0 %v10743_v10  ;;  %4256 = vmatprep.subr.mxu1 %v10744_v58 }
 0x91b   :  { %4186 = vmatpush1.msra.mxu0 %v10745_v30  ;;  %4257 = vmatpush1.msra.mxu1 %v10746_v13 }
 0x91c   :  { %4187 = vmatprep.subr.mxu0 %v10747_v60  ;;  %4258 = vmatprep.subr.mxu1 %v10748_v26 }
 0x91d   :  { %4188 = vmatpush1.msra.mxu0 %v10749_v25  ;;  %4259 = vmatpush1.msra.mxu1 %v10750_v19 }
 0x91e   :  { %4189 = vmatprep.subr.mxu0 %v10751_v61  ;;  %4260 = vmatprep.subr.mxu1 %v10752_v32 }
 0x91f   :  { %4190 = vmatpush1.msra.mxu0 %v10753_v37  ;;  %4261 = vmatpush1.msra.mxu1 %v10754_v63 }
 0x920   :  { %4223 = vmatprep.mubr.f32.mxu0 %v9835_v27  ;;  %4294 = vmatprep.mubr.f32.mxu1 %v9835_v27 }
 0x921   :  { %4301 = vmatprep.subr.mxu0 %v10755_v2  ;;  %4372 = vmatprep.subr.mxu1 %v10756_v51 }
 0x97c   :  { %v3744_v62 = vpop.f32.mrf.mxu0  ;;  %v3815_v57 = vpop.f32.mrf.mxu1 }
 0x97d   :  { %v3745_v28 = vadd.f32 %v3744_v62, %v6583_v41  ;;  %v3816_v51 = vadd.f32 %v3815_v57, %v6592_v0 }
 0x97e   :  { %v3746_v3 = vpop.f32.mrf.mxu0  ;;  %v3817_v24 = vpop.f32.mrf.mxu1 }
 0x97f   :  { %v3747_v4 = vadd.f32 %v3746_v3, %v6578_v20  ;;  %v3818_v3 = vadd.f32 %v3817_v24, %v6597_v8  ;;  %v10769_v24 = vld [vmem:[#allocation79_spill] sm:$0xff] }
 0x99d   :  { %v3886_v42 = vpop.f32.mrf.mxu0  ;;  %v3957_v52 = vpop.f32.mrf.mxu1 }
 0x99e   :  { %v3887_v10 = vadd.f32 %v3886_v42, %v3745_v28  ;;  %v10786_v28 = vld [vmem:[#allocation112_spill] sm:$0xff] }
 0x99f   :  { %v3888_v5 = vpop.f32.mrf.mxu0  ;;  %v3959_v35 = vpop.f32.mrf.mxu1 }
 0x9a0   :  { %v3889_v7 = vadd.f32 %v3888_v5, %v3747_v4  ;;  %v4634_v30 = vmul.f32 -1.442695, %v3887_v10  ;;  %v3958_v5 = vadd.f32 %v3957_v52, %v3816_v51  ;;  %v10770_v52 = vld [vmem:[#allocation78_spill] sm:$0xff]  ;;  %v10783_v4 = vld [vmem:[#allocation87_spill] sm:$0xff] }
 0x9a1   :  { %v10789_v10 = vld [vmem:[#allocation115_spill] sm:$0xff] }
 0x9a2   :  { %v4635_v58 = vmul.f32 -1.442695, %v3889_v7  ;;  %v10787_v7 = vld [vmem:[#allocation113_spill] sm:$0xff] }
 0x9bf   :  { %v4059_v12 = vpop.f32.mrf.mxu0  ;;  %v4130_v33 = vpop.f32.mrf.mxu1 }
 0x9c0   :  { %v4060_v47 = vadd.f32 %v4059_v12, %v10757_v14  ;;  %v4131_v31 = vadd.f32 %v4130_v33, %v10759_v17  ;;  %v3960_v12 = vadd.f32 %v3959_v35, %v3818_v3  ;;  %v4636_v14 = vmul.f32 -1.442695, %v3958_v5  ;;  %v10774_v35 = vld [vmem:[#allocation96_spill] sm:$0xff]  ;;  %v10775_v33 = vld [vmem:[#allocation95_spill] sm:$0xff]  ;;  %v10776_v17 = vld [vmem:[#allocation97_spill] sm:$0xff] }
 0x9c1   :  { %v4061_v6 = vpop.f32.mrf.mxu0  ;;  %v4132_v18 = vpop.f32.mrf.mxu1  ;;  %v10803_v3 = vld [vmem:[#allocation129_spill] sm:$0xff]  ;;  %v10805_v5 = vld [vmem:[#allocation131_spill] sm:$0xff] }
 0x9c2   :  { %v4637_v59 = vmul.f32 -1.442695, %v4060_v47  ;;  %v4062_v54 = vadd.f32 %v4061_v6, %v10758_v23  ;;  %v4639_v36 = vmul.f32 -1.442695, %v4131_v31  ;;  %v4133_v43 = vadd.f32 %v4132_v18, %v10760_v21  ;;  %v10777_v31 = vld [vmem:[#allocation107_spill] sm:$0xff]  ;;  %v10778_v18 = vld [vmem:[#allocation108_spill] sm:$0xff] }
 0x9c3   :  { %v10780_v21 = vld [vmem:[#allocation110_spill] sm:$0xff] }
 0x9c4   :  { %4911 = vpow2.f32 %v4637_v59  ;;  %v4638_v55 = vmul.f32 -1.442695, %v4062_v54  ;;  %v10771_v59 = vld [vmem:[#allocation81_spill] sm:$0xff]  ;;  %v10772_v54 = vld [vmem:[#allocation106_spill] sm:$0xff] }
 0x9c6   :  { %4913 = vpow2.f32 %v4638_v55  ;;  %v10773_v55 = vld [vmem:[#allocation94_spill] sm:$0xff] }
 0x9c7   :  { %4915 = vpow2.f32 %v4639_v36  ;;  %v10779_v36 = vld [vmem:[#allocation109_spill] sm:$0xff] }
 0x9c8   :  { %4917 = vtanh.f32 %v4133_v43  ;;  %v10781_v43 = vld [vmem:[#allocation86_spill] sm:$0xff] }
 0x9d1   :  { %v4912_v44 = vpop.eup %4911 }
 0x9d2   :  { %v4144_v34 = vadd.f32 1.0, %v4912_v44  ;;  %v10782_v44 = vld [vmem:[#allocation88_spill] sm:$0xff] }
 0x9d3   :  { %v4914_v50 = vpop.eup %4913 }
 0x9d4   :  { %4919 = vrcp.f32 %v4144_v34  ;;  %v4145_v9 = vadd.f32 1.0, %v4914_v50  ;;  %v4916_v13 = vpop.eup %4915  ;;  %v10784_v34 = vld [vmem:[#allocation89_spill] sm:$0xff]  ;;  %v10785_v50 = vld [vmem:[#allocation111_spill] sm:$0xff] }
 0x9d5   :  { %v4918_v60 = vpop.eup %4917  ;;  %v4146_v61 = vadd.f32 1.0, %v4916_v13  ;;  %v10792_v13 = vld [vmem:[#allocation118_spill] sm:$0xff] }
 0x9d6   :  { %4921 = vrcp.f32 %v4145_v9  ;;  %v10788_v9 = vld [vmem:[#allocation114_spill] sm:$0xff] }
 0x9d7   :  { %4923 = vpow2.f32 %v4635_v58  ;;  %v10790_v58 = vld [vmem:[#allocation116_spill] sm:$0xff] }
 0x9d8   :  { %4925 = vpow2.f32 %v4634_v30  ;;  %v10791_v30 = vld [vmem:[#allocation117_spill] sm:$0xff] }
 0x9d9   :  { %4927 = vrcp.f32 %v4146_v61  ;;  %v10797_v61 = vld [vmem:[#allocation123_spill] sm:$0xff] }
 0x9e1   :  { %v4920_v26 = vpop.eup %4919 }
 0x9e2   :  { %v4155_v25 = vmul.f32 %v4920_v26, %v4918_v60  ;;  %v10793_v60 = vld [vmem:[#allocation119_spill] sm:$0xff]  ;;  %v10794_v26 = vld [vmem:[#allocation120_spill] sm:$0xff] }
 0x9e3   :  { %v4922_v19 = vpop.eup %4921 }
 0x9e4   :  { %v4154_v32 = vmul.f32 %v4922_v19, %v8679_v45  ;;  %v4924_v63 = vpop.eup %4923  ;;  %v10796_v19 = vld [vmem:[#allocation122_spill] sm:$0xff] }
 0x9e5   :  { %v4926_v2 = vpop.eup %4925  ;;  %v3972_v62 = vadd.f32 1.0, %v4924_v63  ;;  %v10800_v63 = vld [vmem:[#allocation126_spill] sm:$0xff] }
 0x9e6   :  { %v4156_v37 = vadd.f32 %v4155_v25, %v4154_v32  ;;  %v3971_v42 = vadd.f32 1.0, %v4926_v2  ;;  %v4928_v47 = vpop.eup %4927  ;;  %v10795_v25 = vld [vmem:[#allocation121_spill] sm:$0xff]  ;;  %v10798_v32 = vld [vmem:[#allocation124_spill] sm:$0xff]  ;;  %v10801_v2 = vld [vmem:[#allocation127_spill] sm:$0xff] }
 0x9e8   :  { %4929 = vtanh.f32 %v4156_v37  ;;  %v10799_v37 = vld [vmem:[#allocation125_spill] sm:$0xff] }
 0x9e9   :  { %4931 = vrcp.f32 %v3972_v62  ;;  %v10802_v62 = vld [vmem:[#allocation128_spill] sm:$0xff] }
 0x9ea   :  { %4933 = vrcp.f32 %v3971_v42  ;;  %v10804_v42 = vld [vmem:[#allocation130_spill] sm:$0xff] }
 0x9eb   :  { %4935 = vtanh.f32 %v3960_v12 }
 0x9ec   :  { %4937 = vpow2.f32 %v4636_v14  ;;  %v10806_v14 = vld [vmem:[#allocation132_spill] sm:$0xff] }
 0x9f5   :  { %v4930_v6 = vpop.eup %4929 }
 0x9f6   :  { %v4158_v45 = vmul.f32 %v4930_v6, %v4928_v47  ;;  %v4932_v57 = vpop.eup %4931  ;;  %v10807_v47 = vld [vmem:[#allocation133_spill] sm:$0xff]  ;;  %v10808_v6 = vld [vmem:[#allocation134_spill] sm:$0xff] }
 0x9f8   :  { %4224 = vmatmul.mubr.f32.vlgmr.msra.gmra.mxu0 %v4158_v45  ;;  %4295 = vmatmul.mubr.f32.vlgmr.msra.gmra.mxu1 %v4158_v45 }
 0x9f9   :  { %4302 = vmatpush1.msra.mxu0 %v8688_v15  ;;  %4373 = vmatpush1.msra.mxu1 %v8691_v49  ;;  %v4934_v15 = vpop.eup %4933  ;;  %v3981_v49 = vmul.f32 %v4932_v57, %v8749_v48  ;;  %v10809_v57 = vld [vmem:[#allocation135_spill] sm:$0xff] }
 0x9fa   :  { %4303 = vmatprep.subr.mxu0 %v8694_v46  ;;  %4374 = vmatprep.subr.mxu1 %v8697_v39  ;;  %v10761_v46 = vld [vmem:[#allocation71_spill] sm:$0xff]  ;;  %v4936_v39 = vpop.eup %4935 }
 0x9fb   :  { %4304 = vmatpush1.msra.mxu0 %v8700_v22  ;;  %4375 = vmatpush1.msra.mxu1 %v8703_v38  ;;  %v10762_v22 = vld [vmem:[#allocation72_spill] sm:$0xff]  ;;  %v10763_v38 = vld [vmem:[#allocation73_spill] sm:$0xff] }
 0x9fc   :  { %4305 = vmatprep.subr.mxu0 %v8706_v53  ;;  %4376 = vmatprep.subr.mxu1 %v8709_v1  ;;  %v3982_v53 = vmul.f32 %v4936_v39, %v4934_v15  ;;  %v10764_v1 = vld [vmem:[#allocation74_spill] sm:$0xff] }
 0x9fd   :  { %4306 = vmatpush1.msra.mxu0 %v8712_v56  ;;  %4377 = vmatpush1.msra.mxu1 %v8715_v16  ;;  %v10765_v56 = vld [vmem:[#allocation75_spill] sm:$0xff]  ;;  %v4938_v16 = vpop.eup %4937  ;;  %v4482_v15 = vld [vmem:[%s9151_s7 + $0x78] sm:$0xff] }
 0x9fe   :  { %4307 = vmatprep.subr.mxu0 %v8718_v29  ;;  %4378 = vmatprep.subr.mxu1 %v8721_v40  ;;  %v10766_v29 = vld [vmem:[#allocation76_spill] sm:$0xff]  ;;  %v10767_v40 = vld [vmem:[#allocation77_spill] sm:$0xff]  ;;  %v9024_v48 = vadd.f32 %v3982_v53, %v3981_v49  ;;  %v3973_v23 = vadd.f32 1.0, %v4938_v16  ;;  %v4479_v39 = vld [vmem:[%s9151_s7 + $0x60] sm:$0xff] }
 0x9ff   :  { %4308 = vmatpush1.msra.mxu0 %v8725_v11  ;;  %4379 = vmatpush1.msra.mxu1 %v10761_v46  ;;  %v10768_v11 = vld [vmem:[#allocation80_spill] sm:$0xff] }
 0xa00   :  { %4309 = vmatprep.subr.mxu0 %v10762_v22  ;;  %4380 = vmatprep.subr.mxu1 %v10763_v38  ;;  %4939 = vtanh.f32 %v9024_v48  ;;  %v4481_v49 = vld [vmem:[%s9151_s7 + $0x70] sm:$0xff]  ;;  %v4480_v46 = vld [vmem:[%s9151_s7 + $0x68] sm:$0xff]  ;;  %v4478_v22 = vld [vmem:[%s9151_s7 + $0x58] sm:$0xff] }
 0xa01   :  { %4310 = vmatpush1.msra.mxu0 %v10764_v1  ;;  %4381 = vmatpush1.msra.mxu1 %v10765_v56  ;;  %4941 = vrcp.f32 %v3973_v23  ;;  %v4477_v38 = vld [vmem:[%s9151_s7 + $0x50] sm:$0xff]  ;;  %v4476_v53 = vld [vmem:[%s9151_s7 + $0x48] sm:$0xff]  ;;  %v4475_v1 = vld [vmem:[%s9151_s7 + $0x40] sm:$0xff] }
 0xa02   :  { %4311 = vmatprep.subr.mxu0 %v10766_v29  ;;  %4382 = vmatprep.subr.mxu1 %v10767_v40  ;;  %v4474_v56 = vld [vmem:[%s9151_s7 + $0x38] sm:$0xff]  ;;  %v4473_v16 = vld [vmem:[%s9151_s7 + $0x30] sm:$0xff]  ;;  %v4472_v29 = vld [vmem:[%s9151_s7 + $0x28] sm:$0xff] }
 0xa03   :  { %4312 = vmatpush1.msra.mxu0 %v10768_v11  ;;  %4383 = vmatpush1.msra.mxu1 %v10769_v24  ;;  %v4471_v40 = vld [vmem:[%s9151_s7 + $0x20] sm:$0xff]  ;;  %v4470_v11 = vld [vmem:[%s9151_s7 + $0x18] sm:$0xff]  ;;  %v4469_v24 = vld [vmem:[%s9151_s7 + $0x10] sm:$0xff] }
 0xa04   :  { %4313 = vmatprep.subr.mxu0 %v10770_v52  ;;  %4384 = vmatprep.subr.mxu1 %v10771_v59  ;;  %v4468_v52 = vld [vmem:[%s9151_s7 + $0x8] sm:$0xff]  ;;  %v4467_v59 = vld [vmem:[%s9151_s7] sm:$0xff] }
 0xa05   :  { %4314 = vmatpush1.msra.mxu0 %v10772_v54  ;;  %4385 = vmatpush1.msra.mxu1 %v10773_v55 }
 0xa06   :  { %4315 = vmatprep.subr.mxu0 %v10774_v35  ;;  %4386 = vmatprep.subr.mxu1 %v10775_v33 }
 0xa07   :  { %4316 = vmatpush1.msra.mxu0 %v10776_v17  ;;  %4387 = vmatpush1.msra.mxu1 %v10777_v31 }
 0xa08   :  { %4317 = vmatprep.subr.mxu0 %v10778_v18  ;;  %4388 = vmatprep.subr.mxu1 %v10779_v36 }
 0xa09   :  { %4318 = vmatpush1.msra.mxu0 %v10780_v21  ;;  %4389 = vmatpush1.msra.mxu1 %v10781_v43 }
 0xa0a   :  { %4319 = vmatprep.subr.mxu0 %v10782_v44  ;;  %4390 = vmatprep.subr.mxu1 %v10783_v4 }
 0xa0b   :  { %4320 = vmatpush1.msra.mxu0 %v10784_v34  ;;  %4391 = vmatpush1.msra.mxu1 %v10785_v50 }
 0xa0c   :  { %4321 = vmatprep.subr.mxu0 %v10786_v28  ;;  %4392 = vmatprep.subr.mxu1 %v10787_v7 }
 0xa0d   :  { %4322 = vmatpush1.msra.mxu0 %v10788_v9  ;;  %4393 = vmatpush1.msra.mxu1 %v10789_v10  ;;  %v4940_v51 = vpop.eup %4939 }
 0xa0e   :  { %4323 = vmatprep.subr.mxu0 %v10790_v58  ;;  %4394 = vmatprep.subr.mxu1 %v10791_v30  ;;  %v4942_v12 = vpop.eup %4941 }
 0xa0f   :  { %4324 = vmatpush1.msra.mxu0 %v10792_v13  ;;  %4395 = vmatpush1.msra.mxu1 %v10793_v60  ;;  %v3985_v45 = vmul.f32 %v4942_v12, %v4940_v51 }
 0xa10   :  { %4325 = vmatprep.subr.mxu0 %v10794_v26  ;;  %4396 = vmatprep.subr.mxu1 %v10795_v25 }
 0xa11   :  { %4326 = vmatpush1.msra.mxu0 %v10796_v19  ;;  %4397 = vmatpush1.msra.mxu1 %v10797_v61 }
 0xa12   :  { %4327 = vmatprep.subr.mxu0 %v10798_v32  ;;  %4398 = vmatprep.subr.mxu1 %v10799_v37 }
 0xa13   :  { %4328 = vmatpush1.msra.mxu0 %v10800_v63  ;;  %4399 = vmatpush1.msra.mxu1 %v10801_v2  ;;  %v4643_v63 = vld [vmem:[#allocation3] ss:$0 sm:$0xff] }
 0xa14   :  { %4329 = vmatprep.subr.mxu0 %v10802_v62  ;;  %4400 = vmatprep.subr.mxu1 %v10803_v3 }
 0xa15   :  { %4330 = vmatpush1.msra.mxu0 %v10804_v42  ;;  %4401 = vmatpush1.msra.mxu1 %v10805_v5 }
 0xa16   :  { %4331 = vmatprep.subr.mxu0 %v10806_v14  ;;  %4402 = vmatprep.subr.mxu1 %v10807_v47 }
 0xa17   :  { %4332 = vmatpush1.msra.mxu0 %v10808_v6  ;;  %4365 = vmatprep.mubr.f32.mxu0 %v9835_v27 }
 0xa18   :  { %4403 = vmatpush1.msra.mxu1 %v10809_v57  ;;  %4436 = vmatprep.mubr.f32.mxu1 %v9835_v27 }
 0xa19   :  { %4366 = vmatmul.mubr.f32.vlgmr.msra.gmra.mxu0 %v3985_v45  ;;  %4437 = vmatmul.mubr.f32.vlgmr.msra.gmra.mxu1 %v3985_v45 }
 0xa1a   :  { %4661 = vmatprep.subr.mxu0 %v9835_v27  ;;  %4693 = vmatprep.mubr.msk.f32.mxu0 %vm5627_vm2, %v9835_v27 }
 0xa1b   :  { %4662 = vmatpush3.msra.mxu0 %v4482_v15 }
 0xa1c   :  { %4663 = vmatprep.subr.mxu0 %v9835_v27 }
 0xa1d   :  { %4664 = vmatpush3.msra.mxu0 %v4481_v49 }
 0xa1e   :  { %4665 = vmatprep.subr.mxu0 %v9835_v27 }
 0xa1f   :  { %4666 = vmatpush3.msra.mxu0 %v4480_v46 }
 0xa20   :  { %4667 = vmatprep.subr.mxu0 %v9835_v27 }
 0xa21   :  { %4668 = vmatpush3.msra.mxu0 %v4479_v39 }
 0xa22   :  { %4669 = vmatprep.subr.mxu0 %v9835_v27 }
 0xa23   :  { %4670 = vmatpush3.msra.mxu0 %v4478_v22 }
 0xa24   :  { %4671 = vmatprep.subr.mxu0 %v9835_v27 }
 0xa25   :  { %4672 = vmatpush3.msra.mxu0 %v4477_v38 }
 0xa26   :  { %4673 = vmatprep.subr.mxu0 %v9835_v27 }
 0xa27   :  { %4674 = vmatpush3.msra.mxu0 %v4476_v53 }
 0xa28   :  { %4675 = vmatprep.subr.mxu0 %v9835_v27 }
 0xa29   :  { %4676 = vmatpush3.msra.mxu0 %v4475_v1 }
 0xa2a   :  { %4677 = vmatprep.subr.mxu0 %v9835_v27 }
 0xa2b   :  { %4678 = vmatpush3.msra.mxu0 %v4474_v56 }
 0xa2c   :  { %4679 = vmatprep.subr.mxu0 %v9835_v27 }
 0xa2d   :  { %4680 = vmatpush3.msra.mxu0 %v4473_v16 }
 0xa2e   :  { %4681 = vmatprep.subr.mxu0 %v9835_v27 }
 0xa2f   :  { %4682 = vmatpush3.msra.mxu0 %v4472_v29 }
 0xa30   :  { %4683 = vmatprep.subr.mxu0 %v9835_v27 }
 0xa31   :  { %4684 = vmatpush3.msra.mxu0 %v4471_v40 }
 0xa32   :  { %4685 = vmatprep.subr.mxu0 %v9835_v27 }
 0xa33   :  { %4686 = vmatpush3.msra.mxu0 %v4470_v11 }
 0xa34   :  { %4687 = vmatprep.subr.mxu0 %v9835_v27 }
 0xa35   :  { %4688 = vmatpush3.msra.mxu0 %v4469_v24 }
 0xa36   :  { %4689 = vmatprep.subr.mxu0 %v9835_v27 }
 0xa37   :  { %4690 = vmatpush3.msra.mxu0 %v4468_v52 }
 0xa38   :  { %4691 = vmatprep.subr.mxu0 %v9835_v27 }
 0xa39   :  { %4692 = vmatpush3.msra.mxu0 %v4467_v59 }
 0xab8   :  { %v4225_v23 = vpop.f32.mrf.mxu0  ;;  %v4296_v18 = vpop.f32.mrf.mxu1 }
 0xab9   :  { %v4226_v55 = vadd.f32 %v4225_v23, %v6583_v41  ;;  %v4297_v27 = vadd.f32 %v4296_v18, %v6592_v0 }
 0xaba   :  { %v4227_v54 = vpop.f32.mrf.mxu0  ;;  %v4298_v44 = vpop.f32.mrf.mxu1 }
 0xabb   :  { %v4228_v33 = vadd.f32 %v4227_v54, %v6578_v20  ;;  %v4299_v28 = vadd.f32 %v4298_v44, %v6597_v8 }
 0xad9   :  { %v4367_v35 = vpop.f32.mrf.mxu0  ;;  %v4438_v4 = vpop.f32.mrf.mxu1 }
 0xada   :  { %v4368_v17 = vadd.f32 %v4367_v35, %v4226_v55  ;;  %v4439_v34 = vadd.f32 %v4438_v4, %v4297_v27 }
 0xadb   :  { %v4369_v31 = vpop.f32.mrf.mxu0  ;;  %v4440_v50 = vpop.f32.mrf.mxu1 }
 0xadc   :  { %v4640_v36 = vmul.f32 -1.442695, %v4368_v17  ;;  %v4370_v21 = vadd.f32 %v4369_v31, %v4228_v33  ;;  %v4642_v41 = vmul.f32 -1.442695, %v4439_v34  ;;  %v4441_v9 = vadd.f32 %v4440_v50, %v4299_v28 }
 0xade   :  { %4943 = vpow2.f32 %v4640_v36  ;;  %v4641_v43 = vmul.f32 -1.442695, %v4370_v21 }
 0xae0   :  { %4945 = vpow2.f32 %v4641_v43 }
 0xae1   :  { %4947 = vpow2.f32 %v4642_v41 }
 0xaeb   :  { %v4944_v7 = vpop.eup %4943 }
 0xaec   :  { %v4452_v20 = vadd.f32 1.0, %v4944_v7 }
 0xaed   :  { %v4946_v10 = vpop.eup %4945 }
 0xaee   :  { %4949 = vrcp.f32 %v4452_v20  ;;  %v4453_v58 = vadd.f32 1.0, %v4946_v10  ;;  %v4948_v30 = vpop.eup %4947 }
 0xaef   :  { %4951 = vtanh.f32 %v4441_v9  ;;  %v4454_v25 = vadd.f32 1.0, %v4948_v30 }
 0xaf0   :  { %4953 = vrcp.f32 %v4453_v58 }
 0xaf1   :  { %4955 = vrcp.f32 %v4454_v25 }
 0xafb   :  { %v4950_v13 = vpop.eup %4949 }
 0xafc   :  { %v4952_v60 = vpop.eup %4951 }
 0xafd   :  { %v4954_v26 = vpop.eup %4953  ;;  %v4463_v19 = vmul.f32 %v4952_v60, %v4950_v13 }
 0xafe   :  { %v4462_v0 = vmul.f32 %v4954_v26, %v9024_v48  ;;  %v4956_v8 = vpop.eup %4955 }
 0xb00   :  { %v4464_v61 = vadd.f32 %v4463_v19, %v4462_v0 }
 0xb02   :  { %4957 = vtanh.f32 %v4464_v61 }
 0xb0f   :  { %v4958_v32 = vpop.eup %4957 }
 0xb10   :  { %v4466_v37 = vmul.f32 %v4958_v32, %v4956_v8 }
 0xb12   :  { %4694 = vmatmul.mubr.f32.vlgmr.msra.gmra.mxu0 %v4466_v37 }
 0xbd2   :  { %v4556_v2 = vpop.f32.mrf.mxu0 }
 0xbd3   :  { %v4557_v51 = vadd.f32 %v4643_v63, %v4556_v2 }
 0xbd4   :  { %v4695_v62 = vpop.f32.mrf.mxu0 }
 0xbd5   :  { %4561 = vst.msk [vmem:[%s9153_s9] sm:$0xff] %vm4560_vm3, %v4557_v51 }
 0xbd6   :  { %4566 = vsyncpa [#allocation5], 1 }
 0xbd7   :  { %4567 = vsyncpa [#allocation7], 1 }

</bundles_post_ra>
